<compile_context>
chip_gen: v6e
topology: v6e:2x2x1
jax: 0.10.0
libtpu: 0.0.40
codegen_flags: <defaults>
</compile_context>

<pallas_src>
import functools

import jax
import jax.numpy as jnp
from jax.experimental import pallas as pl
from jax.experimental.pallas import tpu as pltpu

KSIZE = 7
PAD = 3


def _tree_sum(vals):
    vals = list(vals)
    while len(vals) > 1:
        nxt = []
        for i in range(0, len(vals) - 1, 2):
            nxt.append(vals[i] + vals[i + 1])
        if len(vals) % 2:
            nxt.append(vals[-1])
        vals = nxt
    return vals[0]


def _tensorcores_per_device():
    # Best-effort heuristic: dual-TensorCore chips (v4 / v5p / v7x) benefit
    # from 2 "parallel" grid steps; single-core chips (v5e / v6e) prefer one
    # fused step.  Either choice is correct, this only affects scheduling.
    try:
        kind = jax.devices()[0].device_kind.lower()
    except Exception:
        return 1
    for tag in ("v4", "v5p", "v7", "7x"):
        if tag in kind:
            return 2
    return 1


def csab_kernel(x_ref, w1t_ref, w2_ref, cw_ref, cb_ref, o_ref, *, H, W):
    # x_ref : (Bb, C, H*W) VMEM, lane-dense        o_ref: same shape
    # w1t_ref: (C, mid) VMEM   (fc1 weight, transposed)
    # w2_ref : (C, mid) VMEM   (fc2 weight)
    # cw_ref : (2*7*7,) SMEM   (spatial conv weight, [c, ky, kx] flattened)
    # cb_ref : (1,)     SMEM   (spatial conv bias)
    Bb, C, HW = x_ref.shape

    # ------------- hoisted, batch-invariant values -------------
    w1t = w1t_ref[...]                                    # (C, mid)
    w2 = w2_ref[...]                                      # (C, mid)
    bias = cb_ref[0]

    # Hoist all 98 conv-weight SMEM scalar reads out of the conv loops; they
    # are reused by every fused batch element in this grid step.
    wconv = [[[cw_ref[c * KSIZE * KSIZE + dy * KSIZE + dx]
               for dx in range(KSIZE)]
              for dy in range(KSIZE)]
             for c in range(2)]

    # Static spatial-coordinate masks for the "same"-padded 7x7 conv, built
    # once from a lane iota (no padded scratch map is ever materialized).
    lane = jax.lax.broadcasted_iota(jnp.int32, (1, HW), 1)
    if W > 0 and (W & (W - 1)) == 0:
        xs = lane & (W - 1)
        ys = lane >> (W.bit_length() - 1)
    else:
        xs = lane % W
        ys = lane // W
    xmask = [(xs >= PAD - dx) & (xs < W + PAD - dx) for dx in range(KSIZE)]
    ymask = [(ys >= PAD - dy) & (ys < H + PAD - dy) for dy in range(KSIZE)]

    inv_hw = 1.0 / HW
    inv_c = 1.0 / C

    for b in range(Bb):
        x = x_ref[b]                                      # (C, HW)

        # ---------------- channel attention (VPU/XLU only) ----------------
        avg = jnp.sum(x, axis=1, keepdims=True) * inv_hw  # (C, 1) lane-reduce
        mx = jnp.max(x, axis=1, keepdims=True)            # (C, 1)

        # fc1 as sublane reductions over C (mid is tiny, no MXU round-trip).
        h_avg = jnp.sum(w1t * avg, axis=0, keepdims=True)     # (1, mid)
        h_max = jnp.sum(w1t * mx, axis=0, keepdims=True)      # (1, mid)
        # fc2 has no bias -> fc2(relu(h_avg)) + fc2(relu(h_max))
        #                    == fc2(relu(h_avg) + relu(h_max)).
        hs = jnp.maximum(h_avg, 0.0) + jnp.maximum(h_max, 0.0)
        ca = jax.nn.sigmoid(jnp.sum(w2 * hs, axis=1, keepdims=True))  # (C, 1)

        scaled = x * ca                                   # (C, HW)

        # ---------------- spatial attention ----------------
        avg_s = jnp.sum(scaled, axis=0, keepdims=True) * inv_c   # (1, HW)
        max_s = jnp.max(scaled, axis=0, keepdims=True)           # (1, HW)

        # 7x7 "same" conv, 2 in-channels -> 1 out-channel, stride 1, bias.
        # out[y, x] = b + sum_{c,dy,dx} w[c,dy,dx] * pooled[c, y+dy-3, x+dx-3]
        # In the flat lane domain the (dy, dx) shift is a static lane roll of
        # (dy-3)*W + (dx-3); border handling is done with the iota masks.
        # 7 independent per-dy partials -> short dependence chains.
        partials = []
        for dy in range(KSIZE):
            p = None
            for dx in range(KSIZE):
                off = (dy - PAD) * W + (dx - PAD)
                sh = (-off) % HW
                if sh == 0:
                    ra, rm = avg_s, max_s
                else:
                    ra = pltpu.roll(avg_s, sh, 1)
                    rm = pltpu.roll(max_s, sh, 1)
                contrib = wconv[0][dy][dx] * ra + wconv[1][dy][dx] * rm
                contrib = jnp.where(xmask[dx], contrib, 0.0)
                p = contrib if p is None else p + contrib
            partials.append(jnp.where(ymask[dy], p, 0.0))

        acc = _tree_sum(partials) + bias                  # (1, HW)
        sa = jax.nn.sigmoid(acc)                          # (1, HW)

        o_ref[b] = (scaled * sa).astype(o_ref.dtype)


def csab(x, w1, w2, conv_w, conv_b, *, num_steps=None):
    B, C, H, W = x.shape
    mid = w1.shape[0]
    HW = H * W

    # Lane-dense layout for all heavy work (free reshape on the HBM array).
    x_flat = x.reshape(B, C, HW)
    w1t = jnp.asarray(w1, jnp.float32).T                 # (C, mid)
    w2f = jnp.asarray(w2, jnp.float32)                   # (C, mid)
    cw_flat = conv_w.reshape(-1).astype(jnp.float32)     # (2*7*7,)
    cb = conv_b.astype(jnp.float32)                      # (1,)

    if num_steps is None:
        num_steps = min(B, _tensorcores_per_device())
    if num_steps < 1 or B % num_steps != 0:
        num_steps = B
    Bb = B // num_steps

    kernel = functools.partial(csab_kernel, H=H, W=W)

    grid_spec = pltpu.PrefetchScalarGridSpec(
        num_scalar_prefetch=0,
        grid=(num_steps,),
        in_specs=[
            pl.BlockSpec((Bb, C, HW), lambda i: (i, 0, 0)),
            pl.BlockSpec((C, mid), lambda i: (0, 0)),
            pl.BlockSpec((C, mid), lambda i: (0, 0)),
            pl.BlockSpec(memory_space=pltpu.MemorySpace.SMEM),
            pl.BlockSpec(memory_space=pltpu.MemorySpace.SMEM),
        ],
        out_specs=pl.BlockSpec((Bb, C, HW), lambda i: (i, 0, 0)),
    )

    out_flat = pl.pallas_call(
        kernel,
        out_shape=jax.ShapeDtypeStruct((B, C, HW), x.dtype),
        grid_spec=grid_spec,
        compiler_params=pltpu.CompilerParams(
            dimension_semantics=("parallel",),
            vmem_limit_bytes=8 * 1024 * 1024,
        ),
    )(x_flat, w1t, w2f, cw_flat, cb)
    return out_flat.reshape(B, C, H, W)


def csab_ref(x, w1, w2, conv_w, conv_b):
    # Pure-JAX reference mirroring the PyTorch forward.
    avg = jnp.mean(x, axis=(2, 3))   # (B, C)
    mx = jnp.max(x, axis=(2, 3))     # (B, C)

    def mlp(p):
        h = jnp.maximum(p @ w1.T, 0.0)
        return h @ w2.T

    ca = jax.nn.sigmoid(mlp(avg) + mlp(mx))[:, :, None, None]
    o1 = x * ca
    a_s = jnp.mean(o1, axis=1, keepdims=True)
    m_s = jnp.max(o1, axis=1, keepdims=True)
    s_in = jnp.concatenate([a_s, m_s], axis=1)            # (B, 2, H, W)
    conv = jax.lax.conv_general_dilated(
        s_in, conv_w, window_strides=(1, 1), padding=[(PAD, PAD), (PAD, PAD)],
        dimension_numbers=("NCHW", "OIHW", "NCHW"))
    sa = jax.nn.sigmoid(conv + conv_b[None, :, None, None])
    return o1 * sa


if __name__ == "__main__":
    B, C, H, W = 2, 32, 16, 16
    reduction_ratio = 16
    mid = C // reduction_ratio   # 2

    key = jax.random.PRNGKey(0)
    kx, k1, k2, k3, k4 = jax.random.split(key, 5)
    x = jax.random.normal(kx, (B, C, H, W), dtype=jnp.float32)
    w1 = jax.random.normal(k1, (mid, C), dtype=jnp.float32) * 0.1   # fc1 (1x1 conv, no bias)
    w2 = jax.random.normal(k2, (C, mid), dtype=jnp.float32) * 0.1   # fc2 (1x1 conv, no bias)
    conv_w = jax.random.normal(k3, (1, 2, KSIZE, KSIZE), dtype=jnp.float32) * 0.1
    conv_b = jax.random.normal(k4, (1,), dtype=jnp.float32) * 0.1

    out = csab(x, w1, w2, conv_w, conv_b)
    out = jax.block_until_ready(out)

    ref = csab_ref(x, w1, w2, conv_w, conv_b)
    assert out.shape == (B, C, H, W)
    assert jnp.allclose(out, ref, atol=1e-4, rtol=1e-4), "mismatch vs JAX reference"

    print("KERNEL_OK")
</pallas_src>

<mosaic_0001>
module attributes {stable_mosaic.version = 11 : i64} {
  func.func @csab_kernel(%arg0: i32, %arg1: memref<2x32x256xf32, #tpu.memory_space<vmem>>, %arg2: memref<32x2xf32, #tpu.memory_space<vmem>>, %arg3: memref<32x2xf32, #tpu.memory_space<vmem>>, %arg4: memref<98xf32, #tpu.memory_space<smem>>, %arg5: memref<1xf32, #tpu.memory_space<smem>>, %arg6: memref<2x32x256xf32, #tpu.memory_space<vmem>>) attributes {dimension_semantics = [#tpu.dimension_semantics<parallel>], iteration_bounds = array<i64: 1>, scalar_prefetch = 0 : i64, scratch_operands = 0 : i64, tpu.core_type = #tpu.core_type<tc>, window_params = [{transform_indices = @transform_0, window_bounds = array<i64: 2, 32, 256>}, {pipeline_mode = #tpu.pipeline_mode<synchronous>, transform_indices = @transform_1, window_bounds = array<i64: 32, 2>}, {pipeline_mode = #tpu.pipeline_mode<synchronous>, transform_indices = @transform_2, window_bounds = array<i64: 32, 2>}, {transform_indices = @transform_3, window_bounds = array<i64: 98>}, {transform_indices = @transform_4, window_bounds = array<i64: 1>}, {transform_indices = @transform_5, window_bounds = array<i64: 2, 32, 256>}]} {
    %c0 = arith.constant 0 : index
    %c0_0 = arith.constant 0 : index
    %0 = vector.load %arg2[%c0, %c0_0] : memref<32x2xf32, #tpu.memory_space<vmem>>, vector<32x2xf32>
    %c0_1 = arith.constant 0 : index
    %c0_2 = arith.constant 0 : index
    %1 = vector.load %arg3[%c0_1, %c0_2] : memref<32x2xf32, #tpu.memory_space<vmem>>, vector<32x2xf32>
    %c0_3 = arith.constant 0 : index
    %2 = memref.load %arg5[%c0_3] : memref<1xf32, #tpu.memory_space<smem>>
    %c0_4 = arith.constant 0 : index
    %3 = memref.load %arg4[%c0_4] : memref<98xf32, #tpu.memory_space<smem>>
    %c1 = arith.constant 1 : index
    %4 = memref.load %arg4[%c1] : memref<98xf32, #tpu.memory_space<smem>>
    %c2 = arith.constant 2 : index
    %5 = memref.load %arg4[%c2] : memref<98xf32, #tpu.memory_space<smem>>
    %c3 = arith.constant 3 : index
    %6 = memref.load %arg4[%c3] : memref<98xf32, #tpu.memory_space<smem>>
    %c4 = arith.constant 4 : index
    %7 = memref.load %arg4[%c4] : memref<98xf32, #tpu.memory_space<smem>>
    %c5 = arith.constant 5 : index
    %8 = memref.load %arg4[%c5] : memref<98xf32, #tpu.memory_space<smem>>
    %c6 = arith.constant 6 : index
    %9 = memref.load %arg4[%c6] : memref<98xf32, #tpu.memory_space<smem>>
    %c7 = arith.constant 7 : index
    %10 = memref.load %arg4[%c7] : memref<98xf32, #tpu.memory_space<smem>>
    %c8 = arith.constant 8 : index
    %11 = memref.load %arg4[%c8] : memref<98xf32, #tpu.memory_space<smem>>
    %c9 = arith.constant 9 : index
    %12 = memref.load %arg4[%c9] : memref<98xf32, #tpu.memory_space<smem>>
    %c10 = arith.constant 10 : index
    %13 = memref.load %arg4[%c10] : memref<98xf32, #tpu.memory_space<smem>>
    %c11 = arith.constant 11 : index
    %14 = memref.load %arg4[%c11] : memref<98xf32, #tpu.memory_space<smem>>
    %c12 = arith.constant 12 : index
    %15 = memref.load %arg4[%c12] : memref<98xf32, #tpu.memory_space<smem>>
    %c13 = arith.constant 13 : index
    %16 = memref.load %arg4[%c13] : memref<98xf32, #tpu.memory_space<smem>>
    %c14 = arith.constant 14 : index
    %17 = memref.load %arg4[%c14] : memref<98xf32, #tpu.memory_space<smem>>
    %c15 = arith.constant 15 : index
    %18 = memref.load %arg4[%c15] : memref<98xf32, #tpu.memory_space<smem>>
    %c16 = arith.constant 16 : index
    %19 = memref.load %arg4[%c16] : memref<98xf32, #tpu.memory_space<smem>>
    %c17 = arith.constant 17 : index
    %20 = memref.load %arg4[%c17] : memref<98xf32, #tpu.memory_space<smem>>
    %c18 = arith.constant 18 : index
    %21 = memref.load %arg4[%c18] : memref<98xf32, #tpu.memory_space<smem>>
    %c19 = arith.constant 19 : index
    %22 = memref.load %arg4[%c19] : memref<98xf32, #tpu.memory_space<smem>>
    %c20 = arith.constant 20 : index
    %23 = memref.load %arg4[%c20] : memref<98xf32, #tpu.memory_space<smem>>
    %c21 = arith.constant 21 : index
    %24 = memref.load %arg4[%c21] : memref<98xf32, #tpu.memory_space<smem>>
    %c22 = arith.constant 22 : index
    %25 = memref.load %arg4[%c22] : memref<98xf32, #tpu.memory_space<smem>>
    %c23 = arith.constant 23 : index
    %26 = memref.load %arg4[%c23] : memref<98xf32, #tpu.memory_space<smem>>
    %c24 = arith.constant 24 : index
    %27 = memref.load %arg4[%c24] : memref<98xf32, #tpu.memory_space<smem>>
    %c25 = arith.constant 25 : index
    %28 = memref.load %arg4[%c25] : memref<98xf32, #tpu.memory_space<smem>>
    %c26 = arith.constant 26 : index
    %29 = memref.load %arg4[%c26] : memref<98xf32, #tpu.memory_space<smem>>
    %c27 = arith.constant 27 : index
    %30 = memref.load %arg4[%c27] : memref<98xf32, #tpu.memory_space<smem>>
    %c28 = arith.constant 28 : index
    %31 = memref.load %arg4[%c28] : memref<98xf32, #tpu.memory_space<smem>>
    %c29 = arith.constant 29 : index
    %32 = memref.load %arg4[%c29] : memref<98xf32, #tpu.memory_space<smem>>
    %c30 = arith.constant 30 : index
    %33 = memref.load %arg4[%c30] : memref<98xf32, #tpu.memory_space<smem>>
    %c31 = arith.constant 31 : index
    %34 = memref.load %arg4[%c31] : memref<98xf32, #tpu.memory_space<smem>>
    %c32 = arith.constant 32 : index
    %35 = memref.load %arg4[%c32] : memref<98xf32, #tpu.memory_space<smem>>
    %c33 = arith.constant 33 : index
    %36 = memref.load %arg4[%c33] : memref<98xf32, #tpu.memory_space<smem>>
    %c34 = arith.constant 34 : index
    %37 = memref.load %arg4[%c34] : memref<98xf32, #tpu.memory_space<smem>>
    %c35 = arith.constant 35 : index
    %38 = memref.load %arg4[%c35] : memref<98xf32, #tpu.memory_space<smem>>
    %c36 = arith.constant 36 : index
    %39 = memref.load %arg4[%c36] : memref<98xf32, #tpu.memory_space<smem>>
    %c37 = arith.constant 37 : index
    %40 = memref.load %arg4[%c37] : memref<98xf32, #tpu.memory_space<smem>>
    %c38 = arith.constant 38 : index
    %41 = memref.load %arg4[%c38] : memref<98xf32, #tpu.memory_space<smem>>
    %c39 = arith.constant 39 : index
    %42 = memref.load %arg4[%c39] : memref<98xf32, #tpu.memory_space<smem>>
    %c40 = arith.constant 40 : index
    %43 = memref.load %arg4[%c40] : memref<98xf32, #tpu.memory_space<smem>>
    %c41 = arith.constant 41 : index
    %44 = memref.load %arg4[%c41] : memref<98xf32, #tpu.memory_space<smem>>
    %c42 = arith.constant 42 : index
    %45 = memref.load %arg4[%c42] : memref<98xf32, #tpu.memory_space<smem>>
    %c43 = arith.constant 43 : index
    %46 = memref.load %arg4[%c43] : memref<98xf32, #tpu.memory_space<smem>>
    %c44 = arith.constant 44 : index
    %47 = memref.load %arg4[%c44] : memref<98xf32, #tpu.memory_space<smem>>
    %c45 = arith.constant 45 : index
    %48 = memref.load %arg4[%c45] : memref<98xf32, #tpu.memory_space<smem>>
    %c46 = arith.constant 46 : index
    %49 = memref.load %arg4[%c46] : memref<98xf32, #tpu.memory_space<smem>>
    %c47 = arith.constant 47 : index
    %50 = memref.load %arg4[%c47] : memref<98xf32, #tpu.memory_space<smem>>
    %c48 = arith.constant 48 : index
    %51 = memref.load %arg4[%c48] : memref<98xf32, #tpu.memory_space<smem>>
    %c49 = arith.constant 49 : index
    %52 = memref.load %arg4[%c49] : memref<98xf32, #tpu.memory_space<smem>>
    %c50 = arith.constant 50 : index
    %53 = memref.load %arg4[%c50] : memref<98xf32, #tpu.memory_space<smem>>
    %c51 = arith.constant 51 : index
    %54 = memref.load %arg4[%c51] : memref<98xf32, #tpu.memory_space<smem>>
    %c52 = arith.constant 52 : index
    %55 = memref.load %arg4[%c52] : memref<98xf32, #tpu.memory_space<smem>>
    %c53 = arith.constant 53 : index
    %56 = memref.load %arg4[%c53] : memref<98xf32, #tpu.memory_space<smem>>
    %c54 = arith.constant 54 : index
    %57 = memref.load %arg4[%c54] : memref<98xf32, #tpu.memory_space<smem>>
    %c55 = arith.constant 55 : index
    %58 = memref.load %arg4[%c55] : memref<98xf32, #tpu.memory_space<smem>>
    %c56 = arith.constant 56 : index
    %59 = memref.load %arg4[%c56] : memref<98xf32, #tpu.memory_space<smem>>
    %c57 = arith.constant 57 : index
    %60 = memref.load %arg4[%c57] : memref<98xf32, #tpu.memory_space<smem>>
    %c58 = arith.constant 58 : index
    %61 = memref.load %arg4[%c58] : memref<98xf32, #tpu.memory_space<smem>>
    %c59 = arith.constant 59 : index
    %62 = memref.load %arg4[%c59] : memref<98xf32, #tpu.memory_space<smem>>
    %c60 = arith.constant 60 : index
    %63 = memref.load %arg4[%c60] : memref<98xf32, #tpu.memory_space<smem>>
    %c61 = arith.constant 61 : index
    %64 = memref.load %arg4[%c61] : memref<98xf32, #tpu.memory_space<smem>>
    %c62 = arith.constant 62 : index
    %65 = memref.load %arg4[%c62] : memref<98xf32, #tpu.memory_space<smem>>
    %c63 = arith.constant 63 : index
    %66 = memref.load %arg4[%c63] : memref<98xf32, #tpu.memory_space<smem>>
    %c64 = arith.constant 64 : index
    %67 = memref.load %arg4[%c64] : memref<98xf32, #tpu.memory_space<smem>>
    %c65 = arith.constant 65 : index
    %68 = memref.load %arg4[%c65] : memref<98xf32, #tpu.memory_space<smem>>
    %c66 = arith.constant 66 : index
    %69 = memref.load %arg4[%c66] : memref<98xf32, #tpu.memory_space<smem>>
    %c67 = arith.constant 67 : index
    %70 = memref.load %arg4[%c67] : memref<98xf32, #tpu.memory_space<smem>>
    %c68 = arith.constant 68 : index
    %71 = memref.load %arg4[%c68] : memref<98xf32, #tpu.memory_space<smem>>
    %c69 = arith.constant 69 : index
    %72 = memref.load %arg4[%c69] : memref<98xf32, #tpu.memory_space<smem>>
    %c70 = arith.constant 70 : index
    %73 = memref.load %arg4[%c70] : memref<98xf32, #tpu.memory_space<smem>>
    %c71 = arith.constant 71 : index
    %74 = memref.load %arg4[%c71] : memref<98xf32, #tpu.memory_space<smem>>
    %c72 = arith.constant 72 : index
    %75 = memref.load %arg4[%c72] : memref<98xf32, #tpu.memory_space<smem>>
    %c73 = arith.constant 73 : index
    %76 = memref.load %arg4[%c73] : memref<98xf32, #tpu.memory_space<smem>>
    %c74 = arith.constant 74 : index
    %77 = memref.load %arg4[%c74] : memref<98xf32, #tpu.memory_space<smem>>
    %c75 = arith.constant 75 : index
    %78 = memref.load %arg4[%c75] : memref<98xf32, #tpu.memory_space<smem>>
    %c76 = arith.constant 76 : index
    %79 = memref.load %arg4[%c76] : memref<98xf32, #tpu.memory_space<smem>>
    %c77 = arith.constant 77 : index
    %80 = memref.load %arg4[%c77] : memref<98xf32, #tpu.memory_space<smem>>
    %c78 = arith.constant 78 : index
    %81 = memref.load %arg4[%c78] : memref<98xf32, #tpu.memory_space<smem>>
    %c79 = arith.constant 79 : index
    %82 = memref.load %arg4[%c79] : memref<98xf32, #tpu.memory_space<smem>>
    %c80 = arith.constant 80 : index
    %83 = memref.load %arg4[%c80] : memref<98xf32, #tpu.memory_space<smem>>
    %c81 = arith.constant 81 : index
    %84 = memref.load %arg4[%c81] : memref<98xf32, #tpu.memory_space<smem>>
    %c82 = arith.constant 82 : index
    %85 = memref.load %arg4[%c82] : memref<98xf32, #tpu.memory_space<smem>>
    %c83 = arith.constant 83 : index
    %86 = memref.load %arg4[%c83] : memref<98xf32, #tpu.memory_space<smem>>
    %c84 = arith.constant 84 : index
    %87 = memref.load %arg4[%c84] : memref<98xf32, #tpu.memory_space<smem>>
    %c85 = arith.constant 85 : index
    %88 = memref.load %arg4[%c85] : memref<98xf32, #tpu.memory_space<smem>>
    %c86 = arith.constant 86 : index
    %89 = memref.load %arg4[%c86] : memref<98xf32, #tpu.memory_space<smem>>
    %c87 = arith.constant 87 : index
    %90 = memref.load %arg4[%c87] : memref<98xf32, #tpu.memory_space<smem>>
    %c88 = arith.constant 88 : index
    %91 = memref.load %arg4[%c88] : memref<98xf32, #tpu.memory_space<smem>>
    %c89 = arith.constant 89 : index
    %92 = memref.load %arg4[%c89] : memref<98xf32, #tpu.memory_space<smem>>
    %c90 = arith.constant 90 : index
    %93 = memref.load %arg4[%c90] : memref<98xf32, #tpu.memory_space<smem>>
    %c91 = arith.constant 91 : index
    %94 = memref.load %arg4[%c91] : memref<98xf32, #tpu.memory_space<smem>>
    %c92 = arith.constant 92 : index
    %95 = memref.load %arg4[%c92] : memref<98xf32, #tpu.memory_space<smem>>
    %c93 = arith.constant 93 : index
    %96 = memref.load %arg4[%c93] : memref<98xf32, #tpu.memory_space<smem>>
    %c94 = arith.constant 94 : index
    %97 = memref.load %arg4[%c94] : memref<98xf32, #tpu.memory_space<smem>>
    %c95 = arith.constant 95 : index
    %98 = memref.load %arg4[%c95] : memref<98xf32, #tpu.memory_space<smem>>
    %c96 = arith.constant 96 : index
    %99 = memref.load %arg4[%c96] : memref<98xf32, #tpu.memory_space<smem>>
    %c97 = arith.constant 97 : index
    %100 = memref.load %arg4[%c97] : memref<98xf32, #tpu.memory_space<smem>>
    %101 = tpu.iota {dimensions = array<i32: 1>} : vector<1x256xi32>
    %c15_i32 = arith.constant 15 : i32
    %102 = vector.broadcast %c15_i32 : i32 to vector<1x256xi32>
    %103 = arith.andi %101, %102 : vector<1x256xi32>
    %c4_i32 = arith.constant 4 : i32
    %104 = vector.broadcast %c4_i32 : i32 to vector<1x256xi32>
    %105 = arith.shrsi %101, %104 : vector<1x256xi32>
    %c3_i32 = arith.constant 3 : i32
    %106 = vector.broadcast %c3_i32 : i32 to vector<1x256xi32>
    %107 = arith.cmpi sge, %103, %106 : vector<1x256xi32>
    %c19_i32 = arith.constant 19 : i32
    %108 = vector.broadcast %c19_i32 : i32 to vector<1x256xi32>
    %109 = arith.cmpi slt, %103, %108 : vector<1x256xi32>
    %110 = arith.andi %107, %109 : vector<1x256xi1>
    %c2_i32 = arith.constant 2 : i32
    %111 = vector.broadcast %c2_i32 : i32 to vector<1x256xi32>
    %112 = arith.cmpi sge, %103, %111 : vector<1x256xi32>
    %c18_i32 = arith.constant 18 : i32
    %113 = vector.broadcast %c18_i32 : i32 to vector<1x256xi32>
    %114 = arith.cmpi slt, %103, %113 : vector<1x256xi32>
    %115 = arith.andi %112, %114 : vector<1x256xi1>
    %c1_i32 = arith.constant 1 : i32
    %116 = vector.broadcast %c1_i32 : i32 to vector<1x256xi32>
    %117 = arith.cmpi sge, %103, %116 : vector<1x256xi32>
    %c17_i32 = arith.constant 17 : i32
    %118 = vector.broadcast %c17_i32 : i32 to vector<1x256xi32>
    %119 = arith.cmpi slt, %103, %118 : vector<1x256xi32>
    %120 = arith.andi %117, %119 : vector<1x256xi1>
    %c0_i32 = arith.constant 0 : i32
    %121 = vector.broadcast %c0_i32 : i32 to vector<1x256xi32>
    %122 = arith.cmpi sge, %103, %121 : vector<1x256xi32>
    %c16_i32 = arith.constant 16 : i32
    %123 = vector.broadcast %c16_i32 : i32 to vector<1x256xi32>
    %124 = arith.cmpi slt, %103, %123 : vector<1x256xi32>
    %125 = arith.andi %122, %124 : vector<1x256xi1>
    %c-1_i32 = arith.constant -1 : i32
    %126 = vector.broadcast %c-1_i32 : i32 to vector<1x256xi32>
    %127 = arith.cmpi sge, %103, %126 : vector<1x256xi32>
    %c15_i32_5 = arith.constant 15 : i32
    %128 = vector.broadcast %c15_i32_5 : i32 to vector<1x256xi32>
    %129 = arith.cmpi slt, %103, %128 : vector<1x256xi32>
    %130 = arith.andi %127, %129 : vector<1x256xi1>
    %c-2_i32 = arith.constant -2 : i32
    %131 = vector.broadcast %c-2_i32 : i32 to vector<1x256xi32>
    %132 = arith.cmpi sge, %103, %131 : vector<1x256xi32>
    %c14_i32 = arith.constant 14 : i32
    %133 = vector.broadcast %c14_i32 : i32 to vector<1x256xi32>
    %134 = arith.cmpi slt, %103, %133 : vector<1x256xi32>
    %135 = arith.andi %132, %134 : vector<1x256xi1>
    %c-3_i32 = arith.constant -3 : i32
    %136 = vector.broadcast %c-3_i32 : i32 to vector<1x256xi32>
    %137 = arith.cmpi sge, %103, %136 : vector<1x256xi32>
    %c13_i32 = arith.constant 13 : i32
    %138 = vector.broadcast %c13_i32 : i32 to vector<1x256xi32>
    %139 = arith.cmpi slt, %103, %138 : vector<1x256xi32>
    %140 = arith.andi %137, %139 : vector<1x256xi1>
    %c3_i32_6 = arith.constant 3 : i32
    %141 = vector.broadcast %c3_i32_6 : i32 to vector<1x256xi32>
    %142 = arith.cmpi sge, %105, %141 : vector<1x256xi32>
    %c19_i32_7 = arith.constant 19 : i32
    %143 = vector.broadcast %c19_i32_7 : i32 to vector<1x256xi32>
    %144 = arith.cmpi slt, %105, %143 : vector<1x256xi32>
    %145 = arith.andi %142, %144 : vector<1x256xi1>
    %c2_i32_8 = arith.constant 2 : i32
    %146 = vector.broadcast %c2_i32_8 : i32 to vector<1x256xi32>
    %147 = arith.cmpi sge, %105, %146 : vector<1x256xi32>
    %c18_i32_9 = arith.constant 18 : i32
    %148 = vector.broadcast %c18_i32_9 : i32 to vector<1x256xi32>
    %149 = arith.cmpi slt, %105, %148 : vector<1x256xi32>
    %150 = arith.andi %147, %149 : vector<1x256xi1>
    %c1_i32_10 = arith.constant 1 : i32
    %151 = vector.broadcast %c1_i32_10 : i32 to vector<1x256xi32>
    %152 = arith.cmpi sge, %105, %151 : vector<1x256xi32>
    %c17_i32_11 = arith.constant 17 : i32
    %153 = vector.broadcast %c17_i32_11 : i32 to vector<1x256xi32>
    %154 = arith.cmpi slt, %105, %153 : vector<1x256xi32>
    %155 = arith.andi %152, %154 : vector<1x256xi1>
    %c0_i32_12 = arith.constant 0 : i32
    %156 = vector.broadcast %c0_i32_12 : i32 to vector<1x256xi32>
    %157 = arith.cmpi sge, %105, %156 : vector<1x256xi32>
    %c16_i32_13 = arith.constant 16 : i32
    %158 = vector.broadcast %c16_i32_13 : i32 to vector<1x256xi32>
    %159 = arith.cmpi slt, %105, %158 : vector<1x256xi32>
    %160 = arith.andi %157, %159 : vector<1x256xi1>
    %c-1_i32_14 = arith.constant -1 : i32
    %161 = vector.broadcast %c-1_i32_14 : i32 to vector<1x256xi32>
    %162 = arith.cmpi sge, %105, %161 : vector<1x256xi32>
    %c15_i32_15 = arith.constant 15 : i32
    %163 = vector.broadcast %c15_i32_15 : i32 to vector<1x256xi32>
    %164 = arith.cmpi slt, %105, %163 : vector<1x256xi32>
    %165 = arith.andi %162, %164 : vector<1x256xi1>
    %c-2_i32_16 = arith.constant -2 : i32
    %166 = vector.broadcast %c-2_i32_16 : i32 to vector<1x256xi32>
    %167 = arith.cmpi sge, %105, %166 : vector<1x256xi32>
    %c14_i32_17 = arith.constant 14 : i32
    %168 = vector.broadcast %c14_i32_17 : i32 to vector<1x256xi32>
    %169 = arith.cmpi slt, %105, %168 : vector<1x256xi32>
    %170 = arith.andi %167, %169 : vector<1x256xi1>
    %c-3_i32_18 = arith.constant -3 : i32
    %171 = vector.broadcast %c-3_i32_18 : i32 to vector<1x256xi32>
    %172 = arith.cmpi sge, %105, %171 : vector<1x256xi32>
    %c13_i32_19 = arith.constant 13 : i32
    %173 = vector.broadcast %c13_i32_19 : i32 to vector<1x256xi32>
    %174 = arith.cmpi slt, %105, %173 : vector<1x256xi32>
    %175 = arith.andi %172, %174 : vector<1x256xi1>
    %c0_20 = arith.constant 0 : index
    %c0_21 = arith.constant 0 : index
    %c0_22 = arith.constant 0 : index
    %176 = vector.load %arg1[%c0_20, %c0_21, %c0_22] : memref<2x32x256xf32, #tpu.memory_space<vmem>>, vector<1x32x256xf32>
    %177 = vector.shape_cast %176 : vector<1x32x256xf32> to vector<32x256xf32>
    %cst = arith.constant dense<0.000000e+00> : vector<32xf32>
    %178 = vector.multi_reduction <add>, %177, %cst [1] : vector<32x256xf32> to vector<32xf32>
    %179 = vector.shape_cast %178 : vector<32xf32> to vector<32x1xf32>
    %cst_23 = arith.constant 3.906250e-03 : f32
    %180 = vector.broadcast %cst_23 : f32 to vector<32x1xf32>
    %181 = arith.mulf %179, %180 : vector<32x1xf32>
    %cst_24 = arith.constant dense<0xFF800000> : vector<32xf32>
    %182 = vector.multi_reduction <maximumf>, %177, %cst_24 [1] : vector<32x256xf32> to vector<32xf32>
    %183 = vector.shape_cast %182 : vector<32xf32> to vector<32x1xf32>
    %184 = vector.broadcast %181 : vector<32x1xf32> to vector<32x2xf32>
    %185 = arith.mulf %0, %184 : vector<32x2xf32>
    %cst_25 = arith.constant dense<0.000000e+00> : vector<2xf32>
    %186 = vector.multi_reduction <add>, %185, %cst_25 [0] : vector<32x2xf32> to vector<2xf32>
    %187 = vector.shape_cast %186 : vector<2xf32> to vector<1x2xf32>
    %188 = vector.broadcast %183 : vector<32x1xf32> to vector<32x2xf32>
    %189 = arith.mulf %0, %188 : vector<32x2xf32>
    %cst_26 = arith.constant dense<0.000000e+00> : vector<2xf32>
    %190 = vector.multi_reduction <add>, %189, %cst_26 [0] : vector<32x2xf32> to vector<2xf32>
    %191 = vector.shape_cast %190 : vector<2xf32> to vector<1x2xf32>
    %cst_27 = arith.constant 0.000000e+00 : f32
    %192 = vector.broadcast %cst_27 : f32 to vector<1x2xf32>
    %193 = arith.maximumf %187, %192 : vector<1x2xf32>
    %cst_28 = arith.constant 0.000000e+00 : f32
    %194 = vector.broadcast %cst_28 : f32 to vector<1x2xf32>
    %195 = arith.maximumf %191, %194 : vector<1x2xf32>
    %196 = arith.addf %193, %195 : vector<1x2xf32>
    %197 = vector.broadcast %196 : vector<1x2xf32> to vector<32x2xf32>
    %198 = arith.mulf %1, %197 : vector<32x2xf32>
    %cst_29 = arith.constant dense<0.000000e+00> : vector<32xf32>
    %199 = vector.multi_reduction <add>, %198, %cst_29 [1] : vector<32x2xf32> to vector<32xf32>
    %200 = vector.shape_cast %199 : vector<32xf32> to vector<32x1xf32>
    %201 = arith.negf %200 : vector<32x1xf32>
    %202 = math.exp %201 : vector<32x1xf32>
    %cst_30 = arith.constant 1.000000e+00 : f32
    %203 = vector.broadcast %cst_30 : f32 to vector<32x1xf32>
    %204 = arith.addf %203, %202 : vector<32x1xf32>
    %205 = arith.divf %203, %204 : vector<32x1xf32>
    %206 = vector.broadcast %205 : vector<32x1xf32> to vector<32x256xf32>
    %207 = arith.mulf %177, %206 : vector<32x256xf32>
    %cst_31 = arith.constant dense<0.000000e+00> : vector<256xf32>
    %208 = vector.multi_reduction <add>, %207, %cst_31 [0] : vector<32x256xf32> to vector<256xf32>
    %209 = vector.shape_cast %208 : vector<256xf32> to vector<1x256xf32>
    %cst_32 = arith.constant 3.125000e-02 : f32
    %210 = vector.broadcast %cst_32 : f32 to vector<1x256xf32>
    %211 = arith.mulf %209, %210 : vector<1x256xf32>
    %cst_33 = arith.constant dense<0xFF800000> : vector<256xf32>
    %212 = vector.multi_reduction <maximumf>, %207, %cst_33 [0] : vector<32x256xf32> to vector<256xf32>
    %213 = vector.shape_cast %212 : vector<256xf32> to vector<1x256xf32>
    %c51_i32 = arith.constant 51 : i32
    %214 = tpu.dynamic_rotate %211 by %c51_i32 dim 1 : vector<1x256xf32>, i32 -> vector<1x256xf32>
    %c51_i32_34 = arith.constant 51 : i32
    %215 = tpu.dynamic_rotate %213 by %c51_i32_34 dim 1 : vector<1x256xf32>, i32 -> vector<1x256xf32>
    %216 = vector.broadcast %3 : f32 to vector<1x256xf32>
    %217 = arith.mulf %216, %214 : vector<1x256xf32>
    %218 = vector.broadcast %52 : f32 to vector<1x256xf32>
    %219 = arith.mulf %218, %215 : vector<1x256xf32>
    %220 = arith.addf %217, %219 : vector<1x256xf32>
    %cst_35 = arith.constant 0.000000e+00 : f32
    %221 = vector.broadcast %cst_35 : f32 to vector<1x256xf32>
    %222 = arith.select %110, %220, %221 : vector<1x256xi1>, vector<1x256xf32>
    %c50_i32 = arith.constant 50 : i32
    %223 = tpu.dynamic_rotate %211 by %c50_i32 dim 1 : vector<1x256xf32>, i32 -> vector<1x256xf32>
    %c50_i32_36 = arith.constant 50 : i32
    %224 = tpu.dynamic_rotate %213 by %c50_i32_36 dim 1 : vector<1x256xf32>, i32 -> vector<1x256xf32>
    %225 = vector.broadcast %4 : f32 to vector<1x256xf32>
    %226 = arith.mulf %225, %223 : vector<1x256xf32>
    %227 = vector.broadcast %53 : f32 to vector<1x256xf32>
    %228 = arith.mulf %227, %224 : vector<1x256xf32>
    %229 = arith.addf %226, %228 : vector<1x256xf32>
    %cst_37 = arith.constant 0.000000e+00 : f32
    %230 = vector.broadcast %cst_37 : f32 to vector<1x256xf32>
    %231 = arith.select %115, %229, %230 : vector<1x256xi1>, vector<1x256xf32>
    %232 = arith.addf %222, %231 : vector<1x256xf32>
    %c49_i32 = arith.constant 49 : i32
    %233 = tpu.dynamic_rotate %211 by %c49_i32 dim 1 : vector<1x256xf32>, i32 -> vector<1x256xf32>
    %c49_i32_38 = arith.constant 49 : i32
    %234 = tpu.dynamic_rotate %213 by %c49_i32_38 dim 1 : vector<1x256xf32>, i32 -> vector<1x256xf32>
    %235 = vector.broadcast %5 : f32 to vector<1x256xf32>
    %236 = arith.mulf %235, %233 : vector<1x256xf32>
    %237 = vector.broadcast %54 : f32 to vector<1x256xf32>
    %238 = arith.mulf %237, %234 : vector<1x256xf32>
    %239 = arith.addf %236, %238 : vector<1x256xf32>
    %cst_39 = arith.constant 0.000000e+00 : f32
    %240 = vector.broadcast %cst_39 : f32 to vector<1x256xf32>
    %241 = arith.select %120, %239, %240 : vector<1x256xi1>, vector<1x256xf32>
    %242 = arith.addf %232, %241 : vector<1x256xf32>
    %c48_i32 = arith.constant 48 : i32
    %243 = tpu.dynamic_rotate %211 by %c48_i32 dim 1 : vector<1x256xf32>, i32 -> vector<1x256xf32>
    %c48_i32_40 = arith.constant 48 : i32
    %244 = tpu.dynamic_rotate %213 by %c48_i32_40 dim 1 : vector<1x256xf32>, i32 -> vector<1x256xf32>
    %245 = vector.broadcast %6 : f32 to vector<1x256xf32>
    %246 = arith.mulf %245, %243 : vector<1x256xf32>
    %247 = vector.broadcast %55 : f32 to vector<1x256xf32>
    %248 = arith.mulf %247, %244 : vector<1x256xf32>
    %249 = arith.addf %246, %248 : vector<1x256xf32>
    %cst_41 = arith.constant 0.000000e+00 : f32
    %250 = vector.broadcast %cst_41 : f32 to vector<1x256xf32>
    %251 = arith.select %125, %249, %250 : vector<1x256xi1>, vector<1x256xf32>
    %252 = arith.addf %242, %251 : vector<1x256xf32>
    %c47_i32 = arith.constant 47 : i32
    %253 = tpu.dynamic_rotate %211 by %c47_i32 dim 1 : vector<1x256xf32>, i32 -> vector<1x256xf32>
    %c47_i32_42 = arith.constant 47 : i32
    %254 = tpu.dynamic_rotate %213 by %c47_i32_42 dim 1 : vector<1x256xf32>, i32 -> vector<1x256xf32>
    %255 = vector.broadcast %7 : f32 to vector<1x256xf32>
    %256 = arith.mulf %255, %253 : vector<1x256xf32>
    %257 = vector.broadcast %56 : f32 to vector<1x256xf32>
    %258 = arith.mulf %257, %254 : vector<1x256xf32>
    %259 = arith.addf %256, %258 : vector<1x256xf32>
    %cst_43 = arith.constant 0.000000e+00 : f32
    %260 = vector.broadcast %cst_43 : f32 to vector<1x256xf32>
    %261 = arith.select %130, %259, %260 : vector<1x256xi1>, vector<1x256xf32>
    %262 = arith.addf %252, %261 : vector<1x256xf32>
    %c46_i32 = arith.constant 46 : i32
    %263 = tpu.dynamic_rotate %211 by %c46_i32 dim 1 : vector<1x256xf32>, i32 -> vector<1x256xf32>
    %c46_i32_44 = arith.constant 46 : i32
    %264 = tpu.dynamic_rotate %213 by %c46_i32_44 dim 1 : vector<1x256xf32>, i32 -> vector<1x256xf32>
    %265 = vector.broadcast %8 : f32 to vector<1x256xf32>
    %266 = arith.mulf %265, %263 : vector<1x256xf32>
    %267 = vector.broadcast %57 : f32 to vector<1x256xf32>
    %268 = arith.mulf %267, %264 : vector<1x256xf32>
    %269 = arith.addf %266, %268 : vector<1x256xf32>
    %cst_45 = arith.constant 0.000000e+00 : f32
    %270 = vector.broadcast %cst_45 : f32 to vector<1x256xf32>
    %271 = arith.select %135, %269, %270 : vector<1x256xi1>, vector<1x256xf32>
    %272 = arith.addf %262, %271 : vector<1x256xf32>
    %c45_i32 = arith.constant 45 : i32
    %273 = tpu.dynamic_rotate %211 by %c45_i32 dim 1 : vector<1x256xf32>, i32 -> vector<1x256xf32>
    %c45_i32_46 = arith.constant 45 : i32
    %274 = tpu.dynamic_rotate %213 by %c45_i32_46 dim 1 : vector<1x256xf32>, i32 -> vector<1x256xf32>
    %275 = vector.broadcast %9 : f32 to vector<1x256xf32>
    %276 = arith.mulf %275, %273 : vector<1x256xf32>
    %277 = vector.broadcast %58 : f32 to vector<1x256xf32>
    %278 = arith.mulf %277, %274 : vector<1x256xf32>
    %279 = arith.addf %276, %278 : vector<1x256xf32>
    %cst_47 = arith.constant 0.000000e+00 : f32
    %280 = vector.broadcast %cst_47 : f32 to vector<1x256xf32>
    %281 = arith.select %140, %279, %280 : vector<1x256xi1>, vector<1x256xf32>
    %282 = arith.addf %272, %281 : vector<1x256xf32>
    %cst_48 = arith.constant 0.000000e+00 : f32
    %283 = vector.broadcast %cst_48 : f32 to vector<1x256xf32>
    %284 = arith.select %145, %282, %283 : vector<1x256xi1>, vector<1x256xf32>
    %c35_i32 = arith.constant 35 : i32
    %285 = tpu.dynamic_rotate %211 by %c35_i32 dim 1 : vector<1x256xf32>, i32 -> vector<1x256xf32>
    %c35_i32_49 = arith.constant 35 : i32
    %286 = tpu.dynamic_rotate %213 by %c35_i32_49 dim 1 : vector<1x256xf32>, i32 -> vector<1x256xf32>
    %287 = vector.broadcast %10 : f32 to vector<1x256xf32>
    %288 = arith.mulf %287, %285 : vector<1x256xf32>
    %289 = vector.broadcast %59 : f32 to vector<1x256xf32>
    %290 = arith.mulf %289, %286 : vector<1x256xf32>
    %291 = arith.addf %288, %290 : vector<1x256xf32>
    %cst_50 = arith.constant 0.000000e+00 : f32
    %292 = vector.broadcast %cst_50 : f32 to vector<1x256xf32>
    %293 = arith.select %110, %291, %292 : vector<1x256xi1>, vector<1x256xf32>
    %c34_i32 = arith.constant 34 : i32
    %294 = tpu.dynamic_rotate %211 by %c34_i32 dim 1 : vector<1x256xf32>, i32 -> vector<1x256xf32>
    %c34_i32_51 = arith.constant 34 : i32
    %295 = tpu.dynamic_rotate %213 by %c34_i32_51 dim 1 : vector<1x256xf32>, i32 -> vector<1x256xf32>
    %296 = vector.broadcast %11 : f32 to vector<1x256xf32>
    %297 = arith.mulf %296, %294 : vector<1x256xf32>
    %298 = vector.broadcast %60 : f32 to vector<1x256xf32>
    %299 = arith.mulf %298, %295 : vector<1x256xf32>
    %300 = arith.addf %297, %299 : vector<1x256xf32>
    %cst_52 = arith.constant 0.000000e+00 : f32
    %301 = vector.broadcast %cst_52 : f32 to vector<1x256xf32>
    %302 = arith.select %115, %300, %301 : vector<1x256xi1>, vector<1x256xf32>
    %303 = arith.addf %293, %302 : vector<1x256xf32>
    %c33_i32 = arith.constant 33 : i32
    %304 = tpu.dynamic_rotate %211 by %c33_i32 dim 1 : vector<1x256xf32>, i32 -> vector<1x256xf32>
    %c33_i32_53 = arith.constant 33 : i32
    %305 = tpu.dynamic_rotate %213 by %c33_i32_53 dim 1 : vector<1x256xf32>, i32 -> vector<1x256xf32>
    %306 = vector.broadcast %12 : f32 to vector<1x256xf32>
    %307 = arith.mulf %306, %304 : vector<1x256xf32>
    %308 = vector.broadcast %61 : f32 to vector<1x256xf32>
    %309 = arith.mulf %308, %305 : vector<1x256xf32>
    %310 = arith.addf %307, %309 : vector<1x256xf32>
    %cst_54 = arith.constant 0.000000e+00 : f32
    %311 = vector.broadcast %cst_54 : f32 to vector<1x256xf32>
    %312 = arith.select %120, %310, %311 : vector<1x256xi1>, vector<1x256xf32>
    %313 = arith.addf %303, %312 : vector<1x256xf32>
    %c32_i32 = arith.constant 32 : i32
    %314 = tpu.dynamic_rotate %211 by %c32_i32 dim 1 : vector<1x256xf32>, i32 -> vector<1x256xf32>
    %c32_i32_55 = arith.constant 32 : i32
    %315 = tpu.dynamic_rotate %213 by %c32_i32_55 dim 1 : vector<1x256xf32>, i32 -> vector<1x256xf32>
    %316 = vector.broadcast %13 : f32 to vector<1x256xf32>
    %317 = arith.mulf %316, %314 : vector<1x256xf32>
    %318 = vector.broadcast %62 : f32 to vector<1x256xf32>
    %319 = arith.mulf %318, %315 : vector<1x256xf32>
    %320 = arith.addf %317, %319 : vector<1x256xf32>
    %cst_56 = arith.constant 0.000000e+00 : f32
    %321 = vector.broadcast %cst_56 : f32 to vector<1x256xf32>
    %322 = arith.select %125, %320, %321 : vector<1x256xi1>, vector<1x256xf32>
    %323 = arith.addf %313, %322 : vector<1x256xf32>
    %c31_i32 = arith.constant 31 : i32
    %324 = tpu.dynamic_rotate %211 by %c31_i32 dim 1 : vector<1x256xf32>, i32 -> vector<1x256xf32>
    %c31_i32_57 = arith.constant 31 : i32
    %325 = tpu.dynamic_rotate %213 by %c31_i32_57 dim 1 : vector<1x256xf32>, i32 -> vector<1x256xf32>
    %326 = vector.broadcast %14 : f32 to vector<1x256xf32>
    %327 = arith.mulf %326, %324 : vector<1x256xf32>
    %328 = vector.broadcast %63 : f32 to vector<1x256xf32>
    %329 = arith.mulf %328, %325 : vector<1x256xf32>
    %330 = arith.addf %327, %329 : vector<1x256xf32>
    %cst_58 = arith.constant 0.000000e+00 : f32
    %331 = vector.broadcast %cst_58 : f32 to vector<1x256xf32>
    %332 = arith.select %130, %330, %331 : vector<1x256xi1>, vector<1x256xf32>
    %333 = arith.addf %323, %332 : vector<1x256xf32>
    %c30_i32 = arith.constant 30 : i32
    %334 = tpu.dynamic_rotate %211 by %c30_i32 dim 1 : vector<1x256xf32>, i32 -> vector<1x256xf32>
    %c30_i32_59 = arith.constant 30 : i32
    %335 = tpu.dynamic_rotate %213 by %c30_i32_59 dim 1 : vector<1x256xf32>, i32 -> vector<1x256xf32>
    %336 = vector.broadcast %15 : f32 to vector<1x256xf32>
    %337 = arith.mulf %336, %334 : vector<1x256xf32>
    %338 = vector.broadcast %64 : f32 to vector<1x256xf32>
    %339 = arith.mulf %338, %335 : vector<1x256xf32>
    %340 = arith.addf %337, %339 : vector<1x256xf32>
    %cst_60 = arith.constant 0.000000e+00 : f32
    %341 = vector.broadcast %cst_60 : f32 to vector<1x256xf32>
    %342 = arith.select %135, %340, %341 : vector<1x256xi1>, vector<1x256xf32>
    %343 = arith.addf %333, %342 : vector<1x256xf32>
    %c29_i32 = arith.constant 29 : i32
    %344 = tpu.dynamic_rotate %211 by %c29_i32 dim 1 : vector<1x256xf32>, i32 -> vector<1x256xf32>
    %c29_i32_61 = arith.constant 29 : i32
    %345 = tpu.dynamic_rotate %213 by %c29_i32_61 dim 1 : vector<1x256xf32>, i32 -> vector<1x256xf32>
    %346 = vector.broadcast %16 : f32 to vector<1x256xf32>
    %347 = arith.mulf %346, %344 : vector<1x256xf32>
    %348 = vector.broadcast %65 : f32 to vector<1x256xf32>
    %349 = arith.mulf %348, %345 : vector<1x256xf32>
    %350 = arith.addf %347, %349 : vector<1x256xf32>
    %cst_62 = arith.constant 0.000000e+00 : f32
    %351 = vector.broadcast %cst_62 : f32 to vector<1x256xf32>
    %352 = arith.select %140, %350, %351 : vector<1x256xi1>, vector<1x256xf32>
    %353 = arith.addf %343, %352 : vector<1x256xf32>
    %cst_63 = arith.constant 0.000000e+00 : f32
    %354 = vector.broadcast %cst_63 : f32 to vector<1x256xf32>
    %355 = arith.select %150, %353, %354 : vector<1x256xi1>, vector<1x256xf32>
    %c19_i32_64 = arith.constant 19 : i32
    %356 = tpu.dynamic_rotate %211 by %c19_i32_64 dim 1 : vector<1x256xf32>, i32 -> vector<1x256xf32>
    %c19_i32_65 = arith.constant 19 : i32
    %357 = tpu.dynamic_rotate %213 by %c19_i32_65 dim 1 : vector<1x256xf32>, i32 -> vector<1x256xf32>
    %358 = vector.broadcast %17 : f32 to vector<1x256xf32>
    %359 = arith.mulf %358, %356 : vector<1x256xf32>
    %360 = vector.broadcast %66 : f32 to vector<1x256xf32>
    %361 = arith.mulf %360, %357 : vector<1x256xf32>
    %362 = arith.addf %359, %361 : vector<1x256xf32>
    %cst_66 = arith.constant 0.000000e+00 : f32
    %363 = vector.broadcast %cst_66 : f32 to vector<1x256xf32>
    %364 = arith.select %110, %362, %363 : vector<1x256xi1>, vector<1x256xf32>
    %c18_i32_67 = arith.constant 18 : i32
    %365 = tpu.dynamic_rotate %211 by %c18_i32_67 dim 1 : vector<1x256xf32>, i32 -> vector<1x256xf32>
    %c18_i32_68 = arith.constant 18 : i32
    %366 = tpu.dynamic_rotate %213 by %c18_i32_68 dim 1 : vector<1x256xf32>, i32 -> vector<1x256xf32>
    %367 = vector.broadcast %18 : f32 to vector<1x256xf32>
    %368 = arith.mulf %367, %365 : vector<1x256xf32>
    %369 = vector.broadcast %67 : f32 to vector<1x256xf32>
    %370 = arith.mulf %369, %366 : vector<1x256xf32>
    %371 = arith.addf %368, %370 : vector<1x256xf32>
    %cst_69 = arith.constant 0.000000e+00 : f32
    %372 = vector.broadcast %cst_69 : f32 to vector<1x256xf32>
    %373 = arith.select %115, %371, %372 : vector<1x256xi1>, vector<1x256xf32>
    %374 = arith.addf %364, %373 : vector<1x256xf32>
    %c17_i32_70 = arith.constant 17 : i32
    %375 = tpu.dynamic_rotate %211 by %c17_i32_70 dim 1 : vector<1x256xf32>, i32 -> vector<1x256xf32>
    %c17_i32_71 = arith.constant 17 : i32
    %376 = tpu.dynamic_rotate %213 by %c17_i32_71 dim 1 : vector<1x256xf32>, i32 -> vector<1x256xf32>
    %377 = vector.broadcast %19 : f32 to vector<1x256xf32>
    %378 = arith.mulf %377, %375 : vector<1x256xf32>
    %379 = vector.broadcast %68 : f32 to vector<1x256xf32>
    %380 = arith.mulf %379, %376 : vector<1x256xf32>
    %381 = arith.addf %378, %380 : vector<1x256xf32>
    %cst_72 = arith.constant 0.000000e+00 : f32
    %382 = vector.broadcast %cst_72 : f32 to vector<1x256xf32>
    %383 = arith.select %120, %381, %382 : vector<1x256xi1>, vector<1x256xf32>
    %384 = arith.addf %374, %383 : vector<1x256xf32>
    %c16_i32_73 = arith.constant 16 : i32
    %385 = tpu.dynamic_rotate %211 by %c16_i32_73 dim 1 : vector<1x256xf32>, i32 -> vector<1x256xf32>
    %c16_i32_74 = arith.constant 16 : i32
    %386 = tpu.dynamic_rotate %213 by %c16_i32_74 dim 1 : vector<1x256xf32>, i32 -> vector<1x256xf32>
    %387 = vector.broadcast %20 : f32 to vector<1x256xf32>
    %388 = arith.mulf %387, %385 : vector<1x256xf32>
    %389 = vector.broadcast %69 : f32 to vector<1x256xf32>
    %390 = arith.mulf %389, %386 : vector<1x256xf32>
    %391 = arith.addf %388, %390 : vector<1x256xf32>
    %cst_75 = arith.constant 0.000000e+00 : f32
    %392 = vector.broadcast %cst_75 : f32 to vector<1x256xf32>
    %393 = arith.select %125, %391, %392 : vector<1x256xi1>, vector<1x256xf32>
    %394 = arith.addf %384, %393 : vector<1x256xf32>
    %c15_i32_76 = arith.constant 15 : i32
    %395 = tpu.dynamic_rotate %211 by %c15_i32_76 dim 1 : vector<1x256xf32>, i32 -> vector<1x256xf32>
    %c15_i32_77 = arith.constant 15 : i32
    %396 = tpu.dynamic_rotate %213 by %c15_i32_77 dim 1 : vector<1x256xf32>, i32 -> vector<1x256xf32>
    %397 = vector.broadcast %21 : f32 to vector<1x256xf32>
    %398 = arith.mulf %397, %395 : vector<1x256xf32>
    %399 = vector.broadcast %70 : f32 to vector<1x256xf32>
    %400 = arith.mulf %399, %396 : vector<1x256xf32>
    %401 = arith.addf %398, %400 : vector<1x256xf32>
    %cst_78 = arith.constant 0.000000e+00 : f32
    %402 = vector.broadcast %cst_78 : f32 to vector<1x256xf32>
    %403 = arith.select %130, %401, %402 : vector<1x256xi1>, vector<1x256xf32>
    %404 = arith.addf %394, %403 : vector<1x256xf32>
    %c14_i32_79 = arith.constant 14 : i32
    %405 = tpu.dynamic_rotate %211 by %c14_i32_79 dim 1 : vector<1x256xf32>, i32 -> vector<1x256xf32>
    %c14_i32_80 = arith.constant 14 : i32
    %406 = tpu.dynamic_rotate %213 by %c14_i32_80 dim 1 : vector<1x256xf32>, i32 -> vector<1x256xf32>
    %407 = vector.broadcast %22 : f32 to vector<1x256xf32>
    %408 = arith.mulf %407, %405 : vector<1x256xf32>
    %409 = vector.broadcast %71 : f32 to vector<1x256xf32>
    %410 = arith.mulf %409, %406 : vector<1x256xf32>
    %411 = arith.addf %408, %410 : vector<1x256xf32>
    %cst_81 = arith.constant 0.000000e+00 : f32
    %412 = vector.broadcast %cst_81 : f32 to vector<1x256xf32>
    %413 = arith.select %135, %411, %412 : vector<1x256xi1>, vector<1x256xf32>
    %414 = arith.addf %404, %413 : vector<1x256xf32>
    %c13_i32_82 = arith.constant 13 : i32
    %415 = tpu.dynamic_rotate %211 by %c13_i32_82 dim 1 : vector<1x256xf32>, i32 -> vector<1x256xf32>
    %c13_i32_83 = arith.constant 13 : i32
    %416 = tpu.dynamic_rotate %213 by %c13_i32_83 dim 1 : vector<1x256xf32>, i32 -> vector<1x256xf32>
    %417 = vector.broadcast %23 : f32 to vector<1x256xf32>
    %418 = arith.mulf %417, %415 : vector<1x256xf32>
    %419 = vector.broadcast %72 : f32 to vector<1x256xf32>
    %420 = arith.mulf %419, %416 : vector<1x256xf32>
    %421 = arith.addf %418, %420 : vector<1x256xf32>
    %cst_84 = arith.constant 0.000000e+00 : f32
    %422 = vector.broadcast %cst_84 : f32 to vector<1x256xf32>
    %423 = arith.select %140, %421, %422 : vector<1x256xi1>, vector<1x256xf32>
    %424 = arith.addf %414, %423 : vector<1x256xf32>
    %cst_85 = arith.constant 0.000000e+00 : f32
    %425 = vector.broadcast %cst_85 : f32 to vector<1x256xf32>
    %426 = arith.select %155, %424, %425 : vector<1x256xi1>, vector<1x256xf32>
    %c3_i32_86 = arith.constant 3 : i32
    %427 = tpu.dynamic_rotate %211 by %c3_i32_86 dim 1 : vector<1x256xf32>, i32 -> vector<1x256xf32>
    %c3_i32_87 = arith.constant 3 : i32
    %428 = tpu.dynamic_rotate %213 by %c3_i32_87 dim 1 : vector<1x256xf32>, i32 -> vector<1x256xf32>
    %429 = vector.broadcast %24 : f32 to vector<1x256xf32>
    %430 = arith.mulf %429, %427 : vector<1x256xf32>
    %431 = vector.broadcast %73 : f32 to vector<1x256xf32>
    %432 = arith.mulf %431, %428 : vector<1x256xf32>
    %433 = arith.addf %430, %432 : vector<1x256xf32>
    %cst_88 = arith.constant 0.000000e+00 : f32
    %434 = vector.broadcast %cst_88 : f32 to vector<1x256xf32>
    %435 = arith.select %110, %433, %434 : vector<1x256xi1>, vector<1x256xf32>
    %c2_i32_89 = arith.constant 2 : i32
    %436 = tpu.dynamic_rotate %211 by %c2_i32_89 dim 1 : vector<1x256xf32>, i32 -> vector<1x256xf32>
    %c2_i32_90 = arith.constant 2 : i32
    %437 = tpu.dynamic_rotate %213 by %c2_i32_90 dim 1 : vector<1x256xf32>, i32 -> vector<1x256xf32>
    %438 = vector.broadcast %25 : f32 to vector<1x256xf32>
    %439 = arith.mulf %438, %436 : vector<1x256xf32>
    %440 = vector.broadcast %74 : f32 to vector<1x256xf32>
    %441 = arith.mulf %440, %437 : vector<1x256xf32>
    %442 = arith.addf %439, %441 : vector<1x256xf32>
    %cst_91 = arith.constant 0.000000e+00 : f32
    %443 = vector.broadcast %cst_91 : f32 to vector<1x256xf32>
    %444 = arith.select %115, %442, %443 : vector<1x256xi1>, vector<1x256xf32>
    %445 = arith.addf %435, %444 : vector<1x256xf32>
    %c1_i32_92 = arith.constant 1 : i32
    %446 = tpu.dynamic_rotate %211 by %c1_i32_92 dim 1 : vector<1x256xf32>, i32 -> vector<1x256xf32>
    %c1_i32_93 = arith.constant 1 : i32
    %447 = tpu.dynamic_rotate %213 by %c1_i32_93 dim 1 : vector<1x256xf32>, i32 -> vector<1x256xf32>
    %448 = vector.broadcast %26 : f32 to vector<1x256xf32>
    %449 = arith.mulf %448, %446 : vector<1x256xf32>
    %450 = vector.broadcast %75 : f32 to vector<1x256xf32>
    %451 = arith.mulf %450, %447 : vector<1x256xf32>
    %452 = arith.addf %449, %451 : vector<1x256xf32>
    %cst_94 = arith.constant 0.000000e+00 : f32
    %453 = vector.broadcast %cst_94 : f32 to vector<1x256xf32>
    %454 = arith.select %120, %452, %453 : vector<1x256xi1>, vector<1x256xf32>
    %455 = arith.addf %445, %454 : vector<1x256xf32>
    %456 = vector.broadcast %27 : f32 to vector<1x256xf32>
    %457 = arith.mulf %456, %211 : vector<1x256xf32>
    %458 = vector.broadcast %76 : f32 to vector<1x256xf32>
    %459 = arith.mulf %458, %213 : vector<1x256xf32>
    %460 = arith.addf %457, %459 : vector<1x256xf32>
    %cst_95 = arith.constant 0.000000e+00 : f32
    %461 = vector.broadcast %cst_95 : f32 to vector<1x256xf32>
    %462 = arith.select %125, %460, %461 : vector<1x256xi1>, vector<1x256xf32>
    %463 = arith.addf %455, %462 : vector<1x256xf32>
    %c255_i32 = arith.constant 255 : i32
    %464 = tpu.dynamic_rotate %211 by %c255_i32 dim 1 : vector<1x256xf32>, i32 -> vector<1x256xf32>
    %c255_i32_96 = arith.constant 255 : i32
    %465 = tpu.dynamic_rotate %213 by %c255_i32_96 dim 1 : vector<1x256xf32>, i32 -> vector<1x256xf32>
    %466 = vector.broadcast %28 : f32 to vector<1x256xf32>
    %467 = arith.mulf %466, %464 : vector<1x256xf32>
    %468 = vector.broadcast %77 : f32 to vector<1x256xf32>
    %469 = arith.mulf %468, %465 : vector<1x256xf32>
    %470 = arith.addf %467, %469 : vector<1x256xf32>
    %cst_97 = arith.constant 0.000000e+00 : f32
    %471 = vector.broadcast %cst_97 : f32 to vector<1x256xf32>
    %472 = arith.select %130, %470, %471 : vector<1x256xi1>, vector<1x256xf32>
    %473 = arith.addf %463, %472 : vector<1x256xf32>
    %c254_i32 = arith.constant 254 : i32
    %474 = tpu.dynamic_rotate %211 by %c254_i32 dim 1 : vector<1x256xf32>, i32 -> vector<1x256xf32>
    %c254_i32_98 = arith.constant 254 : i32
    %475 = tpu.dynamic_rotate %213 by %c254_i32_98 dim 1 : vector<1x256xf32>, i32 -> vector<1x256xf32>
    %476 = vector.broadcast %29 : f32 to vector<1x256xf32>
    %477 = arith.mulf %476, %474 : vector<1x256xf32>
    %478 = vector.broadcast %78 : f32 to vector<1x256xf32>
    %479 = arith.mulf %478, %475 : vector<1x256xf32>
    %480 = arith.addf %477, %479 : vector<1x256xf32>
    %cst_99 = arith.constant 0.000000e+00 : f32
    %481 = vector.broadcast %cst_99 : f32 to vector<1x256xf32>
    %482 = arith.select %135, %480, %481 : vector<1x256xi1>, vector<1x256xf32>
    %483 = arith.addf %473, %482 : vector<1x256xf32>
    %c253_i32 = arith.constant 253 : i32
    %484 = tpu.dynamic_rotate %211 by %c253_i32 dim 1 : vector<1x256xf32>, i32 -> vector<1x256xf32>
    %c253_i32_100 = arith.constant 253 : i32
    %485 = tpu.dynamic_rotate %213 by %c253_i32_100 dim 1 : vector<1x256xf32>, i32 -> vector<1x256xf32>
    %486 = vector.broadcast %30 : f32 to vector<1x256xf32>
    %487 = arith.mulf %486, %484 : vector<1x256xf32>
    %488 = vector.broadcast %79 : f32 to vector<1x256xf32>
    %489 = arith.mulf %488, %485 : vector<1x256xf32>
    %490 = arith.addf %487, %489 : vector<1x256xf32>
    %cst_101 = arith.constant 0.000000e+00 : f32
    %491 = vector.broadcast %cst_101 : f32 to vector<1x256xf32>
    %492 = arith.select %140, %490, %491 : vector<1x256xi1>, vector<1x256xf32>
    %493 = arith.addf %483, %492 : vector<1x256xf32>
    %cst_102 = arith.constant 0.000000e+00 : f32
    %494 = vector.broadcast %cst_102 : f32 to vector<1x256xf32>
    %495 = arith.select %160, %493, %494 : vector<1x256xi1>, vector<1x256xf32>
    %c243_i32 = arith.constant 243 : i32
    %496 = tpu.dynamic_rotate %211 by %c243_i32 dim 1 : vector<1x256xf32>, i32 -> vector<1x256xf32>
    %c243_i32_103 = arith.constant 243 : i32
    %497 = tpu.dynamic_rotate %213 by %c243_i32_103 dim 1 : vector<1x256xf32>, i32 -> vector<1x256xf32>
    %498 = vector.broadcast %31 : f32 to vector<1x256xf32>
    %499 = arith.mulf %498, %496 : vector<1x256xf32>
    %500 = vector.broadcast %80 : f32 to vector<1x256xf32>
    %501 = arith.mulf %500, %497 : vector<1x256xf32>
    %502 = arith.addf %499, %501 : vector<1x256xf32>
    %cst_104 = arith.constant 0.000000e+00 : f32
    %503 = vector.broadcast %cst_104 : f32 to vector<1x256xf32>
    %504 = arith.select %110, %502, %503 : vector<1x256xi1>, vector<1x256xf32>
    %c242_i32 = arith.constant 242 : i32
    %505 = tpu.dynamic_rotate %211 by %c242_i32 dim 1 : vector<1x256xf32>, i32 -> vector<1x256xf32>
    %c242_i32_105 = arith.constant 242 : i32
    %506 = tpu.dynamic_rotate %213 by %c242_i32_105 dim 1 : vector<1x256xf32>, i32 -> vector<1x256xf32>
    %507 = vector.broadcast %32 : f32 to vector<1x256xf32>
    %508 = arith.mulf %507, %505 : vector<1x256xf32>
    %509 = vector.broadcast %81 : f32 to vector<1x256xf32>
    %510 = arith.mulf %509, %506 : vector<1x256xf32>
    %511 = arith.addf %508, %510 : vector<1x256xf32>
    %cst_106 = arith.constant 0.000000e+00 : f32
    %512 = vector.broadcast %cst_106 : f32 to vector<1x256xf32>
    %513 = arith.select %115, %511, %512 : vector<1x256xi1>, vector<1x256xf32>
    %514 = arith.addf %504, %513 : vector<1x256xf32>
    %c241_i32 = arith.constant 241 : i32
    %515 = tpu.dynamic_rotate %211 by %c241_i32 dim 1 : vector<1x256xf32>, i32 -> vector<1x256xf32>
    %c241_i32_107 = arith.constant 241 : i32
    %516 = tpu.dynamic_rotate %213 by %c241_i32_107 dim 1 : vector<1x256xf32>, i32 -> vector<1x256xf32>
    %517 = vector.broadcast %33 : f32 to vector<1x256xf32>
    %518 = arith.mulf %517, %515 : vector<1x256xf32>
    %519 = vector.broadcast %82 : f32 to vector<1x256xf32>
    %520 = arith.mulf %519, %516 : vector<1x256xf32>
    %521 = arith.addf %518, %520 : vector<1x256xf32>
    %cst_108 = arith.constant 0.000000e+00 : f32
    %522 = vector.broadcast %cst_108 : f32 to vector<1x256xf32>
    %523 = arith.select %120, %521, %522 : vector<1x256xi1>, vector<1x256xf32>
    %524 = arith.addf %514, %523 : vector<1x256xf32>
    %c240_i32 = arith.constant 240 : i32
    %525 = tpu.dynamic_rotate %211 by %c240_i32 dim 1 : vector<1x256xf32>, i32 -> vector<1x256xf32>
    %c240_i32_109 = arith.constant 240 : i32
    %526 = tpu.dynamic_rotate %213 by %c240_i32_109 dim 1 : vector<1x256xf32>, i32 -> vector<1x256xf32>
    %527 = vector.broadcast %34 : f32 to vector<1x256xf32>
    %528 = arith.mulf %527, %525 : vector<1x256xf32>
    %529 = vector.broadcast %83 : f32 to vector<1x256xf32>
    %530 = arith.mulf %529, %526 : vector<1x256xf32>
    %531 = arith.addf %528, %530 : vector<1x256xf32>
    %cst_110 = arith.constant 0.000000e+00 : f32
    %532 = vector.broadcast %cst_110 : f32 to vector<1x256xf32>
    %533 = arith.select %125, %531, %532 : vector<1x256xi1>, vector<1x256xf32>
    %534 = arith.addf %524, %533 : vector<1x256xf32>
    %c239_i32 = arith.constant 239 : i32
    %535 = tpu.dynamic_rotate %211 by %c239_i32 dim 1 : vector<1x256xf32>, i32 -> vector<1x256xf32>
    %c239_i32_111 = arith.constant 239 : i32
    %536 = tpu.dynamic_rotate %213 by %c239_i32_111 dim 1 : vector<1x256xf32>, i32 -> vector<1x256xf32>
    %537 = vector.broadcast %35 : f32 to vector<1x256xf32>
    %538 = arith.mulf %537, %535 : vector<1x256xf32>
    %539 = vector.broadcast %84 : f32 to vector<1x256xf32>
    %540 = arith.mulf %539, %536 : vector<1x256xf32>
    %541 = arith.addf %538, %540 : vector<1x256xf32>
    %cst_112 = arith.constant 0.000000e+00 : f32
    %542 = vector.broadcast %cst_112 : f32 to vector<1x256xf32>
    %543 = arith.select %130, %541, %542 : vector<1x256xi1>, vector<1x256xf32>
    %544 = arith.addf %534, %543 : vector<1x256xf32>
    %c238_i32 = arith.constant 238 : i32
    %545 = tpu.dynamic_rotate %211 by %c238_i32 dim 1 : vector<1x256xf32>, i32 -> vector<1x256xf32>
    %c238_i32_113 = arith.constant 238 : i32
    %546 = tpu.dynamic_rotate %213 by %c238_i32_113 dim 1 : vector<1x256xf32>, i32 -> vector<1x256xf32>
    %547 = vector.broadcast %36 : f32 to vector<1x256xf32>
    %548 = arith.mulf %547, %545 : vector<1x256xf32>
    %549 = vector.broadcast %85 : f32 to vector<1x256xf32>
    %550 = arith.mulf %549, %546 : vector<1x256xf32>
    %551 = arith.addf %548, %550 : vector<1x256xf32>
    %cst_114 = arith.constant 0.000000e+00 : f32
    %552 = vector.broadcast %cst_114 : f32 to vector<1x256xf32>
    %553 = arith.select %135, %551, %552 : vector<1x256xi1>, vector<1x256xf32>
    %554 = arith.addf %544, %553 : vector<1x256xf32>
    %c237_i32 = arith.constant 237 : i32
    %555 = tpu.dynamic_rotate %211 by %c237_i32 dim 1 : vector<1x256xf32>, i32 -> vector<1x256xf32>
    %c237_i32_115 = arith.constant 237 : i32
    %556 = tpu.dynamic_rotate %213 by %c237_i32_115 dim 1 : vector<1x256xf32>, i32 -> vector<1x256xf32>
    %557 = vector.broadcast %37 : f32 to vector<1x256xf32>
    %558 = arith.mulf %557, %555 : vector<1x256xf32>
    %559 = vector.broadcast %86 : f32 to vector<1x256xf32>
    %560 = arith.mulf %559, %556 : vector<1x256xf32>
    %561 = arith.addf %558, %560 : vector<1x256xf32>
    %cst_116 = arith.constant 0.000000e+00 : f32
    %562 = vector.broadcast %cst_116 : f32 to vector<1x256xf32>
    %563 = arith.select %140, %561, %562 : vector<1x256xi1>, vector<1x256xf32>
    %564 = arith.addf %554, %563 : vector<1x256xf32>
    %cst_117 = arith.constant 0.000000e+00 : f32
    %565 = vector.broadcast %cst_117 : f32 to vector<1x256xf32>
    %566 = arith.select %165, %564, %565 : vector<1x256xi1>, vector<1x256xf32>
    %c227_i32 = arith.constant 227 : i32
    %567 = tpu.dynamic_rotate %211 by %c227_i32 dim 1 : vector<1x256xf32>, i32 -> vector<1x256xf32>
    %c227_i32_118 = arith.constant 227 : i32
    %568 = tpu.dynamic_rotate %213 by %c227_i32_118 dim 1 : vector<1x256xf32>, i32 -> vector<1x256xf32>
    %569 = vector.broadcast %38 : f32 to vector<1x256xf32>
    %570 = arith.mulf %569, %567 : vector<1x256xf32>
    %571 = vector.broadcast %87 : f32 to vector<1x256xf32>
    %572 = arith.mulf %571, %568 : vector<1x256xf32>
    %573 = arith.addf %570, %572 : vector<1x256xf32>
    %cst_119 = arith.constant 0.000000e+00 : f32
    %574 = vector.broadcast %cst_119 : f32 to vector<1x256xf32>
    %575 = arith.select %110, %573, %574 : vector<1x256xi1>, vector<1x256xf32>
    %c226_i32 = arith.constant 226 : i32
    %576 = tpu.dynamic_rotate %211 by %c226_i32 dim 1 : vector<1x256xf32>, i32 -> vector<1x256xf32>
    %c226_i32_120 = arith.constant 226 : i32
    %577 = tpu.dynamic_rotate %213 by %c226_i32_120 dim 1 : vector<1x256xf32>, i32 -> vector<1x256xf32>
    %578 = vector.broadcast %39 : f32 to vector<1x256xf32>
    %579 = arith.mulf %578, %576 : vector<1x256xf32>
    %580 = vector.broadcast %88 : f32 to vector<1x256xf32>
    %581 = arith.mulf %580, %577 : vector<1x256xf32>
    %582 = arith.addf %579, %581 : vector<1x256xf32>
    %cst_121 = arith.constant 0.000000e+00 : f32
    %583 = vector.broadcast %cst_121 : f32 to vector<1x256xf32>
    %584 = arith.select %115, %582, %583 : vector<1x256xi1>, vector<1x256xf32>
    %585 = arith.addf %575, %584 : vector<1x256xf32>
    %c225_i32 = arith.constant 225 : i32
    %586 = tpu.dynamic_rotate %211 by %c225_i32 dim 1 : vector<1x256xf32>, i32 -> vector<1x256xf32>
    %c225_i32_122 = arith.constant 225 : i32
    %587 = tpu.dynamic_rotate %213 by %c225_i32_122 dim 1 : vector<1x256xf32>, i32 -> vector<1x256xf32>
    %588 = vector.broadcast %40 : f32 to vector<1x256xf32>
    %589 = arith.mulf %588, %586 : vector<1x256xf32>
    %590 = vector.broadcast %89 : f32 to vector<1x256xf32>
    %591 = arith.mulf %590, %587 : vector<1x256xf32>
    %592 = arith.addf %589, %591 : vector<1x256xf32>
    %cst_123 = arith.constant 0.000000e+00 : f32
    %593 = vector.broadcast %cst_123 : f32 to vector<1x256xf32>
    %594 = arith.select %120, %592, %593 : vector<1x256xi1>, vector<1x256xf32>
    %595 = arith.addf %585, %594 : vector<1x256xf32>
    %c224_i32 = arith.constant 224 : i32
    %596 = tpu.dynamic_rotate %211 by %c224_i32 dim 1 : vector<1x256xf32>, i32 -> vector<1x256xf32>
    %c224_i32_124 = arith.constant 224 : i32
    %597 = tpu.dynamic_rotate %213 by %c224_i32_124 dim 1 : vector<1x256xf32>, i32 -> vector<1x256xf32>
    %598 = vector.broadcast %41 : f32 to vector<1x256xf32>
    %599 = arith.mulf %598, %596 : vector<1x256xf32>
    %600 = vector.broadcast %90 : f32 to vector<1x256xf32>
    %601 = arith.mulf %600, %597 : vector<1x256xf32>
    %602 = arith.addf %599, %601 : vector<1x256xf32>
    %cst_125 = arith.constant 0.000000e+00 : f32
    %603 = vector.broadcast %cst_125 : f32 to vector<1x256xf32>
    %604 = arith.select %125, %602, %603 : vector<1x256xi1>, vector<1x256xf32>
    %605 = arith.addf %595, %604 : vector<1x256xf32>
    %c223_i32 = arith.constant 223 : i32
    %606 = tpu.dynamic_rotate %211 by %c223_i32 dim 1 : vector<1x256xf32>, i32 -> vector<1x256xf32>
    %c223_i32_126 = arith.constant 223 : i32
    %607 = tpu.dynamic_rotate %213 by %c223_i32_126 dim 1 : vector<1x256xf32>, i32 -> vector<1x256xf32>
    %608 = vector.broadcast %42 : f32 to vector<1x256xf32>
    %609 = arith.mulf %608, %606 : vector<1x256xf32>
    %610 = vector.broadcast %91 : f32 to vector<1x256xf32>
    %611 = arith.mulf %610, %607 : vector<1x256xf32>
    %612 = arith.addf %609, %611 : vector<1x256xf32>
    %cst_127 = arith.constant 0.000000e+00 : f32
    %613 = vector.broadcast %cst_127 : f32 to vector<1x256xf32>
    %614 = arith.select %130, %612, %613 : vector<1x256xi1>, vector<1x256xf32>
    %615 = arith.addf %605, %614 : vector<1x256xf32>
    %c222_i32 = arith.constant 222 : i32
    %616 = tpu.dynamic_rotate %211 by %c222_i32 dim 1 : vector<1x256xf32>, i32 -> vector<1x256xf32>
    %c222_i32_128 = arith.constant 222 : i32
    %617 = tpu.dynamic_rotate %213 by %c222_i32_128 dim 1 : vector<1x256xf32>, i32 -> vector<1x256xf32>
    %618 = vector.broadcast %43 : f32 to vector<1x256xf32>
    %619 = arith.mulf %618, %616 : vector<1x256xf32>
    %620 = vector.broadcast %92 : f32 to vector<1x256xf32>
    %621 = arith.mulf %620, %617 : vector<1x256xf32>
    %622 = arith.addf %619, %621 : vector<1x256xf32>
    %cst_129 = arith.constant 0.000000e+00 : f32
    %623 = vector.broadcast %cst_129 : f32 to vector<1x256xf32>
    %624 = arith.select %135, %622, %623 : vector<1x256xi1>, vector<1x256xf32>
    %625 = arith.addf %615, %624 : vector<1x256xf32>
    %c221_i32 = arith.constant 221 : i32
    %626 = tpu.dynamic_rotate %211 by %c221_i32 dim 1 : vector<1x256xf32>, i32 -> vector<1x256xf32>
    %c221_i32_130 = arith.constant 221 : i32
    %627 = tpu.dynamic_rotate %213 by %c221_i32_130 dim 1 : vector<1x256xf32>, i32 -> vector<1x256xf32>
    %628 = vector.broadcast %44 : f32 to vector<1x256xf32>
    %629 = arith.mulf %628, %626 : vector<1x256xf32>
    %630 = vector.broadcast %93 : f32 to vector<1x256xf32>
    %631 = arith.mulf %630, %627 : vector<1x256xf32>
    %632 = arith.addf %629, %631 : vector<1x256xf32>
    %cst_131 = arith.constant 0.000000e+00 : f32
    %633 = vector.broadcast %cst_131 : f32 to vector<1x256xf32>
    %634 = arith.select %140, %632, %633 : vector<1x256xi1>, vector<1x256xf32>
    %635 = arith.addf %625, %634 : vector<1x256xf32>
    %cst_132 = arith.constant 0.000000e+00 : f32
    %636 = vector.broadcast %cst_132 : f32 to vector<1x256xf32>
    %637 = arith.select %170, %635, %636 : vector<1x256xi1>, vector<1x256xf32>
    %c211_i32 = arith.constant 211 : i32
    %638 = tpu.dynamic_rotate %211 by %c211_i32 dim 1 : vector<1x256xf32>, i32 -> vector<1x256xf32>
    %c211_i32_133 = arith.constant 211 : i32
    %639 = tpu.dynamic_rotate %213 by %c211_i32_133 dim 1 : vector<1x256xf32>, i32 -> vector<1x256xf32>
    %640 = vector.broadcast %45 : f32 to vector<1x256xf32>
    %641 = arith.mulf %640, %638 : vector<1x256xf32>
    %642 = vector.broadcast %94 : f32 to vector<1x256xf32>
    %643 = arith.mulf %642, %639 : vector<1x256xf32>
    %644 = arith.addf %641, %643 : vector<1x256xf32>
    %cst_134 = arith.constant 0.000000e+00 : f32
    %645 = vector.broadcast %cst_134 : f32 to vector<1x256xf32>
    %646 = arith.select %110, %644, %645 : vector<1x256xi1>, vector<1x256xf32>
    %c210_i32 = arith.constant 210 : i32
    %647 = tpu.dynamic_rotate %211 by %c210_i32 dim 1 : vector<1x256xf32>, i32 -> vector<1x256xf32>
    %c210_i32_135 = arith.constant 210 : i32
    %648 = tpu.dynamic_rotate %213 by %c210_i32_135 dim 1 : vector<1x256xf32>, i32 -> vector<1x256xf32>
    %649 = vector.broadcast %46 : f32 to vector<1x256xf32>
    %650 = arith.mulf %649, %647 : vector<1x256xf32>
    %651 = vector.broadcast %95 : f32 to vector<1x256xf32>
    %652 = arith.mulf %651, %648 : vector<1x256xf32>
    %653 = arith.addf %650, %652 : vector<1x256xf32>
    %cst_136 = arith.constant 0.000000e+00 : f32
    %654 = vector.broadcast %cst_136 : f32 to vector<1x256xf32>
    %655 = arith.select %115, %653, %654 : vector<1x256xi1>, vector<1x256xf32>
    %656 = arith.addf %646, %655 : vector<1x256xf32>
    %c209_i32 = arith.constant 209 : i32
    %657 = tpu.dynamic_rotate %211 by %c209_i32 dim 1 : vector<1x256xf32>, i32 -> vector<1x256xf32>
    %c209_i32_137 = arith.constant 209 : i32
    %658 = tpu.dynamic_rotate %213 by %c209_i32_137 dim 1 : vector<1x256xf32>, i32 -> vector<1x256xf32>
    %659 = vector.broadcast %47 : f32 to vector<1x256xf32>
    %660 = arith.mulf %659, %657 : vector<1x256xf32>
    %661 = vector.broadcast %96 : f32 to vector<1x256xf32>
    %662 = arith.mulf %661, %658 : vector<1x256xf32>
    %663 = arith.addf %660, %662 : vector<1x256xf32>
    %cst_138 = arith.constant 0.000000e+00 : f32
    %664 = vector.broadcast %cst_138 : f32 to vector<1x256xf32>
    %665 = arith.select %120, %663, %664 : vector<1x256xi1>, vector<1x256xf32>
    %666 = arith.addf %656, %665 : vector<1x256xf32>
    %c208_i32 = arith.constant 208 : i32
    %667 = tpu.dynamic_rotate %211 by %c208_i32 dim 1 : vector<1x256xf32>, i32 -> vector<1x256xf32>
    %c208_i32_139 = arith.constant 208 : i32
    %668 = tpu.dynamic_rotate %213 by %c208_i32_139 dim 1 : vector<1x256xf32>, i32 -> vector<1x256xf32>
    %669 = vector.broadcast %48 : f32 to vector<1x256xf32>
    %670 = arith.mulf %669, %667 : vector<1x256xf32>
    %671 = vector.broadcast %97 : f32 to vector<1x256xf32>
    %672 = arith.mulf %671, %668 : vector<1x256xf32>
    %673 = arith.addf %670, %672 : vector<1x256xf32>
    %cst_140 = arith.constant 0.000000e+00 : f32
    %674 = vector.broadcast %cst_140 : f32 to vector<1x256xf32>
    %675 = arith.select %125, %673, %674 : vector<1x256xi1>, vector<1x256xf32>
    %676 = arith.addf %666, %675 : vector<1x256xf32>
    %c207_i32 = arith.constant 207 : i32
    %677 = tpu.dynamic_rotate %211 by %c207_i32 dim 1 : vector<1x256xf32>, i32 -> vector<1x256xf32>
    %c207_i32_141 = arith.constant 207 : i32
    %678 = tpu.dynamic_rotate %213 by %c207_i32_141 dim 1 : vector<1x256xf32>, i32 -> vector<1x256xf32>
    %679 = vector.broadcast %49 : f32 to vector<1x256xf32>
    %680 = arith.mulf %679, %677 : vector<1x256xf32>
    %681 = vector.broadcast %98 : f32 to vector<1x256xf32>
    %682 = arith.mulf %681, %678 : vector<1x256xf32>
    %683 = arith.addf %680, %682 : vector<1x256xf32>
    %cst_142 = arith.constant 0.000000e+00 : f32
    %684 = vector.broadcast %cst_142 : f32 to vector<1x256xf32>
    %685 = arith.select %130, %683, %684 : vector<1x256xi1>, vector<1x256xf32>
    %686 = arith.addf %676, %685 : vector<1x256xf32>
    %c206_i32 = arith.constant 206 : i32
    %687 = tpu.dynamic_rotate %211 by %c206_i32 dim 1 : vector<1x256xf32>, i32 -> vector<1x256xf32>
    %c206_i32_143 = arith.constant 206 : i32
    %688 = tpu.dynamic_rotate %213 by %c206_i32_143 dim 1 : vector<1x256xf32>, i32 -> vector<1x256xf32>
    %689 = vector.broadcast %50 : f32 to vector<1x256xf32>
    %690 = arith.mulf %689, %687 : vector<1x256xf32>
    %691 = vector.broadcast %99 : f32 to vector<1x256xf32>
    %692 = arith.mulf %691, %688 : vector<1x256xf32>
    %693 = arith.addf %690, %692 : vector<1x256xf32>
    %cst_144 = arith.constant 0.000000e+00 : f32
    %694 = vector.broadcast %cst_144 : f32 to vector<1x256xf32>
    %695 = arith.select %135, %693, %694 : vector<1x256xi1>, vector<1x256xf32>
    %696 = arith.addf %686, %695 : vector<1x256xf32>
    %c205_i32 = arith.constant 205 : i32
    %697 = tpu.dynamic_rotate %211 by %c205_i32 dim 1 : vector<1x256xf32>, i32 -> vector<1x256xf32>
    %c205_i32_145 = arith.constant 205 : i32
    %698 = tpu.dynamic_rotate %213 by %c205_i32_145 dim 1 : vector<1x256xf32>, i32 -> vector<1x256xf32>
    %699 = vector.broadcast %51 : f32 to vector<1x256xf32>
    %700 = arith.mulf %699, %697 : vector<1x256xf32>
    %701 = vector.broadcast %100 : f32 to vector<1x256xf32>
    %702 = arith.mulf %701, %698 : vector<1x256xf32>
    %703 = arith.addf %700, %702 : vector<1x256xf32>
    %cst_146 = arith.constant 0.000000e+00 : f32
    %704 = vector.broadcast %cst_146 : f32 to vector<1x256xf32>
    %705 = arith.select %140, %703, %704 : vector<1x256xi1>, vector<1x256xf32>
    %706 = arith.addf %696, %705 : vector<1x256xf32>
    %cst_147 = arith.constant 0.000000e+00 : f32
    %707 = vector.broadcast %cst_147 : f32 to vector<1x256xf32>
    %708 = arith.select %175, %706, %707 : vector<1x256xi1>, vector<1x256xf32>
    %709 = arith.addf %284, %355 : vector<1x256xf32>
    %710 = arith.addf %426, %495 : vector<1x256xf32>
    %711 = arith.addf %566, %637 : vector<1x256xf32>
    %712 = arith.addf %709, %710 : vector<1x256xf32>
    %713 = arith.addf %711, %708 : vector<1x256xf32>
    %714 = arith.addf %712, %713 : vector<1x256xf32>
    %715 = vector.broadcast %2 : f32 to vector<1x256xf32>
    %716 = arith.addf %714, %715 : vector<1x256xf32>
    %717 = arith.negf %716 : vector<1x256xf32>
    %718 = math.exp %717 : vector<1x256xf32>
    %cst_148 = arith.constant 1.000000e+00 : f32
    %719 = vector.broadcast %cst_148 : f32 to vector<1x256xf32>
    %720 = arith.addf %719, %718 : vector<1x256xf32>
    %721 = arith.divf %719, %720 : vector<1x256xf32>
    %722 = vector.broadcast %721 : vector<1x256xf32> to vector<32x256xf32>
    %723 = arith.mulf %207, %722 : vector<32x256xf32>
    %c0_149 = arith.constant 0 : index
    %c0_150 = arith.constant 0 : index
    %c0_151 = arith.constant 0 : index
    %724 = vector.load %arg6[%c0_149, %c0_150, %c0_151] : memref<2x32x256xf32, #tpu.memory_space<vmem>>, vector<1x32x256xf32>
    %725 = vector.shape_cast %724 : vector<1x32x256xf32> to vector<32x256xf32>
    %726 = vector.shape_cast %723 : vector<32x256xf32> to vector<1x32x256xf32>
    tpu.vector_store %arg6[%c0_149, %c0_150, %c0_151], %726 {strides = array<i32>} : memref<2x32x256xf32, #tpu.memory_space<vmem>>, vector<1x32x256xf32>,
    %c1_152 = arith.constant 1 : index
    %c0_153 = arith.constant 0 : index
    %c0_154 = arith.constant 0 : index
    %727 = vector.load %arg1[%c1_152, %c0_153, %c0_154] : memref<2x32x256xf32, #tpu.memory_space<vmem>>, vector<1x32x256xf32>
    %728 = vector.shape_cast %727 : vector<1x32x256xf32> to vector<32x256xf32>
    %cst_155 = arith.constant dense<0.000000e+00> : vector<32xf32>
    %729 = vector.multi_reduction <add>, %728, %cst_155 [1] : vector<32x256xf32> to vector<32xf32>
    %730 = vector.shape_cast %729 : vector<32xf32> to vector<32x1xf32>
    %cst_156 = arith.constant 3.906250e-03 : f32
    %731 = vector.broadcast %cst_156 : f32 to vector<32x1xf32>
    %732 = arith.mulf %730, %731 : vector<32x1xf32>
    %cst_157 = arith.constant dense<0xFF800000> : vector<32xf32>
    %733 = vector.multi_reduction <maximumf>, %728, %cst_157 [1] : vector<32x256xf32> to vector<32xf32>
    %734 = vector.shape_cast %733 : vector<32xf32> to vector<32x1xf32>
    %735 = vector.broadcast %732 : vector<32x1xf32> to vector<32x2xf32>
    %736 = arith.mulf %0, %735 : vector<32x2xf32>
    %cst_158 = arith.constant dense<0.000000e+00> : vector<2xf32>
    %737 = vector.multi_reduction <add>, %736, %cst_158 [0] : vector<32x2xf32> to vector<2xf32>
    %738 = vector.shape_cast %737 : vector<2xf32> to vector<1x2xf32>
    %739 = vector.broadcast %734 : vector<32x1xf32> to vector<32x2xf32>
    %740 = arith.mulf %0, %739 : vector<32x2xf32>
    %cst_159 = arith.constant dense<0.000000e+00> : vector<2xf32>
    %741 = vector.multi_reduction <add>, %740, %cst_159 [0] : vector<32x2xf32> to vector<2xf32>
    %742 = vector.shape_cast %741 : vector<2xf32> to vector<1x2xf32>
    %cst_160 = arith.constant 0.000000e+00 : f32
    %743 = vector.broadcast %cst_160 : f32 to vector<1x2xf32>
    %744 = arith.maximumf %738, %743 : vector<1x2xf32>
    %cst_161 = arith.constant 0.000000e+00 : f32
    %745 = vector.broadcast %cst_161 : f32 to vector<1x2xf32>
    %746 = arith.maximumf %742, %745 : vector<1x2xf32>
    %747 = arith.addf %744, %746 : vector<1x2xf32>
    %748 = vector.broadcast %747 : vector<1x2xf32> to vector<32x2xf32>
    %749 = arith.mulf %1, %748 : vector<32x2xf32>
    %cst_162 = arith.constant dense<0.000000e+00> : vector<32xf32>
    %750 = vector.multi_reduction <add>, %749, %cst_162 [1] : vector<32x2xf32> to vector<32xf32>
    %751 = vector.shape_cast %750 : vector<32xf32> to vector<32x1xf32>
    %752 = arith.negf %751 : vector<32x1xf32>
    %753 = math.exp %752 : vector<32x1xf32>
    %cst_163 = arith.constant 1.000000e+00 : f32
    %754 = vector.broadcast %cst_163 : f32 to vector<32x1xf32>
    %755 = arith.addf %754, %753 : vector<32x1xf32>
    %756 = arith.divf %754, %755 : vector<32x1xf32>
    %757 = vector.broadcast %756 : vector<32x1xf32> to vector<32x256xf32>
    %758 = arith.mulf %728, %757 : vector<32x256xf32>
    %cst_164 = arith.constant dense<0.000000e+00> : vector<256xf32>
    %759 = vector.multi_reduction <add>, %758, %cst_164 [0] : vector<32x256xf32> to vector<256xf32>
    %760 = vector.shape_cast %759 : vector<256xf32> to vector<1x256xf32>
    %cst_165 = arith.constant 3.125000e-02 : f32
    %761 = vector.broadcast %cst_165 : f32 to vector<1x256xf32>
    %762 = arith.mulf %760, %761 : vector<1x256xf32>
    %cst_166 = arith.constant dense<0xFF800000> : vector<256xf32>
    %763 = vector.multi_reduction <maximumf>, %758, %cst_166 [0] : vector<32x256xf32> to vector<256xf32>
    %764 = vector.shape_cast %763 : vector<256xf32> to vector<1x256xf32>
    %c51_i32_167 = arith.constant 51 : i32
    %765 = tpu.dynamic_rotate %762 by %c51_i32_167 dim 1 : vector<1x256xf32>, i32 -> vector<1x256xf32>
    %c51_i32_168 = arith.constant 51 : i32
    %766 = tpu.dynamic_rotate %764 by %c51_i32_168 dim 1 : vector<1x256xf32>, i32 -> vector<1x256xf32>
    %767 = vector.broadcast %3 : f32 to vector<1x256xf32>
    %768 = arith.mulf %767, %765 : vector<1x256xf32>
    %769 = vector.broadcast %52 : f32 to vector<1x256xf32>
    %770 = arith.mulf %769, %766 : vector<1x256xf32>
    %771 = arith.addf %768, %770 : vector<1x256xf32>
    %cst_169 = arith.constant 0.000000e+00 : f32
    %772 = vector.broadcast %cst_169 : f32 to vector<1x256xf32>
    %773 = arith.select %110, %771, %772 : vector<1x256xi1>, vector<1x256xf32>
    %c50_i32_170 = arith.constant 50 : i32
    %774 = tpu.dynamic_rotate %762 by %c50_i32_170 dim 1 : vector<1x256xf32>, i32 -> vector<1x256xf32>
    %c50_i32_171 = arith.constant 50 : i32
    %775 = tpu.dynamic_rotate %764 by %c50_i32_171 dim 1 : vector<1x256xf32>, i32 -> vector<1x256xf32>
    %776 = vector.broadcast %4 : f32 to vector<1x256xf32>
    %777 = arith.mulf %776, %774 : vector<1x256xf32>
    %778 = vector.broadcast %53 : f32 to vector<1x256xf32>
    %779 = arith.mulf %778, %775 : vector<1x256xf32>
    %780 = arith.addf %777, %779 : vector<1x256xf32>
    %cst_172 = arith.constant 0.000000e+00 : f32
    %781 = vector.broadcast %cst_172 : f32 to vector<1x256xf32>
    %782 = arith.select %115, %780, %781 : vector<1x256xi1>, vector<1x256xf32>
    %783 = arith.addf %773, %782 : vector<1x256xf32>
    %c49_i32_173 = arith.constant 49 : i32
    %784 = tpu.dynamic_rotate %762 by %c49_i32_173 dim 1 : vector<1x256xf32>, i32 -> vector<1x256xf32>
    %c49_i32_174 = arith.constant 49 : i32
    %785 = tpu.dynamic_rotate %764 by %c49_i32_174 dim 1 : vector<1x256xf32>, i32 -> vector<1x256xf32>
    %786 = vector.broadcast %5 : f32 to vector<1x256xf32>
    %787 = arith.mulf %786, %784 : vector<1x256xf32>
    %788 = vector.broadcast %54 : f32 to vector<1x256xf32>
    %789 = arith.mulf %788, %785 : vector<1x256xf32>
    %790 = arith.addf %787, %789 : vector<1x256xf32>
    %cst_175 = arith.constant 0.000000e+00 : f32
    %791 = vector.broadcast %cst_175 : f32 to vector<1x256xf32>
    %792 = arith.select %120, %790, %791 : vector<1x256xi1>, vector<1x256xf32>
    %793 = arith.addf %783, %792 : vector<1x256xf32>
    %c48_i32_176 = arith.constant 48 : i32
    %794 = tpu.dynamic_rotate %762 by %c48_i32_176 dim 1 : vector<1x256xf32>, i32 -> vector<1x256xf32>
    %c48_i32_177 = arith.constant 48 : i32
    %795 = tpu.dynamic_rotate %764 by %c48_i32_177 dim 1 : vector<1x256xf32>, i32 -> vector<1x256xf32>
    %796 = vector.broadcast %6 : f32 to vector<1x256xf32>
    %797 = arith.mulf %796, %794 : vector<1x256xf32>
    %798 = vector.broadcast %55 : f32 to vector<1x256xf32>
    %799 = arith.mulf %798, %795 : vector<1x256xf32>
    %800 = arith.addf %797, %799 : vector<1x256xf32>
    %cst_178 = arith.constant 0.000000e+00 : f32
    %801 = vector.broadcast %cst_178 : f32 to vector<1x256xf32>
    %802 = arith.select %125, %800, %801 : vector<1x256xi1>, vector<1x256xf32>
    %803 = arith.addf %793, %802 : vector<1x256xf32>
    %c47_i32_179 = arith.constant 47 : i32
    %804 = tpu.dynamic_rotate %762 by %c47_i32_179 dim 1 : vector<1x256xf32>, i32 -> vector<1x256xf32>
    %c47_i32_180 = arith.constant 47 : i32
    %805 = tpu.dynamic_rotate %764 by %c47_i32_180 dim 1 : vector<1x256xf32>, i32 -> vector<1x256xf32>
    %806 = vector.broadcast %7 : f32 to vector<1x256xf32>
    %807 = arith.mulf %806, %804 : vector<1x256xf32>
    %808 = vector.broadcast %56 : f32 to vector<1x256xf32>
    %809 = arith.mulf %808, %805 : vector<1x256xf32>
    %810 = arith.addf %807, %809 : vector<1x256xf32>
    %cst_181 = arith.constant 0.000000e+00 : f32
    %811 = vector.broadcast %cst_181 : f32 to vector<1x256xf32>
    %812 = arith.select %130, %810, %811 : vector<1x256xi1>, vector<1x256xf32>
    %813 = arith.addf %803, %812 : vector<1x256xf32>
    %c46_i32_182 = arith.constant 46 : i32
    %814 = tpu.dynamic_rotate %762 by %c46_i32_182 dim 1 : vector<1x256xf32>, i32 -> vector<1x256xf32>
    %c46_i32_183 = arith.constant 46 : i32
    %815 = tpu.dynamic_rotate %764 by %c46_i32_183 dim 1 : vector<1x256xf32>, i32 -> vector<1x256xf32>
    %816 = vector.broadcast %8 : f32 to vector<1x256xf32>
    %817 = arith.mulf %816, %814 : vector<1x256xf32>
    %818 = vector.broadcast %57 : f32 to vector<1x256xf32>
    %819 = arith.mulf %818, %815 : vector<1x256xf32>
    %820 = arith.addf %817, %819 : vector<1x256xf32>
    %cst_184 = arith.constant 0.000000e+00 : f32
    %821 = vector.broadcast %cst_184 : f32 to vector<1x256xf32>
    %822 = arith.select %135, %820, %821 : vector<1x256xi1>, vector<1x256xf32>
    %823 = arith.addf %813, %822 : vector<1x256xf32>
    %c45_i32_185 = arith.constant 45 : i32
    %824 = tpu.dynamic_rotate %762 by %c45_i32_185 dim 1 : vector<1x256xf32>, i32 -> vector<1x256xf32>
    %c45_i32_186 = arith.constant 45 : i32
    %825 = tpu.dynamic_rotate %764 by %c45_i32_186 dim 1 : vector<1x256xf32>, i32 -> vector<1x256xf32>
    %826 = vector.broadcast %9 : f32 to vector<1x256xf32>
    %827 = arith.mulf %826, %824 : vector<1x256xf32>
    %828 = vector.broadcast %58 : f32 to vector<1x256xf32>
    %829 = arith.mulf %828, %825 : vector<1x256xf32>
    %830 = arith.addf %827, %829 : vector<1x256xf32>
    %cst_187 = arith.constant 0.000000e+00 : f32
    %831 = vector.broadcast %cst_187 : f32 to vector<1x256xf32>
    %832 = arith.select %140, %830, %831 : vector<1x256xi1>, vector<1x256xf32>
    %833 = arith.addf %823, %832 : vector<1x256xf32>
    %cst_188 = arith.constant 0.000000e+00 : f32
    %834 = vector.broadcast %cst_188 : f32 to vector<1x256xf32>
    %835 = arith.select %145, %833, %834 : vector<1x256xi1>, vector<1x256xf32>
    %c35_i32_189 = arith.constant 35 : i32
    %836 = tpu.dynamic_rotate %762 by %c35_i32_189 dim 1 : vector<1x256xf32>, i32 -> vector<1x256xf32>
    %c35_i32_190 = arith.constant 35 : i32
    %837 = tpu.dynamic_rotate %764 by %c35_i32_190 dim 1 : vector<1x256xf32>, i32 -> vector<1x256xf32>
    %838 = vector.broadcast %10 : f32 to vector<1x256xf32>
    %839 = arith.mulf %838, %836 : vector<1x256xf32>
    %840 = vector.broadcast %59 : f32 to vector<1x256xf32>
    %841 = arith.mulf %840, %837 : vector<1x256xf32>
    %842 = arith.addf %839, %841 : vector<1x256xf32>
    %cst_191 = arith.constant 0.000000e+00 : f32
    %843 = vector.broadcast %cst_191 : f32 to vector<1x256xf32>
    %844 = arith.select %110, %842, %843 : vector<1x256xi1>, vector<1x256xf32>
    %c34_i32_192 = arith.constant 34 : i32
    %845 = tpu.dynamic_rotate %762 by %c34_i32_192 dim 1 : vector<1x256xf32>, i32 -> vector<1x256xf32>
    %c34_i32_193 = arith.constant 34 : i32
    %846 = tpu.dynamic_rotate %764 by %c34_i32_193 dim 1 : vector<1x256xf32>, i32 -> vector<1x256xf32>
    %847 = vector.broadcast %11 : f32 to vector<1x256xf32>
    %848 = arith.mulf %847, %845 : vector<1x256xf32>
    %849 = vector.broadcast %60 : f32 to vector<1x256xf32>
    %850 = arith.mulf %849, %846 : vector<1x256xf32>
    %851 = arith.addf %848, %850 : vector<1x256xf32>
    %cst_194 = arith.constant 0.000000e+00 : f32
    %852 = vector.broadcast %cst_194 : f32 to vector<1x256xf32>
    %853 = arith.select %115, %851, %852 : vector<1x256xi1>, vector<1x256xf32>
    %854 = arith.addf %844, %853 : vector<1x256xf32>
    %c33_i32_195 = arith.constant 33 : i32
    %855 = tpu.dynamic_rotate %762 by %c33_i32_195 dim 1 : vector<1x256xf32>, i32 -> vector<1x256xf32>
    %c33_i32_196 = arith.constant 33 : i32
    %856 = tpu.dynamic_rotate %764 by %c33_i32_196 dim 1 : vector<1x256xf32>, i32 -> vector<1x256xf32>
    %857 = vector.broadcast %12 : f32 to vector<1x256xf32>
    %858 = arith.mulf %857, %855 : vector<1x256xf32>
    %859 = vector.broadcast %61 : f32 to vector<1x256xf32>
    %860 = arith.mulf %859, %856 : vector<1x256xf32>
    %861 = arith.addf %858, %860 : vector<1x256xf32>
    %cst_197 = arith.constant 0.000000e+00 : f32
    %862 = vector.broadcast %cst_197 : f32 to vector<1x256xf32>
    %863 = arith.select %120, %861, %862 : vector<1x256xi1>, vector<1x256xf32>
    %864 = arith.addf %854, %863 : vector<1x256xf32>
    %c32_i32_198 = arith.constant 32 : i32
    %865 = tpu.dynamic_rotate %762 by %c32_i32_198 dim 1 : vector<1x256xf32>, i32 -> vector<1x256xf32>
    %c32_i32_199 = arith.constant 32 : i32
    %866 = tpu.dynamic_rotate %764 by %c32_i32_199 dim 1 : vector<1x256xf32>, i32 -> vector<1x256xf32>
    %867 = vector.broadcast %13 : f32 to vector<1x256xf32>
    %868 = arith.mulf %867, %865 : vector<1x256xf32>
    %869 = vector.broadcast %62 : f32 to vector<1x256xf32>
    %870 = arith.mulf %869, %866 : vector<1x256xf32>
    %871 = arith.addf %868, %870 : vector<1x256xf32>
    %cst_200 = arith.constant 0.000000e+00 : f32
    %872 = vector.broadcast %cst_200 : f32 to vector<1x256xf32>
    %873 = arith.select %125, %871, %872 : vector<1x256xi1>, vector<1x256xf32>
    %874 = arith.addf %864, %873 : vector<1x256xf32>
    %c31_i32_201 = arith.constant 31 : i32
    %875 = tpu.dynamic_rotate %762 by %c31_i32_201 dim 1 : vector<1x256xf32>, i32 -> vector<1x256xf32>
    %c31_i32_202 = arith.constant 31 : i32
    %876 = tpu.dynamic_rotate %764 by %c31_i32_202 dim 1 : vector<1x256xf32>, i32 -> vector<1x256xf32>
    %877 = vector.broadcast %14 : f32 to vector<1x256xf32>
    %878 = arith.mulf %877, %875 : vector<1x256xf32>
    %879 = vector.broadcast %63 : f32 to vector<1x256xf32>
    %880 = arith.mulf %879, %876 : vector<1x256xf32>
    %881 = arith.addf %878, %880 : vector<1x256xf32>
    %cst_203 = arith.constant 0.000000e+00 : f32
    %882 = vector.broadcast %cst_203 : f32 to vector<1x256xf32>
    %883 = arith.select %130, %881, %882 : vector<1x256xi1>, vector<1x256xf32>
    %884 = arith.addf %874, %883 : vector<1x256xf32>
    %c30_i32_204 = arith.constant 30 : i32
    %885 = tpu.dynamic_rotate %762 by %c30_i32_204 dim 1 : vector<1x256xf32>, i32 -> vector<1x256xf32>
    %c30_i32_205 = arith.constant 30 : i32
    %886 = tpu.dynamic_rotate %764 by %c30_i32_205 dim 1 : vector<1x256xf32>, i32 -> vector<1x256xf32>
    %887 = vector.broadcast %15 : f32 to vector<1x256xf32>
    %888 = arith.mulf %887, %885 : vector<1x256xf32>
    %889 = vector.broadcast %64 : f32 to vector<1x256xf32>
    %890 = arith.mulf %889, %886 : vector<1x256xf32>
    %891 = arith.addf %888, %890 : vector<1x256xf32>
    %cst_206 = arith.constant 0.000000e+00 : f32
    %892 = vector.broadcast %cst_206 : f32 to vector<1x256xf32>
    %893 = arith.select %135, %891, %892 : vector<1x256xi1>, vector<1x256xf32>
    %894 = arith.addf %884, %893 : vector<1x256xf32>
    %c29_i32_207 = arith.constant 29 : i32
    %895 = tpu.dynamic_rotate %762 by %c29_i32_207 dim 1 : vector<1x256xf32>, i32 -> vector<1x256xf32>
    %c29_i32_208 = arith.constant 29 : i32
    %896 = tpu.dynamic_rotate %764 by %c29_i32_208 dim 1 : vector<1x256xf32>, i32 -> vector<1x256xf32>
    %897 = vector.broadcast %16 : f32 to vector<1x256xf32>
    %898 = arith.mulf %897, %895 : vector<1x256xf32>
    %899 = vector.broadcast %65 : f32 to vector<1x256xf32>
    %900 = arith.mulf %899, %896 : vector<1x256xf32>
    %901 = arith.addf %898, %900 : vector<1x256xf32>
    %cst_209 = arith.constant 0.000000e+00 : f32
    %902 = vector.broadcast %cst_209 : f32 to vector<1x256xf32>
    %903 = arith.select %140, %901, %902 : vector<1x256xi1>, vector<1x256xf32>
    %904 = arith.addf %894, %903 : vector<1x256xf32>
    %cst_210 = arith.constant 0.000000e+00 : f32
    %905 = vector.broadcast %cst_210 : f32 to vector<1x256xf32>
    %906 = arith.select %150, %904, %905 : vector<1x256xi1>, vector<1x256xf32>
    %c19_i32_211 = arith.constant 19 : i32
    %907 = tpu.dynamic_rotate %762 by %c19_i32_211 dim 1 : vector<1x256xf32>, i32 -> vector<1x256xf32>
    %c19_i32_212 = arith.constant 19 : i32
    %908 = tpu.dynamic_rotate %764 by %c19_i32_212 dim 1 : vector<1x256xf32>, i32 -> vector<1x256xf32>
    %909 = vector.broadcast %17 : f32 to vector<1x256xf32>
    %910 = arith.mulf %909, %907 : vector<1x256xf32>
    %911 = vector.broadcast %66 : f32 to vector<1x256xf32>
    %912 = arith.mulf %911, %908 : vector<1x256xf32>
    %913 = arith.addf %910, %912 : vector<1x256xf32>
    %cst_213 = arith.constant 0.000000e+00 : f32
    %914 = vector.broadcast %cst_213 : f32 to vector<1x256xf32>
    %915 = arith.select %110, %913, %914 : vector<1x256xi1>, vector<1x256xf32>
    %c18_i32_214 = arith.constant 18 : i32
    %916 = tpu.dynamic_rotate %762 by %c18_i32_214 dim 1 : vector<1x256xf32>, i32 -> vector<1x256xf32>
    %c18_i32_215 = arith.constant 18 : i32
    %917 = tpu.dynamic_rotate %764 by %c18_i32_215 dim 1 : vector<1x256xf32>, i32 -> vector<1x256xf32>
    %918 = vector.broadcast %18 : f32 to vector<1x256xf32>
    %919 = arith.mulf %918, %916 : vector<1x256xf32>
    %920 = vector.broadcast %67 : f32 to vector<1x256xf32>
    %921 = arith.mulf %920, %917 : vector<1x256xf32>
    %922 = arith.addf %919, %921 : vector<1x256xf32>
    %cst_216 = arith.constant 0.000000e+00 : f32
    %923 = vector.broadcast %cst_216 : f32 to vector<1x256xf32>
    %924 = arith.select %115, %922, %923 : vector<1x256xi1>, vector<1x256xf32>
    %925 = arith.addf %915, %924 : vector<1x256xf32>
    %c17_i32_217 = arith.constant 17 : i32
    %926 = tpu.dynamic_rotate %762 by %c17_i32_217 dim 1 : vector<1x256xf32>, i32 -> vector<1x256xf32>
    %c17_i32_218 = arith.constant 17 : i32
    %927 = tpu.dynamic_rotate %764 by %c17_i32_218 dim 1 : vector<1x256xf32>, i32 -> vector<1x256xf32>
    %928 = vector.broadcast %19 : f32 to vector<1x256xf32>
    %929 = arith.mulf %928, %926 : vector<1x256xf32>
    %930 = vector.broadcast %68 : f32 to vector<1x256xf32>
    %931 = arith.mulf %930, %927 : vector<1x256xf32>
    %932 = arith.addf %929, %931 : vector<1x256xf32>
    %cst_219 = arith.constant 0.000000e+00 : f32
    %933 = vector.broadcast %cst_219 : f32 to vector<1x256xf32>
    %934 = arith.select %120, %932, %933 : vector<1x256xi1>, vector<1x256xf32>
    %935 = arith.addf %925, %934 : vector<1x256xf32>
    %c16_i32_220 = arith.constant 16 : i32
    %936 = tpu.dynamic_rotate %762 by %c16_i32_220 dim 1 : vector<1x256xf32>, i32 -> vector<1x256xf32>
    %c16_i32_221 = arith.constant 16 : i32
    %937 = tpu.dynamic_rotate %764 by %c16_i32_221 dim 1 : vector<1x256xf32>, i32 -> vector<1x256xf32>
    %938 = vector.broadcast %20 : f32 to vector<1x256xf32>
    %939 = arith.mulf %938, %936 : vector<1x256xf32>
    %940 = vector.broadcast %69 : f32 to vector<1x256xf32>
    %941 = arith.mulf %940, %937 : vector<1x256xf32>
    %942 = arith.addf %939, %941 : vector<1x256xf32>
    %cst_222 = arith.constant 0.000000e+00 : f32
    %943 = vector.broadcast %cst_222 : f32 to vector<1x256xf32>
    %944 = arith.select %125, %942, %943 : vector<1x256xi1>, vector<1x256xf32>
    %945 = arith.addf %935, %944 : vector<1x256xf32>
    %c15_i32_223 = arith.constant 15 : i32
    %946 = tpu.dynamic_rotate %762 by %c15_i32_223 dim 1 : vector<1x256xf32>, i32 -> vector<1x256xf32>
    %c15_i32_224 = arith.constant 15 : i32
    %947 = tpu.dynamic_rotate %764 by %c15_i32_224 dim 1 : vector<1x256xf32>, i32 -> vector<1x256xf32>
    %948 = vector.broadcast %21 : f32 to vector<1x256xf32>
    %949 = arith.mulf %948, %946 : vector<1x256xf32>
    %950 = vector.broadcast %70 : f32 to vector<1x256xf32>
    %951 = arith.mulf %950, %947 : vector<1x256xf32>
    %952 = arith.addf %949, %951 : vector<1x256xf32>
    %cst_225 = arith.constant 0.000000e+00 : f32
    %953 = vector.broadcast %cst_225 : f32 to vector<1x256xf32>
    %954 = arith.select %130, %952, %953 : vector<1x256xi1>, vector<1x256xf32>
    %955 = arith.addf %945, %954 : vector<1x256xf32>
    %c14_i32_226 = arith.constant 14 : i32
    %956 = tpu.dynamic_rotate %762 by %c14_i32_226 dim 1 : vector<1x256xf32>, i32 -> vector<1x256xf32>
    %c14_i32_227 = arith.constant 14 : i32
    %957 = tpu.dynamic_rotate %764 by %c14_i32_227 dim 1 : vector<1x256xf32>, i32 -> vector<1x256xf32>
    %958 = vector.broadcast %22 : f32 to vector<1x256xf32>
    %959 = arith.mulf %958, %956 : vector<1x256xf32>
    %960 = vector.broadcast %71 : f32 to vector<1x256xf32>
    %961 = arith.mulf %960, %957 : vector<1x256xf32>
    %962 = arith.addf %959, %961 : vector<1x256xf32>
    %cst_228 = arith.constant 0.000000e+00 : f32
    %963 = vector.broadcast %cst_228 : f32 to vector<1x256xf32>
    %964 = arith.select %135, %962, %963 : vector<1x256xi1>, vector<1x256xf32>
    %965 = arith.addf %955, %964 : vector<1x256xf32>
    %c13_i32_229 = arith.constant 13 : i32
    %966 = tpu.dynamic_rotate %762 by %c13_i32_229 dim 1 : vector<1x256xf32>, i32 -> vector<1x256xf32>
    %c13_i32_230 = arith.constant 13 : i32
    %967 = tpu.dynamic_rotate %764 by %c13_i32_230 dim 1 : vector<1x256xf32>, i32 -> vector<1x256xf32>
    %968 = vector.broadcast %23 : f32 to vector<1x256xf32>
    %969 = arith.mulf %968, %966 : vector<1x256xf32>
    %970 = vector.broadcast %72 : f32 to vector<1x256xf32>
    %971 = arith.mulf %970, %967 : vector<1x256xf32>
    %972 = arith.addf %969, %971 : vector<1x256xf32>
    %cst_231 = arith.constant 0.000000e+00 : f32
    %973 = vector.broadcast %cst_231 : f32 to vector<1x256xf32>
    %974 = arith.select %140, %972, %973 : vector<1x256xi1>, vector<1x256xf32>
    %975 = arith.addf %965, %974 : vector<1x256xf32>
    %cst_232 = arith.constant 0.000000e+00 : f32
    %976 = vector.broadcast %cst_232 : f32 to vector<1x256xf32>
    %977 = arith.select %155, %975, %976 : vector<1x256xi1>, vector<1x256xf32>
    %c3_i32_233 = arith.constant 3 : i32
    %978 = tpu.dynamic_rotate %762 by %c3_i32_233 dim 1 : vector<1x256xf32>, i32 -> vector<1x256xf32>
    %c3_i32_234 = arith.constant 3 : i32
    %979 = tpu.dynamic_rotate %764 by %c3_i32_234 dim 1 : vector<1x256xf32>, i32 -> vector<1x256xf32>
    %980 = vector.broadcast %24 : f32 to vector<1x256xf32>
    %981 = arith.mulf %980, %978 : vector<1x256xf32>
    %982 = vector.broadcast %73 : f32 to vector<1x256xf32>
    %983 = arith.mulf %982, %979 : vector<1x256xf32>
    %984 = arith.addf %981, %983 : vector<1x256xf32>
    %cst_235 = arith.constant 0.000000e+00 : f32
    %985 = vector.broadcast %cst_235 : f32 to vector<1x256xf32>
    %986 = arith.select %110, %984, %985 : vector<1x256xi1>, vector<1x256xf32>
    %c2_i32_236 = arith.constant 2 : i32
    %987 = tpu.dynamic_rotate %762 by %c2_i32_236 dim 1 : vector<1x256xf32>, i32 -> vector<1x256xf32>
    %c2_i32_237 = arith.constant 2 : i32
    %988 = tpu.dynamic_rotate %764 by %c2_i32_237 dim 1 : vector<1x256xf32>, i32 -> vector<1x256xf32>
    %989 = vector.broadcast %25 : f32 to vector<1x256xf32>
    %990 = arith.mulf %989, %987 : vector<1x256xf32>
    %991 = vector.broadcast %74 : f32 to vector<1x256xf32>
    %992 = arith.mulf %991, %988 : vector<1x256xf32>
    %993 = arith.addf %990, %992 : vector<1x256xf32>
    %cst_238 = arith.constant 0.000000e+00 : f32
    %994 = vector.broadcast %cst_238 : f32 to vector<1x256xf32>
    %995 = arith.select %115, %993, %994 : vector<1x256xi1>, vector<1x256xf32>
    %996 = arith.addf %986, %995 : vector<1x256xf32>
    %c1_i32_239 = arith.constant 1 : i32
    %997 = tpu.dynamic_rotate %762 by %c1_i32_239 dim 1 : vector<1x256xf32>, i32 -> vector<1x256xf32>
    %c1_i32_240 = arith.constant 1 : i32
    %998 = tpu.dynamic_rotate %764 by %c1_i32_240 dim 1 : vector<1x256xf32>, i32 -> vector<1x256xf32>
    %999 = vector.broadcast %26 : f32 to vector<1x256xf32>
    %1000 = arith.mulf %999, %997 : vector<1x256xf32>
    %1001 = vector.broadcast %75 : f32 to vector<1x256xf32>
    %1002 = arith.mulf %1001, %998 : vector<1x256xf32>
    %1003 = arith.addf %1000, %1002 : vector<1x256xf32>
    %cst_241 = arith.constant 0.000000e+00 : f32
    %1004 = vector.broadcast %cst_241 : f32 to vector<1x256xf32>
    %1005 = arith.select %120, %1003, %1004 : vector<1x256xi1>, vector<1x256xf32>
    %1006 = arith.addf %996, %1005 : vector<1x256xf32>
    %1007 = vector.broadcast %27 : f32 to vector<1x256xf32>
    %1008 = arith.mulf %1007, %762 : vector<1x256xf32>
    %1009 = vector.broadcast %76 : f32 to vector<1x256xf32>
    %1010 = arith.mulf %1009, %764 : vector<1x256xf32>
    %1011 = arith.addf %1008, %1010 : vector<1x256xf32>
    %cst_242 = arith.constant 0.000000e+00 : f32
    %1012 = vector.broadcast %cst_242 : f32 to vector<1x256xf32>
    %1013 = arith.select %125, %1011, %1012 : vector<1x256xi1>, vector<1x256xf32>
    %1014 = arith.addf %1006, %1013 : vector<1x256xf32>
    %c255_i32_243 = arith.constant 255 : i32
    %1015 = tpu.dynamic_rotate %762 by %c255_i32_243 dim 1 : vector<1x256xf32>, i32 -> vector<1x256xf32>
    %c255_i32_244 = arith.constant 255 : i32
    %1016 = tpu.dynamic_rotate %764 by %c255_i32_244 dim 1 : vector<1x256xf32>, i32 -> vector<1x256xf32>
    %1017 = vector.broadcast %28 : f32 to vector<1x256xf32>
    %1018 = arith.mulf %1017, %1015 : vector<1x256xf32>
    %1019 = vector.broadcast %77 : f32 to vector<1x256xf32>
    %1020 = arith.mulf %1019, %1016 : vector<1x256xf32>
    %1021 = arith.addf %1018, %1020 : vector<1x256xf32>
    %cst_245 = arith.constant 0.000000e+00 : f32
    %1022 = vector.broadcast %cst_245 : f32 to vector<1x256xf32>
    %1023 = arith.select %130, %1021, %1022 : vector<1x256xi1>, vector<1x256xf32>
    %1024 = arith.addf %1014, %1023 : vector<1x256xf32>
    %c254_i32_246 = arith.constant 254 : i32
    %1025 = tpu.dynamic_rotate %762 by %c254_i32_246 dim 1 : vector<1x256xf32>, i32 -> vector<1x256xf32>
    %c254_i32_247 = arith.constant 254 : i32
    %1026 = tpu.dynamic_rotate %764 by %c254_i32_247 dim 1 : vector<1x256xf32>, i32 -> vector<1x256xf32>
    %1027 = vector.broadcast %29 : f32 to vector<1x256xf32>
    %1028 = arith.mulf %1027, %1025 : vector<1x256xf32>
    %1029 = vector.broadcast %78 : f32 to vector<1x256xf32>
    %1030 = arith.mulf %1029, %1026 : vector<1x256xf32>
    %1031 = arith.addf %1028, %1030 : vector<1x256xf32>
    %cst_248 = arith.constant 0.000000e+00 : f32
    %1032 = vector.broadcast %cst_248 : f32 to vector<1x256xf32>
    %1033 = arith.select %135, %1031, %1032 : vector<1x256xi1>, vector<1x256xf32>
    %1034 = arith.addf %1024, %1033 : vector<1x256xf32>
    %c253_i32_249 = arith.constant 253 : i32
    %1035 = tpu.dynamic_rotate %762 by %c253_i32_249 dim 1 : vector<1x256xf32>, i32 -> vector<1x256xf32>
    %c253_i32_250 = arith.constant 253 : i32
    %1036 = tpu.dynamic_rotate %764 by %c253_i32_250 dim 1 : vector<1x256xf32>, i32 -> vector<1x256xf32>
    %1037 = vector.broadcast %30 : f32 to vector<1x256xf32>
    %1038 = arith.mulf %1037, %1035 : vector<1x256xf32>
    %1039 = vector.broadcast %79 : f32 to vector<1x256xf32>
    %1040 = arith.mulf %1039, %1036 : vector<1x256xf32>
    %1041 = arith.addf %1038, %1040 : vector<1x256xf32>
    %cst_251 = arith.constant 0.000000e+00 : f32
    %1042 = vector.broadcast %cst_251 : f32 to vector<1x256xf32>
    %1043 = arith.select %140, %1041, %1042 : vector<1x256xi1>, vector<1x256xf32>
    %1044 = arith.addf %1034, %1043 : vector<1x256xf32>
    %cst_252 = arith.constant 0.000000e+00 : f32
    %1045 = vector.broadcast %cst_252 : f32 to vector<1x256xf32>
    %1046 = arith.select %160, %1044, %1045 : vector<1x256xi1>, vector<1x256xf32>
    %c243_i32_253 = arith.constant 243 : i32
    %1047 = tpu.dynamic_rotate %762 by %c243_i32_253 dim 1 : vector<1x256xf32>, i32 -> vector<1x256xf32>
    %c243_i32_254 = arith.constant 243 : i32
    %1048 = tpu.dynamic_rotate %764 by %c243_i32_254 dim 1 : vector<1x256xf32>, i32 -> vector<1x256xf32>
    %1049 = vector.broadcast %31 : f32 to vector<1x256xf32>
    %1050 = arith.mulf %1049, %1047 : vector<1x256xf32>
    %1051 = vector.broadcast %80 : f32 to vector<1x256xf32>
    %1052 = arith.mulf %1051, %1048 : vector<1x256xf32>
    %1053 = arith.addf %1050, %1052 : vector<1x256xf32>
    %cst_255 = arith.constant 0.000000e+00 : f32
    %1054 = vector.broadcast %cst_255 : f32 to vector<1x256xf32>
    %1055 = arith.select %110, %1053, %1054 : vector<1x256xi1>, vector<1x256xf32>
    %c242_i32_256 = arith.constant 242 : i32
    %1056 = tpu.dynamic_rotate %762 by %c242_i32_256 dim 1 : vector<1x256xf32>, i32 -> vector<1x256xf32>
    %c242_i32_257 = arith.constant 242 : i32
    %1057 = tpu.dynamic_rotate %764 by %c242_i32_257 dim 1 : vector<1x256xf32>, i32 -> vector<1x256xf32>
    %1058 = vector.broadcast %32 : f32 to vector<1x256xf32>
    %1059 = arith.mulf %1058, %1056 : vector<1x256xf32>
    %1060 = vector.broadcast %81 : f32 to vector<1x256xf32>
    %1061 = arith.mulf %1060, %1057 : vector<1x256xf32>
    %1062 = arith.addf %1059, %1061 : vector<1x256xf32>
    %cst_258 = arith.constant 0.000000e+00 : f32
    %1063 = vector.broadcast %cst_258 : f32 to vector<1x256xf32>
    %1064 = arith.select %115, %1062, %1063 : vector<1x256xi1>, vector<1x256xf32>
    %1065 = arith.addf %1055, %1064 : vector<1x256xf32>
    %c241_i32_259 = arith.constant 241 : i32
    %1066 = tpu.dynamic_rotate %762 by %c241_i32_259 dim 1 : vector<1x256xf32>, i32 -> vector<1x256xf32>
    %c241_i32_260 = arith.constant 241 : i32
    %1067 = tpu.dynamic_rotate %764 by %c241_i32_260 dim 1 : vector<1x256xf32>, i32 -> vector<1x256xf32>
    %1068 = vector.broadcast %33 : f32 to vector<1x256xf32>
    %1069 = arith.mulf %1068, %1066 : vector<1x256xf32>
    %1070 = vector.broadcast %82 : f32 to vector<1x256xf32>
    %1071 = arith.mulf %1070, %1067 : vector<1x256xf32>
    %1072 = arith.addf %1069, %1071 : vector<1x256xf32>
    %cst_261 = arith.constant 0.000000e+00 : f32
    %1073 = vector.broadcast %cst_261 : f32 to vector<1x256xf32>
    %1074 = arith.select %120, %1072, %1073 : vector<1x256xi1>, vector<1x256xf32>
    %1075 = arith.addf %1065, %1074 : vector<1x256xf32>
    %c240_i32_262 = arith.constant 240 : i32
    %1076 = tpu.dynamic_rotate %762 by %c240_i32_262 dim 1 : vector<1x256xf32>, i32 -> vector<1x256xf32>
    %c240_i32_263 = arith.constant 240 : i32
    %1077 = tpu.dynamic_rotate %764 by %c240_i32_263 dim 1 : vector<1x256xf32>, i32 -> vector<1x256xf32>
    %1078 = vector.broadcast %34 : f32 to vector<1x256xf32>
    %1079 = arith.mulf %1078, %1076 : vector<1x256xf32>
    %1080 = vector.broadcast %83 : f32 to vector<1x256xf32>
    %1081 = arith.mulf %1080, %1077 : vector<1x256xf32>
    %1082 = arith.addf %1079, %1081 : vector<1x256xf32>
    %cst_264 = arith.constant 0.000000e+00 : f32
    %1083 = vector.broadcast %cst_264 : f32 to vector<1x256xf32>
    %1084 = arith.select %125, %1082, %1083 : vector<1x256xi1>, vector<1x256xf32>
    %1085 = arith.addf %1075, %1084 : vector<1x256xf32>
    %c239_i32_265 = arith.constant 239 : i32
    %1086 = tpu.dynamic_rotate %762 by %c239_i32_265 dim 1 : vector<1x256xf32>, i32 -> vector<1x256xf32>
    %c239_i32_266 = arith.constant 239 : i32
    %1087 = tpu.dynamic_rotate %764 by %c239_i32_266 dim 1 : vector<1x256xf32>, i32 -> vector<1x256xf32>
    %1088 = vector.broadcast %35 : f32 to vector<1x256xf32>
    %1089 = arith.mulf %1088, %1086 : vector<1x256xf32>
    %1090 = vector.broadcast %84 : f32 to vector<1x256xf32>
    %1091 = arith.mulf %1090, %1087 : vector<1x256xf32>
    %1092 = arith.addf %1089, %1091 : vector<1x256xf32>
    %cst_267 = arith.constant 0.000000e+00 : f32
    %1093 = vector.broadcast %cst_267 : f32 to vector<1x256xf32>
    %1094 = arith.select %130, %1092, %1093 : vector<1x256xi1>, vector<1x256xf32>
    %1095 = arith.addf %1085, %1094 : vector<1x256xf32>
    %c238_i32_268 = arith.constant 238 : i32
    %1096 = tpu.dynamic_rotate %762 by %c238_i32_268 dim 1 : vector<1x256xf32>, i32 -> vector<1x256xf32>
    %c238_i32_269 = arith.constant 238 : i32
    %1097 = tpu.dynamic_rotate %764 by %c238_i32_269 dim 1 : vector<1x256xf32>, i32 -> vector<1x256xf32>
    %1098 = vector.broadcast %36 : f32 to vector<1x256xf32>
    %1099 = arith.mulf %1098, %1096 : vector<1x256xf32>
    %1100 = vector.broadcast %85 : f32 to vector<1x256xf32>
    %1101 = arith.mulf %1100, %1097 : vector<1x256xf32>
    %1102 = arith.addf %1099, %1101 : vector<1x256xf32>
    %cst_270 = arith.constant 0.000000e+00 : f32
    %1103 = vector.broadcast %cst_270 : f32 to vector<1x256xf32>
    %1104 = arith.select %135, %1102, %1103 : vector<1x256xi1>, vector<1x256xf32>
    %1105 = arith.addf %1095, %1104 : vector<1x256xf32>
    %c237_i32_271 = arith.constant 237 : i32
    %1106 = tpu.dynamic_rotate %762 by %c237_i32_271 dim 1 : vector<1x256xf32>, i32 -> vector<1x256xf32>
    %c237_i32_272 = arith.constant 237 : i32
    %1107 = tpu.dynamic_rotate %764 by %c237_i32_272 dim 1 : vector<1x256xf32>, i32 -> vector<1x256xf32>
    %1108 = vector.broadcast %37 : f32 to vector<1x256xf32>
    %1109 = arith.mulf %1108, %1106 : vector<1x256xf32>
    %1110 = vector.broadcast %86 : f32 to vector<1x256xf32>
    %1111 = arith.mulf %1110, %1107 : vector<1x256xf32>
    %1112 = arith.addf %1109, %1111 : vector<1x256xf32>
    %cst_273 = arith.constant 0.000000e+00 : f32
    %1113 = vector.broadcast %cst_273 : f32 to vector<1x256xf32>
    %1114 = arith.select %140, %1112, %1113 : vector<1x256xi1>, vector<1x256xf32>
    %1115 = arith.addf %1105, %1114 : vector<1x256xf32>
    %cst_274 = arith.constant 0.000000e+00 : f32
    %1116 = vector.broadcast %cst_274 : f32 to vector<1x256xf32>
    %1117 = arith.select %165, %1115, %1116 : vector<1x256xi1>, vector<1x256xf32>
    %c227_i32_275 = arith.constant 227 : i32
    %1118 = tpu.dynamic_rotate %762 by %c227_i32_275 dim 1 : vector<1x256xf32>, i32 -> vector<1x256xf32>
    %c227_i32_276 = arith.constant 227 : i32
    %1119 = tpu.dynamic_rotate %764 by %c227_i32_276 dim 1 : vector<1x256xf32>, i32 -> vector<1x256xf32>
    %1120 = vector.broadcast %38 : f32 to vector<1x256xf32>
    %1121 = arith.mulf %1120, %1118 : vector<1x256xf32>
    %1122 = vector.broadcast %87 : f32 to vector<1x256xf32>
    %1123 = arith.mulf %1122, %1119 : vector<1x256xf32>
    %1124 = arith.addf %1121, %1123 : vector<1x256xf32>
    %cst_277 = arith.constant 0.000000e+00 : f32
    %1125 = vector.broadcast %cst_277 : f32 to vector<1x256xf32>
    %1126 = arith.select %110, %1124, %1125 : vector<1x256xi1>, vector<1x256xf32>
    %c226_i32_278 = arith.constant 226 : i32
    %1127 = tpu.dynamic_rotate %762 by %c226_i32_278 dim 1 : vector<1x256xf32>, i32 -> vector<1x256xf32>
    %c226_i32_279 = arith.constant 226 : i32
    %1128 = tpu.dynamic_rotate %764 by %c226_i32_279 dim 1 : vector<1x256xf32>, i32 -> vector<1x256xf32>
    %1129 = vector.broadcast %39 : f32 to vector<1x256xf32>
    %1130 = arith.mulf %1129, %1127 : vector<1x256xf32>
    %1131 = vector.broadcast %88 : f32 to vector<1x256xf32>
    %1132 = arith.mulf %1131, %1128 : vector<1x256xf32>
    %1133 = arith.addf %1130, %1132 : vector<1x256xf32>
    %cst_280 = arith.constant 0.000000e+00 : f32
    %1134 = vector.broadcast %cst_280 : f32 to vector<1x256xf32>
    %1135 = arith.select %115, %1133, %1134 : vector<1x256xi1>, vector<1x256xf32>
    %1136 = arith.addf %1126, %1135 : vector<1x256xf32>
    %c225_i32_281 = arith.constant 225 : i32
    %1137 = tpu.dynamic_rotate %762 by %c225_i32_281 dim 1 : vector<1x256xf32>, i32 -> vector<1x256xf32>
    %c225_i32_282 = arith.constant 225 : i32
    %1138 = tpu.dynamic_rotate %764 by %c225_i32_282 dim 1 : vector<1x256xf32>, i32 -> vector<1x256xf32>
    %1139 = vector.broadcast %40 : f32 to vector<1x256xf32>
    %1140 = arith.mulf %1139, %1137 : vector<1x256xf32>
    %1141 = vector.broadcast %89 : f32 to vector<1x256xf32>
    %1142 = arith.mulf %1141, %1138 : vector<1x256xf32>
    %1143 = arith.addf %1140, %1142 : vector<1x256xf32>
    %cst_283 = arith.constant 0.000000e+00 : f32
    %1144 = vector.broadcast %cst_283 : f32 to vector<1x256xf32>
    %1145 = arith.select %120, %1143, %1144 : vector<1x256xi1>, vector<1x256xf32>
    %1146 = arith.addf %1136, %1145 : vector<1x256xf32>
    %c224_i32_284 = arith.constant 224 : i32
    %1147 = tpu.dynamic_rotate %762 by %c224_i32_284 dim 1 : vector<1x256xf32>, i32 -> vector<1x256xf32>
    %c224_i32_285 = arith.constant 224 : i32
    %1148 = tpu.dynamic_rotate %764 by %c224_i32_285 dim 1 : vector<1x256xf32>, i32 -> vector<1x256xf32>
    %1149 = vector.broadcast %41 : f32 to vector<1x256xf32>
    %1150 = arith.mulf %1149, %1147 : vector<1x256xf32>
    %1151 = vector.broadcast %90 : f32 to vector<1x256xf32>
    %1152 = arith.mulf %1151, %1148 : vector<1x256xf32>
    %1153 = arith.addf %1150, %1152 : vector<1x256xf32>
    %cst_286 = arith.constant 0.000000e+00 : f32
    %1154 = vector.broadcast %cst_286 : f32 to vector<1x256xf32>
    %1155 = arith.select %125, %1153, %1154 : vector<1x256xi1>, vector<1x256xf32>
    %1156 = arith.addf %1146, %1155 : vector<1x256xf32>
    %c223_i32_287 = arith.constant 223 : i32
    %1157 = tpu.dynamic_rotate %762 by %c223_i32_287 dim 1 : vector<1x256xf32>, i32 -> vector<1x256xf32>
    %c223_i32_288 = arith.constant 223 : i32
    %1158 = tpu.dynamic_rotate %764 by %c223_i32_288 dim 1 : vector<1x256xf32>, i32 -> vector<1x256xf32>
    %1159 = vector.broadcast %42 : f32 to vector<1x256xf32>
    %1160 = arith.mulf %1159, %1157 : vector<1x256xf32>
    %1161 = vector.broadcast %91 : f32 to vector<1x256xf32>
    %1162 = arith.mulf %1161, %1158 : vector<1x256xf32>
    %1163 = arith.addf %1160, %1162 : vector<1x256xf32>
    %cst_289 = arith.constant 0.000000e+00 : f32
    %1164 = vector.broadcast %cst_289 : f32 to vector<1x256xf32>
    %1165 = arith.select %130, %1163, %1164 : vector<1x256xi1>, vector<1x256xf32>
    %1166 = arith.addf %1156, %1165 : vector<1x256xf32>
    %c222_i32_290 = arith.constant 222 : i32
    %1167 = tpu.dynamic_rotate %762 by %c222_i32_290 dim 1 : vector<1x256xf32>, i32 -> vector<1x256xf32>
    %c222_i32_291 = arith.constant 222 : i32
    %1168 = tpu.dynamic_rotate %764 by %c222_i32_291 dim 1 : vector<1x256xf32>, i32 -> vector<1x256xf32>
    %1169 = vector.broadcast %43 : f32 to vector<1x256xf32>
    %1170 = arith.mulf %1169, %1167 : vector<1x256xf32>
    %1171 = vector.broadcast %92 : f32 to vector<1x256xf32>
    %1172 = arith.mulf %1171, %1168 : vector<1x256xf32>
    %1173 = arith.addf %1170, %1172 : vector<1x256xf32>
    %cst_292 = arith.constant 0.000000e+00 : f32
    %1174 = vector.broadcast %cst_292 : f32 to vector<1x256xf32>
    %1175 = arith.select %135, %1173, %1174 : vector<1x256xi1>, vector<1x256xf32>
    %1176 = arith.addf %1166, %1175 : vector<1x256xf32>
    %c221_i32_293 = arith.constant 221 : i32
    %1177 = tpu.dynamic_rotate %762 by %c221_i32_293 dim 1 : vector<1x256xf32>, i32 -> vector<1x256xf32>
    %c221_i32_294 = arith.constant 221 : i32
    %1178 = tpu.dynamic_rotate %764 by %c221_i32_294 dim 1 : vector<1x256xf32>, i32 -> vector<1x256xf32>
    %1179 = vector.broadcast %44 : f32 to vector<1x256xf32>
    %1180 = arith.mulf %1179, %1177 : vector<1x256xf32>
    %1181 = vector.broadcast %93 : f32 to vector<1x256xf32>
    %1182 = arith.mulf %1181, %1178 : vector<1x256xf32>
    %1183 = arith.addf %1180, %1182 : vector<1x256xf32>
    %cst_295 = arith.constant 0.000000e+00 : f32
    %1184 = vector.broadcast %cst_295 : f32 to vector<1x256xf32>
    %1185 = arith.select %140, %1183, %1184 : vector<1x256xi1>, vector<1x256xf32>
    %1186 = arith.addf %1176, %1185 : vector<1x256xf32>
    %cst_296 = arith.constant 0.000000e+00 : f32
    %1187 = vector.broadcast %cst_296 : f32 to vector<1x256xf32>
    %1188 = arith.select %170, %1186, %1187 : vector<1x256xi1>, vector<1x256xf32>
    %c211_i32_297 = arith.constant 211 : i32
    %1189 = tpu.dynamic_rotate %762 by %c211_i32_297 dim 1 : vector<1x256xf32>, i32 -> vector<1x256xf32>
    %c211_i32_298 = arith.constant 211 : i32
    %1190 = tpu.dynamic_rotate %764 by %c211_i32_298 dim 1 : vector<1x256xf32>, i32 -> vector<1x256xf32>
    %1191 = vector.broadcast %45 : f32 to vector<1x256xf32>
    %1192 = arith.mulf %1191, %1189 : vector<1x256xf32>
    %1193 = vector.broadcast %94 : f32 to vector<1x256xf32>
    %1194 = arith.mulf %1193, %1190 : vector<1x256xf32>
    %1195 = arith.addf %1192, %1194 : vector<1x256xf32>
    %cst_299 = arith.constant 0.000000e+00 : f32
    %1196 = vector.broadcast %cst_299 : f32 to vector<1x256xf32>
    %1197 = arith.select %110, %1195, %1196 : vector<1x256xi1>, vector<1x256xf32>
    %c210_i32_300 = arith.constant 210 : i32
    %1198 = tpu.dynamic_rotate %762 by %c210_i32_300 dim 1 : vector<1x256xf32>, i32 -> vector<1x256xf32>
    %c210_i32_301 = arith.constant 210 : i32
    %1199 = tpu.dynamic_rotate %764 by %c210_i32_301 dim 1 : vector<1x256xf32>, i32 -> vector<1x256xf32>
    %1200 = vector.broadcast %46 : f32 to vector<1x256xf32>
    %1201 = arith.mulf %1200, %1198 : vector<1x256xf32>
    %1202 = vector.broadcast %95 : f32 to vector<1x256xf32>
    %1203 = arith.mulf %1202, %1199 : vector<1x256xf32>
    %1204 = arith.addf %1201, %1203 : vector<1x256xf32>
    %cst_302 = arith.constant 0.000000e+00 : f32
    %1205 = vector.broadcast %cst_302 : f32 to vector<1x256xf32>
    %1206 = arith.select %115, %1204, %1205 : vector<1x256xi1>, vector<1x256xf32>
    %1207 = arith.addf %1197, %1206 : vector<1x256xf32>
    %c209_i32_303 = arith.constant 209 : i32
    %1208 = tpu.dynamic_rotate %762 by %c209_i32_303 dim 1 : vector<1x256xf32>, i32 -> vector<1x256xf32>
    %c209_i32_304 = arith.constant 209 : i32
    %1209 = tpu.dynamic_rotate %764 by %c209_i32_304 dim 1 : vector<1x256xf32>, i32 -> vector<1x256xf32>
    %1210 = vector.broadcast %47 : f32 to vector<1x256xf32>
    %1211 = arith.mulf %1210, %1208 : vector<1x256xf32>
    %1212 = vector.broadcast %96 : f32 to vector<1x256xf32>
    %1213 = arith.mulf %1212, %1209 : vector<1x256xf32>
    %1214 = arith.addf %1211, %1213 : vector<1x256xf32>
    %cst_305 = arith.constant 0.000000e+00 : f32
    %1215 = vector.broadcast %cst_305 : f32 to vector<1x256xf32>
    %1216 = arith.select %120, %1214, %1215 : vector<1x256xi1>, vector<1x256xf32>
    %1217 = arith.addf %1207, %1216 : vector<1x256xf32>
    %c208_i32_306 = arith.constant 208 : i32
    %1218 = tpu.dynamic_rotate %762 by %c208_i32_306 dim 1 : vector<1x256xf32>, i32 -> vector<1x256xf32>
    %c208_i32_307 = arith.constant 208 : i32
    %1219 = tpu.dynamic_rotate %764 by %c208_i32_307 dim 1 : vector<1x256xf32>, i32 -> vector<1x256xf32>
    %1220 = vector.broadcast %48 : f32 to vector<1x256xf32>
    %1221 = arith.mulf %1220, %1218 : vector<1x256xf32>
    %1222 = vector.broadcast %97 : f32 to vector<1x256xf32>
    %1223 = arith.mulf %1222, %1219 : vector<1x256xf32>
    %1224 = arith.addf %1221, %1223 : vector<1x256xf32>
    %cst_308 = arith.constant 0.000000e+00 : f32
    %1225 = vector.broadcast %cst_308 : f32 to vector<1x256xf32>
    %1226 = arith.select %125, %1224, %1225 : vector<1x256xi1>, vector<1x256xf32>
    %1227 = arith.addf %1217, %1226 : vector<1x256xf32>
    %c207_i32_309 = arith.constant 207 : i32
    %1228 = tpu.dynamic_rotate %762 by %c207_i32_309 dim 1 : vector<1x256xf32>, i32 -> vector<1x256xf32>
    %c207_i32_310 = arith.constant 207 : i32
    %1229 = tpu.dynamic_rotate %764 by %c207_i32_310 dim 1 : vector<1x256xf32>, i32 -> vector<1x256xf32>
    %1230 = vector.broadcast %49 : f32 to vector<1x256xf32>
    %1231 = arith.mulf %1230, %1228 : vector<1x256xf32>
    %1232 = vector.broadcast %98 : f32 to vector<1x256xf32>
    %1233 = arith.mulf %1232, %1229 : vector<1x256xf32>
    %1234 = arith.addf %1231, %1233 : vector<1x256xf32>
    %cst_311 = arith.constant 0.000000e+00 : f32
    %1235 = vector.broadcast %cst_311 : f32 to vector<1x256xf32>
    %1236 = arith.select %130, %1234, %1235 : vector<1x256xi1>, vector<1x256xf32>
    %1237 = arith.addf %1227, %1236 : vector<1x256xf32>
    %c206_i32_312 = arith.constant 206 : i32
    %1238 = tpu.dynamic_rotate %762 by %c206_i32_312 dim 1 : vector<1x256xf32>, i32 -> vector<1x256xf32>
    %c206_i32_313 = arith.constant 206 : i32
    %1239 = tpu.dynamic_rotate %764 by %c206_i32_313 dim 1 : vector<1x256xf32>, i32 -> vector<1x256xf32>
    %1240 = vector.broadcast %50 : f32 to vector<1x256xf32>
    %1241 = arith.mulf %1240, %1238 : vector<1x256xf32>
    %1242 = vector.broadcast %99 : f32 to vector<1x256xf32>
    %1243 = arith.mulf %1242, %1239 : vector<1x256xf32>
    %1244 = arith.addf %1241, %1243 : vector<1x256xf32>
    %cst_314 = arith.constant 0.000000e+00 : f32
    %1245 = vector.broadcast %cst_314 : f32 to vector<1x256xf32>
    %1246 = arith.select %135, %1244, %1245 : vector<1x256xi1>, vector<1x256xf32>
    %1247 = arith.addf %1237, %1246 : vector<1x256xf32>
    %c205_i32_315 = arith.constant 205 : i32
    %1248 = tpu.dynamic_rotate %762 by %c205_i32_315 dim 1 : vector<1x256xf32>, i32 -> vector<1x256xf32>
    %c205_i32_316 = arith.constant 205 : i32
    %1249 = tpu.dynamic_rotate %764 by %c205_i32_316 dim 1 : vector<1x256xf32>, i32 -> vector<1x256xf32>
    %1250 = vector.broadcast %51 : f32 to vector<1x256xf32>
    %1251 = arith.mulf %1250, %1248 : vector<1x256xf32>
    %1252 = vector.broadcast %100 : f32 to vector<1x256xf32>
    %1253 = arith.mulf %1252, %1249 : vector<1x256xf32>
    %1254 = arith.addf %1251, %1253 : vector<1x256xf32>
    %cst_317 = arith.constant 0.000000e+00 : f32
    %1255 = vector.broadcast %cst_317 : f32 to vector<1x256xf32>
    %1256 = arith.select %140, %1254, %1255 : vector<1x256xi1>, vector<1x256xf32>
    %1257 = arith.addf %1247, %1256 : vector<1x256xf32>
    %cst_318 = arith.constant 0.000000e+00 : f32
    %1258 = vector.broadcast %cst_318 : f32 to vector<1x256xf32>
    %1259 = arith.select %175, %1257, %1258 : vector<1x256xi1>, vector<1x256xf32>
    %1260 = arith.addf %835, %906 : vector<1x256xf32>
    %1261 = arith.addf %977, %1046 : vector<1x256xf32>
    %1262 = arith.addf %1117, %1188 : vector<1x256xf32>
    %1263 = arith.addf %1260, %1261 : vector<1x256xf32>
    %1264 = arith.addf %1262, %1259 : vector<1x256xf32>
    %1265 = arith.addf %1263, %1264 : vector<1x256xf32>
    %1266 = vector.broadcast %2 : f32 to vector<1x256xf32>
    %1267 = arith.addf %1265, %1266 : vector<1x256xf32>
    %1268 = arith.negf %1267 : vector<1x256xf32>
    %1269 = math.exp %1268 : vector<1x256xf32>
    %cst_319 = arith.constant 1.000000e+00 : f32
    %1270 = vector.broadcast %cst_319 : f32 to vector<1x256xf32>
    %1271 = arith.addf %1270, %1269 : vector<1x256xf32>
    %1272 = arith.divf %1270, %1271 : vector<1x256xf32>
    %1273 = vector.broadcast %1272 : vector<1x256xf32> to vector<32x256xf32>
    %1274 = arith.mulf %758, %1273 : vector<32x256xf32>
    %c1_320 = arith.constant 1 : index
    %c0_321 = arith.constant 0 : index
    %c0_322 = arith.constant 0 : index
    %1275 = vector.load %arg6[%c1_320, %c0_321, %c0_322] : memref<2x32x256xf32, #tpu.memory_space<vmem>>, vector<1x32x256xf32>
    %1276 = vector.shape_cast %1275 : vector<1x32x256xf32> to vector<32x256xf32>
    %1277 = vector.shape_cast %1274 : vector<32x256xf32> to vector<1x32x256xf32>
    tpu.vector_store %arg6[%c1_320, %c0_321, %c0_322], %1277 {strides = array<i32>} : memref<2x32x256xf32, #tpu.memory_space<vmem>>, vector<1x32x256xf32>,
    return
  }
  func.func @transform_0(%arg0: i32) -> (i32, i32, i32) {
    %c0_i32 = arith.constant 0 : i32
    %c0_i32_0 = arith.constant 0 : i32
    %c0_i32_1 = arith.constant 0 : i32
    return %arg0, %c0_i32, %c0_i32_0 : i32, i32, i32
  }
  func.func @transform_1(%arg0: i32) -> (i32, i32) {
    %c0_i32 = arith.constant 0 : i32
    %c0_i32_0 = arith.constant 0 : i32
    %c0_i32_1 = arith.constant 0 : i32
    return %c0_i32, %c0_i32_0 : i32, i32
  }
  func.func @transform_2(%arg0: i32) -> (i32, i32) {
    %c0_i32 = arith.constant 0 : i32
    %c0_i32_0 = arith.constant 0 : i32
    %c0_i32_1 = arith.constant 0 : i32
    return %c0_i32, %c0_i32_0 : i32, i32
  }
  func.func @transform_3(%arg0: i32) -> i32 {
    %c0_i32 = arith.constant 0 : i32
    %c0_i32_0 = arith.constant 0 : i32
    return %c0_i32 : i32
  }
  func.func @transform_4(%arg0: i32) -> i32 {
    %c0_i32 = arith.constant 0 : i32
    %c0_i32_0 = arith.constant 0 : i32
    return %c0_i32 : i32
  }
  func.func @transform_5(%arg0: i32) -> (i32, i32, i32) {
    %c0_i32 = arith.constant 0 : i32
    %c0_i32_0 = arith.constant 0 : i32
    %c0_i32_1 = arith.constant 0 : i32
    return %arg0, %c0_i32, %c0_i32_0 : i32, i32, i32
  }
}

</mosaic_0001>

<bundles_post_ra>
// kernel: tpu_custom_call.1
= control target key start
LH: loop header
LB: loop body
LE: loop exit
PB: predicated region body
PF: predicated region fallthrough
CT: control target
= control target key end

     0   :  { %s8228_s0 = inlined_call_operand.hbm [shape: f32[2,32,256], index: 0, kind: input, shape index: {}]   ;;  %s8229_s1 = inlined_call_operand.vmem [shape: f32[32,2], index: 1, kind: input, shape index: {}]   ;;  %s8230_s2 = inlined_call_operand.vmem [shape: f32[32,2], index: 2, kind: input, shape index: {}]   ;;  %s8231_s3 = inlined_call_operand.vmem [shape: f32[98], index: 3, kind: input, shape index: {}]   ;;  %s8232_s4 = inlined_call_operand.<no memory space> [shape: f32[1], index: 4, kind: input, shape index: {}]   ;;  %s8233_s5 = inlined_call_operand.hbm [shape: f32[2,32,256], index: 5, kind: output, shape index: {}]  }
   0x1   :  { %8788 = sst [smem:[#allocation199_spill]] %s8229_s1 }
   0x2   :  { %8789 = sst [smem:[#allocation200_spill]] %s8230_s2 }
   0x3   :  { %8790 = sst [smem:[#allocation201_spill]] %s8232_s4 }
   0x4   :  { %8791 = sst [smem:[#allocation202_spill]] %s8233_s5 }
   0x5   :  { %11 = vsyncpa [#allocation4], 0 }
   0x6   :  { %12 = vsyncpa [#allocation6], 0 }
   0x7   :  { %13 = vsyncpa [#allocation5], 0  ;;  %s3248_s18 = smov [#allocation3]   ;;  %s36_s22 = sshll.u32 %s8231_s3, 4  ;;  %s37_s22 = int_to_ptr.vmem [resolvable:$true] %s36_s22 }
   0x8   :  { %s19_s19 = sshll.u32 %s3248_s18, 4  ;;  %s20_s19 = int_to_ptr.vmem [resolvable:$true] %s19_s19 }
   0x9   :  { %s3198_s23 = scalar_lea.vmem %s20_s19, 2048  ;;  %p3203_p1 = scmp.lt.s32.totalorder %s20_s19, %s20_s19 }
   0xa   :  { %p3199_p0 = scmp.ne.s32.totalorder %s20_s19, %s3198_s23  ;;  %p3204_p2 = scmp.lt.s32.totalorder %s3198_s23, %s3198_s23 }
   0xc   :  { %p3205_p3 = por %p3204_p2, %p3203_p1 }
   0xe   :  { %p3206_p4 = pnand %p3205_p3, %p3199_p0 }
  0x10   :  { %3209 = shalt.err (!%p3206_p4)
}
  0x11   :  { %s8234_s24 = smov 256   ;;  %s8289_s25 = smov 16  }
  0x12   :  { %25 = dma.hbm_to_vmem [thread:$0]  %s8228_s0, 2048, %s20_s19, [#allocation4], %s8234_s24, %s8234_s24, %s8289_s25  }
  0x13   :  { %s3210_s28 = scalar_lea.vmem %s37_s22, 16  ;;  %p3215_p6 = scmp.lt.s32.totalorder %s37_s22, %s37_s22 }
  0x14   :  { %p3211_p5 = scmp.ne.s32.totalorder %s37_s22, %s3210_s28  ;;  %p3216_p7 = scmp.lt.s32.totalorder %s3210_s28, %s3210_s28 }
  0x16   :  { %p3217_p8 = por %p3216_p7, %p3215_p6 }
  0x18   :  { %p3218_p9 = pnand %p3217_p8, %p3211_p5 }
  0x1a   :  { %3221 = shalt.err (!%p3218_p9)
}
  0x1b   :  { %s3251_s3 = smov [#allocation7]  }
  0x1c   :  { %39 = dma.vmem_to_smem %s37_s22, 16, %s3251_s3, [#allocation6]  }
  0x1d   :  { %3242 = dma.done.wait [#allocation4], 2048  }
  0x1e   :  { %3243 = vsyncadd [#allocation4], 4294965248 }
  0x1f   :  { %3244 = dma.done.wait [#allocation6], 16  }
  0x20   :  { %3245 = vsyncadd [#allocation6], 4294967280 }
  0x21   :  { %48 = sfence }
  0x22   :  { %v3339_v0 = vld [vmem:[#allocation3 + $0x20] sm:$0xff]  ;;  %v3341_v1 = vld [vmem:[#allocation3 + $0x28] sm:$0xff]  ;;  %v3349_v5 = vld [vmem:[#allocation3 + $0x30] sm:$0xff]  ;;  %vm8439_vm0 = vcmask 15360   ;;  %s8343_s19 = smov 50   ;;  %s8345_s20 = smov 51  }
  0x23   :  { %v3343_v2 = vld [vmem:[#allocation3] sm:$0xff]  ;;  %v261_v3 = vadd.f32 %v3341_v1, %v3339_v0  ;;  %v3347_v4 = vld [vmem:[#allocation3 + $0x8] sm:$0xff]  ;;  %v3351_v6 = vld [vmem:[#allocation3 + $0x38] sm:$0xff]  ;;  %v277_v15 = vmax.f32 %v3339_v0, %v3341_v1  ;;  %s8339_s21 = smov 49   ;;  %s8337_s22 = smov 48  }
  0x24   :  { %v255_v7 = vadd.f32 %v3347_v4, %v3343_v2  ;;  %v3355_v8 = vld [vmem:[#allocation3 + $0x10] sm:$0xff]  ;;  %v3357_v9 = vld [vmem:[#allocation3 + $0x18] sm:$0xff]  ;;  %v264_v10 = vadd.f32 %v3351_v6, %v3349_v5  ;;  %v271_v13 = vmax.f32 %v3343_v2, %v3347_v4  ;;  %v280_v14 = vmax.f32 %v3349_v5, %v3351_v6  ;;  %v49_v19 = vld [vmem:[%s8229_s1] sm:$0xff]  ;;  %s8335_s23 = smov 47   ;;  %s8333_s26 = smov 46  }
  0x25   :  { %262 = vadd.xlane.f32.xlu1 %v261_v3  ;;  %v258_v11 = vadd.f32 %v3357_v9, %v3355_v8  ;;  %v274_v12 = vmax.f32 %v3355_v8, %v3357_v9  ;;  %v51_v22 = vld [vmem:[%s8229_s1 + $0x10] sm:$0xff]  ;;  %v50_v24 = vld [vmem:[%s8229_s1 + $0x8] sm:$0xff]  ;;  %v52_v28 = vld [vmem:[%s8229_s1 + $0x18] sm:$0xff]  ;;  %s8331_s27 = smov 45   ;;  %s8327_s28 = smov 35  }
  0x26   :  { %256 = vadd.xlane.f32.xlu0 %v255_v7  ;;  %s8325_s3 = smov 34   ;;  %s8323_s0 = smov 33  }
  0x27   :  { %s8321_s29 = smov 32   ;;  %s8315_s30 = smov 31  }
  0x28   :  { %s8313_s6 = smov 30   ;;  %s8311_s7 = smov 29  }
  0x29   :  { %265 = vadd.xlane.f32.xlu1 %v264_v10  ;;  %s8309_s8 = smov 19   ;;  %s8299_s9 = smov 18  }
  0x2a   :  { %259 = vadd.xlane.f32.xlu0 %v258_v11  ;;  %s8295_s10 = smov 17   ;;  %s8277_s11 = smov 15  }
  0x2b   :  { %s8281_s12 = smov 14   ;;  %s8285_s13 = smov 13  }
  0x2c   :  { %s8235_s14 = smov 3   ;;  %s8237_s15 = smov 2  }
  0x2d   :  { %275 = vmax.xlane.f32.xlu1 %v274_v12  ;;  %v54_v12 = vld [vmem:[%s8230_s2 + $0x8] sm:$0xff]  ;;  %s8239_s16 = smov 1   ;;  %s8241_s17 = smov 127  }
  0x2e   :  { %272 = vmax.xlane.f32.xlu0 %v271_v13  ;;  %v53_v13 = vld [vmem:[%s8230_s2] sm:$0xff]  ;;  %s8305_s18 = smov 126   ;;  %s8243_s24 = smov 125  }
  0x2f   :  { %s3967_s5 = sld [smem:[#allocation7 + $0x3f]] }
  0x30   :  { %s4019_s1 = sld [smem:[#allocation7 + $0x4b]] }
  0x31   :  { %281 = vmax.xlane.f32.xlu1 %v280_v14  ;;  %s4028_s4 = sld [smem:[#allocation7 + $0x4d]] }
  0x32   :  { %278 = vmax.xlane.f32.xlu0 %v277_v15  ;;  %v56_v15 = vld [vmem:[%s8230_s2 + $0x18] sm:$0xff] }
  0xae   :  { %v263_v16 = vpop.xlane.xlu1 %262 }
  0xaf   :  { %v257_v17 = vpop.xlane.xlu0 %256  ;;  %v269_v20 = vmul.f32 0.00390625, %v263_v16  ;;  %v55_v16 = vld [vmem:[%s8230_s2 + $0x10] sm:$0xff]  ;;  %s4010_s2 = sld [smem:[#allocation7 + $0x4a]] }
  0xb0   :  { %v267_v18 = vmul.f32 0.00390625, %v257_v17 }
  0xb1   :  { %v285_v29 = vmul.f32 %v269_v20, %v51_v22 }
  0xb2   :  { %v266_v21 = vpop.xlane.xlu1 %265  ;;  %v283_v25 = vmul.f32 %v267_v18, %v49_v19 }
  0xb3   :  { %v260_v23 = vpop.xlane.xlu0 %259  ;;  %v270_v26 = vmul.f32 0.00390625, %v266_v21  ;;  %v291_v39 = vsel %vm8439_vm0, %v285_v29, 0.0 }
  0xb4   :  { %v268_v27 = vmul.f32 0.00390625, %v260_v23  ;;  %v288_v34 = vsel %vm8439_vm0, %v283_v25, 0.0 }
  0xb5   :  { %v286_v35 = vmul.f32 %v270_v26, %v52_v28  ;;  %8875 = sst [smem:[#allocation81_spill]] %s4010_s2  ;;  %s8880_s2 = smov 96  }
  0xb6   :  { %v284_v30 = vmul.f32 %v268_v27, %v50_v24  ;;  %v276_v31 = vpop.xlane.xlu1 %275 }
  0xb7   :  { %v302_v32 = vmul.f32 %v276_v31, %v50_v24  ;;  %v273_v33 = vpop.xlane.xlu0 %272  ;;  %v293_v46 = vsel %vm8439_vm0, %v286_v35, 0.0 }
  0xb8   :  { %v289_v36 = vsel %vm8439_vm0, %v284_v30, 0.0  ;;  %v301_v37 = vmul.f32 %v273_v33, %v49_v19 }
  0xb9   :  { %v290_v38 = vadd.f32 %v289_v36, %v288_v34  ;;  %v306_v40 = vsel %vm8439_vm0, %v302_v32, 0.0 }
  0xba   :  { %v305_v41 = vsel %vm8439_vm0, %v301_v37, 0.0  ;;  %v282_v42 = vpop.xlane.xlu1 %281 }
  0xbb   :  { %v292_v43 = vadd.f32 %v291_v39, %v290_v38  ;;  %v279_v44 = vpop.xlane.xlu0 %278  ;;  %v304_v45 = vmul.f32 %v282_v42, %v52_v28  ;;  %v307_v49 = vadd.f32 %v306_v40, %v305_v41 }
  0xbc   :  { %v303_v47 = vmul.f32 %v279_v44, %v51_v22 }
  0xbd   :  { %v294_v48 = vadd.f32 %v293_v46, %v292_v43  ;;  %v310_v51 = vsel %vm8439_vm0, %v304_v45, 0.0 }
  0xbe   :  { %v308_v50 = vsel %vm8439_vm0, %v303_v47, 0.0 }
  0xbf   :  { %v295_v52 = vrot.slane %v294_v48, 4  ;;  %v309_v53 = vadd.f32 %v308_v50, %v307_v49 }
  0xc1   :  { %v296_v54 = vadd.f32 %v295_v52, %v294_v48  ;;  %v311_v55 = vadd.f32 %v310_v51, %v309_v53 }
  0xc3   :  { %v297_v56 = vrot.slane %v296_v54, 2  ;;  %v312_v57 = vrot.slane %v311_v55, 4 }
  0xc5   :  { %v298_v58 = vadd.f32 %v297_v56, %v296_v54  ;;  %v313_v59 = vadd.f32 %v312_v57, %v311_v55 }
  0xc7   :  { %v314_v60 = vrot.slane %v313_v59, 2  ;;  %v299_v61 = vrot.slane %v298_v58, 1 }
  0xc9   :  { %v315_v62 = vadd.f32 %v314_v60, %v313_v59  ;;  %v300_v3 = vadd.f32 %v299_v61, %v298_v58 }
  0xcb   :  { %v316_v63 = vrot.slane %v315_v62, 1  ;;  %v318_v11 = vmax.f32 %v300_v3, 0.0 }
  0xcd   :  { %v317_v7 = vadd.f32 %v316_v63, %v315_v62 }
  0xcf   :  { %v319_v10 = vmax.f32 %v317_v7, 0.0 }
  0xd1   :  { %v320_v14 = vadd.f32 %v319_v10, %v318_v11 }
  0xd3   :  { %v322_v17 = vmul.f32 %v320_v14, %v54_v12  ;;  %v321_v18 = vmul.f32 %v320_v14, %v53_v13  ;;  %v324_v21 = vmul.f32 %v320_v14, %v56_v15  ;;  %v323_v22 = vmul.f32 %v320_v14, %v55_v16 }
  0xd5   :  { %v328_v19 = vsel %vm8439_vm0, %v322_v17, 0.0  ;;  %v325_v20 = vsel %vm8439_vm0, %v321_v18, 0.0  ;;  %v334_v23 = vsel %vm8439_vm0, %v324_v21, 0.0  ;;  %v331_v24 = vsel %vm8439_vm0, %v323_v22, 0.0 }
  0xd6   :  { %329 = vadd.xlane.f32.xlu1 %v328_v19  ;;  %326 = vadd.xlane.f32.xlu0 %v325_v20 }
  0xda   :  { %335 = vadd.xlane.f32.xlu1 %v334_v23  ;;  %332 = vadd.xlane.f32.xlu0 %v331_v24 }
 0x15f   :  { %v330_v25 = vpop.xlane.xlu1 %329  ;;  %v327_v26 = vpop.xlane.xlu0 %326 }
 0x160   :  { %v3063_v27 = vmul.f32 -1.442695, %v330_v25  ;;  %v3062_v28 = vmul.f32 -1.442695, %v327_v26 }
 0x162   :  { %3126 = vpow2.f32 %v3063_v27 }
 0x163   :  { %3128 = vpow2.f32 %v3062_v28  ;;  %v336_v29 = vpop.xlane.xlu1 %335  ;;  %v333_v30 = vpop.xlane.xlu0 %332 }
 0x164   :  { %v3065_v31 = vmul.f32 -1.442695, %v336_v29  ;;  %v3064_v32 = vmul.f32 -1.442695, %v333_v30 }
 0x166   :  { %3130 = vpow2.f32 %v3065_v31 }
 0x167   :  { %3132 = vpow2.f32 %v3064_v32 }
 0x16f   :  { %v3127_v33 = vpop.eup %3126 }
 0x170   :  { %v3129_v34 = vpop.eup %3128  ;;  %v350_v35 = vadd.f32 1.0, %v3127_v33 }
 0x171   :  { %v349_v36 = vadd.f32 1.0, %v3129_v34 }
 0x172   :  { %3134 = vrcp.f32 %v350_v35 }
 0x173   :  { %v3131_v37 = vpop.eup %3130  ;;  %3136 = vrcp.f32 %v349_v36 }
 0x174   :  { %v3133_v38 = vpop.eup %3132  ;;  %v352_v39 = vadd.f32 1.0, %v3131_v37 }
 0x175   :  { %v351_v40 = vadd.f32 1.0, %v3133_v38 }
 0x176   :  { %3138 = vrcp.f32 %v352_v39 }
 0x177   :  { %3140 = vrcp.f32 %v351_v40 }
 0x17f   :  { %v3135_v41 = vpop.eup %3134 }
 0x180   :  { %v3137_v42 = vpop.eup %3136  ;;  %v3408_v45 = vmul.f32 %v3135_v41, %v3355_v8  ;;  %v3411_v46 = vmul.f32 %v3135_v41, %v3357_v9 }
 0x181   :  { %v3420_v49 = vmul.f32 %v3137_v42, %v3343_v2  ;;  %v3423_v50 = vmul.f32 %v3137_v42, %v3347_v4 }
 0x182   :  { %8792 = vst [vmem:[#allocation12_spill] sm:$0xff] %v3408_v45  ;;  %8793 = vst [vmem:[#allocation13_spill] sm:$0xff] %v3411_v46 }
 0x183   :  { %v3139_v43 = vpop.eup %3138  ;;  %8796 = vst [vmem:[#allocation16_spill] sm:$0xff] %v3420_v49  ;;  %8797 = vst [vmem:[#allocation17_spill] sm:$0xff] %v3423_v50  ;;  %v369_v13 = vadd.f32 %v3408_v45, %v3420_v49  ;;  %v378_v17 = vadd.f32 %v3411_v46, %v3423_v50 }
 0x184   :  { %v3141_v44 = vpop.eup %3140  ;;  %v3414_v47 = vmul.f32 %v3139_v43, %v3349_v5  ;;  %v3417_v48 = vmul.f32 %v3139_v43, %v3351_v6 }
 0x185   :  { %v3426_v51 = vmul.f32 %v3141_v44, %v3339_v0  ;;  %v3429_v8 = vmul.f32 %v3141_v44, %v3341_v1 }
 0x186   :  { %8794 = vst [vmem:[#allocation14_spill] sm:$0xff] %v3414_v47  ;;  %8795 = vst [vmem:[#allocation15_spill] sm:$0xff] %v3417_v48  ;;  %v390_v9 = vmax.f32 %v3408_v45, %v3414_v47  ;;  %v399_v5 = vmax.f32 %v3411_v46, %v3417_v48 }
 0x187   :  { %8798 = vst [vmem:[#allocation18_spill] sm:$0xff] %v3426_v51  ;;  %8799 = vst [vmem:[#allocation19_spill] sm:$0xff] %v3429_v8  ;;  %v389_v6 = vmax.f32 %v3420_v49, %v3426_v51  ;;  %v398_v2 = vmax.f32 %v3423_v50, %v3429_v8  ;;  %v370_v14 = vadd.f32 %v369_v13, %v3426_v51 }
 0x188   :  { %v379_v19 = vadd.f32 %v378_v17, %v3429_v8 }
 0x189   :  { %v391_v4 = vmax.f32 %v389_v6, %v390_v9  ;;  %v400_v52 = vmax.f32 %v398_v2, %v399_v5  ;;  %v371_v18 = vadd.f32 %v370_v14, %v3414_v47 }
 0x18a   :  { %v380_v23 = vadd.f32 %v379_v19, %v3417_v48 }
 0x18b   :  { %v392_v53 = vrot.slane %v391_v4, 4  ;;  %v401_v0 = vrot.slane %v400_v52, 4  ;;  %v372_v22 = vrot.slane %v371_v18, 4 }
 0x18c   :  { %v381_v27 = vrot.slane %v380_v23, 4 }
 0x18d   :  { %v393_v54 = vmax.f32 %v391_v4, %v392_v53  ;;  %v402_v55 = vmax.f32 %v400_v52, %v401_v0  ;;  %v373_v26 = vadd.f32 %v372_v22, %v371_v18 }
 0x18e   :  { %v382_v31 = vadd.f32 %v381_v27, %v380_v23 }
 0x18f   :  { %v394_v1 = vrot.slane %v393_v54, 2  ;;  %v403_v56 = vrot.slane %v402_v55, 2  ;;  %v374_v30 = vrot.slane %v373_v26, 2 }
 0x190   :  { %v383_v35 = vrot.slane %v382_v31, 2 }
 0x191   :  { %v395_v57 = vmax.f32 %v393_v54, %v394_v1  ;;  %v404_v58 = vmax.f32 %v402_v55, %v403_v56  ;;  %v375_v34 = vadd.f32 %v374_v30, %v373_v26 }
 0x192   :  { %v384_v39 = vadd.f32 %v383_v35, %v382_v31 }
 0x193   :  { %v396_v59 = vrot.slane %v395_v57, 1  ;;  %v405_v61 = vrot.slane %v404_v58, 1  ;;  %v376_v38 = vrot.slane %v375_v34, 1 }
 0x194   :  { %v385_v43 = vrot.slane %v384_v39, 1 }
 0x195   :  { %v3439_v60 = vmax.f32 %v395_v57, %v396_v59  ;;  %v3445_v62 = vmax.f32 %v404_v58, %v405_v61  ;;  %v377_v42 = vadd.f32 %v376_v38, %v375_v34 }
 0x196   :  { %v386_v5 = vadd.f32 %v385_v43, %v384_v39 }
 0x197   :  { %437 = vrot.lane.b32.xlu0 %v3439_v60, %s8343_s19  ;;  %414 = vrot.lane.b32.xlu1 %v3439_v60, %s8345_s20  ;;  %v3655_v6 = vmul.f32 0.03125, %v377_v42 }
 0x198   :  { %v3665_v52 = vmul.f32 0.03125, %v386_v5 }
 0x19b   :  { %462 = vrot.lane.b32.xlu0 %v3439_v60, %s8339_s21  ;;  %416 = vrot.lane.b32.xlu1 %v3445_v62, %s8345_s20 }
 0x19f   :  { %487 = vrot.lane.b32.xlu0 %v3439_v60, %s8337_s22  ;;  %439 = vrot.lane.b32.xlu1 %v3445_v62, %s8343_s19 }
 0x1a3   :  { %512 = vrot.lane.b32.xlu0 %v3439_v60, %s8335_s23  ;;  %464 = vrot.lane.b32.xlu1 %v3445_v62, %s8339_s21 }
 0x1a7   :  { %537 = vrot.lane.b32.xlu0 %v3439_v60, %s8333_s26  ;;  %489 = vrot.lane.b32.xlu1 %v3445_v62, %s8337_s22 }
 0x1ab   :  { %562 = vrot.lane.b32.xlu0 %v3439_v60, %s8331_s27  ;;  %514 = vrot.lane.b32.xlu1 %v3445_v62, %s8335_s23 }
 0x1af   :  { %589 = vrot.lane.b32.xlu0 %v3439_v60, %s8327_s28  ;;  %539 = vrot.lane.b32.xlu1 %v3445_v62, %s8333_s26 }
 0x1b3   :  { %612 = vrot.lane.b32.xlu0 %v3439_v60, %s8325_s3  ;;  %564 = vrot.lane.b32.xlu1 %v3445_v62, %s8331_s27 }
 0x1b7   :  { %637 = vrot.lane.b32.xlu0 %v3439_v60, %s8323_s0  ;;  %591 = vrot.lane.b32.xlu1 %v3445_v62, %s8327_s28 }
 0x1bb   :  { %662 = vrot.lane.b32.xlu0 %v3439_v60, %s8321_s29  ;;  %614 = vrot.lane.b32.xlu1 %v3445_v62, %s8325_s3 }
 0x1bf   :  { %687 = vrot.lane.b32.xlu0 %v3439_v60, %s8315_s30  ;;  %639 = vrot.lane.b32.xlu1 %v3445_v62, %s8323_s0 }
 0x1c3   :  { %712 = vrot.lane.b32.xlu0 %v3439_v60, %s8313_s6  ;;  %664 = vrot.lane.b32.xlu1 %v3445_v62, %s8321_s29 }
 0x1c7   :  { %737 = vrot.lane.b32.xlu0 %v3439_v60, %s8311_s7  ;;  %689 = vrot.lane.b32.xlu1 %v3445_v62, %s8315_s30 }
 0x1cb   :  { %764 = vrot.lane.b32.xlu0 %v3439_v60, %s8309_s8  ;;  %714 = vrot.lane.b32.xlu1 %v3445_v62, %s8313_s6 }
 0x1cf   :  { %787 = vrot.lane.b32.xlu0 %v3439_v60, %s8299_s9  ;;  %739 = vrot.lane.b32.xlu1 %v3445_v62, %s8311_s7 }
 0x1d3   :  { %812 = vrot.lane.b32.xlu0 %v3439_v60, %s8295_s10  ;;  %766 = vrot.lane.b32.xlu1 %v3445_v62, %s8309_s8 }
 0x1d7   :  { %837 = vrot.lane.b32.xlu0 %v3439_v60, %s8289_s25  ;;  %789 = vrot.lane.b32.xlu1 %v3445_v62, %s8299_s9 }
 0x1db   :  { %862 = vrot.lane.b32.xlu0 %v3439_v60, %s8277_s11  ;;  %814 = vrot.lane.b32.xlu1 %v3445_v62, %s8295_s10 }
 0x1df   :  { %887 = vrot.lane.b32.xlu0 %v3439_v60, %s8281_s12  ;;  %839 = vrot.lane.b32.xlu1 %v3445_v62, %s8289_s25 }
 0x1e3   :  { %912 = vrot.lane.b32.xlu0 %v3439_v60, %s8285_s13  ;;  %864 = vrot.lane.b32.xlu1 %v3445_v62, %s8277_s11 }
 0x1e7   :  { %939 = vrot.lane.b32.xlu0 %v3439_v60, %s8235_s14  ;;  %889 = vrot.lane.b32.xlu1 %v3445_v62, %s8281_s12 }
 0x1eb   :  { %962 = vrot.lane.b32.xlu0 %v3439_v60, %s8237_s15  ;;  %914 = vrot.lane.b32.xlu1 %v3445_v62, %s8285_s13 }
 0x1ef   :  { %987 = vrot.lane.b32.xlu0 %v3439_v60, %s8239_s16  ;;  %941 = vrot.lane.b32.xlu1 %v3445_v62, %s8235_s14  ;;  %s8245_s14 = smov 115  }
 0x1f3   :  { %1024 = vrot.lane.b32.xlu0 %v3439_v60, %s8241_s17  ;;  %964 = vrot.lane.b32.xlu1 %v3445_v62, %s8237_s15  ;;  %s8319_s15 = smov 114  }
 0x1f7   :  { %1049 = vrot.lane.b32.xlu0 %v3439_v60, %s8305_s18  ;;  %989 = vrot.lane.b32.xlu1 %v3445_v62, %s8239_s16  ;;  %s8247_s16 = smov 113  }
 0x1fb   :  { %1074 = vrot.lane.b32.xlu0 %v3439_v60, %s8243_s24  ;;  %1026 = vrot.lane.b32.xlu1 %v3445_v62, %s8241_s17  ;;  %s8249_s17 = smov 112  }
 0x1ff   :  { %1101 = vrot.lane.b32.xlu0 %v3439_v60, %s8245_s14  ;;  %1051 = vrot.lane.b32.xlu1 %v3445_v62, %s8305_s18 }
 0x203   :  { %1124 = vrot.lane.b32.xlu0 %v3439_v60, %s8319_s15  ;;  %1076 = vrot.lane.b32.xlu1 %v3445_v62, %s8243_s24  ;;  %s8251_s24 = smov 111  }
 0x207   :  { %1149 = vrot.lane.b32.xlu0 %v3439_v60, %s8247_s16  ;;  %1103 = vrot.lane.b32.xlu1 %v3445_v62, %s8245_s14  ;;  %s8253_s14 = smov 110  }
 0x209   :  { %v3559_v63 = vpop.permute.xlu0 %437  ;;  %v3561_v3 = vpop.permute.xlu1 %414 }
 0x20b   :  { %1174 = vrot.lane.b32.xlu0 %v3439_v60, %s8249_s17  ;;  %1126 = vrot.lane.b32.xlu1 %v3445_v62, %s8319_s15 }
 0x20d   :  { %v3567_v7 = vpop.permute.xlu0 %462  ;;  %v3569_v10 = vpop.permute.xlu1 %416 }
 0x20f   :  { %1199 = vrot.lane.b32.xlu0 %v3439_v60, %s8251_s24  ;;  %1151 = vrot.lane.b32.xlu1 %v3445_v62, %s8247_s16  ;;  %s8255_s16 = smov 109  }
 0x211   :  { %v3575_v11 = vpop.permute.xlu0 %487  ;;  %v3577_v12 = vpop.permute.xlu1 %439 }
 0x213   :  { %1224 = vrot.lane.b32.xlu0 %v3439_v60, %s8253_s14  ;;  %1176 = vrot.lane.b32.xlu1 %v3445_v62, %s8249_s17  ;;  %s8257_s17 = smov 99  }
 0x215   :  { %v3586_v15 = vpop.permute.xlu0 %512  ;;  %v3588_v16 = vpop.permute.xlu1 %464 }
 0x217   :  { %1249 = vrot.lane.b32.xlu0 %v3439_v60, %s8255_s16  ;;  %1201 = vrot.lane.b32.xlu1 %v3445_v62, %s8251_s24  ;;  %s8259_s24 = smov 98  }
 0x219   :  { %v3598_v20 = vpop.permute.xlu0 %537  ;;  %v3600_v21 = vpop.permute.xlu1 %489 }
 0x21b   :  { %1276 = vrot.lane.b32.xlu0 %v3439_v60, %s8257_s17  ;;  %1226 = vrot.lane.b32.xlu1 %v3445_v62, %s8253_s14  ;;  %s8261_s14 = smov 97  }
 0x21d   :  { %v3607_v24 = vpop.permute.xlu0 %562  ;;  %v3609_v25 = vpop.permute.xlu1 %514 }
 0x21f   :  { %1299 = vrot.lane.b32.xlu0 %v3439_v60, %s8259_s24  ;;  %1251 = vrot.lane.b32.xlu1 %v3445_v62, %s8255_s16  ;;  %s8355_s16 = smov 96  }
 0x221   :  { %v3615_v28 = vpop.permute.xlu0 %589  ;;  %v3617_v29 = vpop.permute.xlu1 %539 }
 0x223   :  { %1324 = vrot.lane.b32.xlu0 %v3439_v60, %s8261_s14  ;;  %1278 = vrot.lane.b32.xlu1 %v3445_v62, %s8257_s17  ;;  %s8351_s17 = smov 95  }
 0x225   :  { %v3623_v32 = vpop.permute.xlu0 %612  ;;  %v3625_v33 = vpop.permute.xlu1 %564 }
 0x227   :  { %1349 = vrot.lane.b32.xlu0 %v3439_v60, %s8355_s16  ;;  %1301 = vrot.lane.b32.xlu1 %v3445_v62, %s8259_s24  ;;  %s8349_s24 = smov 94  }
 0x229   :  { %v3631_v36 = vpop.permute.xlu0 %637  ;;  %v3633_v37 = vpop.permute.xlu1 %591 }
 0x22b   :  { %1374 = vrot.lane.b32.xlu0 %v3439_v60, %s8351_s17  ;;  %1326 = vrot.lane.b32.xlu1 %v3445_v62, %s8261_s14  ;;  %s8347_s14 = smov 93  }
 0x22d   :  { %v3639_v40 = vpop.permute.xlu0 %662  ;;  %v3641_v41 = vpop.permute.xlu1 %614 }
 0x22f   :  { %1399 = vrot.lane.b32.xlu0 %v3439_v60, %s8349_s24  ;;  %1351 = vrot.lane.b32.xlu1 %v3445_v62, %s8355_s16  ;;  %s3965_s16 = sld [smem:[#allocation7 + $0x3e]] }
 0x231   :  { %v3647_v44 = vpop.permute.xlu0 %687  ;;  %v3649_v9 = vpop.permute.xlu1 %639 }
 0x233   :  { %1424 = vrot.lane.b32.xlu0 %v3439_v60, %s8347_s14  ;;  %1376 = vrot.lane.b32.xlu1 %v3445_v62, %s8351_s17  ;;  %s8865_s14 = smov 109   ;;  %s3959_s17 = sld [smem:[#allocation7 + $0x3d]] }
 0x235   :  { %v3657_v2 = vpop.permute.xlu0 %712  ;;  %v3659_v4 = vpop.permute.xlu1 %664 }
 0x237   :  { %1401 = vrot.lane.b32.xlu1 %v3445_v62, %s8349_s24  ;;  %407 = vrot.lane.b32.xlu0 %v3655_v6, %s8345_s20  ;;  %s3957_s24 = sld [smem:[#allocation7 + $0x3c]] }
 0x239   :  { %v3667_v53 = vpop.permute.xlu0 %737  ;;  %v3669_v0 = vpop.permute.xlu1 %689 }
 0x23b   :  { %409 = vrot.lane.b32.xlu1 %v3665_v52, %s8345_s20  ;;  %430 = vrot.lane.b32.xlu0 %v3655_v6, %s8343_s19  ;;  %s3951_s20 = sld [smem:[#allocation7 + $0x3b]] }
 0x23d   :  { %v3675_v54 = vpop.permute.xlu0 %764  ;;  %v3677_v55 = vpop.permute.xlu1 %714 }
 0x23f   :  { %432 = vrot.lane.b32.xlu1 %v3665_v52, %s8343_s19  ;;  %455 = vrot.lane.b32.xlu0 %v3655_v6, %s8339_s21  ;;  %s3949_s19 = sld [smem:[#allocation7 + $0x3a]] }
 0x241   :  { %v3683_v1 = vpop.permute.xlu0 %787  ;;  %v3685_v56 = vpop.permute.xlu1 %739 }
 0x243   :  { %457 = vrot.lane.b32.xlu1 %v3665_v52, %s8339_s21  ;;  %480 = vrot.lane.b32.xlu0 %v3655_v6, %s8337_s22  ;;  %s3943_s21 = sld [smem:[#allocation7 + $0x39]] }
 0x245   :  { %v3691_v57 = vpop.permute.xlu0 %812  ;;  %v3693_v58 = vpop.permute.xlu1 %766 }
 0x247   :  { %482 = vrot.lane.b32.xlu1 %v3665_v52, %s8337_s22  ;;  %505 = vrot.lane.b32.xlu0 %v3655_v6, %s8335_s23  ;;  %s3941_s22 = sld [smem:[#allocation7 + $0x38]] }
 0x249   :  { %v3699_v59 = vpop.permute.xlu0 %837  ;;  %v3701_v61 = vpop.permute.xlu1 %789 }
 0x24a   :  { %8800 = vst [vmem:[#allocation20_spill] sm:$0xff] %v3699_v59 }
 0x24b   :  { %507 = vrot.lane.b32.xlu1 %v3665_v52, %s8335_s23  ;;  %530 = vrot.lane.b32.xlu0 %v3655_v6, %s8333_s26  ;;  %s8862_s23 = smov 110  }
 0x24d   :  { %v3707_v13 = vpop.permute.xlu0 %862  ;;  %v3709_v14 = vpop.permute.xlu1 %814 }
 0x24e   :  { %8801 = vst [vmem:[#allocation21_spill] sm:$0xff] %v3707_v13 }
 0x24f   :  { %532 = vrot.lane.b32.xlu1 %v3665_v52, %s8333_s26  ;;  %555 = vrot.lane.b32.xlu0 %v3655_v6, %s8331_s27  ;;  %s3935_s26 = sld [smem:[#allocation7 + $0x37]] }
 0x251   :  { %v3715_v17 = vpop.permute.xlu0 %887  ;;  %v3717_v18 = vpop.permute.xlu1 %839 }
 0x252   :  { %8802 = vst [vmem:[#allocation22_spill] sm:$0xff] %v3715_v17 }
 0x253   :  { %557 = vrot.lane.b32.xlu1 %v3665_v52, %s8331_s27  ;;  %582 = vrot.lane.b32.xlu0 %v3655_v6, %s8327_s28  ;;  %s3933_s27 = sld [smem:[#allocation7 + $0x36]] }
 0x255   :  { %v3723_v19 = vpop.permute.xlu0 %912  ;;  %v3725_v22 = vpop.permute.xlu1 %864 }
 0x256   :  { %8803 = vst [vmem:[#allocation23_spill] sm:$0xff] %v3723_v19  ;;  %8804 = vst [vmem:[#allocation24_spill] sm:$0xff] %v3725_v22 }
 0x257   :  { %584 = vrot.lane.b32.xlu1 %v3665_v52, %s8327_s28  ;;  %605 = vrot.lane.b32.xlu0 %v3655_v6, %s8325_s3  ;;  %s3927_s28 = sld [smem:[#allocation7 + $0x35]] }
 0x259   :  { %v3731_v23 = vpop.permute.xlu0 %939  ;;  %v3733_v26 = vpop.permute.xlu1 %889 }
 0x25a   :  { %8805 = vst [vmem:[#allocation25_spill] sm:$0xff] %v3731_v23  ;;  %8806 = vst [vmem:[#allocation26_spill] sm:$0xff] %v3733_v26 }
 0x25b   :  { %607 = vrot.lane.b32.xlu1 %v3665_v52, %s8325_s3  ;;  %630 = vrot.lane.b32.xlu0 %v3655_v6, %s8323_s0  ;;  %s3925_s3 = sld [smem:[#allocation7 + $0x34]] }
 0x25d   :  { %v3739_v27 = vpop.permute.xlu0 %962  ;;  %v3741_v30 = vpop.permute.xlu1 %914 }
 0x25e   :  { %8807 = vst [vmem:[#allocation27_spill] sm:$0xff] %v3739_v27  ;;  %8808 = vst [vmem:[#allocation28_spill] sm:$0xff] %v3741_v30  ;;  %v4087_v27 = vstv %s3941_s22  ;;  %s4222_s22 = sld [smem:[#allocation7 + $0x58]] }
 0x25f   :  { %632 = vrot.lane.b32.xlu1 %v3665_v52, %s8323_s0  ;;  %655 = vrot.lane.b32.xlu0 %v3655_v6, %s8321_s29  ;;  %s8859_s0 = smov 111   ;;  %8893 = vst [vmem:[#allocation97_spill] sm:$0xff] %v4087_v27 }
 0x261   :  { %v3747_v31 = vpop.permute.xlu0 %987  ;;  %v3749_v34 = vpop.permute.xlu1 %941 }
 0x262   :  { %8809 = vst [vmem:[#allocation29_spill] sm:$0xff] %v3747_v31  ;;  %8810 = vst [vmem:[#allocation30_spill] sm:$0xff] %v3749_v34  ;;  %v4084_v31 = vstv %s3935_s26  ;;  %s4275_s26 = sld [smem:[#allocation7]] }
 0x263   :  { %657 = vrot.lane.b32.xlu1 %v3665_v52, %s8321_s29  ;;  %680 = vrot.lane.b32.xlu0 %v3655_v6, %s8315_s30  ;;  %s3919_s29 = sld [smem:[#allocation7 + $0x33]]  ;;  %8892 = vst [vmem:[#allocation96_spill] sm:$0xff] %v4084_v31 }
 0x265   :  { %v3755_v35 = vpop.permute.xlu0 %1024  ;;  %v3757_v38 = vpop.permute.xlu1 %964 }
 0x266   :  { %8811 = vst [vmem:[#allocation31_spill] sm:$0xff] %v3755_v35  ;;  %8812 = vst [vmem:[#allocation32_spill] sm:$0xff] %v3757_v38  ;;  %v4090_v38 = vstv %s3943_s21  ;;  %s4110_s21 = sld [smem:[#allocation7 + $0x53]] }
 0x267   :  { %682 = vrot.lane.b32.xlu1 %v3665_v52, %s8315_s30  ;;  %705 = vrot.lane.b32.xlu0 %v3655_v6, %s8313_s6  ;;  %s3911_s30 = sld [smem:[#allocation7 + $0x31]]  ;;  %8894 = vst [vmem:[#allocation98_spill] sm:$0xff] %v4090_v38 }
 0x269   :  { %v3763_v39 = vpop.permute.xlu0 %1049  ;;  %v3765_v42 = vpop.permute.xlu1 %989 }
 0x26a   :  { %8813 = vst [vmem:[#allocation33_spill] sm:$0xff] %v3763_v39  ;;  %8814 = vst [vmem:[#allocation34_spill] sm:$0xff] %v3765_v42  ;;  %v4081_v42 = vstv %s3933_s27  ;;  %s3292_s27 = smov 83  }
 0x26b   :  { %707 = vrot.lane.b32.xlu1 %v3665_v52, %s8313_s6  ;;  %730 = vrot.lane.b32.xlu0 %v3655_v6, %s8311_s7  ;;  %s3909_s6 = sld [smem:[#allocation7 + $0x18]]  ;;  %8891 = vst [vmem:[#allocation95_spill] sm:$0xff] %v4081_v42 }
 0x26d   :  { %v3771_v43 = vpop.permute.xlu0 %1074  ;;  %v3773_v5 = vpop.permute.xlu1 %1026 }
 0x26e   :  { %8815 = vst [vmem:[#allocation35_spill] sm:$0xff] %v3771_v43  ;;  %8816 = vst [vmem:[#allocation36_spill] sm:$0xff] %v3773_v5 }
 0x26f   :  { %732 = vrot.lane.b32.xlu1 %v3665_v52, %s8311_s7  ;;  %757 = vrot.lane.b32.xlu0 %v3655_v6, %s8309_s8  ;;  %s3907_s7 = sld [smem:[#allocation7 + $0x49]] }
 0x271   :  { %v3779_v47 = vpop.permute.xlu0 %1101  ;;  %v3781_v51 = vpop.permute.xlu1 %1051 }
 0x272   :  { %8817 = vst [vmem:[#allocation37_spill] sm:$0xff] %v3779_v47  ;;  %8818 = vst [vmem:[#allocation38_spill] sm:$0xff] %v3781_v51 }
 0x273   :  { %759 = vrot.lane.b32.xlu1 %v3665_v52, %s8309_s8  ;;  %780 = vrot.lane.b32.xlu0 %v3655_v6, %s8299_s9  ;;  %s8856_s8 = smov 112  }
 0x275   :  { %v3787_v45 = vpop.permute.xlu0 %1124  ;;  %v3789_v49 = vpop.permute.xlu1 %1076 }
 0x276   :  { %8819 = vst [vmem:[#allocation39_spill] sm:$0xff] %v3787_v45  ;;  %8820 = vst [vmem:[#allocation40_spill] sm:$0xff] %v3789_v49 }
 0x277   :  { %782 = vrot.lane.b32.xlu1 %v3665_v52, %s8299_s9  ;;  %805 = vrot.lane.b32.xlu0 %v3655_v6, %s8295_s10  ;;  %s8848_s9 = smov 115  }
 0x279   :  { %v3795_v48 = vpop.permute.xlu0 %1149  ;;  %v3797_v8 = vpop.permute.xlu1 %1103 }
 0x27a   :  { %8821 = vst [vmem:[#allocation41_spill] sm:$0xff] %v3795_v48  ;;  %8822 = vst [vmem:[#allocation42_spill] sm:$0xff] %v3797_v8  ;;  %v4026_v8 = vstv %s3907_s7  ;;  %s4050_s7 = sld [smem:[#allocation7 + $0x4f]] }
 0x27b   :  { %807 = vrot.lane.b32.xlu1 %v3665_v52, %s8295_s10  ;;  %830 = vrot.lane.b32.xlu0 %v3655_v6, %s8289_s25  ;;  %s8845_s10 = smov 125   ;;  %8879 = vst [vmem:[#allocation85_spill] sm:$0xff] %v4026_v8  ;;  %v1009_v51 = vmul.f32 %v4026_v8, %v3439_v60 }
 0x27d   :  { %v3803_v46 = vpop.permute.xlu0 %1174  ;;  %v3805_v50 = vpop.permute.xlu1 %1126 }
 0x27e   :  { %8823 = vst [vmem:[#allocation43_spill] sm:$0xff] %v3803_v46  ;;  %8824 = vst [vmem:[#allocation44_spill] sm:$0xff] %v3805_v50 }
 0x27f   :  { %832 = vrot.lane.b32.xlu1 %v3665_v52, %s8289_s25  ;;  %855 = vrot.lane.b32.xlu0 %v3655_v6, %s8277_s11  ;;  %s8840_s25 = smov 127  }
 0x281   :  { %v3811_v45 = vpop.permute.xlu0 %1199  ;;  %v3813_v48 = vpop.permute.xlu1 %1151 }
 0x282   :  { %8825 = vst [vmem:[#allocation45_spill] sm:$0xff] %v3811_v45  ;;  %8826 = vst [vmem:[#allocation46_spill] sm:$0xff] %v3813_v48 }
 0x283   :  { %857 = vrot.lane.b32.xlu1 %v3665_v52, %s8277_s11  ;;  %880 = vrot.lane.b32.xlu0 %v3655_v6, %s8281_s12  ;;  %s8831_s11 = smov 3  }
 0x285   :  { %v3819_v47 = vpop.permute.xlu0 %1224  ;;  %v3821_v46 = vpop.permute.xlu1 %1176 }
 0x286   :  { %8827 = vst [vmem:[#allocation47_spill] sm:$0xff] %v3819_v47  ;;  %8828 = vst [vmem:[#allocation48_spill] sm:$0xff] %v3821_v46 }
 0x287   :  { %882 = vrot.lane.b32.xlu1 %v3665_v52, %s8281_s12  ;;  %905 = vrot.lane.b32.xlu0 %v3655_v6, %s8285_s13  ;;  %s8834_s12 = smov 2  }
 0x289   :  { %v3827_v50 = vpop.permute.xlu0 %1249  ;;  %v3829_v45 = vpop.permute.xlu1 %1201 }
 0x28a   :  { %8829 = vst [vmem:[#allocation49_spill] sm:$0xff] %v3827_v50  ;;  %8830 = vst [vmem:[#allocation50_spill] sm:$0xff] %v3829_v45 }
 0x28b   :  { %907 = vrot.lane.b32.xlu1 %v3665_v52, %s8285_s13  ;;  %932 = vrot.lane.b32.xlu0 %v3655_v6, %s8831_s11  ;;  %s8837_s13 = smov 1  }
 0x28d   :  { %v3835_v48 = vpop.permute.xlu0 %1276  ;;  %v3837_v47 = vpop.permute.xlu1 %1226 }
 0x28e   :  { %8832 = vst [vmem:[#allocation51_spill] sm:$0xff] %v3835_v48  ;;  %8833 = vst [vmem:[#allocation52_spill] sm:$0xff] %v3837_v47 }
 0x28f   :  { %934 = vrot.lane.b32.xlu1 %v3665_v52, %s8831_s11  ;;  %955 = vrot.lane.b32.xlu0 %v3655_v6, %s8834_s12  ;;  %s8874_s11 = smov 97  }
 0x291   :  { %v3843_v46 = vpop.permute.xlu0 %1299  ;;  %v3845_v50 = vpop.permute.xlu1 %1251 }
 0x292   :  { %8835 = vst [vmem:[#allocation53_spill] sm:$0xff] %v3843_v46  ;;  %8836 = vst [vmem:[#allocation54_spill] sm:$0xff] %v3845_v50 }
 0x293   :  { %957 = vrot.lane.b32.xlu1 %v3665_v52, %s8834_s12  ;;  %980 = vrot.lane.b32.xlu0 %v3655_v6, %s8837_s13  ;;  %s3999_s12 = sld [smem:[#allocation7 + $0x47]] }
 0x295   :  { %v3851_v45 = vpop.permute.xlu0 %1324  ;;  %v3853_v48 = vpop.permute.xlu1 %1278 }
 0x296   :  { %8838 = vst [vmem:[#allocation55_spill] sm:$0xff] %v3851_v45  ;;  %8839 = vst [vmem:[#allocation56_spill] sm:$0xff] %v3853_v48 }
 0x297   :  { %982 = vrot.lane.b32.xlu1 %v3665_v52, %s8837_s13  ;;  %1017 = vrot.lane.b32.xlu0 %v3655_v6, %s8840_s25  ;;  %s3997_s13 = sld [smem:[#allocation7 + $0x46]] }
 0x299   :  { %v3859_v47 = vpop.permute.xlu0 %1349  ;;  %v3861_v46 = vpop.permute.xlu1 %1301  ;;  %v4149_v13 = vstv %s3999_s12  ;;  %s4416_s12 = sld [smem:[#allocation7 + $0x6]] }
 0x29a   :  { %8841 = vst [vmem:[#allocation57_spill] sm:$0xff] %v3859_v47  ;;  %8842 = vst [vmem:[#allocation58_spill] sm:$0xff] %v3861_v46 }
 0x29b   :  { %1019 = vrot.lane.b32.xlu1 %v3665_v52, %s8840_s25  ;;  %1042 = vrot.lane.b32.xlu0 %v3655_v6, %s8305_s18  ;;  %s3991_s25 = sld [smem:[#allocation7 + $0x45]]  ;;  %8912 = vst [vmem:[#allocation114_spill] sm:$0xff] %v4149_v13 }
 0x29d   :  { %v3867_v50 = vpop.permute.xlu0 %1374  ;;  %v3869_v45 = vpop.permute.xlu1 %1326 }
 0x29e   :  { %8843 = vst [vmem:[#allocation59_spill] sm:$0xff] %v3867_v50  ;;  %8844 = vst [vmem:[#allocation60_spill] sm:$0xff] %v3869_v45 }
 0x29f   :  { %1044 = vrot.lane.b32.xlu1 %v3665_v52, %s8305_s18  ;;  %1067 = vrot.lane.b32.xlu0 %v3655_v6, %s8845_s10  ;;  %s8853_s18 = smov 113  }
 0x2a1   :  { %v3875_v48 = vpop.permute.xlu0 %1399  ;;  %v3877_v47 = vpop.permute.xlu1 %1351  ;;  %v4143_v17 = vstv %s3991_s25  ;;  %s4170_s25 = sld [smem:[#allocation7 + $0x56]] }
 0x2a2   :  { %8846 = vst [vmem:[#allocation61_spill] sm:$0xff] %v3875_v48  ;;  %8847 = vst [vmem:[#allocation62_spill] sm:$0xff] %v3877_v47 }
 0x2a3   :  { %1069 = vrot.lane.b32.xlu1 %v3665_v52, %s8845_s10  ;;  %1094 = vrot.lane.b32.xlu0 %v3655_v6, %s8848_s9  ;;  %s8871_s10 = smov 98   ;;  %8910 = vst [vmem:[#allocation112_spill] sm:$0xff] %v4143_v17  ;;  %v4165_v17 = vstv %s4019_s1  ;;  %s4187_s1 = sld [smem:[#allocation7 + $0x57]] }
 0x2a4   :  { %8917 = vst [vmem:[#allocation119_spill] sm:$0xff] %v4165_v17 }
 0x2a5   :  { %v3883_v46 = vpop.permute.xlu0 %1424  ;;  %v3885_v50 = vpop.permute.xlu1 %1376 }
 0x2a6   :  { %8849 = vst [vmem:[#allocation63_spill] sm:$0xff] %v3883_v46  ;;  %8850 = vst [vmem:[#allocation64_spill] sm:$0xff] %v3885_v50 }
 0x2a7   :  { %1096 = vrot.lane.b32.xlu1 %v3665_v52, %s8848_s9  ;;  %1117 = vrot.lane.b32.xlu0 %v3655_v6, %s8319_s15  ;;  %s3983_s9 = sld [smem:[#allocation7 + $0x43]] }
 0x2a9   :  { %v3891_v45 = vpop.permute.xlu1 %1401  ;;  %v3893_v48 = vpop.permute.xlu0 %407 }
 0x2aa   :  { %8851 = vst [vmem:[#allocation65_spill] sm:$0xff] %v3891_v45  ;;  %8852 = vst [vmem:[#allocation66_spill] sm:$0xff] %v3893_v48 }
 0x2ab   :  { %1119 = vrot.lane.b32.xlu1 %v3665_v52, %s8319_s15  ;;  %1142 = vrot.lane.b32.xlu0 %v3655_v6, %s8853_s18  ;;  %s3917_s15 = sld [smem:[#allocation7 + $0x32]] }
 0x2ad   :  { %v3899_v47 = vpop.permute.xlu1 %409  ;;  %v3901_v46 = vpop.permute.xlu0 %430  ;;  %v4132_v30 = vstv %s3983_s9  ;;  %s4364_s9 = sld [smem:[#allocation7 + $0x4]] }
 0x2ae   :  { %8854 = vst [vmem:[#allocation67_spill] sm:$0xff] %v3899_v47  ;;  %8855 = vst [vmem:[#allocation68_spill] sm:$0xff] %v3901_v46  ;;  %v4017_v46 = vstv %s3909_s6  ;;  %s4040_s6 = sld [smem:[#allocation7 + $0x4e]] }
 0x2af   :  { %1144 = vrot.lane.b32.xlu1 %v3665_v52, %s8853_s18  ;;  %1167 = vrot.lane.b32.xlu0 %v3655_v6, %s8856_s8  ;;  %s3981_s18 = sld [smem:[#allocation7 + $0x42]]  ;;  %8878 = vst [vmem:[#allocation84_spill] sm:$0xff] %v4017_v46  ;;  %8907 = vst [vmem:[#allocation110_spill] sm:$0xff] %v4132_v30 }
 0x2b1   :  { %v3913_v45 = vpop.permute.xlu1 %432  ;;  %v3915_v50 = vpop.permute.xlu0 %455  ;;  %v4048_v39 = vstv %s3917_s15  ;;  %s4072_s15 = sld [smem:[#allocation7 + $0x51]] }
 0x2b2   :  { %8857 = vst [vmem:[#allocation69_spill] sm:$0xff] %v3913_v45  ;;  %8858 = vst [vmem:[#allocation70_spill] sm:$0xff] %v3915_v50 }
 0x2b3   :  { %1169 = vrot.lane.b32.xlu1 %v3665_v52, %s8856_s8  ;;  %1192 = vrot.lane.b32.xlu0 %v3655_v6, %s8859_s0  ;;  %s3975_s8 = sld [smem:[#allocation7 + $0x41]]  ;;  %8884 = vst [vmem:[#allocation89_spill] sm:$0xff] %v4048_v39 }
 0x2b4   :  { %v4185_v17 = vstv %s4040_s6  ;;  %s4540_s6 = sld [smem:[#allocation7 + $0xb]] }
 0x2b5   :  { %v3929_v47 = vpop.permute.xlu1 %457  ;;  %v3931_v48 = vpop.permute.xlu0 %480  ;;  %v4129_v19 = vstv %s3981_s18  ;;  %8920 = vst [vmem:[#allocation122_spill] sm:$0xff] %v4185_v17  ;;  %s4524_s18 = sld [smem:[#allocation7 + $0xa]] }
 0x2b6   :  { %8860 = vst [vmem:[#allocation71_spill] sm:$0xff] %v3929_v47  ;;  %8861 = vst [vmem:[#allocation72_spill] sm:$0xff] %v3931_v48 }
 0x2b7   :  { %1194 = vrot.lane.b32.xlu1 %v3665_v52, %s8859_s0  ;;  %1217 = vrot.lane.b32.xlu0 %v3655_v6, %s8862_s23  ;;  %s3971_s0 = sld [smem:[#allocation7 + $0x40]]  ;;  %8906 = vst [vmem:[#allocation109_spill] sm:$0xff] %v4129_v19 }
 0x2b9   :  { %v3945_v50 = vpop.permute.xlu1 %482  ;;  %v3947_v45 = vpop.permute.xlu0 %505  ;;  %v4126_v34 = vstv %s3975_s8  ;;  %s4345_s8 = sld [smem:[#allocation7 + $0x3]] }
 0x2ba   :  { %8863 = vst [vmem:[#allocation73_spill] sm:$0xff] %v3945_v50  ;;  %8864 = vst [vmem:[#allocation74_spill] sm:$0xff] %v3947_v45 }
 0x2bb   :  { %1219 = vrot.lane.b32.xlu1 %v3665_v52, %s8862_s23  ;;  %1242 = vrot.lane.b32.xlu0 %v3655_v6, %s8865_s14  ;;  %s8868_s23 = smov 99   ;;  %8905 = vst [vmem:[#allocation108_spill] sm:$0xff] %v4126_v34  ;;  %v4146_v34 = vstv %s3997_s13  ;;  %s3293_s13 = smov 82  }
 0x2bc   :  { %8911 = vst [vmem:[#allocation113_spill] sm:$0xff] %v4146_v34 }
 0x2bd   :  { %v3961_v48 = vpop.permute.xlu1 %507  ;;  %v3963_v47 = vpop.permute.xlu0 %530 }
 0x2be   :  { %8866 = vst [vmem:[#allocation75_spill] sm:$0xff] %v3961_v48  ;;  %8867 = vst [vmem:[#allocation76_spill] sm:$0xff] %v3963_v47  ;;  %v8384_v47 = vlaneseq }
 0x2bf   :  { %1244 = vrot.lane.b32.xlu1 %v3665_v52, %s8865_s14  ;;  %1269 = vrot.lane.b32.xlu0 %v3655_v6, %s8868_s23  ;;  %s3987_s14 = sld [smem:[#allocation7 + $0x44]] }
 0x2c0   :  { %v4008_v48 = vand.u32 127, %v8384_v47  ;;  %v1007_v47 = vmul.f32 %v4017_v46, %v3665_v52 }
 0x2c1   :  { %v3977_v45 = vpop.permute.xlu1 %532  ;;  %v3979_v50 = vpop.permute.xlu0 %555 }
 0x2c2   :  { %8869 = vst [vmem:[#allocation77_spill] sm:$0xff] %v3977_v45  ;;  %8870 = vst [vmem:[#allocation78_spill] sm:$0xff] %v3979_v50  ;;  %vm8570_vm1 = vcmp.lt.s32.totalorder %v4008_v48, 51  ;;  %vm8550_vm2 = vcmp.lt.s32.totalorder %v4008_v48, 50  ;;  %vm8569_vm3 = vcmp.lt.s32.totalorder %v4008_v48, 49  ;;  %vm8576_vm4 = vcmp.lt.s32.totalorder %v4008_v48, 48 }
 0x2c3   :  { %1271 = vrot.lane.b32.xlu1 %v3665_v52, %s8868_s23  ;;  %1292 = vrot.lane.b32.xlu0 %v3655_v6, %s8871_s10  ;;  %s4003_s23 = sld [smem:[#allocation7 + $0x48]]  ;;  %vm8574_vm5 = vcmp.lt.s32.totalorder %v4008_v48, 47  ;;  %vm8583_vm6 = vcmp.lt.s32.totalorder %v4008_v48, 46  ;;  %vm8451_vm7 = vcmp.lt.s32.totalorder %v4008_v48, 45  ;;  %vm8445_vm8 = vcmp.lt.s32.totalorder %v4008_v48, 35 }
 0x2c4   :  { %vm8449_vm9 = vcmp.lt.s32.totalorder %v4008_v48, 34  ;;  %vm8455_vm10 = vcmp.lt.s32.totalorder %v4008_v48, 33  ;;  %v466_v17 = vsel %vm8569_vm3, %v3567_v7, %v3588_v16  ;;  %vm8460_vm11 = vcmp.lt.s32.totalorder %v4008_v48, 32 }
 0x2c5   :  { %v3993_v45 = vpop.permute.xlu1 %557  ;;  %v3995_v50 = vpop.permute.xlu0 %582  ;;  %v4140_v26 = vstv %s3987_s14  ;;  %vm8464_vm12 = vcmp.lt.s32.totalorder %v4008_v48, 31  ;;  %vm8471_vm13 = vcmp.lt.s32.totalorder %v4008_v48, 30  ;;  %vm8465_vm14 = vcmp.lt.s32.totalorder %v4008_v48, 29  ;;  %s4453_s14 = sld [smem:[#allocation7 + $0x7]] }
 0x2c6   :  { %8872 = vst [vmem:[#allocation79_spill] sm:$0xff] %v3993_v45  ;;  %8873 = vst [vmem:[#allocation80_spill] sm:$0xff] %v3995_v50  ;;  %vm8468_vm15 = vcmp.lt.s32.totalorder %v4008_v48, 19  ;;  %vm8472_vm0 = vcmp.lt.s32.totalorder %v4008_v48, 18 }
 0x2c7   :  { %1294 = vrot.lane.b32.xlu1 %v3665_v52, %s8871_s10  ;;  %1317 = vrot.lane.b32.xlu0 %v3655_v6, %s8874_s11  ;;  %s4021_s10 = sld [smem:[#allocation7 + $0x4c]]  ;;  %8909 = vst [vmem:[#allocation111_spill] sm:$0xff] %v4140_v26 }
 0x2c9   :  { %v4012_v45 = vpop.permute.xlu1 %584  ;;  %v4014_v50 = vpop.permute.xlu0 %605  ;;  %v4159_v22 = vstv %s4003_s23  ;;  %s4241_s23 = sld [smem:[#allocation7 + $0x59]] }
 0x2ca   :  { %8876 = vst [vmem:[#allocation82_spill] sm:$0xff] %v4012_v45  ;;  %8877 = vst [vmem:[#allocation83_spill] sm:$0xff] %v4014_v50  ;;  %v1006_v50 = vmul.f32 %v4017_v46, %v3655_v6  ;;  %v4038_v45 = vstv %s3911_s30  ;;  %v1010_v46 = vmul.f32 %v4026_v8, %v3445_v62  ;;  %s4064_s30 = sld [smem:[#allocation7 + $0x50]]  ;;  %v4070_v8 = vstv %s3927_s28 }
 0x2cb   :  { %1319 = vrot.lane.b32.xlu1 %v3665_v52, %s8874_s11  ;;  %1342 = vrot.lane.b32.xlu0 %v3655_v6, %s8880_s2  ;;  %8881 = vst [vmem:[#allocation86_spill] sm:$0xff] %v4038_v45  ;;  %8887 = vst [vmem:[#allocation92_spill] sm:$0xff] %v4070_v8  ;;  %s4092_s28 = sld [smem:[#allocation7 + $0x52]] }
 0x2cc   :  { %v4076_v35 = vadd.f32 %v1010_v46, %v1007_v47  ;;  %v4078_v5 = vadd.f32 %v1009_v51, %v1006_v50  ;;  %v4099_v47 = vstv %s3949_s19  ;;  %v4102_v50 = vstv %s3951_s20  ;;  %s4134_s19 = sld [smem:[#allocation7 + $0x54]]  ;;  %8915 = vst [vmem:[#allocation117_spill] sm:$0xff] %v4159_v22 }
 0x2cd   :  { %v4042_v43 = vpop.permute.xlu1 %607  ;;  %v4044_v49 = vpop.permute.xlu0 %630  ;;  %8897 = vst [vmem:[#allocation101_spill] sm:$0xff] %v4099_v47  ;;  %8898 = vst [vmem:[#allocation102_spill] sm:$0xff] %v4102_v50  ;;  %v4105_v51 = vstv %s3957_s24  ;;  %s8904_s24 = sld [smem:[#allocation81_spill]]  ;;  %v4168_v59 = vstv %s4021_s10  ;;  %v467_v22 = vsel %vm8569_vm3, %v3588_v16, %v3567_v7  ;;  %v492_v7 = vsel %vm8576_vm4, %v3600_v21, %v3575_v11 }
 0x2ce   :  { %8882 = vst [vmem:[#allocation87_spill] sm:$0xff] %v4042_v43  ;;  %8883 = vst [vmem:[#allocation88_spill] sm:$0xff] %v4044_v49  ;;  %v4058_v43 = vstv %s3919_s29  ;;  %v4062_v49 = vstv %s3925_s3  ;;  %s8888_s29 = smov 95   ;;  %s4151_s20 = sld [smem:[#allocation7 + $0x55]]  ;;  %v4239_v16 = vstv %s4110_s21 }
 0x2cf   :  { %8885 = vst [vmem:[#allocation90_spill] sm:$0xff] %v4058_v43  ;;  %8886 = vst [vmem:[#allocation91_spill] sm:$0xff] %v4062_v49  ;;  %1344 = vrot.lane.b32.xlu1 %v3665_v52, %s8880_s2  ;;  %1367 = vrot.lane.b32.xlu0 %v3655_v6, %s8888_s29  ;;  %s4294_s3 = sld [smem:[#allocation7 + $0x1]] }
 0x2d0   :  { %8889 = vst [vmem:[#allocation93_spill] sm:$0xff] %v4076_v35  ;;  %8890 = vst [vmem:[#allocation94_spill] sm:$0xff] %v4078_v5  ;;  %v4108_v35 = vstv %s3959_s17  ;;  %v4114_v5 = vstv %s3965_s16  ;;  %s4398_s10 = sld [smem:[#allocation7 + $0x5]] }
 0x2d1   :  { %v4094_v23 = vpop.permute.xlu1 %632  ;;  %v4096_v46 = vpop.permute.xlu0 %655  ;;  %8899 = vst [vmem:[#allocation103_spill] sm:$0xff] %v4105_v51  ;;  %8900 = vst [vmem:[#allocation104_spill] sm:$0xff] %v4108_v35  ;;  %s4471_s16 = sld [smem:[#allocation7 + $0x8]] }
 0x2d2   :  { %8895 = vst [vmem:[#allocation99_spill] sm:$0xff] %v4094_v23  ;;  %8896 = vst [vmem:[#allocation100_spill] sm:$0xff] %v4096_v46  ;;  %v4117_v23 = vstv %s3967_s5  ;;  %v4120_v46 = vstv %s3971_s0  ;;  %s8908_s5 = smov 94   ;;  %s4313_s0 = sld [smem:[#allocation7 + $0x2]] }
 0x2d3   :  { %8901 = vst [vmem:[#allocation105_spill] sm:$0xff] %v4114_v5  ;;  %8902 = vst [vmem:[#allocation106_spill] sm:$0xff] %v4117_v23  ;;  %1369 = vrot.lane.b32.xlu1 %v3665_v52, %s8888_s29  ;;  %1392 = vrot.lane.b32.xlu0 %v3655_v6, %s8908_s5  ;;  %v4162_v26 = vstv %s8904_s24  ;;  %s4490_s17 = sld [smem:[#allocation7 + $0x9]] }
 0x2d4   :  { %8903 = vst [vmem:[#allocation107_spill] sm:$0xff] %v4120_v46  ;;  %8916 = vst [vmem:[#allocation118_spill] sm:$0xff] %v4162_v26  ;;  %v4182_v26 = vstv %s4028_s4  ;;  %s8923_s4 = smov 93   ;;  %s4630_s21 = sld [smem:[#allocation7 + $0xf]] }
 0x2d5   :  { %v4153_v30 = vpop.permute.xlu1 %657  ;;  %v4155_v19 = vpop.permute.xlu0 %680  ;;  %8918 = vst [vmem:[#allocation120_spill] sm:$0xff] %v4168_v59  ;;  %8919 = vst [vmem:[#allocation121_spill] sm:$0xff] %v4182_v26  ;;  %v441_v59 = vsel %vm8550_vm2, %v3559_v63, %v3577_v12  ;;  %v4203_v26 = vstv %s4064_s30  ;;  %s3294_s30 = smov 81   ;;  %s4649_s24 = sld [smem:[#allocation7 + $0x10]] }
 0x2d6   :  { %8913 = vst [vmem:[#allocation115_spill] sm:$0xff] %v4153_v30  ;;  %8914 = vst [vmem:[#allocation116_spill] sm:$0xff] %v4155_v19  ;;  %v418_v30 = vsel %vm8570_vm1, %v3561_v3, %v3569_v10  ;;  %v419_v19 = vsel %vm8570_vm1, %v3569_v10, %v3561_v3  ;;  %v442_v3 = vsel %vm8550_vm2, %v3577_v12, %v3559_v63  ;;  %v4200_v10 = vstv %s4050_s7  ;;  %s4559_s7 = sld [smem:[#allocation7 + $0xc]] }
 0x2d7   :  { %1394 = vrot.lane.b32.xlu1 %v3665_v52, %s8908_s5  ;;  %8921 = vst [vmem:[#allocation123_spill] sm:$0xff] %v4200_v10  ;;  %8922 = vst [vmem:[#allocation124_spill] sm:$0xff] %v4203_v26  ;;  %1417 = vrot.lane.b32.xlu0 %v3655_v6, %s8923_s4  ;;  %v4217_v63 = vstv %s4072_s15  ;;  %v4220_v12 = vstv %s4092_s28  ;;  %v4229_v13 = vmul.f32 %v4038_v45, %v419_v19  ;;  %s4578_s15 = sld [smem:[#allocation7 + $0xd]] }
 0x2d8   :  { %8924 = vst [vmem:[#allocation125_spill] sm:$0xff] %v4217_v63  ;;  %8925 = vst [vmem:[#allocation126_spill] sm:$0xff] %v4220_v12  ;;  %v4232_v34 = vmul.f32 %v4038_v45, %v418_v30  ;;  %v491_v19 = vsel %vm8576_vm4, %v3575_v11, %v3600_v21  ;;  %v517_v30 = vsel %vm8574_vm5, %v3609_v25, %v3586_v15  ;;  %v4273_v21 = vstv %s4134_s19  ;;  %s4612_s28 = sld [smem:[#allocation7 + $0xe]] }
 0x2d9   :  { %v4224_v26 = vpop.permute.xlu1 %682  ;;  %v4226_v10 = vpop.permute.xlu0 %705  ;;  %8928 = vst [vmem:[#allocation129_spill] sm:$0xff] %v4239_v16  ;;  %v516_v11 = vsel %vm8574_vm5, %v3586_v15, %v3609_v25  ;;  %8929 = vst [vmem:[#allocation130_spill] sm:$0xff] %v4273_v21  ;;  %v541_v15 = vsel %vm8583_vm6, %v3598_v20, %v3617_v29  ;;  %v542_v25 = vsel %vm8583_vm6, %v3617_v29, %v3598_v20  ;;  %v4311_v29 = vstv %s4170_s25  ;;  %s4670_s19 = sld [smem:[#allocation7 + $0x11]] }
 0x2da   :  { %8926 = vst [vmem:[#allocation127_spill] sm:$0xff] %v4224_v26  ;;  %8927 = vst [vmem:[#allocation128_spill] sm:$0xff] %v4226_v10  ;;  %v4244_v26 = vmul.f32 %v4048_v39, %v442_v3  ;;  %v4247_v10 = vmul.f32 %v4048_v39, %v441_v59  ;;  %v4262_v59 = vmul.f32 %v4058_v43, %v467_v22  ;;  %s4704_s25 = sld [smem:[#allocation7 + $0x12]] }
 0x2db   :  { %1419 = vrot.lane.b32.xlu1 %v3665_v52, %s8923_s4  ;;  %v4265_v3 = vmul.f32 %v4058_v43, %v466_v17  ;;  %1444 = vrot.lane.b32.xlu0 %v3655_v6, %s3292_s27  ;;  %v4280_v22 = vmul.f32 %v4062_v49, %v492_v7  ;;  %v4292_v17 = vstv %s4151_s20  ;;  %v4301_v45 = vmul.f32 %v4062_v49, %v491_v19  ;;  %s3295_s20 = smov 80  }
 0x2dc   :  { %8931 = vst [vmem:[#allocation132_spill] sm:$0xff] %v4292_v17  ;;  %v4304_v39 = vmul.f32 %v4070_v8, %v517_v30  ;;  %v567_v20 = vsel %vm8451_vm7, %v3625_v33, %v3607_v24  ;;  %8934 = vst [vmem:[#allocation135_spill] sm:$0xff] %v4311_v29  ;;  %v566_v19 = vsel %vm8451_vm7, %v3607_v24, %v3625_v33  ;;  %v4324_v30 = vstv %s4187_s1  ;;  %s4724_s1 = sld [smem:[#allocation7 + $0x13]] }
 0x2dd   :  { %8930 = vst [vmem:[#allocation131_spill] sm:$0xff] %v4280_v22  ;;  %v4296_v43 = vpop.permute.xlu1 %707  ;;  %v4298_v7 = vpop.permute.xlu0 %730  ;;  %v4316_v22 = vmul.f32 %v4070_v8, %v516_v11  ;;  %8935 = vst [vmem:[#allocation136_spill] sm:$0xff] %v4324_v30  ;;  %v4327_v49 = vadd.s32 128, %v4008_v48  ;;  %v4335_v11 = vmul.f32 %v4081_v42, %v541_v15  ;;  %v593_v24 = vsel %vm8445_vm8, %v3615_v28, %v3633_v37 }
 0x2de   :  { %8932 = vst [vmem:[#allocation133_spill] sm:$0xff] %v4296_v43  ;;  %8933 = vst [vmem:[#allocation134_spill] sm:$0xff] %v4298_v7  ;;  %v4332_v7 = vmul.f32 %v4081_v42, %v542_v25  ;;  %v594_v33 = vsel %vm8445_vm8, %v3633_v37, %v3615_v28  ;;  %v4350_v25 = vmul.f32 %v4084_v31, %v567_v20  ;;  %vm8477_vm8 = vcmp.lt.s32.totalorder %v4008_v48, 17 }
 0x2df   :  { %1426 = vrot.lane.b32.xlu1 %v3445_v62, %s8923_s4  ;;  %1451 = vrot.lane.b32.xlu0 %v3439_v60, %s3292_s27  ;;  %v616_v15 = vsel %vm8449_vm9, %v3623_v32, %v3641_v41  ;;  %v617_v42 = vsel %vm8449_vm9, %v3641_v41, %v3623_v32  ;;  %v4362_v28 = vstv %s4222_s22  ;;  %v4371_v8 = vmul.f32 %v4084_v31, %v566_v19  ;;  %s4741_s22 = sld [smem:[#allocation7 + $0x14]] }
 0x2e0   :  { %8936 = vst [vmem:[#allocation137_spill] sm:$0xff] %v4362_v28  ;;  %v641_v43 = vsel %vm8455_vm10, %v3631_v36, %v3649_v9  ;;  %v642_v32 = vsel %vm8455_vm10, %v3649_v9, %v3631_v36  ;;  %vm8480_vm9 = vcmp.lt.s32.totalorder %v4008_v48, 16  ;;  %v4383_v41 = vstv %s4241_s23  ;;  %s4760_s23 = sld [smem:[#allocation7 + $0x15]] }
 0x2e1   :  { %v4366_v37 = vpop.permute.xlu1 %732  ;;  %v4368_v20 = vpop.permute.xlu0 %757  ;;  %8939 = vst [vmem:[#allocation140_spill] sm:$0xff] %v4383_v41  ;;  %v4389_v19 = vmul.f32 %v4087_v27, %v593_v24  ;;  %vm8484_vm7 = vcmp.lt.s32.totalorder %v4008_v48, 15  ;;  %v4393_v31 = vand.u32 15, %v4008_v48  ;;  %v4403_v36 = vmul.f32 %v4090_v38, %v617_v42 }
 0x2e2   :  { %8937 = vst [vmem:[#allocation138_spill] sm:$0xff] %v4366_v37  ;;  %8938 = vst [vmem:[#allocation139_spill] sm:$0xff] %v4368_v20  ;;  %v4386_v20 = vmul.f32 %v4087_v27, %v594_v33  ;;  %v4396_v37 = vand.u32 15, %v4327_v49  ;;  %v4406_v9 = vmul.f32 %v4090_v38, %v616_v15  ;;  %v667_v24 = vsel %vm8460_vm11, %v3659_v4, %v3639_v40 }
 0x2e3   :  { %8940 = vst [vmem:[#allocation141_spill] sm:$0xff] %v4389_v19  ;;  %1446 = vrot.lane.b32.xlu1 %v3665_v52, %s3292_s27  ;;  %vm8487_vm10 = vcmp.lt.s32.totalorder %v4008_v48, 14  ;;  %v4414_v33 = vstv %s4275_s26  ;;  %1467 = vrot.lane.b32.xlu0 %v3655_v6, %s3293_s13  ;;  %v4421_v42 = vmul.f32 %v4099_v47, %v642_v32  ;;  %v4424_v15 = vmul.f32 %v4099_v47, %v641_v43  ;;  %s4796_s26 = sld [smem:[#allocation7 + $0x16]] }
 0x2e4   :  { %8941 = vst [vmem:[#allocation142_spill] sm:$0xff] %v4406_v9  ;;  %8942 = vst [vmem:[#allocation143_spill] sm:$0xff] %v4414_v33  ;;  %v666_v38 = vsel %vm8460_vm11, %v3639_v40, %v3659_v4  ;;  %v4431_v27 = vstv %s4294_s3  ;;  %v691_v32 = vsel %vm8464_vm12, %v3647_v44, %v3669_v0  ;;  %v692_v43 = vsel %vm8464_vm12, %v3669_v0, %v3647_v44  ;;  %s4811_s3 = sld [smem:[#allocation7 + $0x17]] }
 0x2e5   :  { %8943 = vst [vmem:[#allocation144_spill] sm:$0xff] %v4431_v27  ;;  %v4433_v19 = vpop.permute.xlu1 %759  ;;  %v4435_v9 = vpop.permute.xlu0 %780  ;;  %v717_v40 = vsel %vm8471_vm13, %v3677_v55, %v3657_v2  ;;  %vm8489_vm11 = vcmp.lt.s32.totalorder %v4008_v48, 13  ;;  %v4451_v4 = vstv %s4313_s0  ;;  %v4456_v47 = vmul.f32 %v4102_v50, %v667_v24  ;;  %s4830_s0 = sld [smem:[#allocation7 + $0x19]] }
 0x2e6   :  { %8944 = vst [vmem:[#allocation145_spill] sm:$0xff] %v4433_v19  ;;  %8945 = vst [vmem:[#allocation146_spill] sm:$0xff] %v4435_v9  ;;  %v716_v44 = vsel %vm8471_vm13, %v3657_v2, %v3677_v55  ;;  %v741_v0 = vsel %vm8465_vm14, %v3667_v53, %v3685_v56  ;;  %v742_v19 = vsel %vm8465_vm14, %v3685_v56, %v3667_v53  ;;  %vm8492_vm12 = vcmp.lt.s32.totalorder %v4008_v48, 3 }
 0x2e7   :  { %8946 = vst [vmem:[#allocation147_spill] sm:$0xff] %v4451_v4  ;;  %8947 = vst [vmem:[#allocation148_spill] sm:$0xff] %v4456_v47  ;;  %1453 = vrot.lane.b32.xlu1 %v3445_v62, %s3292_s27  ;;  %v4476_v2 = vmul.f32 %v4102_v50, %v666_v38  ;;  %v768_v55 = vsel %vm8468_vm15, %v3675_v54, %v3693_v58  ;;  %v769_v53 = vsel %vm8468_vm15, %v3693_v58, %v3675_v54 }
 0x2e8   :  { %vm8498_vm14 = vcmp.lt.s32.totalorder %v4008_v48, 2  ;;  %v4488_v56 = vstv %s4345_s8  ;;  %1474 = vrot.lane.b32.xlu0 %v3439_v60, %s3293_s13  ;;  %v4495_v38 = vmul.f32 %v4105_v51, %v692_v43  ;;  %v4498_v24 = vmul.f32 %v4105_v51, %v691_v32  ;;  %s3296_s8 = smov 79  }
 0x2e9   :  { %8948 = vst [vmem:[#allocation149_spill] sm:$0xff] %v4476_v2  ;;  %8949 = vst [vmem:[#allocation150_spill] sm:$0xff] %v4488_v56  ;;  %v4501_v50 = vmul.f32 %v4108_v35, %v717_v40  ;;  %vm8501_vm15 = vcmp.lt.s32.totalorder %v4008_v48, 1  ;;  %v4505_v54 = vstv %s4364_s9  ;;  %v4507_v58 = vpop.permute.xlu1 %782  ;;  %v4509_v2 = vpop.permute.xlu0 %805  ;;  %v4512_v47 = vmul.f32 %v4108_v35, %v716_v44  ;;  %s4848_s9 = sld [smem:[#allocation7 + $0x1a]] }
 0x2ea   :  { %8950 = vst [vmem:[#allocation151_spill] sm:$0xff] %v4495_v38  ;;  %8951 = vst [vmem:[#allocation152_spill] sm:$0xff] %v4498_v24  ;;  %v4515_v43 = vmul.f32 %v4114_v5, %v742_v19  ;;  %v4518_v32 = vmul.f32 %v4114_v5, %v741_v0  ;;  %v792_v40 = vsel %vm8472_vm0, %v3701_v61, %v3683_v1  ;;  %vm8504_vm13 = vcmp.lt.s32.totalorder %v4008_v48, 127  ;;  %v8964_v5 = vld [vmem:[#allocation20_spill] sm:$0xff] }
 0x2eb   :  { %8952 = vst [vmem:[#allocation153_spill] sm:$0xff] %v4501_v50  ;;  %8953 = vst [vmem:[#allocation154_spill] sm:$0xff] %v4505_v54  ;;  %v4527_v51 = vmul.f32 %v4117_v23, %v769_v53  ;;  %v4530_v44 = vmul.f32 %v4117_v23, %v768_v55  ;;  %v791_v19 = vsel %vm8472_vm0, %v3683_v1, %v3701_v61  ;;  %v4538_v0 = vstv %s4398_s10  ;;  %s4869_s10 = sld [smem:[#allocation7 + $0x1b]] }
 0x2ec   :  { %8954 = vst [vmem:[#allocation155_spill] sm:$0xff] %v4507_v58  ;;  %8955 = vst [vmem:[#allocation156_spill] sm:$0xff] %v4509_v2  ;;  %1469 = vrot.lane.b32.xlu1 %v3665_v52, %s3293_s13  ;;  %v816_v55 = vsel %vm8477_vm8, %v3691_v57, %v3709_v14  ;;  %v817_v53 = vsel %vm8477_vm8, %v3709_v14, %v3691_v57  ;;  %vm8506_vm0 = vcmp.lt.s32.totalorder %v4008_v48, 126  ;;  %v4554_v1 = vshra.s32 %v4008_v48, 4  ;;  %v9000_v2 = vld [vmem:[#allocation29_spill] sm:$0xff] }
 0x2ed   :  { %8956 = vst [vmem:[#allocation157_spill] sm:$0xff] %v4512_v47  ;;  %8957 = vst [vmem:[#allocation158_spill] sm:$0xff] %v4515_v43  ;;  %v4557_v61 = vstv %s4416_s12  ;;  %1492 = vrot.lane.b32.xlu0 %v3655_v6, %s3294_s30  ;;  %v4564_v23 = vmul.f32 %v4120_v46, %v792_v40  ;;  %v841_v57 = vsel %vm8480_vm9, %v8964_v5, %v3717_v18  ;;  %vm8591_vm8 = vcmp.lt.s32.totalorder %v4008_v48, 125  ;;  %v4580_v40 = vpop.permute.xlu1 %807  ;;  %v8971_v43 = vld [vmem:[#allocation108_spill] sm:$0xff]  ;;  %s4900_s12 = sld [smem:[#allocation7 + $0x1c]] }
 0x2ee   :  { %8958 = vst [vmem:[#allocation159_spill] sm:$0xff] %v4518_v32  ;;  %8959 = vst [vmem:[#allocation160_spill] sm:$0xff] %v4527_v51  ;;  %v842_v14 = vsel %vm8480_vm9, %v3717_v18, %v8964_v5  ;;  %v4576_v35 = vshra.s32 %v4327_v49, 4  ;;  %v4585_v51 = vmul.f32 %v4120_v46, %v791_v19  ;;  %v8968_v32 = vld [vmem:[#allocation24_spill] sm:$0xff]  ;;  %vm8514_vm9 = vcmp.lt.s32.totalorder %v4008_v48, 115  ;;  %v8974_v46 = vld [vmem:[#allocation22_spill] sm:$0xff] }
 0x2ef   :  { %8960 = vst [vmem:[#allocation161_spill] sm:$0xff] %v4530_v44  ;;  %8961 = vst [vmem:[#allocation162_spill] sm:$0xff] %v4538_v0  ;;  %v4582_v44 = vpop.permute.xlu0 %830  ;;  %v4597_v5 = vstv %s4453_s14  ;;  %v4603_v19 = vmul.f32 %v8971_v43, %v816_v55  ;;  %v4610_v50 = vstv %s4471_s16  ;;  %v4700_v58 = vstv %s4559_s7  ;;  %s4967_s14 = sld [smem:[#allocation7 + $0x1d]]  ;;  %s3297_s16 = smov 78  }
 0x2f0   :  { %8962 = vst [vmem:[#allocation163_spill] sm:$0xff] %v4557_v61  ;;  %8963 = vst [vmem:[#allocation164_spill] sm:$0xff] %v4564_v23  ;;  %v8969_v23 = vld [vmem:[#allocation21_spill] sm:$0xff]  ;;  %1476 = vrot.lane.b32.xlu1 %v3445_v62, %s3293_s13  ;;  %v4790_v38 = vstv %s4649_s24  ;;  %s5058_s7 = sld [smem:[#allocation7 + $0x21]] }
 0x2f1   :  { %8965 = vst [vmem:[#allocation20_spill] sm:$0xff] %v4580_v40  ;;  %8966 = vst [vmem:[#allocation165_spill] sm:$0xff] %v4582_v44  ;;  %v866_v18 = vsel %vm8484_vm7, %v8969_v23, %v8968_v32  ;;  %v867_v49 = vsel %vm8484_vm7, %v8968_v32, %v8969_v23  ;;  %v4600_v44 = vmul.f32 %v8971_v43, %v817_v53  ;;  %v8977_v23 = vld [vmem:[#allocation109_spill] sm:$0xff]  ;;  %vm8590_vm7 = vcmp.lt.s32.totalorder %v4008_v48, 114  ;;  %v9001_v40 = vld [vmem:[#allocation34_spill] sm:$0xff]  ;;  %s5184_s24 = sld [smem:[#allocation7 + $0x24]] }
 0x2f2   :  { %8967 = vst [vmem:[#allocation166_spill] sm:$0xff] %v4585_v51  ;;  %8970 = vst [vmem:[#allocation24_spill] sm:$0xff] %v4597_v5  ;;  %v8975_v51 = vld [vmem:[#allocation26_spill] sm:$0xff]  ;;  %v4617_v32 = vmul.f32 %v8977_v23, %v842_v14  ;;  %v4620_v53 = vmul.f32 %v8977_v23, %v841_v57  ;;  %v4628_v43 = vstv %s4490_s17  ;;  %1499 = vrot.lane.b32.xlu0 %v3439_v60, %s3294_s30  ;;  %v8981_v14 = vld [vmem:[#allocation110_spill] sm:$0xff]  ;;  %s4983_s17 = sld [smem:[#allocation7 + $0x1e]] }
 0x2f3   :  { %8972 = vst [vmem:[#allocation21_spill] sm:$0xff] %v4600_v44  ;;  %8973 = vst [vmem:[#allocation167_spill] sm:$0xff] %v4603_v19  ;;  %v892_v47 = vsel %vm8487_vm10, %v8975_v51, %v8974_v46  ;;  %v891_v55 = vsel %vm8487_vm10, %v8974_v46, %v8975_v51  ;;  %v4638_v57 = vmul.f32 %v8981_v14, %v866_v18  ;;  %v8984_v23 = vld [vmem:[#allocation28_spill] sm:$0xff]  ;;  %vm8517_vm10 = vcmp.lt.s32.totalorder %v4008_v48, 113  ;;  %v8988_v18 = vld [vmem:[#allocation111_spill] sm:$0xff] }
 0x2f4   :  { %8976 = vst [vmem:[#allocation22_spill] sm:$0xff] %v4610_v50  ;;  %8978 = vst [vmem:[#allocation26_spill] sm:$0xff] %v4617_v32  ;;  %v4635_v32 = vmul.f32 %v8981_v14, %v867_v49  ;;  %v4651_v49 = vpop.permute.xlu1 %832  ;;  %v4656_v14 = vmul.f32 %v8988_v18, %v892_v47  ;;  %v8991_v19 = vld [vmem:[#allocation25_spill] sm:$0xff]  ;;  %v8994_v47 = vld [vmem:[#allocation32_spill] sm:$0xff]  ;;  %1494 = vrot.lane.b32.xlu1 %v3665_v52, %s3294_s30  ;;  %v992_v9 = vsel %vm8501_vm15, %v9001_v40, %v9000_v2 }
 0x2f5   :  { %8979 = vst [vmem:[#allocation168_spill] sm:$0xff] %v4620_v53  ;;  %8980 = vst [vmem:[#allocation169_spill] sm:$0xff] %v4628_v43  ;;  %v8985_v53 = vld [vmem:[#allocation23_spill] sm:$0xff] }
 0x2f6   :  { %8982 = vst [vmem:[#allocation170_spill] sm:$0xff] %v4635_v32  ;;  %8983 = vst [vmem:[#allocation171_spill] sm:$0xff] %v4638_v57  ;;  %v916_v46 = vsel %vm8489_vm11, %v8985_v53, %v8984_v23  ;;  %v917_v51 = vsel %vm8489_vm11, %v8984_v23, %v8985_v53  ;;  %v4653_v32 = vpop.permute.xlu0 %855  ;;  %v8990_v57 = vld [vmem:[#allocation30_spill] sm:$0xff]  ;;  %vm8522_vm11 = vcmp.lt.s32.totalorder %v4008_v48, 112  ;;  %v4668_v53 = vstv %s4524_s18  ;;  %1517 = vrot.lane.b32.xlu0 %v3655_v6, %s3295_s20  ;;  %s5003_s18 = sld [smem:[#allocation7 + $0x1f]] }
 0x2f7   :  { %8986 = vst [vmem:[#allocation28_spill] sm:$0xff] %v4651_v49  ;;  %8987 = vst [vmem:[#allocation23_spill] sm:$0xff] %v4653_v32  ;;  %v943_v44 = vsel %vm8492_vm12, %v8991_v19, %v8990_v57  ;;  %v944_v23 = vsel %vm8492_vm12, %v8990_v57, %v8991_v19  ;;  %v4673_v32 = vmul.f32 %v8988_v18, %v891_v55  ;;  %vm8529_vm12 = vcmp.lt.s32.totalorder %v4008_v48, 111  ;;  %v8997_v55 = vld [vmem:[#allocation112_spill] sm:$0xff] }
 0x2f8   :  { %8989 = vst [vmem:[#allocation172_spill] sm:$0xff] %v4656_v14  ;;  %8992 = vst [vmem:[#allocation30_spill] sm:$0xff] %v4668_v53  ;;  %v8995_v14 = vld [vmem:[#allocation27_spill] sm:$0xff]  ;;  %v4685_v57 = vstv %s4540_s6  ;;  %v4690_v18 = vmul.f32 %v8997_v55, %v917_v51  ;;  %1501 = vrot.lane.b32.xlu1 %v3445_v62, %s3294_s30  ;;  %s5039_s6 = sld [smem:[#allocation7 + $0x20]] }
 0x2f9   :  { %8993 = vst [vmem:[#allocation25_spill] sm:$0xff] %v4673_v32  ;;  %v966_v49 = vsel %vm8498_vm14, %v8995_v14, %v8994_v47  ;;  %v967_v19 = vsel %vm8498_vm14, %v8994_v47, %v8995_v14  ;;  %8996 = vst [vmem:[#allocation32_spill] sm:$0xff] %v4685_v57  ;;  %v4693_v32 = vmul.f32 %v8997_v55, %v916_v46  ;;  %v9003_v14 = vld [vmem:[#allocation113_spill] sm:$0xff]  ;;  %vm8542_vm14 = vcmp.lt.s32.totalorder %v4008_v48, 110 }
 0x2fa   :  { %8998 = vst [vmem:[#allocation27_spill] sm:$0xff] %v4690_v18  ;;  %9002 = vst [vmem:[#allocation29_spill] sm:$0xff] %v4700_v58  ;;  %v4707_v47 = vmul.f32 %v9003_v14, %v944_v23  ;;  %v4710_v51 = vmul.f32 %v9003_v14, %v943_v44  ;;  %v991_v46 = vsel %vm8501_vm15, %v9000_v2, %v9001_v40  ;;  %v4718_v55 = vstv %s4578_s15  ;;  %v4722_v18 = vpop.permute.xlu0 %880  ;;  %v9009_v23 = vld [vmem:[#allocation114_spill] sm:$0xff]  ;;  %v9012_v14 = vld [vmem:[#allocation36_spill] sm:$0xff]  ;;  %s3298_s15 = smov 77  }
 0x2fb   :  { %8999 = vst [vmem:[#allocation173_spill] sm:$0xff] %v4693_v32  ;;  %9006 = vst [vmem:[#allocation175_spill] sm:$0xff] %v4718_v55  ;;  %v4720_v32 = vpop.permute.xlu1 %857  ;;  %v4730_v44 = vmul.f32 %v9009_v23, %v966_v49  ;;  %vm8535_vm15 = vcmp.lt.s32.totalorder %v4008_v48, 109  ;;  %v9016_v49 = vld [vmem:[#allocation38_spill] sm:$0xff]  ;;  %1524 = vrot.lane.b32.xlu0 %v3439_v60, %s3295_s20  ;;  %v9027_v55 = vld [vmem:[#allocation37_spill] sm:$0xff] }
 0x2fc   :  { %9004 = vst [vmem:[#allocation34_spill] sm:$0xff] %v4707_v47  ;;  %9005 = vst [vmem:[#allocation174_spill] sm:$0xff] %v4710_v51  ;;  %v4727_v47 = vmul.f32 %v9009_v23, %v967_v19  ;;  %v9013_v51 = vld [vmem:[#allocation31_spill] sm:$0xff]  ;;  %v9014_v19 = vld [vmem:[#allocation117_spill] sm:$0xff]  ;;  %1519 = vrot.lane.b32.xlu1 %v3665_v52, %s3295_s20 }
 0x2fd   :  { %9007 = vst [vmem:[#allocation176_spill] sm:$0xff] %v4720_v32  ;;  %9008 = vst [vmem:[#allocation177_spill] sm:$0xff] %v4722_v18  ;;  %v1028_v2 = vsel %vm8504_vm13, %v9013_v51, %v9012_v14  ;;  %v1029_v40 = vsel %vm8504_vm13, %v9012_v14, %v9013_v51  ;;  %v9017_v23 = vld [vmem:[#allocation33_spill] sm:$0xff]  ;;  %vm8544_vm13 = vcmp.lt.s32.totalorder %v4008_v48, 99  ;;  %v4756_v14 = vstv %s4612_s28  ;;  %v9020_v51 = vld [vmem:[#allocation40_spill] sm:$0xff]  ;;  %s5132_s28 = sld [smem:[#allocation7 + $0x22]] }
 0x2fe   :  { %9010 = vst [vmem:[#allocation178_spill] sm:$0xff] %v4727_v47  ;;  %9011 = vst [vmem:[#allocation179_spill] sm:$0xff] %v4730_v44  ;;  %v4744_v47 = vmul.f32 %v9014_v19, %v992_v9  ;;  %v1053_v44 = vsel %vm8506_vm0, %v9017_v23, %v9016_v49  ;;  %v1054_v18 = vsel %vm8506_vm0, %v9016_v49, %v9017_v23  ;;  %vm8545_vm0 = vcmp.lt.s32.totalorder %v4008_v48, 98 }
 0x2ff   :  { %9018 = vst [vmem:[#allocation31_spill] sm:$0xff] %v4756_v14  ;;  %v4763_v9 = vmul.f32 %v9014_v19, %v991_v46  ;;  %v4775_v49 = vstv %s4630_s21  ;;  %v9023_v46 = vld [vmem:[#allocation118_spill] sm:$0xff]  ;;  %v9026_v14 = vld [vmem:[#allocation42_spill] sm:$0xff]  ;;  %1542 = vrot.lane.b32.xlu0 %v3655_v6, %s3296_s8  ;;  %s5146_s21 = sld [smem:[#allocation7 + $0x23]] }
 0x300   :  { %9015 = vst [vmem:[#allocation36_spill] sm:$0xff] %v4744_v47  ;;  %v9021_v47 = vld [vmem:[#allocation35_spill] sm:$0xff]  ;;  %9022 = vst [vmem:[#allocation33_spill] sm:$0xff] %v4775_v49  ;;  %v4780_v19 = vmul.f32 %v9023_v46, %v1028_v2  ;;  %v1105_v24 = vsel %vm8514_vm9, %v9027_v55, %v9026_v14  ;;  %v9031_v49 = vld [vmem:[#allocation119_spill] sm:$0xff]  ;;  %1526 = vrot.lane.b32.xlu1 %v3445_v62, %s3295_s20 }
 0x301   :  { %9019 = vst [vmem:[#allocation38_spill] sm:$0xff] %v4763_v9  ;;  %v1078_v32 = vsel %vm8591_vm8, %v9021_v47, %v9020_v51  ;;  %v1079_v23 = vsel %vm8591_vm8, %v9020_v51, %v9021_v47  ;;  %v4783_v9 = vmul.f32 %v9023_v46, %v1029_v40  ;;  %9028 = vst [vmem:[#allocation42_spill] sm:$0xff] %v4790_v38  ;;  %v4792_v47 = vpop.permute.xlu1 %882  ;;  %v4794_v51 = vpop.permute.xlu0 %905  ;;  %v9055_v38 = vld [vmem:[#allocation45_spill] sm:$0xff]  ;;  %vm9137_vm8 = vcmp.lt.s32.totalorder %v4008_v48, 34 }
 0x302   :  { %9024 = vst [vmem:[#allocation40_spill] sm:$0xff] %v4780_v19  ;;  %9029 = vst [vmem:[#allocation37_spill] sm:$0xff] %v4792_v47  ;;  %v4799_v2 = vmul.f32 %v9031_v49, %v1053_v44  ;;  %v4802_v40 = vmul.f32 %v9031_v49, %v1054_v18  ;;  %v1106_v46 = vsel %vm8514_vm9, %v9026_v14, %v9027_v55  ;;  %v9035_v19 = vld [vmem:[#allocation120_spill] sm:$0xff]  ;;  %v9038_v44 = vld [vmem:[#allocation44_spill] sm:$0xff]  ;;  %vm8551_vm9 = vcmp.lt.s32.totalorder %v4008_v48, 97 }
 0x303   :  { %9025 = vst [vmem:[#allocation35_spill] sm:$0xff] %v4783_v9  ;;  %9030 = vst [vmem:[#allocation180_spill] sm:$0xff] %v4794_v51  ;;  %v4809_v9 = vstv %s4670_s19  ;;  %v4814_v51 = vmul.f32 %v9035_v19, %v1078_v32  ;;  %v4817_v47 = vmul.f32 %v9035_v19, %v1079_v23  ;;  %v9040_v32 = vld [vmem:[#allocation121_spill] sm:$0xff]  ;;  %v9042_v23 = vld [vmem:[#allocation46_spill] sm:$0xff]  ;;  %1549 = vrot.lane.b32.xlu0 %v3439_v60, %s3296_s8  ;;  %s5256_s19 = sld [smem:[#allocation7 + $0x25]] }
 0x304   :  { %9032 = vst [vmem:[#allocation181_spill] sm:$0xff] %v4799_v2  ;;  %9033 = vst [vmem:[#allocation182_spill] sm:$0xff] %v4802_v40  ;;  %v9039_v2 = vld [vmem:[#allocation39_spill] sm:$0xff]  ;;  %v4833_v14 = vmul.f32 %v9040_v32, %v1105_v24  ;;  %v9043_v19 = vld [vmem:[#allocation41_spill] sm:$0xff]  ;;  %v4851_v24 = vmul.f32 %v9040_v32, %v1106_v46  ;;  %1544 = vrot.lane.b32.xlu1 %v3665_v52, %s3296_s8 }
 0x305   :  { %9034 = vst [vmem:[#allocation183_spill] sm:$0xff] %v4809_v9  ;;  %9036 = vst [vmem:[#allocation184_spill] sm:$0xff] %v4814_v51  ;;  %v1128_v18 = vsel %vm8590_vm7, %v9039_v2, %v9038_v44  ;;  %v1129_v55 = vsel %vm8590_vm7, %v9038_v44, %v9039_v2  ;;  %v1153_v49 = vsel %vm8517_vm10, %v9043_v19, %v9042_v23  ;;  %v4844_v44 = vstv %s4704_s25  ;;  %v4865_v40 = vpop.permute.xlu1 %907  ;;  %v9051_v46 = vld [vmem:[#allocation122_spill] sm:$0xff]  ;;  %v9054_v9 = vld [vmem:[#allocation50_spill] sm:$0xff]  ;;  %s5290_s25 = sld [smem:[#allocation7 + $0x26]] }
 0x306   :  { %9037 = vst [vmem:[#allocation185_spill] sm:$0xff] %v4817_v47  ;;  %9041 = vst [vmem:[#allocation44_spill] sm:$0xff] %v4833_v14  ;;  %v1154_v2 = vsel %vm8517_vm10, %v9042_v23, %v9043_v19  ;;  %v9046_v14 = vld [vmem:[#allocation48_spill] sm:$0xff]  ;;  %v9047_v47 = vld [vmem:[#allocation43_spill] sm:$0xff]  ;;  %vm8584_vm10 = vcmp.lt.s32.totalorder %v4008_v48, 96  ;;  %v4863_v23 = vstv %s4724_s1  ;;  %v4872_v32 = vmul.f32 %v9051_v46, %v1128_v18  ;;  %s5307_s1 = sld [smem:[#allocation7 + $0x27]] }
 0x307   :  { %9044 = vst [vmem:[#allocation39_spill] sm:$0xff] %v4844_v44  ;;  %9045 = vst [vmem:[#allocation46_spill] sm:$0xff] %v4851_v24  ;;  %v1178_v51 = vsel %vm8522_vm11, %v9047_v47, %v9046_v14  ;;  %v1179_v19 = vsel %vm8522_vm11, %v9046_v14, %v9047_v47  ;;  %v4867_v44 = vpop.permute.xlu0 %932  ;;  %v4875_v24 = vmul.f32 %v9051_v46, %v1129_v55  ;;  %vm8579_vm11 = vcmp.lt.s32.totalorder %v4008_v48, 95  ;;  %v9061_v46 = vld [vmem:[#allocation124_spill] sm:$0xff] }
 0x308   :  { %9048 = vst [vmem:[#allocation41_spill] sm:$0xff] %v4863_v23  ;;  %9049 = vst [vmem:[#allocation48_spill] sm:$0xff] %v4865_v40  ;;  %v1203_v47 = vsel %vm8529_vm12, %v9055_v38, %v9054_v9  ;;  %v4883_v14 = vstv %s4741_s22  ;;  %v9057_v40 = vld [vmem:[#allocation123_spill] sm:$0xff]  ;;  %v1204_v18 = vsel %vm8529_vm12, %v9054_v9, %v9055_v38  ;;  %v4898_v55 = vstv %s4760_s23  ;;  %1567 = vrot.lane.b32.xlu0 %v3655_v6, %s3297_s16  ;;  %s5314_s22 = sld [smem:[#allocation7 + $0x28]] }
 0x309   :  { %9050 = vst [vmem:[#allocation43_spill] sm:$0xff] %v4867_v44  ;;  %9052 = vst [vmem:[#allocation186_spill] sm:$0xff] %v4872_v32  ;;  %v4886_v23 = vmul.f32 %v9057_v40, %v1153_v49  ;;  %v4889_v44 = vmul.f32 %v9057_v40, %v1154_v2  ;;  %v4903_v49 = vmul.f32 %v9061_v46, %v1178_v51  ;;  %v9064_v40 = vld [vmem:[#allocation52_spill] sm:$0xff]  ;;  %v9067_v51 = vld [vmem:[#allocation54_spill] sm:$0xff]  ;;  %vm8571_vm12 = vcmp.lt.s32.totalorder %v4008_v48, 94  ;;  %s5349_s23 = sld [smem:[#allocation7 + $0x29]] }
 0x30a   :  { %9053 = vst [vmem:[#allocation187_spill] sm:$0xff] %v4875_v24  ;;  %9056 = vst [vmem:[#allocation50_spill] sm:$0xff] %v4883_v14  ;;  %v4906_v2 = vmul.f32 %v9061_v46, %v1179_v19  ;;  %v4919_v9 = vmul.f32 %v4217_v63, %v1203_v47  ;;  %v4938_v47 = vmul.f32 %v4217_v63, %v1204_v18  ;;  %v9073_v24 = vld [vmem:[#allocation51_spill] sm:$0xff]  ;;  %v9077_v18 = vld [vmem:[#allocation58_spill] sm:$0xff]  ;;  %1551 = vrot.lane.b32.xlu1 %v3445_v62, %s3296_s8 }
 0x30b   :  { %9058 = vst [vmem:[#allocation45_spill] sm:$0xff] %v4886_v23  ;;  %9059 = vst [vmem:[#allocation188_spill] sm:$0xff] %v4889_v44  ;;  %v9065_v44 = vld [vmem:[#allocation47_spill] sm:$0xff]  ;;  %v9078_v63 = vld [vmem:[#allocation53_spill] sm:$0xff]  ;;  %vm9134_vm7 = vcmp.lt.s32.totalorder %v4008_v48, 35 }
 0x30c   :  { %9060 = vst [vmem:[#allocation189_spill] sm:$0xff] %v4898_v55  ;;  %9062 = vst [vmem:[#allocation190_spill] sm:$0xff] %v4903_v49  ;;  %v1228_v23 = vsel %vm8542_vm14, %v9065_v44, %v9064_v40  ;;  %v1229_v38 = vsel %vm8542_vm14, %v9064_v40, %v9065_v44  ;;  %v9068_v49 = vld [vmem:[#allocation49_spill] sm:$0xff]  ;;  %v4932_v40 = vpop.permute.xlu0 %955  ;;  %v4935_v44 = vstv %s4796_s26  ;;  %vm8672_vm14 = vcmp.ge.s32.totalorder %v4393_v31, 3  ;;  %1574 = vrot.lane.b32.xlu0 %v3439_v60, %s3297_s16  ;;  %s5431_s26 = sld [smem:[#allocation7 + $0x5a]] }
 0x30d   :  { %9063 = vst [vmem:[#allocation191_spill] sm:$0xff] %v4906_v2  ;;  %9066 = vst [vmem:[#allocation52_spill] sm:$0xff] %v4919_v9  ;;  %v1253_v19 = vsel %vm8535_vm15, %v9068_v49, %v9067_v51  ;;  %v1254_v46 = vsel %vm8535_vm15, %v9067_v51, %v9068_v49  ;;  %v4930_v2 = vpop.permute.xlu1 %934  ;;  %v9072_v9 = vld [vmem:[#allocation56_spill] sm:$0xff]  ;;  %v4949_v51 = vstv %s4811_s3  ;;  %v4952_v14 = vmul.f32 %v4220_v12, %v1228_v23  ;;  %s5448_s3 = sld [smem:[#allocation7 + $0x2a]] }
 0x30e   :  { %9069 = vst [vmem:[#allocation47_spill] sm:$0xff] %v4930_v2  ;;  %9070 = vst [vmem:[#allocation54_spill] sm:$0xff] %v4935_v44  ;;  %v1280_v32 = vsel %vm8544_vm13, %v9073_v24, %v9072_v9  ;;  %v1281_v49 = vsel %vm8544_vm13, %v9072_v9, %v9073_v24  ;;  %v4955_v55 = vmul.f32 %v4220_v12, %v1229_v38  ;;  %v4978_v38 = vstv %s4830_s0  ;;  %s5491_s0 = sld [smem:[#allocation7 + $0x5b]] }
 0x30f   :  { %9071 = vst [vmem:[#allocation49_spill] sm:$0xff] %v4938_v47  ;;  %9074 = vst [vmem:[#allocation56_spill] sm:$0xff] %v4949_v51  ;;  %v1303_v47 = vsel %vm8545_vm0, %v9078_v63, %v9077_v18  ;;  %v1304_v44 = vsel %vm8545_vm0, %v9077_v18, %v9078_v63  ;;  %v4970_v24 = vmul.f32 %v4239_v16, %v1253_v19  ;;  %v4981_v9 = vstv %s4848_s9  ;;  %v9086_v19 = vld [vmem:[#allocation69_spill] sm:$0xff]  ;;  %s5518_s9 = sld [smem:[#allocation7 + $0x2b]] }
 0x310   :  { %9075 = vst [vmem:[#allocation51_spill] sm:$0xff] %v4952_v14  ;;  %9076 = vst [vmem:[#allocation192_spill] sm:$0xff] %v4955_v55  ;;  %v4973_v23 = vmul.f32 %v4239_v16, %v1254_v46  ;;  %v4986_v63 = vmul.f32 %v4273_v21, %v1280_v32  ;;  %v4989_v18 = vmul.f32 %v4273_v21, %v1281_v49  ;;  %vm8671_vm15 = vcmp.ge.s32.totalorder %v4393_v31, 2  ;;  %v9085_v46 = vld [vmem:[#allocation68_spill] sm:$0xff]  ;;  %v9092_v55 = vld [vmem:[#allocation55_spill] sm:$0xff] }
 0x311   :  { %9079 = vst [vmem:[#allocation58_spill] sm:$0xff] %v4970_v24  ;;  %9081 = vst [vmem:[#allocation193_spill] sm:$0xff] %v4978_v38  ;;  %v436_v16 = vsel %vm8550_vm2, %v9086_v19, %v9085_v46  ;;  %v4996_v12 = vpop.permute.xlu1 %957  ;;  %v5001_v24 = vstv %s4869_s10  ;;  %v5006_v32 = vmul.f32 %v4292_v17, %v1303_v47  ;;  %v5009_v49 = vmul.f32 %v4292_v17, %v1304_v44  ;;  %v9091_v21 = vld [vmem:[#allocation60_spill] sm:$0xff]  ;;  %v9095_v17 = vld [vmem:[#allocation70_spill] sm:$0xff]  ;;  %s5528_s10 = sld [smem:[#allocation7 + $0x5c]] }
 0x312   :  { %9080 = vst [vmem:[#allocation53_spill] sm:$0xff] %v4973_v23  ;;  %9082 = vst [vmem:[#allocation194_spill] sm:$0xff] %v4981_v9  ;;  %v4998_v23 = vpop.permute.xlu0 %980  ;;  %v1328_v14 = vsel %vm8551_vm9, %v9092_v55, %v9091_v21  ;;  %vm8670_vm13 = vcmp.ge.s32.totalorder %v4396_v37, 2  ;;  %v435_v44 = vsel %vm8550_vm2, %v9085_v46, %v9086_v19  ;;  %vm8594_vm0 = vcmp.ge.s32.totalorder %v4393_v31, 1  ;;  %v9099_v9 = vld [vmem:[#allocation57_spill] sm:$0xff]  ;;  %1569 = vrot.lane.b32.xlu1 %v3665_v52, %s3297_s16 }
 0x313   :  { %9083 = vst [vmem:[#allocation195_spill] sm:$0xff] %v4986_v63  ;;  %9084 = vst [vmem:[#allocation196_spill] sm:$0xff] %v4989_v18  ;;  %v1329_v18 = vsel %vm8551_vm9, %v9091_v21, %v9092_v55  ;;  %v9093_v63 = vld [vmem:[#allocation66_spill] sm:$0xff]  ;;  %v5037_v55 = vstv %s4900_s12  ;;  %vm8673_vm2 = vcmp.ge.s32.totalorder %v4396_v37, 3  ;;  %v444_v19 = vmul.f32 %v4431_v27, %v436_v16  ;;  %1592 = vrot.lane.b32.xlu0 %v3655_v6, %s3298_s15  ;;  %s5533_s12 = sld [smem:[#allocation7 + $0x2c]] }
 0x314   :  { %9087 = vst [vmem:[#allocation68_spill] sm:$0xff] %v4998_v23  ;;  %9088 = vst [vmem:[#allocation69_spill] sm:$0xff] %v5001_v24  ;;  %v9094_v24 = vld [vmem:[#allocation67_spill] sm:$0xff]  ;;  %vm8592_vm9 = vcmp.ge.s32.totalorder %v4396_v37, 1  ;;  %v5061_v51 = vmul.f32 %v4311_v29, %v1328_v14 }
 0x315   :  { %9089 = vst [vmem:[#allocation197_spill] sm:$0xff] %v5006_v32  ;;  %9090 = vst [vmem:[#allocation198_spill] sm:$0xff] %v5009_v49  ;;  %v413_v47 = vsel %vm8570_vm1, %v9094_v24, %v9093_v63  ;;  %v9096_v49 = vld [vmem:[#allocation71_spill] sm:$0xff]  ;;  %v9098_v32 = vld [vmem:[#allocation62_spill] sm:$0xff]  ;;  %v412_v46 = vsel %vm8570_vm1, %v9093_v63, %v9094_v24  ;;  %v5064_v24 = vmul.f32 %v4311_v29, %v1329_v18  ;;  %vm8682_vm1 = vcmp.lt.s32.totalorder %v4396_v37, 15 }
 0x316   :  { %v461_v21 = vsel %vm8569_vm3, %v9096_v49, %v9095_v17  ;;  %9097 = vst [vmem:[#allocation60_spill] sm:$0xff] %v5037_v55  ;;  %v1353_v38 = vsel %vm8584_vm10, %v9099_v9, %v9098_v32  ;;  %v460_v55 = vsel %vm8569_vm3, %v9095_v17, %v9096_v49  ;;  %9100 = vst [vmem:[#allocation55_spill] sm:$0xff] %v5061_v51  ;;  %v9102_v63 = vld [vmem:[#allocation64_spill] sm:$0xff]  ;;  %v9103_v23 = vld [vmem:[#allocation59_spill] sm:$0xff]  ;;  %v5074_v49 = vpop.permute.xlu1 %982  ;;  %v5076_v2 = vpop.permute.xlu0 %1017  ;;  %vm8593_vm3 = vcmp.lt.s32.totalorder %v4393_v31, 15 }
 0x317   :  { %9101 = vst [vmem:[#allocation66_spill] sm:$0xff] %v5064_v24  ;;  %v1354_v16 = vsel %vm8584_vm10, %v9098_v32, %v9099_v9  ;;  %v1378_v17 = vsel %vm8579_vm11, %v9103_v23, %v9102_v63  ;;  %9104 = vst [vmem:[#allocation67_spill] sm:$0xff] %v5076_v2  ;;  %v1379_v14 = vsel %vm8579_vm11, %v9102_v63, %v9103_v23  ;;  %v5093_v2 = vstv %s4967_s14  ;;  %s5574_s14 = sld [smem:[#allocation7 + $0x5d]] }
 0x318   :  { %v421_v18 = vmul.f32 %v4414_v33, %v413_v47  ;;  %v445_v29 = vmul.f32 %v4431_v27, %v435_v44  ;;  %v469_v9 = vmul.f32 %v4451_v4, %v461_v21  ;;  %v5086_v32 = vmul.f32 %v4324_v30, %v1353_v38  ;;  %9106 = vst [vmem:[#allocation71_spill] sm:$0xff] %v5093_v2  ;;  %v9108_v47 = vld [vmem:[#allocation65_spill] sm:$0xff] }
 0x319   :  { %v422_v24 = vmul.f32 %v4414_v33, %v412_v46  ;;  %v470_v51 = vmul.f32 %v4451_v4, %v460_v55  ;;  %v5096_v23 = vmul.f32 %v4324_v30, %v1354_v16  ;;  %v9109_v44 = vld [vmem:[#allocation61_spill] sm:$0xff]  ;;  %v449_v38 = vadd.f32 %v4244_v26, %v444_v19  ;;  %1576 = vrot.lane.b32.xlu1 %v3445_v62, %s3297_s16 }
 0x31a   :  { %9105 = vst [vmem:[#allocation70_spill] sm:$0xff] %v5086_v32  ;;  %v1403_v21 = vsel %vm8571_vm12, %v9109_v44, %v9108_v47  ;;  %v5106_v55 = vstv %s4983_s17  ;;  %v5109_v46 = vmul.f32 %v4362_v28, %v1378_v17  ;;  %v5112_v63 = vmul.f32 %v4362_v28, %v1379_v14  ;;  %v5118_v30 = vpop.permute.xlu1 %1019  ;;  %v5120_v26 = vpop.permute.xlu0 %1042  ;;  %v9114_v28 = vld [vmem:[#allocation72_spill] sm:$0xff]  ;;  %v9115_v4 = vld [vmem:[#allocation73_spill] sm:$0xff]  ;;  %1599 = vrot.lane.b32.xlu0 %v3439_v60, %s3298_s15  ;;  %s5591_s17 = sld [smem:[#allocation7 + $0x2d]] }
 0x31b   :  { %9107 = vst [vmem:[#allocation62_spill] sm:$0xff] %v5096_v23  ;;  %9110 = vst [vmem:[#allocation57_spill] sm:$0xff] %v5106_v55  ;;  %v1404_v16 = vsel %vm8571_vm12, %v9108_v47, %v9109_v44  ;;  %v5123_v19 = vstv %s5003_s18  ;;  %v426_v6 = vadd.f32 %v4229_v13, %v421_v18  ;;  %v450_v17 = vadd.f32 %v4247_v10, %v445_v29  ;;  %v9117_v13 = vld [vmem:[#allocation74_spill] sm:$0xff]  ;;  %v9118_v10 = vld [vmem:[#allocation75_spill] sm:$0xff]  ;;  %s5597_s18 = sld [smem:[#allocation7 + $0x5e]] }
 0x31c   :  { %9111 = vst [vmem:[#allocation64_spill] sm:$0xff] %v5109_v46  ;;  %9112 = vst [vmem:[#allocation59_spill] sm:$0xff] %v5112_v63  ;;  %v474_v14 = vadd.f32 %v4262_v59, %v469_v9  ;;  %v486_v33 = vsel %vm8576_vm4, %v9115_v4, %v9114_v28  ;;  %v5135_v47 = vmul.f32 %v4383_v41, %v1403_v21  ;;  %v5163_v18 = vld [vmem:[#allocation3 + $0x48] sm:$0xff]  ;;  %vm8660_vm12 = vcmp.lt.s32.totalorder %v4393_v31, 14 }
 0x31d   :  { %9113 = vst [vmem:[#allocation65_spill] sm:$0xff] %v5123_v19  ;;  %v427_v44 = vadd.f32 %v4232_v34, %v422_v24  ;;  %v475_v27 = vadd.f32 %v4265_v3, %v470_v51  ;;  %v511_v59 = vsel %vm8574_vm5, %v9118_v10, %v9117_v13  ;;  %v5149_v29 = vmul.f32 %v4383_v41, %v1404_v16  ;;  %v5161_v24 = vld [vmem:[#allocation3 + $0x40] sm:$0xff]  ;;  %v9123_v16 = vld [vmem:[#allocation77_spill] sm:$0xff] }
 0x31e   :  { %9116 = vst [vmem:[#allocation61_spill] sm:$0xff] %v5135_v47  ;;  %v451_v34 = vsel %vm8671_vm15, %v449_v38, 0.0  ;;  %v5156_v3 = vstv %s5039_s6  ;;  %v5159_v51 = vstv %s5058_s7  ;;  %v485_v9 = vsel %vm8576_vm4, %v9114_v28, %v9115_v4  ;;  %v9122_v38 = vld [vmem:[#allocation76_spill] sm:$0xff]  ;;  %v5182_v47 = vpop.permute.xlu0 %1067  ;;  %1594 = vrot.lane.b32.xlu1 %v3665_v52, %s3298_s15  ;;  %v5205_v23 = vld [vmem:[#allocation3 + $0x68] sm:$0xff]  ;;  %s5641_s6 = sld [smem:[#allocation7 + $0x2e]] }
 0x31f   :  { %9119 = vst [vmem:[#allocation72_spill] sm:$0xff] %v5149_v29  ;;  %9120 = vst [vmem:[#allocation73_spill] sm:$0xff] %v5156_v3  ;;  %v494_v21 = vmul.f32 %v4488_v56, %v486_v33  ;;  %v510_v60 = vsel %vm8574_vm5, %v9117_v13, %v9118_v10  ;;  %v536_v41 = vsel %vm8583_vm6, %v9123_v16, %v9122_v38  ;;  %v5180_v29 = vpop.permute.xlu1 %1044  ;;  %v428_v28 = vsel %vm8672_vm14, %v426_v6, 0.0  ;;  %s5670_s7 = sld [smem:[#allocation7 + $0x5f]] }
 0x320   :  { %9121 = vst [vmem:[#allocation74_spill] sm:$0xff] %v5159_v51  ;;  %v452_v33 = vsel %vm8670_vm13, %v450_v17, 0.0  ;;  %v476_v4 = vsel %vm8594_vm0, %v474_v14, 0.0  ;;  %v519_v13 = vmul.f32 %v4505_v54, %v511_v59  ;;  %v429_v10 = vsel %vm8673_vm2, %v427_v44, 0.0  ;;  %v5203_v17 = vld [vmem:[#allocation3 + $0x60] sm:$0xff]  ;;  %v5215_v44 = vld [vmem:[#allocation3 + $0x70] sm:$0xff] }
 0x321   :  { %v453_v63 = vadd.f32 %v451_v34, %v428_v28  ;;  %v477_v46 = vsel %vm8592_vm9, %v475_v27, 0.0  ;;  %v5201_v6 = vadd.f32 %v5163_v18, %v5161_v24  ;;  %v495_v14 = vmul.f32 %v4488_v56, %v485_v9  ;;  %v5217_v34 = vld [vmem:[#allocation3 + $0x78] sm:$0xff]  ;;  %v9124_v51 = vld [vmem:[#allocation131_spill] sm:$0xff]  ;;  %vm9138_vm9 = vmmov %vm9137_vm8 }
 0x322   :  { %v520_v59 = vmul.f32 %v4505_v54, %v510_v60  ;;  %vm8633_vm5 = vcmp.lt.s32.totalorder %v4396_v37, 14  ;;  %v535_v52 = vsel %vm8583_vm6, %v9122_v38, %v9123_v16  ;;  %v544_v27 = vmul.f32 %v4538_v0, %v536_v41  ;;  %v9125_v60 = vld [vmem:[#allocation78_spill] sm:$0xff]  ;;  %v9126_v54 = vld [vmem:[#allocation79_spill] sm:$0xff]  ;;  %v5227_v38 = vpop.permute.xlu0 %1094  ;;  %1601 = vrot.lane.b32.xlu1 %v3445_v62, %s3298_s15 }
 0x323   :  { %v454_v28 = vadd.f32 %v452_v33, %v429_v10  ;;  %v478_v32 = vadd.f32 %v476_v4, %v453_v63  ;;  %v499_v9 = vadd.f32 %v9124_v51, %v494_v21  ;;  %vm8632_vm4 = vcmp.lt.s32.totalorder %v4393_v31, 13  ;;  %v5225_v3 = vpop.permute.xlu1 %1069  ;;  %v5242_v16 = vld [vmem:[#allocation3 + $0x50] sm:$0xff]  ;;  %v5244_v33 = vld [vmem:[#allocation3 + $0x58] sm:$0xff] }
 0x324   :  { %vm9127_vm11 = vcmp.lt.s32.totalorder %v4008_v48, 45  ;;  %v524_v41 = vadd.f32 %v4304_v39, %v519_v13  ;;  %vm8659_vm6 = vcmp.lt.s32.totalorder %v4396_v37, 13  ;;  %v5236_v51 = vstv %s5132_s28  ;;  %s5740_s28 = sld [smem:[#allocation7 + $0x2f]] }
 0x325   :  { %v561_v56 = vsel %vm9127_vm11, %v9126_v54, %v9125_v60  ;;  %vm9128_vm10 = vmmov %vm9127_vm11  ;;  %9129 = vst [vmem:[#allocation75_spill] sm:$0xff] %v5236_v51  ;;  %v5240_v21 = vadd.f32 %v5205_v23, %v5203_v17  ;;  %v479_v4 = vadd.f32 %v477_v46, %v454_v28  ;;  %v545_v39 = vmul.f32 %v4538_v0, %v535_v52 }
 0x326   :  { %v560_v63 = vsel %vm9128_vm10, %v9125_v60, %v9126_v54  ;;  %v5250_v13 = vstv %s5146_s21  ;;  %v5254_v54 = vadd.f32 %v5217_v34, %v5215_v44  ;;  %v500_v10 = vadd.f32 %v4301_v45, %v495_v14  ;;  %v5265_v0 = vpop.permute.xlu0 %1117  ;;  %v9136_v14 = vld [vmem:[#allocation83_spill] sm:$0xff]  ;;  %s5800_s21 = sld [smem:[#allocation7 + $0x60]] }
 0x327   :  { %9130 = vst [vmem:[#allocation76_spill] sm:$0xff] %v5250_v13  ;;  %v525_v60 = vadd.f32 %v4316_v22, %v520_v59  ;;  %v549_v51 = vadd.f32 %v4332_v7, %v544_v27  ;;  %v569_v46 = vmul.f32 %v4557_v61, %v561_v56  ;;  %v503_v52 = vadd.f32 %v499_v9, %v478_v32  ;;  %v5263_v62 = vpop.permute.xlu1 %1096  ;;  %v9132_v22 = vld [vmem:[#allocation80_spill] sm:$0xff]  ;;  %v9133_v7 = vld [vmem:[#allocation82_spill] sm:$0xff]  ;;  %v9135_v32 = vld [vmem:[#allocation87_spill] sm:$0xff] }
 0x328   :  { %v570_v28 = vmul.f32 %v4557_v61, %v560_v63  ;;  %v5268_v13 = vstv %s5184_s24  ;;  %v5272_v19 = vadd.f32 %v5244_v33, %v5242_v16  ;;  %v526_v45 = vsel %vm8593_vm3, %v524_v41, 0.0  ;;  %v9139_v63 = vld [vmem:[#allocation99_spill] sm:$0xff]  ;;  %v9140_v61 = vld [vmem:[#allocation88_spill] sm:$0xff]  ;;  %s5810_s24 = sld [smem:[#allocation7 + $0x30]] }
 0x329   :  { %9131 = vst [vmem:[#allocation77_spill] sm:$0xff] %v5268_v13  ;;  %vm205_vm10 = vcmp.ge.s32.totalorder %v4554_v1, 3  ;;  %vm207_vm11 = vcmp.lt.s32.totalorder %v4554_v1, 19  ;;  %v588_v56 = vsel %vm9134_vm7, %v9133_v7, %v9132_v22  ;;  %v610_v59 = vsel %vm9137_vm8, %v9136_v14, %v9135_v32 }
 0x32a   :  { %v611_v27 = vsel %vm9138_vm9, %v9135_v32, %v9136_v14  ;;  %v550_v9 = vadd.f32 %v4335_v11, %v545_v39  ;;  %vm206_vm3 = vcmp.ge.s32.totalorder %v4576_v35, 3  ;;  %vm208_vm0 = vcmp.lt.s32.totalorder %v4576_v35, 19 }
 0x32b   :  { %v587_v41 = vsel %vm9134_vm7, %v9132_v22, %v9133_v7  ;;  %vm9141_vm8 = vcmp.lt.s32.totalorder %v4008_v48, 33  ;;  %v504_v11 = vadd.f32 %v500_v10, %v479_v4  ;;  %v527_v39 = vsel %vm8682_vm1, %v525_v60, 0.0  ;;  %v5320_v4 = vpop.permute.xlu1 %1119  ;;  %v5322_v10 = vpop.permute.xlu0 %1142 }
 0x32c   :  { %v635_v13 = vsel %vm9141_vm8, %v9140_v61, %v9139_v63  ;;  %vm9142_vm9 = vmmov %vm9141_vm8  ;;  %v551_v22 = vsel %vm8660_vm12, %v549_v51, 0.0  ;;  %v574_v7 = vadd.f32 %v4350_v25, %v569_v46  ;;  %v575_v14 = vadd.f32 %v4371_v8, %v570_v28 }
 0x32d   :  { %v636_v32 = vsel %vm9142_vm9, %v9139_v63, %v9140_v61  ;;  %v596_v55 = vmul.f32 %v4597_v5, %v588_v56  ;;  %v619_v61 = vmul.f32 %v4610_v50, %v611_v27  ;;  %v620_v63 = vmul.f32 %v4610_v50, %v610_v59  ;;  %vm5381_vm9 = vmand %vm205_vm10, %vm207_vm11  ;;  %v9167_v50 = vld [vmem:[#allocation133_spill] sm:$0xff] }
 0x32e   :  { %v528_v60 = vadd.f32 %v526_v45, %v503_v52  ;;  %v597_v2 = vmul.f32 %v4597_v5, %v587_v41  ;;  %v644_v51 = vmul.f32 %v4628_v43, %v636_v32  ;;  %v645_v25 = vmul.f32 %v4628_v43, %v635_v13  ;;  %v9144_v32 = vld [vmem:[#allocation142_spill] sm:$0xff]  ;;  %vm5403_vm10 = vmand %vm206_vm3, %vm208_vm0  ;;  %v9168_v5 = vld [vmem:[#allocation128_spill] sm:$0xff] }
 0x32f   :  { %v552_v8 = vsel %vm8633_vm5, %v550_v9, 0.0  ;;  %v5330_v46 = vstv %s5256_s19  ;;  %v529_v59 = vadd.f32 %v527_v39, %v504_v11  ;;  %v576_v45 = vsel %vm8632_vm4, %v574_v7, 0.0  ;;  %v5345_v11 = vpop.permute.xlu1 %1144  ;;  %v5347_v39 = vpop.permute.xlu0 %1167  ;;  %v9145_v7 = vld [vmem:[#allocation141_spill] sm:$0xff]  ;;  %s5822_s19 = sld [smem:[#allocation7 + $0x61]] }
 0x330   :  { %9143 = vst [vmem:[#allocation131_spill] sm:$0xff] %v5330_v46  ;;  %v553_v52 = vadd.f32 %v551_v22, %v528_v60  ;;  %v577_v27 = vsel %vm8659_vm6, %v575_v14, 0.0  ;;  %v601_v9 = vadd.f32 %v4386_v20, %v596_v55  ;;  %v624_v41 = vadd.f32 %v4403_v36, %v619_v61 }
 0x331   :  { %v625_v56 = vadd.f32 %v9144_v32, %v620_v63  ;;  %v554_v22 = vadd.f32 %v552_v8, %v529_v59  ;;  %v602_v60 = vadd.f32 %v9145_v7, %v597_v2  ;;  %v649_v13 = vadd.f32 %v4421_v42, %v644_v51  ;;  %v9150_v63 = vld [vmem:[#allocation127_spill] sm:$0xff]  ;;  %v9151_v32 = vld [vmem:[#allocation116_spill] sm:$0xff] }
 0x332   :  { %v650_v14 = vadd.f32 %v4424_v15, %v645_v25  ;;  %v5354_v28 = vadd.f32 %v576_v45, %v553_v52  ;;  %v5357_v20 = vstv %s5290_s25  ;;  %v5362_v55 = vstv %s5307_s1  ;;  %v9158_v52 = vld [vmem:[#allocation100_spill] sm:$0xff]  ;;  %v9159_v45 = vld [vmem:[#allocation115_spill] sm:$0xff]  ;;  %s9531_s25 = smov 16   ;;  %s9532_s1 = smov 15  }
 0x333   :  { %9147 = vst [vmem:[#allocation79_spill] sm:$0xff] %v5357_v20  ;;  %9148 = vst [vmem:[#allocation80_spill] sm:$0xff] %v5362_v55  ;;  %v5364_v61 = vadd.f32 %v577_v27, %v554_v22  ;;  %vm9152_vm7 = vcmp.lt.s32.totalorder %v4008_v48, 31  ;;  %v5375_v15 = vstv %s5314_s22  ;;  %v9155_v51 = vmov 0  ;;  %v5395_v22 = vpop.permute.xlu1 %1169  ;;  %v5397_v7 = vpop.permute.xlu0 %1192  ;;  %v9172_v55 = vld [vmem:[#allocation138_spill] sm:$0xff]  ;;  %s9481_s22 = sld [smem:[#allocation201_spill]] }
 0x334   :  { %9146 = vst [vmem:[#allocation78_spill] sm:$0xff] %v5354_v28  ;;  %v685_v2 = vsel %vm9152_vm7, %v9151_v32, %v9150_v63  ;;  %vm9153_vm8 = vmmov %vm9152_vm7  ;;  %v9156_v51 = vsel %vm5381_vm9, 4294967295, %v9155_v51  ;;  %v603_v25 = vsel %vm8672_vm14, %v601_v9, 0.0  ;;  %v626_v8 = vsel %vm8671_vm15, %v624_v41, 0.0  ;;  %v9179_v28 = vld [vmem:[#allocation146_spill] sm:$0xff] }
 0x335   :  { %9149 = vst [vmem:[#allocation82_spill] sm:$0xff] %v5364_v61  ;;  %v686_v42 = vsel %vm9153_vm8, %v9150_v63, %v9151_v32  ;;  %9154 = vst [vmem:[#allocation87_spill] sm:$0xff] %v5375_v15  ;;  %v627_v59 = vsel %vm8670_vm13, %v625_v56, 0.0  ;;  %vm9160_vm7 = vcmp.lt.s32.totalorder %v4008_v48, 32  ;;  %v9162_v9 = vmov 0 }
 0x336   :  { %9157 = vst [vmem:[#allocation83_spill] sm:$0xff] %v9156_v51  ;;  %v661_v27 = vsel %vm9160_vm7, %v9159_v45, %v9158_v52  ;;  %9161 = vst [vmem:[#allocation99_spill] sm:$0xff] %v5397_v7  ;;  %v9163_v9 = vsel %vm5403_vm10, 4294967295, %v9162_v9  ;;  %v604_v56 = vsel %vm8673_vm2, %v602_v60, 0.0  ;;  %vm9165_vm11 = vcmp.ge.s32.totalorder %v4393_v31, 1 }
 0x337   :  { %9164 = vst [vmem:[#allocation88_spill] sm:$0xff] %v9163_v9  ;;  %v651_v41 = vsel %vm9165_vm11, %v649_v13, 0.0  ;;  %vm9166_vm8 = vcmp.ge.s32.totalorder %v4396_v37, 1  ;;  %v660_v32 = vsel %vm9160_vm7, %v9158_v52, %v9159_v45  ;;  %v694_v36 = vmul.f32 %v4685_v57, %v686_v42  ;;  %v9178_v9 = vld [vmem:[#allocation155_spill] sm:$0xff] }
 0x338   :  { %v652_v63 = vsel %vm9166_vm8, %v650_v14, 0.0  ;;  %v695_v43 = vmul.f32 %v4685_v57, %v685_v2  ;;  %vm9169_vm0 = vcmp.lt.s32.totalorder %v4008_v48, 30  ;;  %v628_v15 = vadd.f32 %v626_v8, %v603_v25  ;;  %v9171_v57 = vld [vmem:[#allocation134_spill] sm:$0xff]  ;;  %v5443_v14 = vpop.permute.xlu0 %1217 }
 0x339   :  { %v710_v60 = vsel %vm9169_vm0, %v9168_v5, %v9167_v50  ;;  %vm9170_vm3 = vmmov %vm9169_vm0  ;;  %v629_v52 = vadd.f32 %v627_v59, %v604_v56  ;;  %v669_v42 = vmul.f32 %v4668_v53, %v661_v27  ;;  %v670_v45 = vmul.f32 %v4668_v53, %v660_v32  ;;  %9174 = vst [vmem:[#allocation142_spill] sm:$0xff] %v5443_v14  ;;  %v9176_v32 = vld [vmem:[#allocation151_spill] sm:$0xff]  ;;  %v9177_v53 = vld [vmem:[#allocation152_spill] sm:$0xff] }
 0x33a   :  { %v711_v13 = vsel %vm9170_vm3, %v9167_v50, %v9168_v5  ;;  %vm9173_vm11 = vcmp.lt.s32.totalorder %v4008_v48, 29  ;;  %v5441_v5 = vpop.permute.xlu1 %1194  ;;  %v5446_v25 = vstv %s5349_s23  ;;  %v653_v8 = vadd.f32 %v651_v41, %v628_v15  ;;  %v9182_v15 = vld [vmem:[#allocation148_spill] sm:$0xff]  ;;  %1680 = vadd.xlane.f32.xlu0 %v5201_v6  ;;  %s9515_s23 = smov 50  }
 0x33b   :  { %v736_v50 = vsel %vm9173_vm11, %v9172_v55, %v9171_v57  ;;  %9175 = vst [vmem:[#allocation141_spill] sm:$0xff] %v5446_v25  ;;  %v654_v59 = vadd.f32 %v652_v63, %v629_v52  ;;  %v719_v27 = vmul.f32 %v4700_v58, %v711_v13  ;;  %v720_v56 = vmul.f32 %v4700_v58, %v710_v60  ;;  %vm9183_vm0 = vmmov %vm9173_vm11  ;;  %v9188_v52 = vld [vmem:[#allocation149_spill] sm:$0xff] }
 0x33c   :  { %v699_v2 = vadd.f32 %v9176_v32, %v694_v36  ;;  %v700_v61 = vadd.f32 %v9177_v53, %v695_v43  ;;  %vm9180_vm8 = vcmp.lt.s32.totalorder %v4008_v48, 18  ;;  %v674_v41 = vadd.f32 %v9182_v15, %v669_v42  ;;  %v9184_v36 = vld [vmem:[#allocation175_spill] sm:$0xff]  ;;  %v9186_v53 = vld [vmem:[#allocation145_spill] sm:$0xff] }
 0x33d   :  { %v785_v51 = vsel %vm9180_vm8, %v9179_v28, %v9178_v9  ;;  %vm9181_vm7 = vmmov %vm9180_vm8  ;;  %v735_v63 = vsel %vm9183_vm0, %v9171_v57, %v9172_v55  ;;  %v744_v60 = vmul.f32 %v9184_v36, %v736_v50  ;;  %v9185_v43 = vld [vmem:[#allocation139_spill] sm:$0xff]  ;;  %vm9187_vm3 = vcmp.lt.s32.totalorder %v4008_v48, 19  ;;  %v9191_v57 = vld [vmem:[#allocation156_spill] sm:$0xff]  ;;  %v5489_v50 = vpop.permute.xlu0 %1242 }
 0x33e   :  { %v786_v25 = vsel %vm9181_vm7, %v9178_v9, %v9179_v28  ;;  %v763_v13 = vsel %vm9187_vm3, %v9186_v53, %v9185_v43  ;;  %v675_v32 = vadd.f32 %v9188_v52, %v670_v45  ;;  %vm211_vm11 = vcmp.ge.s32.totalorder %v4554_v1, 2  ;;  %vm9189_vm7 = vmmov %vm9187_vm3  ;;  %v9190_v9 = vld [vmem:[#allocation20_spill] sm:$0xff]  ;;  %v5487_v45 = vpop.permute.xlu1 %1219  ;;  %9195 = vst [vmem:[#allocation116_spill] sm:$0xff] %v5489_v50  ;;  %v9200_v50 = vld [vmem:[#allocation31_spill] sm:$0xff]  ;;  %1686 = vadd.xlane.f32.xlu0 %v5240_v21 }
 0x33f   :  { %vm213_vm8 = vcmp.lt.s32.totalorder %v4554_v1, 18  ;;  %v762_v28 = vsel %vm9189_vm7, %v9185_v43, %v9186_v53  ;;  %vm9192_vm0 = vcmp.lt.s32.totalorder %v4008_v48, 17  ;;  %9194 = vst [vmem:[#allocation127_spill] sm:$0xff] %v5487_v45  ;;  %v9196_v15 = vld [vmem:[#allocation153_spill] sm:$0xff]  ;;  %v9198_v53 = vld [vmem:[#allocation33_spill] sm:$0xff]  ;;  %vm9199_vm7 = vcmp.lt.s32.totalorder %v4393_v31, 15 }
 0x340   :  { %v810_v55 = vsel %vm9192_vm0, %v9191_v57, %v9190_v9  ;;  %vm9193_vm3 = vmmov %vm9192_vm0  ;;  %v724_v52 = vadd.f32 %v9196_v15, %v719_v27  ;;  %v9197_v58 = vld [vmem:[#allocation157_spill] sm:$0xff]  ;;  %v794_v20 = vmul.f32 %v9198_v53, %v786_v25  ;;  %v795_v46 = vmul.f32 %v9198_v53, %v785_v51  ;;  %v9201_v27 = vld [vmem:[#allocation158_spill] sm:$0xff] }
 0x341   :  { %v811_v42 = vsel %vm9193_vm3, %v9190_v9, %v9191_v57  ;;  %v725_v43 = vadd.f32 %v9197_v58, %v720_v56  ;;  %v701_v14 = vsel %vm9199_vm7, %v699_v2, 0.0  ;;  %v702_v9 = vsel %vm8682_vm1, %v700_v61, 0.0  ;;  %v9202_v56 = vld [vmem:[#allocation42_spill] sm:$0xff] }
 0x342   :  { %v745_v57 = vmul.f32 %v9184_v36, %v735_v63  ;;  %v771_v45 = vmul.f32 %v9200_v50, %v763_v13  ;;  %v749_v58 = vadd.f32 %v9201_v27, %v744_v60  ;;  %v772_v25 = vmul.f32 %v9200_v50, %v762_v28  ;;  %v5510_v61 = vpop.permute.xlu1 %1244  ;;  %1689 = vadd.xlane.f32.xlu0 %v5254_v54 }
 0x343   :  { %v819_v15 = vmul.f32 %v9202_v56, %v811_v42  ;;  %v820_v51 = vmul.f32 %v9202_v56, %v810_v55  ;;  %v678_v53 = vadd.f32 %v674_v41, %v653_v8  ;;  %v679_v7 = vadd.f32 %v675_v32, %v654_v59  ;;  %v9205_v8 = vld [vmem:[#allocation164_spill] sm:$0xff]  ;;  %v9206_v41 = vld [vmem:[#allocation166_spill] sm:$0xff]  ;;  %v5526_v32 = vpop.permute.xlu0 %1269  ;;  %v9207_v42 = vld [vmem:[#allocation159_spill] sm:$0xff] }
 0x344   :  { %vm212_vm0 = vcmp.ge.s32.totalorder %v4576_v35, 2  ;;  %vm214_vm3 = vcmp.lt.s32.totalorder %v4576_v35, 18  ;;  %v5513_v2 = vstv %s5431_s26  ;;  %v5516_v63 = vstv %s5448_s3  ;;  %v9208_v56 = vld [vmem:[#allocation160_spill] sm:$0xff]  ;;  %s9493_s3 = sld [smem:[#allocation199_spill]]  ;;  %s9516_s26 = smov 49  }
 0x345   :  { %9203 = vst [vmem:[#allocation100_spill] sm:$0xff] %v5513_v2  ;;  %9204 = vst [vmem:[#allocation115_spill] sm:$0xff] %v5516_v63  ;;  %v726_v6 = vsel %vm8660_vm12, %v724_v52, 0.0  ;;  %v727_v60 = vsel %vm8633_vm5, %v725_v43, 0.0  ;;  %v799_v59 = vadd.f32 %v9205_v8, %v794_v20  ;;  %v800_v13 = vadd.f32 %v9206_v41, %v795_v46  ;;  %v9209_v52 = vld [vmem:[#allocation161_spill] sm:$0xff]  ;;  %v9210_v43 = vld [vmem:[#allocation21_spill] sm:$0xff] }
 0x346   :  { %v703_v28 = vadd.f32 %v701_v14, %v678_v53  ;;  %v704_v55 = vadd.f32 %v702_v9, %v679_v7  ;;  %v750_v27 = vadd.f32 %v9207_v42, %v745_v57  ;;  %v776_v50 = vadd.f32 %v9208_v56, %v771_v45  ;;  %v9211_v41 = vld [vmem:[#allocation167_spill] sm:$0xff]  ;;  %v9212_v7 = vld [vmem:[#allocation165_spill] sm:$0xff]  ;;  %v5544_v9 = vpop.permute.xlu1 %1271  ;;  %v9216_v56 = vld [vmem:[#allocation23_spill] sm:$0xff]  ;;  %1683 = vadd.xlane.f32.xlu1 %v5272_v19 }
 0x347   :  { %v751_v20 = vsel %vm8632_vm4, %v749_v58, 0.0  ;;  %v777_v46 = vadd.f32 %v9209_v52, %v772_v25  ;;  %v824_v8 = vadd.f32 %v9210_v43, %v819_v15  ;;  %v825_v36 = vadd.f32 %v9211_v41, %v820_v51  ;;  %v9213_v53 = vld [vmem:[#allocation28_spill] sm:$0xff]  ;;  %v9217_v15 = vld [vmem:[#allocation176_spill] sm:$0xff]  ;;  %v9226_v42 = vld [vmem:[#allocation183_spill] sm:$0xff] }
 0x348   :  { %v728_v63 = vadd.f32 %v726_v6, %v703_v28  ;;  %v729_v14 = vadd.f32 %v727_v60, %v704_v55  ;;  %vm9214_vm7 = vcmp.lt.s32.totalorder %v4008_v48, 16  ;;  %v5547_v21 = vstv %s5491_s0  ;;  %v5561_v6 = vpop.permute.xlu0 %1292  ;;  %v9227_v41 = vld [vmem:[#allocation39_spill] sm:$0xff]  ;;  %s9518_s0 = smov 47  }
 0x349   :  { %v836_v45 = vsel %vm9214_vm7, %v9213_v53, %v9212_v7  ;;  %v801_v57 = vsel %vm8671_vm15, %v799_v59, 0.0  ;;  %v802_v58 = vsel %vm8670_vm13, %v800_v13, 0.0  ;;  %vm9215_vm4 = vmmov %vm9214_vm7  ;;  %vm9218_vm5 = vcmp.lt.s32.totalorder %v4008_v48, 15 }
 0x34a   :  { %v835_v25 = vsel %vm9215_vm4, %v9212_v7, %v9213_v53  ;;  %v861_v51 = vsel %vm9218_vm5, %v9217_v15, %v9216_v56  ;;  %v752_v60 = vsel %vm8659_vm6, %v750_v27, 0.0  ;;  %v5565_v28 = vadd.f32 %v751_v20, %v728_v63  ;;  %vm9220_vm7 = vmmov %vm9218_vm5  ;;  %v5595_v53 = vpop.permute.xlu1 %1294 }
 0x34b   :  { %v778_v59 = vsel %vm8672_vm14, %v776_v50, 0.0  ;;  %v860_v13 = vsel %vm9220_vm7, %v9216_v56, %v9217_v15  ;;  %vm5580_vm4 = vmand %vm211_vm11, %vm213_vm8  ;;  %v9221_v63 = vmov 0  ;;  %v779_v50 = vsel %vm8673_vm2, %v777_v46, 0.0 }
 0x34c   :  { %9219 = vst [vmem:[#allocation133_spill] sm:$0xff] %v5565_v28  ;;  %v9222_v63 = vsel %vm5580_vm4, 4294967295, %v9221_v63  ;;  %vm9224_vm5 = vcmp.ge.s32.totalorder %v4393_v31, 1  ;;  %vm9225_vm7 = vcmp.ge.s32.totalorder %v4396_v37, 1  ;;  %v844_v27 = vmul.f32 %v9226_v42, %v836_v45  ;;  %vm5624_vm11 = vmand %vm212_vm0, %vm214_vm3 }
 0x34d   :  { %9223 = vst [vmem:[#allocation128_spill] sm:$0xff] %v9222_v63  ;;  %v826_v55 = vsel %vm9224_vm5, %v824_v8, 0.0  ;;  %v827_v54 = vsel %vm9225_vm7, %v825_v36, 0.0  ;;  %v803_v20 = vadd.f32 %v801_v57, %v778_v59  ;;  %v804_v52 = vadd.f32 %v802_v58, %v779_v50  ;;  %v5602_v36 = vpop.permute.xlu0 %1317  ;;  %v9238_v50 = vld [vmem:[#allocation37_spill] sm:$0xff] }
 0x34e   :  { %v845_v43 = vmul.f32 %v9226_v42, %v835_v25  ;;  %v869_v7 = vmul.f32 %v9227_v41, %v861_v51  ;;  %v5599_v46 = vadd.f32 %v752_v60, %v729_v14  ;;  %v870_v8 = vmul.f32 %v9227_v41, %v860_v13  ;;  %v9236_v60 = vld [vmem:[#allocation26_spill] sm:$0xff]  ;;  %v9237_v13 = vld [vmem:[#allocation177_spill] sm:$0xff]  ;;  %v5653_v41 = vpop.permute.xlu1 %1319 }
 0x34f   :  { %v5605_v45 = vstv %s5518_s9  ;;  %v5608_v56 = vstv %s5528_s10  ;;  %v828_v58 = vadd.f32 %v826_v55, %v803_v20  ;;  %v829_v25 = vadd.f32 %v827_v54, %v804_v52  ;;  %v9242_v55 = vld [vmem:[#allocation168_spill] sm:$0xff]  ;;  %s9519_s9 = smov 46   ;;  %s9520_s10 = smov 45  }
 0x350   :  { %9228 = vst [vmem:[#allocation134_spill] sm:$0xff] %v5599_v46  ;;  %9229 = vst [vmem:[#allocation138_spill] sm:$0xff] %v5605_v45  ;;  %v9231_v14 = vmax.f32 %v5161_v24, %v5163_v18  ;;  %v5618_v15 = vstv %s5533_s12  ;;  %v9233_v51 = vmov 0  ;;  %v849_v59 = vadd.f32 %v9236_v60, %v844_v27  ;;  %v9243_v27 = vld [vmem:[#allocation170_spill] sm:$0xff]  ;;  %v9244_v52 = vld [vmem:[#allocation47_spill] sm:$0xff]  ;;  %s9521_s12 = smov 35  }
 0x351   :  { %9230 = vst [vmem:[#allocation151_spill] sm:$0xff] %v5608_v56  ;;  %9232 = vst [vmem:[#allocation152_spill] sm:$0xff] %v5618_v15  ;;  %v9234_v51 = vsel %vm5624_vm11, 4294967295, %v9233_v51  ;;  %vm9239_vm8 = vcmp.lt.s32.totalorder %v4008_v48, 14  ;;  %vm9240_vm5 = vcmp.lt.s32.totalorder %v4008_v48, 2  ;;  %v850_v54 = vadd.f32 %v9242_v55, %v845_v43 }
 0x352   :  { %1696 = vmax.xlane.f32.xlu0 %v9231_v14  ;;  %9235 = vst [vmem:[#allocation155_spill] sm:$0xff] %v9234_v51  ;;  %v886_v19 = vsel %vm9239_vm8, %v9238_v50, %v9237_v13  ;;  %v960_v24 = vsel %vm9240_vm5, %v4932_v40, %v4996_v12  ;;  %vm9241_vm7 = vmmov %vm9240_vm5  ;;  %v874_v20 = vadd.f32 %v9243_v27, %v869_v7  ;;  %v9245_v14 = vld [vmem:[#allocation43_spill] sm:$0xff]  ;;  %vm9246_vm0 = vcmp.lt.s32.totalorder %v4008_v48, 3  ;;  %v9249_v7 = vld [vmem:[#allocation68_spill] sm:$0xff] }
 0x353   :  { %v961_v18 = vsel %vm9241_vm7, %v4996_v12, %v4932_v40  ;;  %v937_v60 = vsel %vm9246_vm0, %v9245_v14, %v9244_v52  ;;  %vm9247_vm3 = vmmov %vm9246_vm0  ;;  %v9248_v12 = vld [vmem:[#allocation171_spill] sm:$0xff]  ;;  %v885_v43 = vsel %vm9239_vm8, %v9237_v13, %v9238_v50  ;;  %vm9250_vm5 = vcmp.lt.s32.totalorder %v4008_v48, 1  ;;  %v9252_v13 = vld [vmem:[#allocation41_spill] sm:$0xff] }
 0x354   :  { %v938_v57 = vsel %vm9247_vm3, %v9244_v52, %v9245_v14  ;;  %v875_v40 = vadd.f32 %v9248_v12, %v870_v8  ;;  %v985_v55 = vsel %vm9250_vm5, %v9249_v7, %v5074_v49  ;;  %vm9251_vm7 = vmmov %vm9250_vm5  ;;  %v5668_v52 = vpop.permute.xlu0 %1342  ;;  %v894_v50 = vmul.f32 %v9252_v13, %v886_v19  ;;  %v9253_v14 = vld [vmem:[#allocation54_spill] sm:$0xff] }
 0x355   :  { %v986_v27 = vsel %vm9251_vm7, %v5074_v49, %v9249_v7  ;;  %v969_v12 = vmul.f32 %v9253_v14, %v961_v18  ;;  %v970_v42 = vmul.f32 %v9253_v14, %v960_v24  ;;  %v9254_v28 = vmax.f32 %v5242_v16, %v5244_v33  ;;  %v9256_v7 = vld [vmem:[#allocation189_spill] sm:$0xff]  ;;  %v5696_v33 = vpop.permute.xlu1 %1344  ;;  %v9263_v14 = vld [vmem:[#allocation180_spill] sm:$0xff] }
 0x356   :  { %v9255_v49 = vmax.f32 %v5203_v17, %v5205_v23  ;;  %v946_v63 = vmul.f32 %v9256_v7, %v938_v57  ;;  %v947_v15 = vmul.f32 %v9256_v7, %v937_v60  ;;  %v5687_v51 = vstv %s5574_s14  ;;  %v9260_v24 = vld [vmem:[#allocation56_spill] sm:$0xff]  ;;  %v9262_v7 = vld [vmem:[#allocation172_spill] sm:$0xff]  ;;  %s9522_s14 = smov 34  }
 0x357   :  { %1699 = vmax.xlane.f32.xlu1 %v9254_v28  ;;  %9257 = vst [vmem:[#allocation146_spill] sm:$0xff] %v5687_v51  ;;  %v5690_v8 = vstv %s5591_s17  ;;  %vm9259_vm0 = vcmp.lt.s32.totalorder %v4393_v31, 15  ;;  %v994_v18 = vmul.f32 %v9260_v24, %v986_v27  ;;  %v995_v16 = vmul.f32 %v9260_v24, %v985_v55  ;;  %v9264_v27 = vld [vmem:[#allocation48_spill] sm:$0xff]  ;;  %v9266_v24 = vld [vmem:[#allocation178_spill] sm:$0xff]  ;;  %v9273_v51 = vld [vmem:[#allocation38_spill] sm:$0xff]  ;;  %s9523_s17 = smov 33  }
 0x358   :  { %1702 = vmax.xlane.f32.xlu0 %v9255_v49  ;;  %9258 = vst [vmem:[#allocation148_spill] sm:$0xff] %v5690_v8  ;;  %v876_v19 = vsel %vm9259_vm0, %v874_v20, 0.0  ;;  %v5699_v23 = vstv %s5597_s18  ;;  %v853_v17 = vadd.f32 %v849_v59, %v828_v58  ;;  %v854_v28 = vadd.f32 %v850_v54, %v829_v25  ;;  %v5704_v49 = vpop.permute.xlu0 %1367  ;;  %v9267_v8 = vld [vmem:[#allocation179_spill] sm:$0xff]  ;;  %s9524_s18 = smov 32  }
 0x359   :  { %9261 = vst [vmem:[#allocation139_spill] sm:$0xff] %v5699_v23  ;;  %v877_v57 = vsel %vm8682_vm1, %v875_v40, 0.0  ;;  %v895_v60 = vmul.f32 %v9252_v13, %v885_v43  ;;  %v899_v20 = vadd.f32 %v9262_v7, %v894_v50  ;;  %vm9265_vm3 = vcmp.lt.s32.totalorder %v4008_v48, 13  ;;  %v9269_v54 = vld [vmem:[#allocation34_spill] sm:$0xff]  ;;  %v9270_v43 = vld [vmem:[#allocation174_spill] sm:$0xff]  ;;  %v9272_v7 = vld [vmem:[#allocation36_spill] sm:$0xff] }
 0x35a   :  { %v911_v55 = vsel %vm9265_vm3, %v9264_v27, %v9263_v14  ;;  %v974_v46 = vadd.f32 %v9266_v24, %v969_v12  ;;  %v975_v58 = vadd.f32 %v9267_v8, %v970_v42  ;;  %v9268_v25 = vmax.f32 %v5215_v44, %v5217_v34  ;;  %v9274_v12 = vld [vmem:[#allocation67_spill] sm:$0xff]  ;;  %v5731_v34 = vpop.permute.xlu1 %1369  ;;  %vm9280_vm7 = vmmov %vm9265_vm3 }
 0x35b   :  { %v878_v59 = vadd.f32 %v876_v19, %v853_v17  ;;  %v951_v40 = vadd.f32 %v9269_v54, %v946_v63  ;;  %v952_v13 = vadd.f32 %v9270_v43, %v947_v15  ;;  %v5719_v50 = vstv %s5641_s6  ;;  %v9277_v15 = vld [vmem:[#allocation25_spill] sm:$0xff]  ;;  %v9278_v19 = vld [vmem:[#allocation50_spill] sm:$0xff]  ;;  %s9525_s6 = smov 31  }
 0x35c   :  { %1705 = vmax.xlane.f32.xlu1 %v9268_v25  ;;  %9271 = vst [vmem:[#allocation145_spill] sm:$0xff] %v5719_v50  ;;  %v999_v23 = vadd.f32 %v9272_v7, %v994_v18  ;;  %v1000_v45 = vadd.f32 %v9273_v51, %v995_v16  ;;  %vm9275_vm8 = vcmp.lt.s32.totalorder %v4008_v48, 127  ;;  %v879_v63 = vadd.f32 %v877_v57, %v854_v28  ;;  %v5735_v18 = vpop.permute.xlu0 %1392  ;;  %v9281_v57 = vld [vmem:[#allocation193_spill] sm:$0xff]  ;;  %v9286_v7 = vld [vmem:[#allocation27_spill] sm:$0xff] }
 0x35d   :  { %v1022_v42 = vsel %vm9275_vm8, %v9274_v12, %v5118_v30  ;;  %vm9276_vm5 = vmmov %vm9275_vm8  ;;  %v900_v8 = vadd.f32 %v9277_v15, %v895_v60  ;;  %v919_v24 = vmul.f32 %v9278_v19, %v911_v55  ;;  %v5738_v51 = vstv %s5670_s7  ;;  %v9289_v50 = vld [vmem:[#allocation40_spill] sm:$0xff]  ;;  %s9502_s7 = sld [smem:[#allocation200_spill]] }
 0x35e   :  { %v1023_v44 = vsel %vm9276_vm5, %v5118_v30, %v9274_v12  ;;  %9279 = vst [vmem:[#allocation149_spill] sm:$0xff] %v5738_v51  ;;  %v901_v16 = vsel %vm8660_vm12, %v899_v20, 0.0  ;;  %v910_v30 = vsel %vm9280_vm7, %v9263_v14, %v9264_v27  ;;  %v976_v17 = vsel %vm8671_vm15, %v974_v46, 0.0  ;;  %v5770_v54 = vpop.permute.xlu1 %1394 }
 0x35f   :  { %v977_v28 = vsel %vm8670_vm13, %v975_v58, 0.0  ;;  %v1031_v60 = vmul.f32 %v9281_v57, %v1022_v42  ;;  %v1032_v55 = vmul.f32 %v9281_v57, %v1023_v44  ;;  %vm9282_vm0 = vcmp.lt.s32.totalorder %v4008_v48, 126  ;;  %v9288_v44 = vld [vmem:[#allocation194_spill] sm:$0xff] }
 0x360   :  { %v1047_v20 = vsel %vm9282_vm0, %v5120_v26, %v5180_v29  ;;  %vm9283_vm3 = vmmov %vm9282_vm0  ;;  %v953_v46 = vsel %vm8672_vm14, %v951_v40, 0.0  ;;  %v954_v27 = vsel %vm8673_vm2, %v952_v13, 0.0  ;;  %vm9284_vm8 = vcmp.ge.s32.totalorder %v4393_v31, 1 }
 0x361   :  { %v1048_v14 = vsel %vm9283_vm3, %v5180_v29, %v5120_v26  ;;  %v1001_v58 = vsel %vm9284_vm8, %v999_v23, 0.0  ;;  %vm9285_vm5 = vcmp.ge.s32.totalorder %v4396_v37, 1  ;;  %v920_v43 = vmul.f32 %v9278_v19, %v910_v30  ;;  %v5774_v29 = vpop.permute.xlu0 %1417  ;;  %v9290_v30 = vld [vmem:[#allocation35_spill] sm:$0xff] }
 0x362   :  { %v1002_v25 = vsel %vm9285_vm5, %v1000_v45, 0.0  ;;  %v924_v12 = vadd.f32 %v9286_v7, %v919_v24  ;;  %v978_v42 = vadd.f32 %v976_v17, %v953_v46  ;;  %v979_v26 = vadd.f32 %v977_v28, %v954_v27  ;;  %v9295_v28 = vld [vmem:[#allocation173_spill] sm:$0xff]  ;;  %v9299_v46 = vld [vmem:[#allocation182_spill] sm:$0xff] }
 0x363   :  { %vm9287_vm7 = vcmp.lt.s32.totalorder %v4396_v37, 14  ;;  %v903_v13 = vadd.f32 %v901_v16, %v878_v59  ;;  %v1056_v15 = vmul.f32 %v9288_v44, %v1047_v20  ;;  %v1057_v23 = vmul.f32 %v9288_v44, %v1048_v14  ;;  %v5798_v16 = vpop.permute.xlu1 %1419  ;;  %v9298_v20 = vld [vmem:[#allocation181_spill] sm:$0xff]  ;;  %v9302_v27 = vld [vmem:[#allocation69_spill] sm:$0xff] }
 0x364   :  { %v902_v40 = vsel %vm9287_vm7, %v900_v8, 0.0  ;;  %v1003_v45 = vadd.f32 %v1001_v58, %v978_v42  ;;  %v1004_v57 = vadd.f32 %v1002_v25, %v979_v26  ;;  %v1036_v51 = vadd.f32 %v9289_v50, %v1031_v60  ;;  %v9304_v42 = vld [vmem:[#allocation94_spill] sm:$0xff] }
 0x365   :  { %v1037_v19 = vadd.f32 %v9290_v30, %v1032_v55  ;;  %vm9291_vm0 = vcmp.lt.s32.totalorder %v4008_v48, 125  ;;  %vm9293_vm8 = vcmp.lt.s32.totalorder %v4008_v48, 114  ;;  %v904_v17 = vadd.f32 %v902_v40, %v879_v63  ;;  %v9305_v40 = vld [vmem:[#allocation93_spill] sm:$0xff] }
 0x366   :  { %v1072_v24 = vsel %vm9291_vm0, %v5182_v47, %v5225_v3  ;;  %vm9292_vm3 = vmmov %vm9291_vm0  ;;  %v1122_v8 = vsel %vm9293_vm8, %v5265_v0, %v5320_v4  ;;  %v925_v60 = vadd.f32 %v9295_v28, %v920_v43  ;;  %vm9296_vm7 = vcmp.lt.s32.totalorder %v4393_v31, 13  ;;  %v9303_v43 = vld [vmem:[#allocation71_spill] sm:$0xff]  ;;  %v9307_v30 = vld [vmem:[#allocation60_spill] sm:$0xff] }
 0x367   :  { %v1073_v59 = vsel %vm9292_vm3, %v5225_v3, %v5182_v47  ;;  %vm9294_vm5 = vmmov %vm9293_vm8  ;;  %v926_v47 = vsel %vm9296_vm7, %v924_v12, 0.0  ;;  %v5805_v3 = vpop.permute.xlu0 %1444  ;;  %v5808_v55 = vstv %s5740_s28  ;;  %v1061_v14 = vadd.f32 %v9298_v20, %v1056_v15  ;;  %v9312_v20 = vld [vmem:[#allocation184_spill] sm:$0xff]  ;;  %s9527_s28 = smov 29  }
 0x368   :  { %v1123_v50 = vsel %vm9294_vm5, %v5320_v4, %v5265_v0  ;;  %9297 = vst [vmem:[#allocation20_spill] sm:$0xff] %v5808_v55  ;;  %v1062_v0 = vadd.f32 %v9299_v46, %v1057_v23  ;;  %vm9300_vm0 = vcmp.lt.s32.totalorder %v4008_v48, 115  ;;  %v1081_v58 = vmul.f32 %v9302_v27, %v1072_v24  ;;  %v9352_v55 = vld [vmem:[#allocation198_spill] sm:$0xff] }
 0x369   :  { %v1099_v4 = vsel %vm9300_vm0, %v5227_v38, %v5263_v62  ;;  %vm9301_vm3 = vmmov %vm9300_vm0  ;;  %v1082_v25 = vmul.f32 %v9302_v27, %v1073_v59  ;;  %v1131_v7 = vmul.f32 %v9303_v43, %v1122_v8  ;;  %v1132_v12 = vmul.f32 %v9303_v43, %v1123_v50 }
 0x36a   :  { %v1100_v63 = vsel %vm9301_vm3, %v5263_v62, %v5227_v38  ;;  %v1015_v26 = vadd.f32 %v9304_v42, %v1003_v45  ;;  %v1016_v15 = vadd.f32 %v9305_v40, %v1004_v57  ;;  %vm9306_vm8 = vcmp.lt.s32.totalorder %v4393_v31, 15  ;;  %v5834_v62 = vpop.permute.xlu1 %1426  ;;  %v9315_v42 = vld [vmem:[#allocation187_spill] sm:$0xff] }
 0x36b   :  { %v1038_v23 = vsel %vm9306_vm8, %v1036_v51, 0.0  ;;  %v1039_v38 = vsel %vm8682_vm1, %v1037_v19, 0.0  ;;  %v1108_v24 = vmul.f32 %v9307_v30, %v1099_v4  ;;  %v1109_v59 = vmul.f32 %v9307_v30, %v1100_v63  ;;  %v5846_v51 = vpop.permute.xlu0 %1451  ;;  %v9313_v4 = vld [vmem:[#allocation185_spill] sm:$0xff] }
 0x36c   :  { %vm9308_vm5 = vcmp.lt.s32.totalorder %v4008_v48, 113  ;;  %v927_v19 = vsel %vm8659_vm6, %v925_v60, 0.0  ;;  %v5850_v45 = vadd.f32 %v926_v47, %v903_v13  ;;  %v1063_v50 = vsel %vm8660_vm12, %v1061_v14, 0.0  ;;  %v9316_v47 = vld [vmem:[#allocation57_spill] sm:$0xff] }
 0x36d   :  { %v1147_v8 = vsel %vm9308_vm5, %v5322_v10, %v5345_v11  ;;  %vm9309_vm7 = vmmov %vm9308_vm5  ;;  %vm9311_vm0 = vcmp.lt.s32.totalorder %v4396_v37, 14  ;;  %v1086_v46 = vadd.f32 %v9312_v20, %v1081_v58  ;;  %v1087_v63 = vadd.f32 %v9313_v4, %v1082_v25  ;;  %v9319_v20 = vld [vmem:[#allocation46_spill] sm:$0xff] }
 0x36e   :  { %v1148_v57 = vsel %vm9309_vm7, %v5345_v11, %v5322_v10  ;;  %9310 = vst [vmem:[#allocation156_spill] sm:$0xff] %v5850_v45  ;;  %v1064_v28 = vsel %vm9311_vm0, %v1062_v0, 0.0  ;;  %v9314_v10 = vld [vmem:[#allocation186_spill] sm:$0xff]  ;;  %v1137_v40 = vadd.f32 %v9315_v42, %v1132_v12  ;;  %v1040_v60 = vadd.f32 %v1038_v23, %v1015_v26  ;;  %v5862_v14 = vpop.permute.xlu1 %1446  ;;  %v9318_v0 = vld [vmem:[#allocation44_spill] sm:$0xff] }
 0x36f   :  { %v1136_v11 = vadd.f32 %v9314_v10, %v1131_v7  ;;  %v1041_v13 = vadd.f32 %v1039_v38, %v1016_v15  ;;  %v1156_v43 = vmul.f32 %v9316_v47, %v1147_v8  ;;  %v1157_v30 = vmul.f32 %v9316_v47, %v1148_v57  ;;  %v5868_v25 = vpop.permute.xlu0 %1467  ;;  %v9325_v57 = vld [vmem:[#allocation188_spill] sm:$0xff]  ;;  %v9350_v47 = vld [vmem:[#allocation73_spill] sm:$0xff] }
 0x370   :  { %v5864_v27 = vadd.f32 %v927_v19, %v904_v17  ;;  %v1113_v58 = vadd.f32 %v9318_v0, %v1108_v24  ;;  %v1114_v44 = vadd.f32 %v9319_v20, %v1109_v59  ;;  %v5871_v4 = vstv %s5800_s21  ;;  %v9324_v59 = vld [vmem:[#allocation45_spill] sm:$0xff]  ;;  %s9528_s21 = smov 19  }
 0x371   :  { %9320 = vst [vmem:[#allocation157_spill] sm:$0xff] %v5871_v4  ;;  %v5873_v7 = vadd.f32 %v1063_v50, %v1040_v60  ;;  %v1066_v12 = vadd.f32 %v1064_v28, %v1041_v13  ;;  %v5876_v26 = vstv %s5810_s24  ;;  %v5879_v15 = vstv %s5822_s19  ;;  %s9529_s24 = smov 18   ;;  %s9530_s19 = smov 17  }
 0x372   :  { %9317 = vst [vmem:[#allocation153_spill] sm:$0xff] %v5864_v27  ;;  %9321 = vst [vmem:[#allocation158_spill] sm:$0xff] %v5876_v26  ;;  %vm9323_vm3 = vcmp.lt.s32.totalorder %v4393_v31, 13  ;;  %v1089_v17 = vsel %vm8659_vm6, %v1087_v63, 0.0  ;;  %v1138_v38 = vsel %vm8671_vm15, %v1136_v11, 0.0  ;;  %v1139_v24 = vsel %vm8670_vm13, %v1137_v40, 0.0 }
 0x373   :  { %9322 = vst [vmem:[#allocation164_spill] sm:$0xff] %v5879_v15  ;;  %v1088_v23 = vsel %vm9323_vm3, %v1086_v46, 0.0  ;;  %v1161_v8 = vadd.f32 %v9324_v59, %v1156_v43  ;;  %v1162_v19 = vadd.f32 %v9325_v57, %v1157_v30  ;;  %vm9326_vm8 = vcmp.lt.s32.totalorder %v4008_v48, 112  ;;  %v5899_v46 = vpop.permute.xlu1 %1453  ;;  %v5913_v11 = vpop.permute.xlu0 %1474  ;;  %v9332_v40 = vld [vmem:[#allocation65_spill] sm:$0xff]  ;;  %v9341_v59 = vld [vmem:[#allocation76_spill] sm:$0xff] }
 0x374   :  { %v1172_v50 = vsel %vm9326_vm8, %v5347_v39, %v5395_v22  ;;  %vm9327_vm5 = vmmov %vm9326_vm8  ;;  %v1115_v63 = vsel %vm8672_vm14, %v1113_v58, 0.0  ;;  %v1116_v43 = vsel %vm8673_vm2, %v1114_v44, 0.0  ;;  %vm9328_vm7 = vcmp.lt.s32.totalorder %v4008_v48, 98  ;;  %v9351_v15 = vld [vmem:[#allocation197_spill] sm:$0xff] }
 0x375   :  { %v1173_v28 = vsel %vm9327_vm5, %v5395_v22, %v5347_v39  ;;  %v1297_v30 = vsel %vm9328_vm7, %v5561_v6, %v5595_v53  ;;  %vm9329_vm0 = vmmov %vm9328_vm7  ;;  %v1140_v39 = vadd.f32 %v1138_v38, %v1115_v63  ;;  %v1141_v22 = vadd.f32 %v1139_v24, %v1116_v43  ;;  %v9338_v24 = vld [vmem:[#allocation99_spill] sm:$0xff] }
 0x376   :  { %v1298_v10 = vsel %vm9329_vm0, %v5595_v53, %v5561_v6  ;;  %vm9330_vm3 = vcmp.lt.s32.totalorder %v4008_v48, 99  ;;  %v1181_v60 = vmul.f32 %v9332_v40, %v1172_v50  ;;  %v1182_v13 = vmul.f32 %v9332_v40, %v1173_v28  ;;  %v9343_v50 = vld [vmem:[#allocation127_spill] sm:$0xff]  ;;  %v9344_v28 = vld [vmem:[#allocation142_spill] sm:$0xff] }
 0x377   :  { %v1274_v42 = vsel %vm9330_vm3, %v5526_v32, %v5544_v9  ;;  %vm9331_vm8 = vmmov %vm9330_vm3  ;;  %vm9333_vm5 = vcmp.lt.s32.totalorder %v4008_v48, 97  ;;  %vm9335_vm0 = vcmp.ge.s32.totalorder %v4393_v31, 1  ;;  %vm9336_vm3 = vcmp.ge.s32.totalorder %v4396_v37, 1  ;;  %v5939_v38 = vpop.permute.xlu1 %1469  ;;  %v9347_v43 = vld [vmem:[#allocation131_spill] sm:$0xff] }
 0x378   :  { %v1275_v44 = vsel %vm9331_vm8, %v5544_v9, %v5526_v32  ;;  %v1322_v6 = vsel %vm9333_vm5, %v5602_v36, %v5653_v41  ;;  %vm9334_vm7 = vmmov %vm9333_vm5  ;;  %v1163_v0 = vsel %vm9335_vm0, %v1161_v8, 0.0  ;;  %v1164_v32 = vsel %vm9336_vm3, %v1162_v19, 0.0  ;;  %v9337_v9 = vld [vmem:[#allocation77_spill] sm:$0xff]  ;;  %v5953_v19 = vpop.permute.xlu0 %1492 }
 0x379   :  { %v1323_v53 = vsel %vm9334_vm7, %v5653_v41, %v5602_v36  ;;  %v1306_v58 = vmul.f32 %v9337_v9, %v1297_v30  ;;  %v1307_v20 = vmul.f32 %v9337_v9, %v1298_v10  ;;  %vm223_vm8 = vcmp.ge.s32.totalorder %v4554_v1, 0  ;;  %9342 = vst [vmem:[#allocation166_spill] sm:$0xff] %v5953_v19 }
 0x37a   :  { %vm225_vm5 = vcmp.lt.s32.totalorder %v4554_v1, 16  ;;  %vm9339_vm7 = vcmp.lt.s32.totalorder %v4008_v48, 111  ;;  %v1283_v8 = vmul.f32 %v9341_v59, %v1274_v42  ;;  %v1284_v57 = vmul.f32 %v9341_v59, %v1275_v44  ;;  %v9349_v59 = vld [vmem:[#allocation191_spill] sm:$0xff] }
 0x37b   :  { %v1197_v41 = vsel %vm9339_vm7, %v9338_v24, %v5441_v5  ;;  %vm9340_vm0 = vmmov %vm9339_vm7  ;;  %vm224_vm3 = vcmp.ge.s32.totalorder %v4576_v35, 0  ;;  %vm226_vm6 = vcmp.lt.s32.totalorder %v4576_v35, 16  ;;  %vm9345_vm12 = vcmp.lt.s32.totalorder %v4008_v48, 110  ;;  %v5973_v19 = vpop.permute.xlu1 %1476 }
 0x37c   :  { %v1198_v36 = vsel %vm9340_vm0, %v5441_v5, %v9338_v24  ;;  %v1222_v63 = vsel %vm9345_vm12, %v9344_v28, %v9343_v50  ;;  %vm9346_vm7 = vmmov %vm9345_vm12  ;;  %v1331_v30 = vmul.f32 %v9347_v43, %v1322_v6  ;;  %v1332_v10 = vmul.f32 %v9347_v43, %v1323_v53  ;;  %v9348_v24 = vld [vmem:[#allocation190_spill] sm:$0xff] }
 0x37d   :  { %v1223_v5 = vsel %vm9346_vm7, %v9343_v50, %v9344_v28  ;;  %v1165_v42 = vadd.f32 %v1163_v0, %v1140_v39  ;;  %v1166_v44 = vadd.f32 %v1164_v32, %v1141_v22  ;;  %v1186_v9 = vadd.f32 %v9348_v24, %v1181_v60  ;;  %v9353_v50 = vld [vmem:[#allocation74_spill] sm:$0xff]  ;;  %v9355_v0 = vld [vmem:[#allocation196_spill] sm:$0xff]  ;;  %v5979_v32 = vpop.permute.xlu0 %1499  ;;  %v9360_v28 = vld [vmem:[#allocation52_spill] sm:$0xff] }
 0x37e   :  { %v1187_v40 = vadd.f32 %v9349_v59, %v1182_v13  ;;  %v1206_v27 = vmul.f32 %v9350_v47, %v1197_v41  ;;  %v1207_v45 = vmul.f32 %v9350_v47, %v1198_v36  ;;  %v1311_v26 = vadd.f32 %v9351_v15, %v1306_v58  ;;  %v9354_v39 = vld [vmem:[#allocation195_spill] sm:$0xff]  ;;  %v9356_v13 = vld [vmem:[#allocation55_spill] sm:$0xff] }
 0x37f   :  { %v1312_v4 = vadd.f32 %v9352_v55, %v1307_v20  ;;  %v1231_v6 = vmul.f32 %v9353_v50, %v1222_v63  ;;  %v1232_v53 = vmul.f32 %v9353_v50, %v1223_v5  ;;  %v1288_v22 = vadd.f32 %v9354_v39, %v1283_v8  ;;  %v9357_v59 = vld [vmem:[#allocation66_spill] sm:$0xff]  ;;  %v9361_v5 = vld [vmem:[#allocation49_spill] sm:$0xff]  ;;  %v6002_v39 = vpop.permute.xlu1 %1494 }
 0x380   :  { %v1289_v60 = vadd.f32 %v9355_v0, %v1284_v57  ;;  %v1336_v41 = vadd.f32 %v9356_v13, %v1331_v30  ;;  %v1337_v36 = vadd.f32 %v9357_v59, %v1332_v10  ;;  %vm9358_vm12 = vcmp.lt.s32.totalorder %v4008_v48, 96  ;;  %v9373_v13 = vld [vmem:[#allocation116_spill] sm:$0xff] }
 0x381   :  { %v1347_v55 = vsel %vm9358_vm12, %v5668_v52, %v5696_v33  ;;  %vm9359_vm0 = vmmov %vm9358_vm12  ;;  %v5992_v58 = vadd.f32 %v1088_v23, %v5873_v7  ;;  %v5994_v20 = vadd.f32 %v1089_v17, %v1066_v12  ;;  %v1190_v8 = vadd.f32 %v1186_v9, %v1165_v42  ;;  %v9363_v7 = vld [vmem:[#allocation192_spill] sm:$0xff] }
 0x382   :  { %v1348_v15 = vsel %vm9359_vm0, %v5696_v33, %v5668_v52  ;;  %v1191_v57 = vadd.f32 %v1187_v40, %v1166_v44  ;;  %v1211_v63 = vadd.f32 %v9360_v28, %v1206_v27  ;;  %v1212_v30 = vadd.f32 %v9361_v5, %v1207_v45  ;;  %v9362_v52 = vld [vmem:[#allocation51_spill] sm:$0xff]  ;;  %v6009_v27 = vpop.permute.xlu0 %1517 }
 0x383   :  { %v1313_v10 = vsel %vm8671_vm15, %v1311_v26, 0.0  ;;  %v1314_v24 = vsel %vm8670_vm13, %v1312_v4, 0.0  ;;  %v1236_v33 = vadd.f32 %v9362_v52, %v1231_v6  ;;  %v1237_v23 = vadd.f32 %v9363_v7, %v1232_v53  ;;  %v9364_v12 = vld [vmem:[#allocation79_spill] sm:$0xff] }
 0x384   :  { %v1356_v17 = vmul.f32 %v9364_v12, %v1347_v55  ;;  %v1357_v40 = vmul.f32 %v9364_v12, %v1348_v15  ;;  %vm8678_vm7 = vcmp.lt.s32.totalorder %v4008_v48, 93  ;;  %v1290_v45 = vsel %vm8672_vm14, %v1288_v22, 0.0  ;;  %v9379_v15 = vld [vmem:[#allocation70_spill] sm:$0xff] }
 0x385   :  { %v1291_v4 = vsel %vm8673_vm2, %v1289_v60, 0.0  ;;  %vm9365_vm12 = vcmp.ge.s32.totalorder %v4393_v31, 1  ;;  %vm9366_vm0 = vcmp.ge.s32.totalorder %v4396_v37, 1  ;;  %vm8679_vm13 = vcmp.lt.s32.totalorder %v4008_v48, 82 }
 0x386   :  { %v1338_v26 = vsel %vm9365_vm12, %v1336_v41, 0.0  ;;  %v1339_v9 = vsel %vm9366_vm0, %v1337_v36, 0.0  ;;  %v1315_v42 = vadd.f32 %v1313_v10, %v1290_v45  ;;  %v1316_v44 = vadd.f32 %v1314_v24, %v1291_v4  ;;  %vm6033_vm12 = vmand %vm223_vm8, %vm225_vm5  ;;  %v6049_v41 = vpop.permute.xlu1 %1501  ;;  %v9383_v24 = vld [vmem:[#allocation80_spill] sm:$0xff] }
 0x387   :  { %vm9367_vm15 = vcmp.lt.s32.totalorder %v4008_v48, 95  ;;  %vm8681_vm2 = vcmp.lt.s32.totalorder %v4008_v48, 83  ;;  %v9369_v22 = vmov 0  ;;  %vm9372_vm0 = vcmp.lt.s32.totalorder %v4393_v31, 15  ;;  %vm6055_vm8 = vmand %vm224_vm3, %vm226_vm6 }
 0x388   :  { %v1372_v6 = vsel %vm9367_vm15, %v5704_v49, %v5731_v34  ;;  %vm9368_vm14 = vmmov %vm9367_vm15  ;;  %v9370_v22 = vsel %vm6033_vm12, 4294967295, %v9369_v22  ;;  %v1213_v0 = vsel %vm9372_vm0, %v1211_v63, 0.0  ;;  %v1214_v60 = vsel %vm8682_vm1, %v1212_v30, 0.0  ;;  %v9380_v63 = vld [vmem:[#allocation62_spill] sm:$0xff]  ;;  %v6061_v30 = vpop.permute.xlu0 %1524 }
 0x389   :  { %v1373_v53 = vsel %vm9368_vm14, %v5731_v34, %v5704_v49  ;;  %9371 = vst [vmem:[#allocation159_spill] sm:$0xff] %v9370_v22  ;;  %vm9374_vm14 = vcmp.lt.s32.totalorder %v4008_v48, 109  ;;  %v9376_v59 = vmov 0  ;;  %v1340_v36 = vadd.f32 %v1338_v26, %v1315_v42  ;;  %v9384_v26 = vld [vmem:[#allocation75_spill] sm:$0xff] }
 0x38a   :  { %v1247_v49 = vsel %vm9374_vm14, %v9373_v13, %v5510_v61  ;;  %vm9375_vm15 = vmmov %vm9374_vm14  ;;  %v9377_v59 = vsel %vm6055_vm8, 4294967295, %v9376_v59  ;;  %v1341_v55 = vadd.f32 %v1339_v9, %v1316_v44  ;;  %v1361_v28 = vadd.f32 %v9379_v15, %v1356_v17  ;;  %v9389_v15 = vld [vmem:[#allocation63_spill] sm:$0xff] }
 0x38b   :  { %v1248_v34 = vsel %vm9375_vm15, %v5510_v61, %v9373_v13  ;;  %9378 = vst [vmem:[#allocation160_spill] sm:$0xff] %v9377_v59  ;;  %v1362_v5 = vadd.f32 %v9380_v63, %v1357_v40  ;;  %vm9381_vm5 = vcmp.lt.s32.totalorder %v4393_v31, 14  ;;  %vm9382_vm0 = vcmp.lt.s32.totalorder %v4396_v37, 14 }
 0x38c   :  { %v1238_v61 = vsel %vm9381_vm5, %v1236_v33, 0.0  ;;  %v1239_v10 = vsel %vm9382_vm0, %v1237_v23, 0.0  ;;  %v1381_v52 = vmul.f32 %v9383_v24, %v1372_v6  ;;  %v1382_v7 = vmul.f32 %v9383_v24, %v1373_v53 }
 0x38d   :  { %v1215_v45 = vadd.f32 %v1213_v0, %v1190_v8  ;;  %v1216_v4 = vadd.f32 %v1214_v60, %v1191_v57  ;;  %v1256_v9 = vmul.f32 %v9384_v26, %v1247_v49  ;;  %v1257_v33 = vmul.f32 %v9384_v26, %v1248_v34  ;;  %v6085_v57 = vpop.permute.xlu1 %1519  ;;  %v6091_v0 = vpop.permute.xlu0 %1542  ;;  %v9387_v60 = vld [vmem:[#allocation64_spill] sm:$0xff]  ;;  %v9388_v49 = vld [vmem:[#allocation59_spill] sm:$0xff] }
 0x38e   :  { %vm9385_vm6 = vcmp.lt.s32.totalorder %v4008_v48, 94  ;;  %v1365_v6 = vadd.f32 %v1361_v28, %v1340_v36  ;;  %v1366_v53 = vadd.f32 %v1362_v5, %v1341_v55  ;;  %v1386_v13 = vadd.f32 %v9387_v60, %v1381_v52 }
 0x38f   :  { %v1397_v23 = vsel %vm9385_vm6, %v5735_v18, %v5770_v54  ;;  %vm9386_vm3 = vmmov %vm9385_vm6  ;;  %v6087_v42 = vadd.f32 %v1238_v61, %v1215_v45  ;;  %v6089_v44 = vadd.f32 %v1239_v10, %v1216_v4  ;;  %v1387_v34 = vadd.f32 %v9388_v49, %v1382_v7  ;;  %v9392_v49 = vld [vmem:[#allocation141_spill] sm:$0xff] }
 0x390   :  { %v1398_v8 = vsel %vm9386_vm3, %v5770_v54, %v5735_v18  ;;  %v1428_v63 = vsel %vm8678_vm7, %v9389_v15, %v5834_v62  ;;  %v1429_v18 = vsel %vm8678_vm7, %v5834_v62, %v9389_v15  ;;  %vm8680_vm14 = vcmp.lt.s32.totalorder %v4008_v48, 81  ;;  %v9390_v54 = vld [vmem:[#allocation87_spill] sm:$0xff] }
 0x391   :  { %v1406_v36 = vmul.f32 %v9390_v54, %v1397_v23  ;;  %v1407_v55 = vmul.f32 %v9390_v54, %v1398_v8  ;;  %v1478_v28 = vsel %vm8679_vm13, %v5913_v11, %v5973_v19  ;;  %v1479_v5 = vsel %vm8679_vm13, %v5973_v19, %v5913_v11  ;;  %v1527_v19 = vpop.permute.xlu1 %1526  ;;  %v1550_v45 = vpop.permute.xlu0 %1549 }
 0x392   :  { %v1422_v62 = vsel %vm8678_vm7, %v5774_v29, %v5798_v16  ;;  %v1423_v61 = vsel %vm8678_vm7, %v5798_v16, %v5774_v29  ;;  %v1455_v10 = vsel %vm8681_vm2, %v5846_v51, %v5899_v46  ;;  %v1456_v11 = vsel %vm8681_vm2, %v5899_v46, %v5846_v51 }
 0x393   :  { %v1434_v52 = vmul.f32 %v5513_v2, %v1428_v63  ;;  %v1435_v7 = vmul.f32 %v5513_v2, %v1429_v18  ;;  %v1472_v29 = vsel %vm8679_vm13, %v5868_v25, %v5939_v38  ;;  %v1473_v16 = vsel %vm8679_vm13, %v5939_v38, %v5868_v25 }
 0x394   :  { %v1449_v51 = vsel %vm8681_vm2, %v5805_v3, %v5862_v14  ;;  %v1450_v46 = vsel %vm8681_vm2, %v5862_v14, %v5805_v3  ;;  %v1484_v4 = vmul.f32 %v5608_v56, %v1478_v28  ;;  %v1485_v23 = vmul.f32 %v5608_v56, %v1479_v5  ;;  %v9393_v14 = vld [vmem:[#allocation138_spill] sm:$0xff] }
 0x395   :  { %vm9391_vm15 = vcmp.lt.s32.totalorder %v4393_v31, 15  ;;  %v1389_v25 = vsel %vm8682_vm1, %v1387_v34, 0.0  ;;  %v1461_v38 = vmul.f32 %v5547_v21, %v1455_v10  ;;  %v1462_v60 = vmul.f32 %v5547_v21, %v1456_v11  ;;  %v9394_v28 = vld [vmem:[#allocation61_spill] sm:$0xff]  ;;  %v9395_v34 = vld [vmem:[#allocation72_spill] sm:$0xff]  ;;  %v9396_v10 = vld [vmem:[#allocation115_spill] sm:$0xff] }
 0x396   :  { %v1388_v8 = vsel %vm9391_vm15, %v1386_v13, 0.0  ;;  %vm8683_vm5 = vcmp.lt.s32.totalorder %v4008_v48, 80  ;;  %v1431_v15 = vmul.f32 %v9392_v49, %v1422_v62  ;;  %v1432_v3 = vmul.f32 %v9392_v49, %v1423_v61  ;;  %v1545_v13 = vpop.permute.xlu1 %1544 }
 0x397   :  { %v1481_v63 = vmul.f32 %v9393_v14, %v1472_v29  ;;  %v1482_v18 = vmul.f32 %v9393_v14, %v1473_v16  ;;  %vm8684_vm0 = vcmp.lt.s32.totalorder %v4008_v48, 79  ;;  %v1411_v5 = vadd.f32 %v9394_v28, %v1406_v36  ;;  %v1568_v29 = vpop.permute.xlu0 %1567 }
 0x398   :  { %v1412_v40 = vadd.f32 %v9395_v34, %v1407_v55  ;;  %v1458_v17 = vmul.f32 %v9396_v10, %v1449_v51  ;;  %v1459_v11 = vmul.f32 %v9396_v10, %v1450_v46  ;;  %vm8685_vm6 = vcmp.lt.s32.totalorder %v4008_v48, 78  ;;  %v9397_v51 = vld [vmem:[#allocation58_spill] sm:$0xff] }
 0x399   :  { %v1436_v62 = vadd.f32 %v1434_v52, %v1431_v15  ;;  %v1437_v2 = vadd.f32 %v1435_v7, %v1432_v3  ;;  %v1486_v61 = vadd.f32 %v1484_v4, %v1481_v63  ;;  %v1487_v49 = vadd.f32 %v1485_v23, %v1482_v18  ;;  %v9398_v52 = vld [vmem:[#allocation53_spill] sm:$0xff] }
 0x39a   :  { %v1463_v26 = vadd.f32 %v1461_v38, %v1458_v17  ;;  %v1464_v16 = vadd.f32 %v1462_v60, %v1459_v11  ;;  %v1503_v36 = vsel %vm8680_vm14, %v5979_v32, %v6049_v41  ;;  %v1504_v55 = vsel %vm8680_vm14, %v6049_v41, %v5979_v32  ;;  %v1552_v23 = vpop.permute.xlu1 %1551  ;;  %v9401_v32 = vld [vmem:[#allocation166_spill] sm:$0xff] }
 0x39b   :  { %v6176_v46 = vadd.f32 %v9397_v51, %v1256_v9  ;;  %v6179_v7 = vadd.f32 %v9398_v52, %v1257_v33  ;;  %v6181_v4 = vadd.f32 %v1388_v8, %v1365_v6  ;;  %v6183_v17 = vadd.f32 %v1389_v25, %v1366_v53  ;;  %v9404_v53 = vld [vmem:[#allocation146_spill] sm:$0xff] }
 0x39c   :  { %vm9399_vm3 = vcmp.lt.s32.totalorder %v4393_v31, 14  ;;  %vm9400_vm15 = vcmp.lt.s32.totalorder %v4396_v37, 14  ;;  %v1497_v41 = vsel %vm8680_vm14, %v9401_v32, %v6002_v39  ;;  %v1498_v9 = vsel %vm8680_vm14, %v6002_v39, %v9401_v32 }
 0x39d   :  { %v6187_v38 = vsel %vm9399_vm3, %v1411_v5, 0.0  ;;  %v6191_v60 = vsel %vm9400_vm15, %v1412_v40, 0.0  ;;  %vm9402_vm7 = vcmp.ge.s32.totalorder %v4393_v31, 2  ;;  %vm9403_vm3 = vcmp.ge.s32.totalorder %v4396_v37, 2 }
 0x39e   :  { %v1488_v33 = vsel %vm9402_vm7, %v1486_v61, 0.0  ;;  %v1489_v6 = vsel %vm9403_vm3, %v1487_v49, 0.0  ;;  %v1509_v8 = vmul.f32 %v9404_v53, %v1503_v36  ;;  %v1510_v40 = vmul.f32 %v9404_v53, %v1504_v55  ;;  %v9409_v49 = vld [vmem:[#allocation152_spill] sm:$0xff]  ;;  %v1570_v5 = vpop.permute.xlu1 %1569  ;;  %v9410_v55 = vld [vmem:[#allocation139_spill] sm:$0xff] }
 0x39f   :  { %vm9405_vm15 = vcmp.lt.s32.totalorder %v4393_v31, 13  ;;  %vm9406_vm13 = vcmp.lt.s32.totalorder %v4396_v37, 13  ;;  %vm9407_vm14 = vcmp.ge.s32.totalorder %v4393_v31, 3  ;;  %vm9408_vm7 = vcmp.ge.s32.totalorder %v4396_v37, 3 }
 0x3a0   :  { %v6209_v25 = vsel %vm9405_vm15, %v1436_v62, 0.0  ;;  %v6213_v15 = vsel %vm9406_vm13, %v1437_v2, 0.0  ;;  %v1465_v39 = vsel %vm9407_vm14, %v1463_v26, 0.0  ;;  %v1466_v3 = vsel %vm9408_vm7, %v1464_v16, 0.0  ;;  %v1575_v26 = vpop.permute.xlu0 %1574 }
 0x3a1   :  { %vm217_vm3 = vcmp.ge.s32.totalorder %v4554_v1, 1  ;;  %vm219_vm2 = vcmp.lt.s32.totalorder %v4554_v1, 17  ;;  %v1506_v63 = vmul.f32 %v9409_v49, %v1497_v41  ;;  %v1507_v18 = vmul.f32 %v9409_v49, %v1498_v9 }
 0x3a2   :  { %v1528_v28 = vsel %vm8683_vm5, %v6061_v30, %v1527_v19  ;;  %v1529_v2 = vsel %vm8683_vm5, %v1527_v19, %v6061_v30  ;;  %vm8687_vm13 = vcmp.lt.s32.totalorder %v4008_v48, 77  ;;  %vm220_vm15 = vcmp.lt.s32.totalorder %v4576_v35, 17 }
 0x3a3   :  { %v1490_v34 = vadd.f32 %v1488_v33, %v1465_v39  ;;  %v1491_v11 = vadd.f32 %v1489_v6, %v1466_v3  ;;  %v1553_v62 = vsel %vm8684_vm0, %v1550_v45, %v1552_v23  ;;  %v1554_v61 = vsel %vm8684_vm0, %v1552_v23, %v1550_v45  ;;  %v1577_v33 = vpop.permute.xlu1 %1576 }
 0x3a4   :  { %v1511_v16 = vadd.f32 %v1509_v8, %v1506_v63  ;;  %v1512_v36 = vadd.f32 %v1510_v40, %v1507_v18  ;;  %v1522_v30 = vsel %vm8683_vm5, %v6009_v27, %v6085_v57  ;;  %v1523_v19 = vsel %vm8683_vm5, %v6085_v57, %v6009_v27  ;;  %v9411_v27 = vld [vmem:[#allocation149_spill] sm:$0xff]  ;;  %v1593_v63 = vpop.permute.xlu0 %1592 }
 0x3a5   :  { %v1534_v51 = vmul.f32 %v9410_v55, %v1528_v28  ;;  %v1535_v45 = vmul.f32 %v9410_v55, %v1529_v2  ;;  %v1547_v52 = vsel %vm8684_vm0, %v6091_v0, %v1545_v13  ;;  %v1548_v23 = vsel %vm8684_vm0, %v1545_v13, %v6091_v0  ;;  %v9412_v0 = vld [vmem:[#allocation148_spill] sm:$0xff]  ;;  %v9414_v18 = vld [vmem:[#allocation157_spill] sm:$0xff]  ;;  %vm6300_vm0 = vmand %vm217_vm3, %vm219_vm2 }
 0x3a6   :  { %v1559_v57 = vmul.f32 %v9411_v27, %v1553_v62  ;;  %v1560_v32 = vmul.f32 %v9411_v27, %v1554_v61  ;;  %v1572_v41 = vsel %vm8685_vm6, %v1568_v29, %v1570_v5  ;;  %v1573_v9 = vsel %vm8685_vm6, %v1570_v5, %v1568_v29  ;;  %v9413_v29 = vld [vmem:[#allocation145_spill] sm:$0xff] }
 0x3a7   :  { %v1531_v13 = vmul.f32 %v9412_v0, %v1522_v30  ;;  %v1532_v6 = vmul.f32 %v9412_v0, %v1523_v19  ;;  %v1578_v8 = vsel %vm8685_vm6, %v1575_v26, %v1577_v33  ;;  %v1579_v40 = vsel %vm8685_vm6, %v1577_v33, %v1575_v26  ;;  %v9417_v62 = vld [vmem:[#allocation20_spill] sm:$0xff] }
 0x3a8   :  { %v1556_v39 = vmul.f32 %v9413_v29, %v1547_v52  ;;  %v1557_v3 = vmul.f32 %v9413_v29, %v1548_v23  ;;  %v1584_v28 = vmul.f32 %v9414_v18, %v1578_v8  ;;  %v1585_v2 = vmul.f32 %v9414_v18, %v1579_v40  ;;  %v1595_v8 = vpop.permute.xlu1 %1594 }
 0x3a9   :  { %vm9415_vm5 = vcmp.ge.s32.totalorder %v4393_v31, 1  ;;  %vm9416_vm6 = vcmp.ge.s32.totalorder %v4396_v37, 1  ;;  %v1581_v61 = vmul.f32 %v9417_v62, %v1572_v41  ;;  %v1582_v30 = vmul.f32 %v9417_v62, %v1573_v9 }
 0x3aa   :  { %v1513_v26 = vsel %vm9415_vm5, %v1511_v16, 0.0  ;;  %v1514_v5 = vsel %vm9416_vm6, %v1512_v36, 0.0  ;;  %v1536_v19 = vadd.f32 %v1534_v51, %v1531_v13  ;;  %v1537_v52 = vadd.f32 %v1535_v45, %v1532_v6 }
 0x3ab   :  { %v1561_v23 = vadd.f32 %v1559_v57, %v1556_v39  ;;  %v1562_v33 = vadd.f32 %v1560_v32, %v1557_v3  ;;  %v1415_v40 = vadd.f32 %v6187_v38, %v6181_v4  ;;  %v1416_v16 = vadd.f32 %v6191_v60, %v6183_v17  ;;  %v1600_v32 = vpop.permute.xlu0 %1599 }
 0x3ac   :  { %v1586_v36 = vadd.f32 %v1584_v28, %v1581_v61  ;;  %v1587_v18 = vadd.f32 %v1585_v2, %v1582_v30  ;;  %vm9418_vm5 = vcmp.lt.s32.totalorder %v4393_v31, 13  ;;  %vm9419_vm6 = vcmp.lt.s32.totalorder %v4396_v37, 13  ;;  %v1602_v9 = vpop.permute.xlu1 %1601  ;;  %v9436_v28 = vld [vmem:[#allocation158_spill] sm:$0xff] }
 0x3ad   :  { %v1263_v41 = vsel %vm9418_vm5, %v6176_v46, 0.0  ;;  %v1264_v51 = vsel %vm9419_vm6, %v6179_v7, 0.0  ;;  %v1515_v45 = vadd.f32 %v1513_v26, %v1490_v34  ;;  %v1516_v57 = vadd.f32 %v1514_v5, %v1491_v11  ;;  %v9437_v5 = vld [vmem:[#allocation164_spill] sm:$0xff] }
 0x3ae   :  { %v9420_v4 = vmov 0  ;;  %v1440_v17 = vadd.f32 %v6209_v25, %v1415_v40  ;;  %v1441_v38 = vadd.f32 %v6213_v15, %v1416_v16  ;;  %v1597_v46 = vsel %vm8687_vm13, %v1593_v63, %v1595_v8  ;;  %v9448_v40 = vld [vmem:[#allocation156_spill] sm:$0xff] }
 0x3af   :  { %v9421_v4 = vsel %vm6300_vm0, 4294967295, %v9420_v4  ;;  %v1598_v7 = vsel %vm8687_vm13, %v1595_v8, %v1593_v63  ;;  %vm9423_vm5 = vcmp.ge.s32.totalorder %v4576_v35, 1  ;;  %v9424_v60 = vmov 0 }
 0x3b0   :  { %9422 = vst [vmem:[#allocation161_spill] sm:$0xff] %v9421_v4  ;;  %vm6314_vm6 = vmand %vm9423_vm5, %vm220_vm15  ;;  %v1540_v34 = vadd.f32 %v1536_v19, %v1515_v45  ;;  %v1541_v11 = vadd.f32 %v1537_v52, %v1516_v57  ;;  %vm9427_vm2 = vcmp.lt.s32.totalorder %v4393_v31, 15  ;;  %vm9428_vm3 = vcmp.lt.s32.totalorder %v4396_v37, 15 }
 0x3b1   :  { %v9425_v60 = vsel %vm6314_vm6, 4294967295, %v9424_v60  ;;  %v1563_v25 = vsel %vm9427_vm2, %v1561_v23, 0.0  ;;  %v1564_v15 = vsel %vm9428_vm3, %v1562_v33, 0.0  ;;  %vm9429_vm14 = vcmp.lt.s32.totalorder %v4393_v31, 14 }
 0x3b2   :  { %9426 = vst [vmem:[#allocation21_spill] sm:$0xff] %v9425_v60  ;;  %v1588_v13 = vsel %vm9429_vm14, %v1586_v36, 0.0  ;;  %vm9430_vm7 = vcmp.lt.s32.totalorder %v4396_v37, 14  ;;  %v1603_v39 = vsel %vm8687_vm13, %v1600_v32, %v1602_v9  ;;  %v1604_v3 = vsel %vm8687_vm13, %v1602_v9, %v1600_v32  ;;  %v9449_v36 = vld [vmem:[#allocation153_spill] sm:$0xff] }
 0x3b3   :  { %v1589_v6 = vsel %vm9430_vm7, %v1587_v18, 0.0  ;;  %vm9431_vm15 = vcmp.lt.s32.totalorder %v4554_v1, 14  ;;  %vm9432_vm5 = vcmp.ge.s32.totalorder %v4554_v1, 4294967294  ;;  %v9433_v63 = vmov 0 }
 0x3b4   :  { %vm6334_vm2 = vmand %vm9432_vm5, %vm9431_vm15  ;;  %v1606_v2 = vmul.f32 %v9436_v28, %v1597_v46  ;;  %v1607_v26 = vmul.f32 %v9436_v28, %v1598_v7  ;;  %v1609_v18 = vmul.f32 %v9437_v5, %v1603_v39  ;;  %v1610_v61 = vmul.f32 %v9437_v5, %v1604_v3 }
 0x3b5   :  { %v9434_v63 = vsel %vm6334_vm2, 4294967295, %v9433_v63  ;;  %vm9438_vm14 = vcmp.lt.s32.totalorder %v4576_v35, 14  ;;  %vm9439_vm7 = vcmp.ge.s32.totalorder %v4576_v35, 4294967294  ;;  %v9440_v30 = vmov 0 }
 0x3b6   :  { %9435 = vst [vmem:[#allocation167_spill] sm:$0xff] %v9434_v63  ;;  %vm6346_vm3 = vmand %vm9439_vm7, %vm9438_vm14  ;;  %v1265_v19 = vadd.f32 %v1263_v41, %v6087_v42  ;;  %v1266_v52 = vadd.f32 %v1264_v51, %v6089_v44  ;;  %v1565_v23 = vadd.f32 %v1563_v25, %v1540_v34  ;;  %v1566_v33 = vadd.f32 %v1564_v15, %v1541_v11 }
 0x3b7   :  { %v9441_v30 = vsel %vm6346_vm3, 4294967295, %v9440_v30  ;;  %vm9443_vm15 = vcmp.lt.s32.totalorder %v4554_v1, 15  ;;  %vm9444_vm5 = vcmp.ge.s32.totalorder %v4554_v1, 4294967295  ;;  %v9445_v8 = vmov 0 }
 0x3b8   :  { %9442 = vst [vmem:[#allocation165_spill] sm:$0xff] %v9441_v30  ;;  %vm6356_vm13 = vmand %vm9444_vm5, %vm9443_vm15  ;;  %v930_v16 = vsel %vm6300_vm0, %v9448_v40, 0.0  ;;  %v931_v42 = vsel %vm6314_vm6, %v9449_v36, 0.0  ;;  %v1611_v41 = vadd.f32 %v1609_v18, %v1606_v2  ;;  %v1612_v44 = vadd.f32 %v1610_v61, %v1607_v26  ;;  %v9473_v26 = vld [vmem:[#allocation133_spill] sm:$0xff] }
 0x3b9   :  { %v9446_v8 = vsel %vm6356_vm13, 4294967295, %v9445_v8  ;;  %vm9450_vm14 = vcmp.lt.s32.totalorder %v4576_v35, 15  ;;  %vm9451_vm7 = vcmp.ge.s32.totalorder %v4576_v35, 4294967295  ;;  %v9452_v51 = vmov 0 }
 0x3ba   :  { %9447 = vst [vmem:[#allocation28_spill] sm:$0xff] %v9446_v8  ;;  %vm6370_vm1 = vmand %vm9451_vm7, %vm9450_vm14  ;;  %v1590_v45 = vadd.f32 %v1588_v13, %v1565_v23  ;;  %v1591_v57 = vadd.f32 %v1589_v6, %v1566_v33  ;;  %v1442_v46 = vsel %vm6334_vm2, %v1440_v17, 0.0  ;;  %v1443_v7 = vsel %vm6346_vm3, %v1441_v38, 0.0  ;;  %v9476_v23 = vld [vmem:[#allocation82_spill] sm:$0xff] }
 0x3bb   :  { %v9453_v51 = vsel %vm6370_vm1, 4294967295, %v9452_v51  ;;  %vm9455_vm15 = vcmp.lt.s32.totalorder %v4554_v1, 13  ;;  %vm9456_vm5 = vcmp.ge.s32.totalorder %v4554_v1, 4294967293  ;;  %v9457_v34 = vmov 0 }
 0x3bc   :  { %9454 = vst [vmem:[#allocation23_spill] sm:$0xff] %v9453_v51  ;;  %vm6382_vm6 = vmand %vm9456_vm5, %vm9455_vm15  ;;  %vm9460_vm14 = vcmp.lt.s32.totalorder %v4393_v31, 13  ;;  %vm9461_vm7 = vcmp.lt.s32.totalorder %v4396_v37, 13  ;;  %v9462_v17 = vsel %vm6055_vm8, %v5994_v20, 0.0  ;;  %v9463_v38 = vsel %vm6033_vm12, %v5992_v58, 0.0  ;;  %v9470_v58 = vld [vmem:[#allocation78_spill] sm:$0xff] }
 0x3bd   :  { %v9458_v34 = vsel %vm6382_vm6, 4294967295, %v9457_v34  ;;  %v1613_v11 = vsel %vm9460_vm14, %v1611_v41, 0.0  ;;  %v1614_v25 = vsel %vm9461_vm7, %v1612_v44, 0.0  ;;  %v1622_v15 = vadd.f32 %v9462_v17, %v931_v42 }
 0x3be   :  { %9459 = vst [vmem:[#allocation176_spill] sm:$0xff] %v9458_v34  ;;  %v1621_v1 = vadd.f32 %v9463_v38, %v930_v16  ;;  %vm9464_vm15 = vcmp.lt.s32.totalorder %v4576_v35, 13  ;;  %vm9465_vm5 = vcmp.ge.s32.totalorder %v4576_v35, 4294967293  ;;  %v9466_v32 = vmov 0  ;;  %v9479_v16 = vld [vmem:[#allocation134_spill] sm:$0xff] }
 0x3bf   :  { %vm6402_vm0 = vmand %vm9465_vm5, %vm9464_vm15  ;;  %v1615_v9 = vadd.f32 %v1613_v11, %v1590_v45  ;;  %v1616_v13 = vadd.f32 %v1614_v25, %v1591_v57  ;;  %v1267_v6 = vsel %vm6356_vm13, %v1265_v19, 0.0  ;;  %v1268_v20 = vsel %vm6370_vm1, %v1266_v52, 0.0 }
 0x3c0   :  { %v9467_v32 = vsel %vm6402_vm0, 4294967295, %v9466_v32  ;;  %v9471_v3 = vsel %vm5381_vm9, %v9470_v58, 0.0  ;;  %v9474_v35 = vsel %vm5580_vm4, %v9473_v26, 0.0  ;;  %v9477_v33 = vsel %vm5403_vm10, %v9476_v23, 0.0 }
 0x3c1   :  { %9468 = vst [vmem:[#allocation26_spill] sm:$0xff] %v9467_v32  ;;  %v1619_v18 = vadd.f32 %v9474_v35, %v9471_v3  ;;  %v9480_v19 = vsel %vm5624_vm11, %v9479_v16, 0.0  ;;  %v1623_v42 = vadd.f32 %v1442_v46, %v1267_v6  ;;  %v1624_v52 = vadd.f32 %v1443_v7, %v1268_v20 }
 0x3c2   :  { %v1620_v36 = vadd.f32 %v9480_v19, %v9477_v33  ;;  %v1617_v41 = vsel %vm6382_vm6, %v1615_v9, 0.0  ;;  %v1618_v44 = vsel %vm6402_vm0, %v1616_v13, 0.0  ;;  %v6433_v17 = vstv %s9481_s22  ;;  %s9514_s22 = smov 51  }
 0x3c3   :  { %v1625_v57 = vadd.f32 %v1621_v1, %v1619_v18  ;;  %v1627_v11 = vadd.f32 %v1623_v42, %v1617_v41  ;;  %v1628_v25 = vadd.f32 %v1624_v52, %v1618_v44  ;;  %9482 = vst [vmem:[#allocation177_spill] sm:$0xff] %v6433_v17  ;;  %v9483_v3 = vlaneseq  ;;  %v1681_v23 = vpop.xlane.xlu0 %1680  ;;  %v9486_v52 = vld [vmem:[#allocation13_spill] sm:$0xff]  ;;  %v9487_v44 = vld [vmem:[#allocation19_spill] sm:$0xff] }
 0x3c4   :  { %v1626_v45 = vadd.f32 %v1622_v15, %v1620_v36  ;;  %v9485_v36 = vld [vmem:[#allocation17_spill] sm:$0xff]  ;;  %vm9494_vm14 = vcmask 15360   ;;  %vm9745_vm10 = vcmp.ge.s32.totalorder %v4396_v37, 2 }
 0x3c5   :  { %v1629_v58 = vadd.f32 %v1627_v11, %v1625_v57  ;;  %v1647_v26 = vshrl.u32 %v9483_v3, 7  ;;  %v9488_v11 = vld [vmem:[#allocation15_spill] sm:$0xff]  ;;  %vm9495_vm7 = vmmov %vm9494_vm14 }
 0x3c6   :  { %v1630_v38 = vadd.f32 %v1628_v25, %v1626_v45  ;;  %vm9496_vm15 = vmmov %vm9495_vm7 }
 0x3c7   :  { %v1632_v7 = vadd.f32 %v6433_v17, %v1629_v58  ;;  %v6438_v35 = vsub.s32 0, %v1647_v26  ;;  %v1687_v57 = vpop.xlane.xlu0 %1686  ;;  %v3174_v26 = vld [vmem:[%s9493_s3] sm:$0xff]  ;;  %vm9497_vm5 = vmmov %vm9495_vm7 }
 0x3c8   :  { %v1633_v46 = vadd.f32 %v6433_v17, %v1630_v38  ;;  %v9489_v38 = vld [vmem:[#allocation16_spill] sm:$0xff]  ;;  %v1693_v3 = vmul.f32 0.00390625, %v1687_v57  ;;  %vm9498_vm0 = vmmov %vm9497_vm5 }
 0x3c9   :  { %v3066_v9 = vmul.f32 -1.442695, %v1632_v7  ;;  %9484 = vst [vmem:[#allocation37_spill] sm:$0xff] %v6438_v35  ;;  %vm9499_vm6 = vmmov %vm9498_vm0 }
 0x3ca   :  { %v3067_v6 = vmul.f32 -1.442695, %v1633_v46  ;;  %v9490_v46 = vld [vmem:[#allocation12_spill] sm:$0xff] }
 0x3cc   :  { %3142 = vpow2.f32 %v3067_v6  ;;  %v9491_v6 = vld [vmem:[#allocation18_spill] sm:$0xff] }
 0x3cd   :  { %3144 = vpow2.f32 %v3066_v9 }
 0x3d9   :  { %v3143_v13 = vpop.eup %3142 }
 0x3da   :  { %v3145_v15 = vpop.eup %3144  ;;  %v1641_v1 = vadd.f32 1.0, %v3143_v13  ;;  %v9492_v13 = vld [vmem:[#allocation14_spill] sm:$0xff] }
 0x3db   :  { %v1640_v20 = vadd.f32 1.0, %v3145_v15 }
 0x3dc   :  { %3146 = vrcp.f32 %v1641_v1  ;;  %v1691_v1 = vmul.f32 0.00390625, %v1681_v23  ;;  %v3176_v23 = vld [vmem:[%s9493_s3 + $0x8] sm:$0xff] }
 0x3dd   :  { %3148 = vrcp.f32 %v1640_v20  ;;  %v1690_v20 = vpop.xlane.xlu0 %1689 }
 0x3e9   :  { %v3147_v18 = vpop.eup %3146 }
 0x3ea   :  { %v3149_v33 = vpop.eup %3148  ;;  %v1653_v16 = vrot.slane %v3147_v18, %v6438_v35  ;;  %v1707_v18 = vmul.f32 %v3174_v26, %v1691_v1 }
 0x3eb   :  { %v1649_v19 = vrot.slane %v3149_v33, %v6438_v35  ;;  %v1684_v33 = vpop.xlane.xlu1 %1683 }
 0x3ec   :  { %v1655_v42 = vmul.f32 %v1653_v16, %v9485_v36  ;;  %v1657_v41 = vmul.f32 %v1653_v16, %v9486_v52  ;;  %v1659_v45 = vmul.f32 %v1653_v16, %v9487_v44  ;;  %v1661_v25 = vmul.f32 %v1653_v16, %v9488_v11  ;;  %v1697_v16 = vpop.xlane.xlu0 %1696 }
 0x3ed   :  { %v1654_v58 = vmul.f32 %v1649_v19, %v9489_v38  ;;  %v1656_v7 = vmul.f32 %v1649_v19, %v9490_v46  ;;  %v1658_v9 = vmul.f32 %v1649_v19, %v9491_v6  ;;  %v1660_v15 = vmul.f32 %v1649_v19, %v9492_v13  ;;  %v3175_v19 = vld [vmem:[%s9493_s3 + $0x10] sm:$0xff] }
 0x3ee   :  { %1663 = vst [vmem:[#allocation8 + $0x8] sm:$0xff] %v1655_v42  ;;  %1665 = vst [vmem:[#allocation8 + $0x18] sm:$0xff] %v1657_v41  ;;  %v1694_v36 = vmul.f32 0.00390625, %v1690_v20  ;;  %v1692_v42 = vmul.f32 0.00390625, %v1684_v33  ;;  %v1709_v52 = vmul.f32 %v3175_v19, %v1693_v3  ;;  %v1724_v44 = vmul.f32 %v3174_v26, %v1697_v16 }
 0x3ef   :  { %1667 = vst [vmem:[#allocation8 + $0x28] sm:$0xff] %v1659_v45  ;;  %1669 = vst [vmem:[#allocation8 + $0x38] sm:$0xff] %v1661_v25  ;;  %v1711_v45 = vsel %vm9494_vm14, %v1707_v18, 0.0  ;;  %v1700_v57 = vpop.xlane.xlu1 %1699  ;;  %v3177_v25 = vld [vmem:[%s9493_s3 + $0x18] sm:$0xff]  ;;  %s9517_s3 = smov 48  }
 0x3f0   :  { %1662 = vst [vmem:[#allocation8] sm:$0xff] %v1654_v58  ;;  %1664 = vst [vmem:[#allocation8 + $0x10] sm:$0xff] %v1656_v7  ;;  %v1708_v41 = vmul.f32 %v3176_v23, %v1692_v42  ;;  %v1703_v11 = vpop.xlane.xlu0 %1702  ;;  %v1710_v38 = vmul.f32 %v3177_v25, %v1694_v36  ;;  %v1725_v46 = vmul.f32 %v3176_v23, %v1700_v57  ;;  %v1728_v13 = vsel %vm9497_vm5, %v1724_v44, 0.0 }
 0x3f1   :  { %1666 = vst [vmem:[#allocation8 + $0x20] sm:$0xff] %v1658_v9  ;;  %1668 = vst [vmem:[#allocation8 + $0x30] sm:$0xff] %v1660_v15  ;;  %v1726_v7 = vmul.f32 %v3175_v19, %v1703_v11  ;;  %v1714_v9 = vsel %vm9496_vm15, %v1709_v52, 0.0 }
 0x3f2   :  { %v1712_v58 = vsel %vm9495_vm7, %v1708_v41, 0.0  ;;  %v1729_v15 = vsel %vm9498_vm0, %v1725_v46, 0.0  ;;  %vm9500_vm14 = vmmov %vm9498_vm0 }
 0x3f3   :  { %v1713_v6 = vadd.f32 %v1712_v58, %v1711_v45  ;;  %v1731_v1 = vsel %vm9499_vm6, %v1726_v7, 0.0  ;;  %v1730_v3 = vadd.f32 %v1729_v15, %v1728_v13  ;;  %v1706_v26 = vpop.xlane.xlu1 %1705  ;;  %v1716_v18 = vsel %vm9500_vm14, %v1710_v38, 0.0  ;;  %vm9501_vm7 = vmmov %vm9498_vm0  ;;  %v3178_v15 = vld [vmem:[%s9502_s7 + $0x8] sm:$0xff] }
 0x3f4   :  { %v1727_v33 = vmul.f32 %v3177_v25, %v1706_v26  ;;  %vm9503_vm6 = vmmov %vm9498_vm0  ;;  %vm9606_vm14 = vcmp.lt.s32.totalorder %v4008_v48, 2 }
 0x3f5   :  { %v1715_v20 = vadd.f32 %v1714_v9, %v1713_v6  ;;  %v1732_v36 = vadd.f32 %v1731_v1, %v1730_v3  ;;  %vm9504_vm15 = vmmov %vm9498_vm0 }
 0x3f6   :  { %v1733_v42 = vsel %vm9501_vm7, %v1727_v33, 0.0  ;;  %v3180_v33 = vld [vmem:[%s9502_s7 + $0x18] sm:$0xff]  ;;  %vm9505_vm5 = vmmov %vm9498_vm0 }
 0x3f7   :  { %v1717_v16 = vadd.f32 %v1716_v18, %v1715_v20  ;;  %v1734_v23 = vadd.f32 %v1733_v42, %v1732_v36  ;;  %v3179_v20 = vld [vmem:[%s9502_s7] sm:$0xff]  ;;  %v3181_v36 = vld [vmem:[%s9502_s7 + $0x10] sm:$0xff]  ;;  %s9526_s7 = smov 30   ;;  %vm9607_vm7 = vmmov %vm9606_vm14 }
 0x3f9   :  { %v1718_v19 = vrot.slane %v1717_v16, 4  ;;  %v1735_v52 = vrot.slane %v1734_v23, 4 }
 0x3fb   :  { %v1719_v41 = vadd.f32 %v1718_v19, %v1717_v16  ;;  %v1736_v44 = vadd.f32 %v1735_v52, %v1734_v23 }
 0x3fd   :  { %v1720_v45 = vrot.slane %v1719_v41, 2  ;;  %v1737_v11 = vrot.slane %v1736_v44, 2 }
 0x3ff   :  { %v1721_v57 = vadd.f32 %v1720_v45, %v1719_v41  ;;  %v1738_v58 = vadd.f32 %v1737_v11, %v1736_v44 }
 0x401   :  { %v1722_v46 = vrot.slane %v1721_v57, 1  ;;  %v1739_v7 = vrot.slane %v1738_v58, 1 }
 0x403   :  { %v1723_v6 = vadd.f32 %v1722_v46, %v1721_v57  ;;  %v1740_v9 = vadd.f32 %v1739_v7, %v1738_v58 }
 0x405   :  { %v1742_v13 = vmax.f32 %v1740_v9, 0.0  ;;  %v1741_v38 = vmax.f32 %v1723_v6, 0.0 }
 0x407   :  { %v1743_v25 = vadd.f32 %v1742_v13, %v1741_v38 }
 0x409   :  { %v1745_v1 = vmul.f32 %v3178_v15, %v1743_v25  ;;  %v1744_v3 = vmul.f32 %v3179_v20, %v1743_v25  ;;  %v1747_v16 = vmul.f32 %v3180_v33, %v1743_v25  ;;  %v1746_v42 = vmul.f32 %v3181_v36, %v1743_v25  ;;  %v3183_v33 = vld [vmem:[#allocation3 + $0x58] sm:$0xff]  ;;  %v3184_v36 = vld [vmem:[#allocation3 + $0x40] sm:$0xff] }
 0x40b   :  { %v1751_v26 = vsel %vm9498_vm0, %v1745_v1, 0.0  ;;  %v1748_v18 = vsel %vm9503_vm6, %v1744_v3, 0.0  ;;  %v1757_v19 = vsel %vm9504_vm15, %v1747_v16, 0.0  ;;  %v1754_v23 = vsel %vm9505_vm5, %v1746_v42, 0.0  ;;  %vm9610_vm15 = vmmov %vm9607_vm7 }
 0x40c   :  { %1752 = vadd.xlane.f32.xlu1 %v1751_v26  ;;  %1749 = vadd.xlane.f32.xlu0 %v1748_v18  ;;  %v3182_v26 = vld [vmem:[#allocation3 + $0x50] sm:$0xff]  ;;  %vm9608_vm0 = vcmp.lt.s32.totalorder %v4008_v48, 3  ;;  %vm9611_vm5 = vmmov %vm9607_vm7 }
 0x40d   :  { %vm9609_vm6 = vmmov %vm9608_vm0 }
 0x410   :  { %1758 = vadd.xlane.f32.xlu1 %v1757_v19  ;;  %1755 = vadd.xlane.f32.xlu0 %v1754_v23  ;;  %v3185_v19 = vld [vmem:[#allocation3 + $0x48] sm:$0xff] }
 0x495   :  { %v1753_v41 = vpop.xlane.xlu1 %1752  ;;  %v1750_v52 = vpop.xlane.xlu0 %1749 }
 0x496   :  { %v3069_v45 = vmul.f32 -1.442695, %v1753_v41  ;;  %v3068_v44 = vmul.f32 -1.442695, %v1750_v52 }
 0x498   :  { %3150 = vpow2.f32 %v3069_v45  ;;  %v3186_v45 = vld [vmem:[#allocation3 + $0x70] sm:$0xff] }
 0x499   :  { %3152 = vpow2.f32 %v3068_v44  ;;  %v1759_v57 = vpop.xlane.xlu1 %1758  ;;  %v1756_v11 = vpop.xlane.xlu0 %1755 }
 0x49a   :  { %v3071_v58 = vmul.f32 -1.442695, %v1759_v57  ;;  %v3070_v46 = vmul.f32 -1.442695, %v1756_v11  ;;  %v3187_v57 = vld [vmem:[#allocation3 + $0x78] sm:$0xff] }
 0x49c   :  { %3154 = vpow2.f32 %v3071_v58 }
 0x49d   :  { %3156 = vpow2.f32 %v3070_v46 }
 0x4a5   :  { %v3151_v7 = vpop.eup %3150 }
 0x4a6   :  { %v3153_v6 = vpop.eup %3152  ;;  %v1773_v9 = vadd.f32 1.0, %v3151_v7  ;;  %v3188_v7 = vld [vmem:[#allocation3 + $0x60] sm:$0xff] }
 0x4a7   :  { %v1772_v13 = vadd.f32 1.0, %v3153_v6 }
 0x4a8   :  { %3158 = vrcp.f32 %v1773_v9  ;;  %v3189_v9 = vld [vmem:[#allocation3 + $0x68] sm:$0xff] }
 0x4a9   :  { %v3155_v38 = vpop.eup %3154  ;;  %3160 = vrcp.f32 %v1772_v13 }
 0x4aa   :  { %v3157_v25 = vpop.eup %3156  ;;  %v1775_v15 = vadd.f32 1.0, %v3155_v38 }
 0x4ab   :  { %v1774_v1 = vadd.f32 1.0, %v3157_v25 }
 0x4ac   :  { %3162 = vrcp.f32 %v1775_v15 }
 0x4ad   :  { %3164 = vrcp.f32 %v1774_v1 }
 0x4b5   :  { %v3159_v20 = vpop.eup %3158 }
 0x4b6   :  { %v3161_v3 = vpop.eup %3160  ;;  %v6486_v18 = vmul.f32 %v3182_v26, %v3159_v20  ;;  %v6488_v16 = vmul.f32 %v3183_v33, %v3159_v20 }
 0x4b7   :  { %v6490_v42 = vmul.f32 %v3184_v36, %v3161_v3  ;;  %v6492_v23 = vmul.f32 %v3185_v19, %v3161_v3 }
 0x4b8   :  { %9506 = vst [vmem:[#allocation168_spill] sm:$0xff] %v6486_v18  ;;  %9507 = vst [vmem:[#allocation170_spill] sm:$0xff] %v6488_v16 }
 0x4b9   :  { %9508 = vst [vmem:[#allocation47_spill] sm:$0xff] %v6490_v42  ;;  %9509 = vst [vmem:[#allocation43_spill] sm:$0xff] %v6492_v23  ;;  %v3163_v41 = vpop.eup %3162  ;;  %v1792_v58 = vadd.f32 %v6486_v18, %v6490_v42  ;;  %v1801_v46 = vadd.f32 %v6488_v16, %v6492_v23 }
 0x4ba   :  { %v3165_v52 = vpop.eup %3164  ;;  %v6494_v44 = vmul.f32 %v3186_v45, %v3163_v41  ;;  %v6496_v11 = vmul.f32 %v3187_v57, %v3163_v41 }
 0x4bb   :  { %v6502_v6 = vmul.f32 %v3188_v7, %v3165_v52  ;;  %v6504_v13 = vmul.f32 %v3189_v9, %v3165_v52 }
 0x4bc   :  { %9510 = vst [vmem:[#allocation171_spill] sm:$0xff] %v6494_v44  ;;  %9511 = vst [vmem:[#allocation68_spill] sm:$0xff] %v6496_v11  ;;  %v1813_v38 = vmax.f32 %v6486_v18, %v6494_v44  ;;  %v1822_v25 = vmax.f32 %v6488_v16, %v6496_v11 }
 0x4bd   :  { %9512 = vst [vmem:[#allocation172_spill] sm:$0xff] %v6502_v6  ;;  %9513 = vst [vmem:[#allocation180_spill] sm:$0xff] %v6504_v13  ;;  %v1793_v15 = vadd.f32 %v1792_v58, %v6502_v6  ;;  %v1802_v1 = vadd.f32 %v1801_v46, %v6504_v13  ;;  %v1812_v20 = vmax.f32 %v6490_v42, %v6502_v6 }
 0x4be   :  { %v1821_v3 = vmax.f32 %v6492_v23, %v6504_v13 }
 0x4bf   :  { %v1794_v26 = vadd.f32 %v1793_v15, %v6494_v44  ;;  %v1803_v33 = vadd.f32 %v1802_v1, %v6496_v11  ;;  %v1814_v36 = vmax.f32 %v1812_v20, %v1813_v38 }
 0x4c0   :  { %v1823_v19 = vmax.f32 %v1821_v3, %v1822_v25 }
 0x4c1   :  { %v1795_v41 = vrot.slane %v1794_v26, 4  ;;  %v1804_v52 = vrot.slane %v1803_v33, 4  ;;  %v1815_v45 = vrot.slane %v1814_v36, 4 }
 0x4c2   :  { %v1824_v57 = vrot.slane %v1823_v19, 4 }
 0x4c3   :  { %v1796_v7 = vadd.f32 %v1795_v41, %v1794_v26  ;;  %v1805_v58 = vadd.f32 %v1804_v52, %v1803_v33  ;;  %v1816_v9 = vmax.f32 %v1814_v36, %v1815_v45 }
 0x4c4   :  { %v1825_v6 = vmax.f32 %v1823_v19, %v1824_v57 }
 0x4c5   :  { %v1797_v46 = vrot.slane %v1796_v7, 2  ;;  %v1806_v16 = vrot.slane %v1805_v58, 2  ;;  %v1817_v18 = vrot.slane %v1816_v9, 2 }
 0x4c6   :  { %v1826_v44 = vrot.slane %v1825_v6, 2 }
 0x4c7   :  { %v1798_v42 = vadd.f32 %v1797_v46, %v1796_v7  ;;  %v1807_v35 = vadd.f32 %v1806_v16, %v1805_v58  ;;  %v1818_v15 = vmax.f32 %v1816_v9, %v1817_v18 }
 0x4c8   :  { %v1827_v26 = vmax.f32 %v1825_v6, %v1826_v44 }
 0x4c9   :  { %v1799_v13 = vrot.slane %v1798_v42, 1  ;;  %v1808_v23 = vrot.slane %v1807_v35, 1  ;;  %v1819_v3 = vrot.slane %v1818_v15, 1 }
 0x4ca   :  { %v1828_v16 = vrot.slane %v1827_v26, 1 }
 0x4cb   :  { %v1800_v1 = vadd.f32 %v1799_v13, %v1798_v42  ;;  %v1809_v38 = vadd.f32 %v1808_v23, %v1807_v35  ;;  %v6526_v33 = vmax.f32 %v1818_v15, %v1819_v3 }
 0x4cc   :  { %v6532_v35 = vmax.f32 %v1827_v26, %v1828_v16 }
 0x4cd   :  { %v6518_v25 = vmul.f32 0.03125, %v1800_v1  ;;  %v6520_v20 = vmul.f32 0.03125, %v1809_v38 }
 0x4cf   :  { %1832 = vrot.lane.b32.xlu1 %v6520_v20, %s9514_s22  ;;  %1830 = vrot.lane.b32.xlu0 %v6518_v25, %s9514_s22 }
 0x4d3   :  { %1836 = vrot.lane.b32.xlu1 %v6526_v33, %s9514_s22  ;;  %1850 = vrot.lane.b32.xlu0 %v6518_v25, %s9515_s23 }
 0x4d7   :  { %1838 = vrot.lane.b32.xlu1 %v6532_v35, %s9514_s22  ;;  %1856 = vrot.lane.b32.xlu0 %v6526_v33, %s9515_s23  ;;  %s9533_s22 = smov 14  }
 0x4db   :  { %1852 = vrot.lane.b32.xlu1 %v6520_v20, %s9515_s23  ;;  %1872 = vrot.lane.b32.xlu0 %v6518_v25, %s9516_s26 }
 0x4df   :  { %1858 = vrot.lane.b32.xlu1 %v6532_v35, %s9515_s23  ;;  %1878 = vrot.lane.b32.xlu0 %v6526_v33, %s9516_s26  ;;  %s9534_s23 = smov 13  }
 0x4e3   :  { %1874 = vrot.lane.b32.xlu1 %v6520_v20, %s9516_s26  ;;  %1894 = vrot.lane.b32.xlu0 %v6518_v25, %s9517_s3 }
 0x4e7   :  { %1880 = vrot.lane.b32.xlu1 %v6532_v35, %s9516_s26  ;;  %1900 = vrot.lane.b32.xlu0 %v6526_v33, %s9517_s3  ;;  %s9536_s26 = smov 3  }
 0x4eb   :  { %1896 = vrot.lane.b32.xlu1 %v6520_v20, %s9517_s3  ;;  %1916 = vrot.lane.b32.xlu0 %v6518_v25, %s9518_s0 }
 0x4ef   :  { %1902 = vrot.lane.b32.xlu1 %v6532_v35, %s9517_s3  ;;  %1922 = vrot.lane.b32.xlu0 %v6526_v33, %s9518_s0  ;;  %s9540_s3 = smov 2  }
 0x4f3   :  { %1918 = vrot.lane.b32.xlu1 %v6520_v20, %s9518_s0  ;;  %1938 = vrot.lane.b32.xlu0 %v6518_v25, %s9519_s9 }
 0x4f7   :  { %1924 = vrot.lane.b32.xlu1 %v6532_v35, %s9518_s0  ;;  %1944 = vrot.lane.b32.xlu0 %v6526_v33, %s9519_s9  ;;  %s9544_s0 = smov 1  }
 0x4fb   :  { %1940 = vrot.lane.b32.xlu1 %v6520_v20, %s9519_s9  ;;  %1960 = vrot.lane.b32.xlu0 %v6518_v25, %s9520_s10 }
 0x4ff   :  { %1946 = vrot.lane.b32.xlu1 %v6532_v35, %s9519_s9  ;;  %1966 = vrot.lane.b32.xlu0 %v6526_v33, %s9520_s10  ;;  %s9549_s9 = smov 127  }
 0x503   :  { %1962 = vrot.lane.b32.xlu1 %v6520_v20, %s9520_s10  ;;  %1984 = vrot.lane.b32.xlu0 %v6518_v25, %s9521_s12 }
 0x507   :  { %1968 = vrot.lane.b32.xlu1 %v6532_v35, %s9520_s10  ;;  %1990 = vrot.lane.b32.xlu0 %v6526_v33, %s9521_s12  ;;  %s9554_s10 = smov 126  }
 0x50b   :  { %1986 = vrot.lane.b32.xlu1 %v6520_v20, %s9521_s12  ;;  %2004 = vrot.lane.b32.xlu0 %v6518_v25, %s9522_s14 }
 0x50f   :  { %1992 = vrot.lane.b32.xlu1 %v6532_v35, %s9521_s12  ;;  %2010 = vrot.lane.b32.xlu0 %v6526_v33, %s9522_s14  ;;  %s9559_s12 = smov 125  }
 0x513   :  { %2006 = vrot.lane.b32.xlu1 %v6520_v20, %s9522_s14  ;;  %2026 = vrot.lane.b32.xlu0 %v6518_v25, %s9523_s17 }
 0x517   :  { %2012 = vrot.lane.b32.xlu1 %v6532_v35, %s9522_s14  ;;  %2032 = vrot.lane.b32.xlu0 %v6526_v33, %s9523_s17  ;;  %s9564_s14 = smov 115  }
 0x51b   :  { %2028 = vrot.lane.b32.xlu1 %v6520_v20, %s9523_s17  ;;  %2048 = vrot.lane.b32.xlu0 %v6518_v25, %s9524_s18 }
 0x51f   :  { %2034 = vrot.lane.b32.xlu1 %v6532_v35, %s9523_s17  ;;  %2054 = vrot.lane.b32.xlu0 %v6526_v33, %s9524_s18  ;;  %s9569_s17 = smov 114  }
 0x523   :  { %2050 = vrot.lane.b32.xlu1 %v6520_v20, %s9524_s18  ;;  %2070 = vrot.lane.b32.xlu0 %v6518_v25, %s9525_s6 }
 0x527   :  { %2056 = vrot.lane.b32.xlu1 %v6532_v35, %s9524_s18  ;;  %2076 = vrot.lane.b32.xlu0 %v6526_v33, %s9525_s6  ;;  %s9574_s18 = smov 113  }
 0x52b   :  { %2072 = vrot.lane.b32.xlu1 %v6520_v20, %s9525_s6  ;;  %2092 = vrot.lane.b32.xlu0 %v6518_v25, %s9526_s7 }
 0x52f   :  { %2078 = vrot.lane.b32.xlu1 %v6532_v35, %s9525_s6  ;;  %2098 = vrot.lane.b32.xlu0 %v6526_v33, %s9526_s7  ;;  %s9579_s6 = smov 112  }
 0x533   :  { %2094 = vrot.lane.b32.xlu1 %v6520_v20, %s9526_s7  ;;  %2114 = vrot.lane.b32.xlu0 %v6518_v25, %s9527_s28 }
 0x537   :  { %2100 = vrot.lane.b32.xlu1 %v6532_v35, %s9526_s7  ;;  %2120 = vrot.lane.b32.xlu0 %v6526_v33, %s9527_s28  ;;  %s9584_s7 = smov 111  }
 0x53b   :  { %2116 = vrot.lane.b32.xlu1 %v6520_v20, %s9527_s28  ;;  %2138 = vrot.lane.b32.xlu0 %v6518_v25, %s9528_s21 }
 0x53f   :  { %2122 = vrot.lane.b32.xlu1 %v6532_v35, %s9527_s28  ;;  %2144 = vrot.lane.b32.xlu0 %v6526_v33, %s9528_s21  ;;  %s9589_s28 = smov 110  }
 0x541   :  { %v6642_v18 = vpop.permute.xlu1 %1832  ;;  %v6644_v42 = vpop.permute.xlu0 %1830 }
 0x543   :  { %2140 = vrot.lane.b32.xlu1 %v6520_v20, %s9528_s21  ;;  %2158 = vrot.lane.b32.xlu0 %v6518_v25, %s9529_s24 }
 0x545   :  { %v6650_v23 = vpop.permute.xlu1 %1836  ;;  %v6652_v44 = vpop.permute.xlu0 %1850 }
 0x547   :  { %2146 = vrot.lane.b32.xlu1 %v6532_v35, %s9528_s21  ;;  %2164 = vrot.lane.b32.xlu0 %v6526_v33, %s9529_s24  ;;  %s9594_s21 = smov 99  }
 0x549   :  { %v6658_v6 = vpop.permute.xlu1 %1838  ;;  %v6660_v13 = vpop.permute.xlu0 %1856 }
 0x54b   :  { %2160 = vrot.lane.b32.xlu1 %v6520_v20, %s9529_s24  ;;  %2180 = vrot.lane.b32.xlu0 %v6518_v25, %s9530_s19 }
 0x54d   :  { %v6666_v36 = vpop.permute.xlu1 %1852  ;;  %v6668_v19 = vpop.permute.xlu0 %1872 }
 0x54f   :  { %2166 = vrot.lane.b32.xlu1 %v6532_v35, %s9529_s24  ;;  %2186 = vrot.lane.b32.xlu0 %v6526_v33, %s9530_s19  ;;  %s9599_s24 = smov 98  }
 0x551   :  { %v6674_v41 = vpop.permute.xlu1 %1858  ;;  %v6676_v52 = vpop.permute.xlu0 %1878 }
 0x553   :  { %2182 = vrot.lane.b32.xlu1 %v6520_v20, %s9530_s19  ;;  %2202 = vrot.lane.b32.xlu0 %v6518_v25, %s9531_s25 }
 0x555   :  { %v6682_v45 = vpop.permute.xlu1 %1874  ;;  %v6684_v57 = vpop.permute.xlu0 %1894 }
 0x557   :  { %2188 = vrot.lane.b32.xlu1 %v6532_v35, %s9530_s19  ;;  %2208 = vrot.lane.b32.xlu0 %v6526_v33, %s9531_s25 }
 0x559   :  { %v6690_v7 = vpop.permute.xlu1 %1880  ;;  %v6692_v58 = vpop.permute.xlu0 %1900 }
 0x55b   :  { %2204 = vrot.lane.b32.xlu1 %v6520_v20, %s9531_s25  ;;  %2224 = vrot.lane.b32.xlu0 %v6518_v25, %s9532_s1 }
 0x55d   :  { %v6698_v9 = vpop.permute.xlu1 %1896  ;;  %v6700_v46 = vpop.permute.xlu0 %1916 }
 0x55f   :  { %2210 = vrot.lane.b32.xlu1 %v6532_v35, %s9531_s25  ;;  %2230 = vrot.lane.b32.xlu0 %v6526_v33, %s9532_s1 }
 0x561   :  { %v6706_v15 = vpop.permute.xlu1 %1902  ;;  %v6708_v1 = vpop.permute.xlu0 %1922 }
 0x563   :  { %2226 = vrot.lane.b32.xlu1 %v6520_v20, %s9532_s1  ;;  %2246 = vrot.lane.b32.xlu0 %v6518_v25, %s9533_s22 }
 0x565   :  { %v6714_v38 = vpop.permute.xlu1 %1918  ;;  %v6716_v3 = vpop.permute.xlu0 %1938 }
 0x567   :  { %2232 = vrot.lane.b32.xlu1 %v6532_v35, %s9532_s1  ;;  %2252 = vrot.lane.b32.xlu0 %v6526_v33, %s9533_s22 }
 0x569   :  { %v6722_v26 = vpop.permute.xlu1 %1924  ;;  %v6724_v16 = vpop.permute.xlu0 %1944 }
 0x56b   :  { %2248 = vrot.lane.b32.xlu1 %v6520_v20, %s9533_s22  ;;  %2268 = vrot.lane.b32.xlu0 %v6518_v25, %s9534_s23 }
 0x56d   :  { %v6730_v11 = vpop.permute.xlu1 %1940  ;;  %v6732_v17 = vpop.permute.xlu0 %1960 }
 0x56f   :  { %2254 = vrot.lane.b32.xlu1 %v6532_v35, %s9533_s22  ;;  %2274 = vrot.lane.b32.xlu0 %v6526_v33, %s9534_s23 }
 0x571   :  { %v6738_v32 = vpop.permute.xlu1 %1946  ;;  %v6740_v34 = vpop.permute.xlu0 %1966 }
 0x572   :  { %9535 = vst [vmem:[#allocation48_spill] sm:$0xff] %v6740_v34 }
 0x573   :  { %2270 = vrot.lane.b32.xlu1 %v6520_v20, %s9534_s23  ;;  %2292 = vrot.lane.b32.xlu0 %v6518_v25, %s9536_s26 }
 0x575   :  { %v6746_v61 = vpop.permute.xlu1 %1962  ;;  %v6748_v39 = vpop.permute.xlu0 %1984 }
 0x576   :  { %9537 = vst [vmem:[#allocation178_spill] sm:$0xff] %v6748_v39 }
 0x577   :  { %2276 = vrot.lane.b32.xlu1 %v6532_v35, %s9534_s23  ;;  %2298 = vrot.lane.b32.xlu0 %v6526_v33, %s9536_s26 }
 0x579   :  { %v6754_v60 = vpop.permute.xlu1 %1968  ;;  %v6756_v4 = vpop.permute.xlu0 %1990 }
 0x57a   :  { %9538 = vst [vmem:[#allocation179_spill] sm:$0xff] %v6754_v60  ;;  %9539 = vst [vmem:[#allocation34_spill] sm:$0xff] %v6756_v4  ;;  %v9615_v60 = vld [vmem:[#allocation113_spill] sm:$0xff] }
 0x57b   :  { %2294 = vrot.lane.b32.xlu1 %v6520_v20, %s9536_s26  ;;  %2312 = vrot.lane.b32.xlu0 %v6518_v25, %s9540_s3  ;;  %v9617_v4 = vld [vmem:[#allocation189_spill] sm:$0xff] }
 0x57d   :  { %v6762_v40 = vpop.permute.xlu1 %1986  ;;  %v6764_v2 = vpop.permute.xlu0 %2004 }
 0x57e   :  { %9541 = vst [vmem:[#allocation174_spill] sm:$0xff] %v6764_v2 }
 0x57f   :  { %2300 = vrot.lane.b32.xlu1 %v6532_v35, %s9536_s26  ;;  %2318 = vrot.lane.b32.xlu0 %v6526_v33, %s9540_s3 }
 0x581   :  { %v6770_v59 = vpop.permute.xlu1 %1992  ;;  %v6772_v22 = vpop.permute.xlu0 %2010 }
 0x582   :  { %9542 = vst [vmem:[#allocation36_spill] sm:$0xff] %v6770_v59  ;;  %9543 = vst [vmem:[#allocation38_spill] sm:$0xff] %v6772_v22 }
 0x583   :  { %2314 = vrot.lane.b32.xlu1 %v6520_v20, %s9540_s3  ;;  %2334 = vrot.lane.b32.xlu0 %v6518_v25, %s9544_s0 }
 0x585   :  { %v6778_v5 = vpop.permute.xlu1 %2006  ;;  %v6780_v28 = vpop.permute.xlu0 %2026 }
 0x586   :  { %9545 = vst [vmem:[#allocation67_spill] sm:$0xff] %v6778_v5  ;;  %9546 = vst [vmem:[#allocation25_spill] sm:$0xff] %v6780_v28 }
 0x587   :  { %2320 = vrot.lane.b32.xlu1 %v6532_v35, %s9540_s3  ;;  %2340 = vrot.lane.b32.xlu0 %v6526_v33, %s9544_s0 }
 0x589   :  { %v6786_v62 = vpop.permute.xlu1 %2012  ;;  %v6788_v30 = vpop.permute.xlu0 %2032 }
 0x58a   :  { %9547 = vst [vmem:[#allocation27_spill] sm:$0xff] %v6786_v62  ;;  %9548 = vst [vmem:[#allocation40_spill] sm:$0xff] %v6788_v30 }
 0x58b   :  { %2336 = vrot.lane.b32.xlu1 %v6520_v20, %s9544_s0  ;;  %2366 = vrot.lane.b32.xlu0 %v6518_v25, %s9549_s9 }
 0x58d   :  { %v6794_v63 = vpop.permute.xlu1 %2028  ;;  %v6796_v51 = vpop.permute.xlu0 %2048 }
 0x58e   :  { %9550 = vst [vmem:[#allocation35_spill] sm:$0xff] %v6794_v63  ;;  %9551 = vst [vmem:[#allocation173_spill] sm:$0xff] %v6796_v51  ;;  %v9614_v63 = vld [vmem:[#allocation114_spill] sm:$0xff] }
 0x58f   :  { %2342 = vrot.lane.b32.xlu1 %v6532_v35, %s9544_s0  ;;  %2372 = vrot.lane.b32.xlu0 %v6526_v33, %s9549_s9 }
 0x591   :  { %v6802_v8 = vpop.permute.xlu1 %2034  ;;  %v6804_v27 = vpop.permute.xlu0 %2054 }
 0x592   :  { %9552 = vst [vmem:[#allocation181_spill] sm:$0xff] %v6802_v8  ;;  %9553 = vst [vmem:[#allocation182_spill] sm:$0xff] %v6804_v27 }
 0x593   :  { %2368 = vrot.lane.b32.xlu1 %v6520_v20, %s9549_s9  ;;  %2388 = vrot.lane.b32.xlu0 %v6518_v25, %s9554_s10 }
 0x595   :  { %v6810_v29 = vpop.permute.xlu1 %2050  ;;  %v6812_v55 = vpop.permute.xlu0 %2070 }
 0x596   :  { %9555 = vst [vmem:[#allocation94_spill] sm:$0xff] %v6810_v29  ;;  %9556 = vst [vmem:[#allocation93_spill] sm:$0xff] %v6812_v55 }
 0x597   :  { %2374 = vrot.lane.b32.xlu1 %v6532_v35, %s9549_s9  ;;  %2394 = vrot.lane.b32.xlu0 %v6526_v33, %s9554_s10 }
 0x599   :  { %v6818_v0 = vpop.permute.xlu1 %2056  ;;  %v6820_v54 = vpop.permute.xlu0 %2076 }
 0x59a   :  { %9557 = vst [vmem:[#allocation184_spill] sm:$0xff] %v6818_v0  ;;  %9558 = vst [vmem:[#allocation185_spill] sm:$0xff] %v6820_v54 }
 0x59b   :  { %2390 = vrot.lane.b32.xlu1 %v6520_v20, %s9554_s10  ;;  %2410 = vrot.lane.b32.xlu0 %v6518_v25, %s9559_s12 }
 0x59d   :  { %v6826_v24 = vpop.permute.xlu1 %2072  ;;  %v6828_v50 = vpop.permute.xlu0 %2092 }
 0x59e   :  { %9560 = vst [vmem:[#allocation186_spill] sm:$0xff] %v6826_v24  ;;  %9561 = vst [vmem:[#allocation187_spill] sm:$0xff] %v6828_v50 }
 0x59f   :  { %2396 = vrot.lane.b32.xlu1 %v6532_v35, %s9554_s10  ;;  %2416 = vrot.lane.b32.xlu0 %v6526_v33, %s9559_s12 }
 0x5a1   :  { %v6834_v12 = vpop.permute.xlu1 %2078  ;;  %v6836_v55 = vpop.permute.xlu0 %2098 }
 0x5a2   :  { %9562 = vst [vmem:[#allocation44_spill] sm:$0xff] %v6834_v12  ;;  %9563 = vst [vmem:[#allocation46_spill] sm:$0xff] %v6836_v55 }
 0x5a3   :  { %2412 = vrot.lane.b32.xlu1 %v6520_v20, %s9559_s12  ;;  %2434 = vrot.lane.b32.xlu0 %v6518_v25, %s9564_s14 }
 0x5a5   :  { %v6842_v54 = vpop.permute.xlu1 %2094  ;;  %v6844_v24 = vpop.permute.xlu0 %2114 }
 0x5a6   :  { %9565 = vst [vmem:[#allocation45_spill] sm:$0xff] %v6842_v54  ;;  %9566 = vst [vmem:[#allocation188_spill] sm:$0xff] %v6844_v24 }
 0x5a7   :  { %2418 = vrot.lane.b32.xlu1 %v6532_v35, %s9559_s12  ;;  %2440 = vrot.lane.b32.xlu0 %v6526_v33, %s9564_s14 }
 0x5a9   :  { %v6850_v50 = vpop.permute.xlu1 %2100  ;;  %v6852_v12 = vpop.permute.xlu0 %2120 }
 0x5aa   :  { %9567 = vst [vmem:[#allocation99_spill] sm:$0xff] %v6850_v50  ;;  %9568 = vst [vmem:[#allocation127_spill] sm:$0xff] %v6852_v12 }
 0x5ab   :  { %2436 = vrot.lane.b32.xlu1 %v6520_v20, %s9564_s14  ;;  %2454 = vrot.lane.b32.xlu0 %v6518_v25, %s9569_s17 }
 0x5ad   :  { %v6858_v55 = vpop.permute.xlu1 %2116  ;;  %v6860_v54 = vpop.permute.xlu0 %2138 }
 0x5ae   :  { %9570 = vst [vmem:[#allocation142_spill] sm:$0xff] %v6858_v55  ;;  %9571 = vst [vmem:[#allocation131_spill] sm:$0xff] %v6860_v54 }
 0x5af   :  { %2442 = vrot.lane.b32.xlu1 %v6532_v35, %s9564_s14  ;;  %2460 = vrot.lane.b32.xlu0 %v6526_v33, %s9569_s17 }
 0x5b1   :  { %v6866_v24 = vpop.permute.xlu1 %2122  ;;  %v6868_v50 = vpop.permute.xlu0 %2144 }
 0x5b2   :  { %9572 = vst [vmem:[#allocation190_spill] sm:$0xff] %v6866_v24  ;;  %9573 = vst [vmem:[#allocation191_spill] sm:$0xff] %v6868_v50 }
 0x5b3   :  { %2456 = vrot.lane.b32.xlu1 %v6520_v20, %s9569_s17  ;;  %2476 = vrot.lane.b32.xlu0 %v6518_v25, %s9574_s18 }
 0x5b5   :  { %v6874_v12 = vpop.permute.xlu1 %2140  ;;  %v6876_v55 = vpop.permute.xlu0 %2158 }
 0x5b6   :  { %9575 = vst [vmem:[#allocation73_spill] sm:$0xff] %v6874_v12  ;;  %9576 = vst [vmem:[#allocation197_spill] sm:$0xff] %v6876_v55 }
 0x5b7   :  { %2462 = vrot.lane.b32.xlu1 %v6532_v35, %s9569_s17  ;;  %2482 = vrot.lane.b32.xlu0 %v6526_v33, %s9574_s18 }
 0x5b9   :  { %v6882_v54 = vpop.permute.xlu1 %2146  ;;  %v6884_v24 = vpop.permute.xlu0 %2164 }
 0x5ba   :  { %9577 = vst [vmem:[#allocation198_spill] sm:$0xff] %v6882_v54  ;;  %9578 = vst [vmem:[#allocation195_spill] sm:$0xff] %v6884_v24 }
 0x5bb   :  { %2478 = vrot.lane.b32.xlu1 %v6520_v20, %s9574_s18  ;;  %2498 = vrot.lane.b32.xlu0 %v6518_v25, %s9579_s6 }
 0x5bd   :  { %v6890_v50 = vpop.permute.xlu1 %2160  ;;  %v6892_v12 = vpop.permute.xlu0 %2180 }
 0x5be   :  { %9580 = vst [vmem:[#allocation196_spill] sm:$0xff] %v6890_v50  ;;  %9581 = vst [vmem:[#allocation55_spill] sm:$0xff] %v6892_v12 }
 0x5bf   :  { %2484 = vrot.lane.b32.xlu1 %v6532_v35, %s9574_s18  ;;  %2504 = vrot.lane.b32.xlu0 %v6526_v33, %s9579_s6 }
 0x5c1   :  { %v6898_v55 = vpop.permute.xlu1 %2166  ;;  %v6900_v54 = vpop.permute.xlu0 %2186 }
 0x5c2   :  { %9582 = vst [vmem:[#allocation66_spill] sm:$0xff] %v6898_v55  ;;  %9583 = vst [vmem:[#allocation52_spill] sm:$0xff] %v6900_v54 }
 0x5c3   :  { %2500 = vrot.lane.b32.xlu1 %v6520_v20, %s9579_s6  ;;  %2520 = vrot.lane.b32.xlu0 %v6518_v25, %s9584_s7 }
 0x5c5   :  { %v6906_v24 = vpop.permute.xlu1 %2182  ;;  %v6908_v50 = vpop.permute.xlu0 %2202 }
 0x5c6   :  { %9585 = vst [vmem:[#allocation49_spill] sm:$0xff] %v6906_v24  ;;  %9586 = vst [vmem:[#allocation51_spill] sm:$0xff] %v6908_v50 }
 0x5c7   :  { %2506 = vrot.lane.b32.xlu1 %v6532_v35, %s9579_s6  ;;  %2526 = vrot.lane.b32.xlu0 %v6526_v33, %s9584_s7 }
 0x5c9   :  { %v6914_v12 = vpop.permute.xlu1 %2188  ;;  %v6916_v55 = vpop.permute.xlu0 %2208 }
 0x5ca   :  { %9587 = vst [vmem:[#allocation192_spill] sm:$0xff] %v6914_v12  ;;  %9588 = vst [vmem:[#allocation116_spill] sm:$0xff] %v6916_v55 }
 0x5cb   :  { %2522 = vrot.lane.b32.xlu1 %v6520_v20, %s9584_s7  ;;  %2542 = vrot.lane.b32.xlu0 %v6518_v25, %s9589_s28 }
 0x5cd   :  { %v6922_v54 = vpop.permute.xlu1 %2204  ;;  %v6924_v24 = vpop.permute.xlu0 %2224 }
 0x5ce   :  { %9590 = vst [vmem:[#allocation70_spill] sm:$0xff] %v6922_v54  ;;  %9591 = vst [vmem:[#allocation62_spill] sm:$0xff] %v6924_v24 }
 0x5cf   :  { %2528 = vrot.lane.b32.xlu1 %v6532_v35, %s9584_s7  ;;  %2548 = vrot.lane.b32.xlu0 %v6526_v33, %s9589_s28 }
 0x5d1   :  { %v6930_v50 = vpop.permute.xlu1 %2210  ;;  %v6932_v12 = vpop.permute.xlu0 %2230 }
 0x5d2   :  { %9592 = vst [vmem:[#allocation64_spill] sm:$0xff] %v6930_v50  ;;  %9593 = vst [vmem:[#allocation59_spill] sm:$0xff] %v6932_v12 }
 0x5d3   :  { %2544 = vrot.lane.b32.xlu1 %v6520_v20, %s9589_s28  ;;  %2590 = vrot.lane.b32.xlu0 %v6520_v20, %s9594_s21 }
 0x5d5   :  { %v6938_v55 = vpop.permute.xlu1 %2226  ;;  %v6940_v54 = vpop.permute.xlu0 %2246 }
 0x5d6   :  { %9595 = vst [vmem:[#allocation63_spill] sm:$0xff] %v6938_v55  ;;  %9596 = vst [vmem:[#allocation61_spill] sm:$0xff] %v6940_v54 }
 0x5d7   :  { %2588 = vrot.lane.b32.xlu1 %v6518_v25, %s9594_s21  ;;  %2596 = vrot.lane.b32.xlu0 %v6532_v35, %s9594_s21 }
 0x5d9   :  { %v6946_v24 = vpop.permute.xlu1 %2232  ;;  %v6948_v50 = vpop.permute.xlu0 %2252 }
 0x5da   :  { %9597 = vst [vmem:[#allocation72_spill] sm:$0xff] %v6946_v24  ;;  %9598 = vst [vmem:[#allocation115_spill] sm:$0xff] %v6948_v50 }
 0x5db   :  { %2594 = vrot.lane.b32.xlu1 %v6526_v33, %s9594_s21  ;;  %2610 = vrot.lane.b32.xlu0 %v6520_v20, %s9599_s24 }
 0x5dd   :  { %v6954_v12 = vpop.permute.xlu1 %2248  ;;  %v6956_v55 = vpop.permute.xlu0 %2268 }
 0x5de   :  { %9600 = vst [vmem:[#allocation58_spill] sm:$0xff] %v6954_v12  ;;  %9601 = vst [vmem:[#allocation53_spill] sm:$0xff] %v6956_v55 }
 0x5df   :  { %2608 = vrot.lane.b32.xlu1 %v6518_v25, %s9599_s24  ;;  %2616 = vrot.lane.b32.xlu0 %v6532_v35, %s9599_s24 }
 0x5e1   :  { %v6962_v54 = vpop.permute.xlu1 %2254  ;;  %v6964_v24 = vpop.permute.xlu0 %2274 }
 0x5e2   :  { %9602 = vst [vmem:[#allocation166_spill] sm:$0xff] %v6962_v54  ;;  %9603 = vst [vmem:[#allocation156_spill] sm:$0xff] %v6964_v24 }
 0x5e3   :  { %2614 = vrot.lane.b32.xlu1 %v6526_v33, %s9599_s24  ;;  %2632 = vrot.lane.b32.xlu0 %v6520_v20, %s8874_s11 }
 0x5e5   :  { %v6970_v50 = vpop.permute.xlu1 %2270  ;;  %v2293_v12 = vpop.permute.xlu0 %2292 }
 0x5e6   :  { %9604 = vst [vmem:[#allocation153_spill] sm:$0xff] %v6970_v50 }
 0x5e7   :  { %2630 = vrot.lane.b32.xlu1 %v6518_v25, %s8874_s11  ;;  %2638 = vrot.lane.b32.xlu0 %v6532_v35, %s8874_s11 }
 0x5e9   :  { %v6976_v55 = vpop.permute.xlu1 %2276  ;;  %v2299_v54 = vpop.permute.xlu0 %2298 }
 0x5ea   :  { %9605 = vst [vmem:[#allocation78_spill] sm:$0xff] %v6976_v55 }
 0x5eb   :  { %2636 = vrot.lane.b32.xlu1 %v6526_v33, %s8874_s11  ;;  %2744 = vrot.lane.b32.xlu0 %v6520_v20, %s3292_s27  ;;  %s3299_s11 = smov [#allocation8]  }
 0x5ed   :  { %v2295_v24 = vpop.permute.xlu1 %2294  ;;  %v2313_v27 = vpop.permute.xlu0 %2312 }
 0x5ef   :  { %2742 = vrot.lane.b32.xlu1 %v6518_v25, %s3292_s27  ;;  %2750 = vrot.lane.b32.xlu0 %v6532_v35, %s3292_s27 }
 0x5f1   :  { %v2301_v50 = vpop.permute.xlu1 %2300  ;;  %v2319_v0 = vpop.permute.xlu0 %2318 }
 0x5f2   :  { %v2302_v14 = vsel %vm9608_vm0, %v2299_v54, %v2301_v50  ;;  %v2303_v30 = vsel %vm9609_vm6, %v2301_v50, %v2299_v54 }
 0x5f3   :  { %2748 = vrot.lane.b32.xlu1 %v6526_v33, %s3292_s27  ;;  %2764 = vrot.lane.b32.xlu0 %v6520_v20, %s3293_s13  ;;  %v2306_v2 = vmul.f32 %v2303_v30, %v9615_v60  ;;  %v2307_v5 = vmul.f32 %v2302_v14, %v9615_v60 }
 0x5f5   :  { %v2315_v55 = vpop.permute.xlu1 %2314  ;;  %v2335_v53 = vpop.permute.xlu0 %2334 }
 0x5f6   :  { %v2316_v8 = vsel %vm9610_vm15, %v2313_v27, %v2315_v55  ;;  %v2317_v28 = vsel %vm9611_vm5, %v2315_v55, %v2313_v27  ;;  %v9616_v55 = vld [vmem:[#allocation54_spill] sm:$0xff] }
 0x5f7   :  { %2762 = vrot.lane.b32.xlu1 %v6518_v25, %s3293_s13  ;;  %2770 = vrot.lane.b32.xlu0 %v6532_v35, %s3293_s13  ;;  %v2324_v27 = vmul.f32 %v2317_v28, %v9616_v55  ;;  %v2325_v62 = vmul.f32 %v2316_v8, %v9616_v55 }
 0x5f9   :  { %v2321_v49 = vpop.permute.xlu1 %2320  ;;  %v2341_v56 = vpop.permute.xlu0 %2340 }
 0x5fa   :  { %v2322_v51 = vsel %vm9606_vm14, %v2319_v0, %v2321_v49  ;;  %v2323_v29 = vsel %vm9607_vm7, %v2321_v49, %v2319_v0  ;;  %vm9612_vm14 = vmmov %vm9608_vm0 }
 0x5fb   :  { %2768 = vrot.lane.b32.xlu1 %v6526_v33, %s3293_s13  ;;  %2786 = vrot.lane.b32.xlu0 %v6520_v20, %s3294_s30  ;;  %v2296_v49 = vsel %vm9612_vm14, %v2293_v12, %v2295_v24  ;;  %vm9613_vm7 = vmmov %vm9608_vm0  ;;  %v2326_v50 = vmul.f32 %v2323_v29, %v9614_v63  ;;  %v2327_v54 = vmul.f32 %v2322_v51, %v9614_v63  ;;  %vm9618_vm0 = vcmp.lt.s32.totalorder %v4008_v48, 1 }
 0x5fc   :  { %v2297_v0 = vsel %vm9613_vm7, %v2295_v24, %v2293_v12  ;;  %v2305_v12 = vmul.f32 %v2296_v49, %v9617_v4  ;;  %vm9619_vm6 = vmmov %vm9618_vm0  ;;  %v9622_v49 = vld [vmem:[#allocation56_spill] sm:$0xff]  ;;  %vm9624_vm14 = vcmp.ge.s32.totalorder %v4393_v31, 2  ;;  %vm9625_vm7 = vcmp.ge.s32.totalorder %v4396_v37, 2 }
 0x5fd   :  { %v2337_v34 = vpop.permute.xlu1 %2336  ;;  %v2367_v22 = vpop.permute.xlu0 %2366  ;;  %v2304_v59 = vmul.f32 %v2297_v0, %v9617_v4  ;;  %v2328_v14 = vadd.f32 %v2326_v50, %v2324_v27  ;;  %v2329_v60 = vadd.f32 %v2327_v54, %v2325_v62  ;;  %vm9620_vm15 = vmmov %vm9618_vm0 }
 0x5fe   :  { %v2338_v24 = vsel %vm9618_vm0, %v2335_v53, %v2337_v34  ;;  %v2339_v29 = vsel %vm9619_vm6, %v2337_v34, %v2335_v53  ;;  %v2309_v30 = vadd.f32 %v2307_v5, %v2305_v12  ;;  %vm9621_vm5 = vmmov %vm9618_vm0  ;;  %v9623_v53 = vld [vmem:[#allocation117_spill] sm:$0xff]  ;;  %vm9626_vm0 = vcmp.lt.s32.totalorder %v4008_v48, 127 }
 0x5ff   :  { %2784 = vrot.lane.b32.xlu1 %v6518_v25, %s3294_s30  ;;  %2792 = vrot.lane.b32.xlu0 %v6532_v35, %s3294_s30  ;;  %v2308_v28 = vadd.f32 %v2306_v2, %v2304_v59  ;;  %v2346_v0 = vmul.f32 %v2339_v29, %v9622_v49  ;;  %v2347_v55 = vmul.f32 %v2338_v24, %v9622_v49  ;;  %v2330_v59 = vsel %vm9624_vm14, %v2328_v14, 0.0  ;;  %vm9627_vm6 = vmmov %vm9626_vm0 }
 0x600   :  { %vm9630_vm14 = vcmp.ge.s32.totalorder %v4393_v31, 1 }
 0x601   :  { %v2343_v63 = vpop.permute.xlu1 %2342  ;;  %v2373_v51 = vpop.permute.xlu0 %2372 }
 0x602   :  { %v2344_v8 = vsel %vm9620_vm15, %v2341_v56, %v2343_v63  ;;  %v2345_v4 = vsel %vm9621_vm5, %v2343_v63, %v2341_v56  ;;  %v2331_v56 = vsel %vm9625_vm7, %v2329_v60, 0.0  ;;  %vm9628_vm15 = vcmp.ge.s32.totalorder %v4393_v31, 3 }
 0x603   :  { %v2348_v34 = vmul.f32 %v2345_v4, %v9623_v53  ;;  %v2349_v39 = vmul.f32 %v2344_v8, %v9623_v53  ;;  %2790 = vrot.lane.b32.xlu1 %v6526_v33, %s3294_s30  ;;  %2654 = vrot.lane.b32.xlu0 %v6520_v20, %s8880_s2  ;;  %v2310_v12 = vsel %vm9628_vm15, %v2308_v28, 0.0  ;;  %vm9629_vm5 = vcmp.ge.s32.totalorder %v4396_v37, 3 }
 0x604   :  { %v2311_v24 = vsel %vm9629_vm5, %v2309_v30, 0.0  ;;  %vm9631_vm7 = vcmp.ge.s32.totalorder %v4396_v37, 1  ;;  %v2332_v14 = vadd.f32 %v2330_v59, %v2310_v12  ;;  %v9633_v30 = vld [vmem:[#allocation85_spill] sm:$0xff]  ;;  %vm9637_vm15 = vcmp.lt.s32.totalorder %v4008_v48, 126 }
 0x605   :  { %v2350_v62 = vadd.f32 %v2348_v34, %v2346_v0  ;;  %v2351_v5 = vadd.f32 %v2349_v39, %v2347_v55  ;;  %v2369_v2 = vpop.permute.xlu1 %2368  ;;  %v2389_v27 = vpop.permute.xlu0 %2388  ;;  %v2333_v60 = vadd.f32 %v2331_v56, %v2311_v24  ;;  %v2359_v8 = vmul.f32 %v6532_v35, %v9633_v30  ;;  %v9635_v56 = vld [vmem:[#allocation193_spill] sm:$0xff]  ;;  %vm9638_vm5 = vmmov %vm9637_vm15 }
 0x606   :  { %v2370_v50 = vsel %vm9626_vm0, %v2367_v22, %v2369_v2  ;;  %v2371_v54 = vsel %vm9627_vm6, %v2369_v2, %v2367_v22  ;;  %v9632_v22 = vld [vmem:[#allocation84_spill] sm:$0xff]  ;;  %v2358_v49 = vmul.f32 %v6526_v33, %v9633_v30  ;;  %vm9634_vm6 = vmmov %vm9626_vm0  ;;  %v9636_v2 = vld [vmem:[#allocation118_spill] sm:$0xff] }
 0x607   :  { %v2352_v29 = vsel %vm9630_vm14, %v2350_v62, 0.0  ;;  %v2353_v39 = vsel %vm9631_vm7, %v2351_v5, 0.0  ;;  %2652 = vrot.lane.b32.xlu1 %v6518_v25, %s8880_s2  ;;  %2660 = vrot.lane.b32.xlu0 %v6532_v35, %s8880_s2  ;;  %v2357_v63 = vmul.f32 %v6520_v20, %v9632_v22  ;;  %v2356_v28 = vmul.f32 %v6518_v25, %v9632_v22 }
 0x608   :  { %v2354_v0 = vadd.f32 %v2352_v29, %v2332_v14  ;;  %v2355_v55 = vadd.f32 %v2353_v39, %v2333_v60  ;;  %v2378_v62 = vmul.f32 %v2370_v50, %v9635_v56  ;;  %v2379_v5 = vmul.f32 %v2371_v54, %v9635_v56 }
 0x609   :  { %v2375_v4 = vpop.permute.xlu1 %2374  ;;  %v2395_v59 = vpop.permute.xlu0 %2394  ;;  %v2361_v29 = vadd.f32 %v2359_v8, %v2357_v63  ;;  %v2360_v39 = vadd.f32 %v2358_v49, %v2356_v28  ;;  %vm9639_vm14 = vcmp.lt.s32.totalorder %v4393_v31, 15  ;;  %vm9640_vm7 = vcmp.lt.s32.totalorder %v4396_v37, 15 }
 0x60a   :  { %v2376_v53 = vsel %vm9626_vm0, %v2373_v51, %v2375_v4  ;;  %v2377_v34 = vsel %vm9634_vm6, %v2375_v4, %v2373_v51  ;;  %vm9641_vm0 = vmmov %vm9638_vm5 }
 0x60b   :  { %v2380_v12 = vmul.f32 %v2376_v53, %v9636_v2  ;;  %v2381_v24 = vmul.f32 %v2377_v34, %v9636_v2  ;;  %2658 = vrot.lane.b32.xlu1 %v6526_v33, %s8880_s2  ;;  %2676 = vrot.lane.b32.xlu0 %v6520_v20, %s8888_s29  ;;  %v2364_v22 = vadd.f32 %v2360_v39, %v2354_v0  ;;  %vm9642_vm6 = vmmov %vm9641_vm0  ;;  %v9643_v34 = vld [vmem:[#allocation194_spill] sm:$0xff]  ;;  %s9667_s2 = smov 109  }
 0x60c   :  { %v2365_v30 = vadd.f32 %v2361_v29, %v2355_v55 }
 0x60d   :  { %v2382_v14 = vadd.f32 %v2380_v12, %v2378_v62  ;;  %v2383_v60 = vadd.f32 %v2381_v24, %v2379_v5  ;;  %v2391_v51 = vpop.permute.xlu1 %2390  ;;  %v2411_v4 = vpop.permute.xlu0 %2410  ;;  %v9644_v5 = vld [vmem:[#allocation119_spill] sm:$0xff] }
 0x60e   :  { %v2392_v50 = vsel %vm9637_vm15, %v2389_v27, %v2391_v51  ;;  %v2393_v54 = vsel %vm9638_vm5, %v2391_v51, %v2389_v27  ;;  %vm9645_vm15 = vcmp.lt.s32.totalorder %v4008_v48, 125 }
 0x60f   :  { %v2384_v53 = vsel %vm9639_vm14, %v2382_v14, 0.0  ;;  %v2385_v63 = vsel %vm9640_vm7, %v2383_v60, 0.0  ;;  %2674 = vrot.lane.b32.xlu1 %v6518_v25, %s8888_s29  ;;  %2682 = vrot.lane.b32.xlu0 %v6532_v35, %s8888_s29  ;;  %v2400_v56 = vmul.f32 %v2392_v50, %v9643_v34  ;;  %v2401_v62 = vmul.f32 %v2393_v54, %v9643_v34  ;;  %vm9646_vm5 = vmmov %vm9645_vm15  ;;  %v9652_v34 = vld [vmem:[#allocation120_spill] sm:$0xff] }
 0x610   :  { %v2386_v28 = vadd.f32 %v2384_v53, %v2364_v22  ;;  %v2387_v8 = vadd.f32 %v2385_v63, %v2365_v30  ;;  %vm9647_vm14 = vcmp.lt.s32.totalorder %v4393_v31, 14  ;;  %vm9648_vm7 = vcmp.lt.s32.totalorder %v4396_v37, 14 }
 0x611   :  { %v2397_v49 = vpop.permute.xlu1 %2396  ;;  %v2417_v55 = vpop.permute.xlu0 %2416 }
 0x612   :  { %v2398_v0 = vsel %vm9641_vm0, %v2395_v59, %v2397_v49  ;;  %v2399_v27 = vsel %vm9642_vm6, %v2397_v49, %v2395_v59  ;;  %vm9649_vm0 = vmmov %vm9646_vm5  ;;  %v9651_v49 = vld [vmem:[#allocation69_spill] sm:$0xff] }
 0x613   :  { %v2402_v2 = vmul.f32 %v2398_v0, %v9644_v5  ;;  %v2403_v12 = vmul.f32 %v2399_v27, %v9644_v5  ;;  %2680 = vrot.lane.b32.xlu1 %v6526_v33, %s8888_s29  ;;  %2808 = vrot.lane.b32.xlu0 %v6520_v20, %s3295_s20  ;;  %vm9650_vm6 = vmmov %vm9649_vm0  ;;  %s2952_s29 = sshll.u32 %s3299_s11, 4  ;;  %s2953_s29 = int_to_ptr.vmem [resolvable:$true] %s2952_s29 }
 0x614   :  { %p3227_p11 = scmp.lt.s32.totalorder %s2953_s29, %s2953_s29 }
 0x615   :  { %v2404_v24 = vadd.f32 %v2402_v2, %v2400_v56  ;;  %v2405_v29 = vadd.f32 %v2403_v12, %v2401_v62  ;;  %v2413_v39 = vpop.permute.xlu1 %2412  ;;  %v2435_v60 = vpop.permute.xlu0 %2434 }
 0x616   :  { %v2414_v59 = vsel %vm9645_vm15, %v2411_v4, %v2413_v39  ;;  %v2415_v14 = vsel %vm9646_vm5, %v2413_v39, %v2411_v4  ;;  %vm9653_vm15 = vcmp.lt.s32.totalorder %v4008_v48, 115 }
 0x617   :  { %v2406_v51 = vsel %vm9647_vm14, %v2404_v24, 0.0  ;;  %v2407_v22 = vsel %vm9648_vm7, %v2405_v29, 0.0  ;;  %2806 = vrot.lane.b32.xlu1 %v6518_v25, %s3295_s20  ;;  %2814 = vrot.lane.b32.xlu0 %v6532_v35, %s3295_s20  ;;  %v2422_v0 = vmul.f32 %v2414_v59, %v9651_v49  ;;  %v2423_v27 = vmul.f32 %v2415_v14, %v9651_v49  ;;  %vm9654_vm5 = vmmov %vm9653_vm15  ;;  %v9660_v49 = vld [vmem:[#allocation121_spill] sm:$0xff] }
 0x618   :  { %v2408_v30 = vadd.f32 %v2406_v51, %v2386_v28  ;;  %v2409_v50 = vadd.f32 %v2407_v22, %v2387_v8  ;;  %vm9655_vm14 = vcmp.lt.s32.totalorder %v4393_v31, 13  ;;  %vm9656_vm7 = vcmp.lt.s32.totalorder %v4396_v37, 13 }
 0x619   :  { %v2419_v54 = vpop.permute.xlu1 %2418  ;;  %v2441_v63 = vpop.permute.xlu0 %2440 }
 0x61a   :  { %v2420_v53 = vsel %vm9649_vm0, %v2417_v55, %v2419_v54  ;;  %v2421_v4 = vsel %vm9650_vm6, %v2419_v54, %v2417_v55  ;;  %vm9657_vm0 = vmmov %vm9654_vm5  ;;  %v9659_v54 = vld [vmem:[#allocation60_spill] sm:$0xff] }
 0x61b   :  { %v2424_v56 = vmul.f32 %v2420_v53, %v9652_v34  ;;  %v2425_v28 = vmul.f32 %v2421_v4, %v9652_v34  ;;  %2812 = vrot.lane.b32.xlu1 %v6526_v33, %s3295_s20  ;;  %2696 = vrot.lane.b32.xlu0 %v6518_v25, %s8908_s5  ;;  %vm9658_vm6 = vmmov %vm9657_vm0 }
 0x61d   :  { %v2426_v8 = vadd.f32 %v2424_v56, %v2422_v0  ;;  %v2427_v62 = vadd.f32 %v2425_v28, %v2423_v27  ;;  %v2437_v5 = vpop.permute.xlu1 %2436  ;;  %v2455_v12 = vpop.permute.xlu0 %2454 }
 0x61e   :  { %v2438_v55 = vsel %vm9653_vm15, %v2435_v60, %v2437_v5  ;;  %v2439_v2 = vsel %vm9654_vm5, %v2437_v5, %v2435_v60  ;;  %vm9661_vm15 = vcmp.lt.s32.totalorder %v4008_v48, 114 }
 0x61f   :  { %v2428_v24 = vsel %vm9655_vm14, %v2426_v8, 0.0  ;;  %v2429_v29 = vsel %vm9656_vm7, %v2427_v62, 0.0  ;;  %2550 = vrot.lane.b32.xlu1 %v6532_v35, %s9589_s28  ;;  %2702 = vrot.lane.b32.xlu0 %v6526_v33, %s8908_s5  ;;  %v2446_v53 = vmul.f32 %v2438_v55, %v9659_v54  ;;  %v2447_v4 = vmul.f32 %v2439_v2, %v9659_v54  ;;  %vm9662_vm5 = vmmov %vm9661_vm15  ;;  %v9665_v2 = vld [vmem:[#allocation71_spill] sm:$0xff] }
 0x620   :  { %v7140_v39 = vadd.f32 %v2428_v24, %v2408_v30  ;;  %v7142_v59 = vadd.f32 %v2429_v29, %v2409_v50  ;;  %vm9663_vm14 = vmmov %vm9662_vm5 }
 0x621   :  { %v2443_v14 = vpop.permute.xlu1 %2442  ;;  %v2461_v22 = vpop.permute.xlu0 %2460  ;;  %vm9664_vm7 = vmmov %vm9662_vm5 }
 0x622   :  { %v2444_v60 = vsel %vm9657_vm0, %v2441_v63, %v2443_v14  ;;  %v2445_v51 = vsel %vm9658_vm6, %v2443_v14, %v2441_v63  ;;  %vm9668_vm0 = vcmp.lt.s32.totalorder %v4008_v48, 113 }
 0x623   :  { %v2448_v30 = vmul.f32 %v2444_v60, %v9660_v49  ;;  %v2449_v50 = vmul.f32 %v2445_v51, %v9660_v49  ;;  %2698 = vrot.lane.b32.xlu1 %v6520_v20, %s8908_s5  ;;  %2828 = vrot.lane.b32.xlu0 %v6518_v25, %s3296_s8  ;;  %vm9669_vm6 = vmmov %vm9668_vm0 }
 0x625   :  { %v2450_v0 = vadd.f32 %v2448_v30, %v2446_v53  ;;  %v2451_v27 = vadd.f32 %v2449_v50, %v2447_v4  ;;  %v2457_v34 = vpop.permute.xlu1 %2456  ;;  %v2477_v28 = vpop.permute.xlu0 %2476 }
 0x626   :  { %v2458_v63 = vsel %vm9661_vm15, %v2455_v12, %v2457_v34  ;;  %v2459_v56 = vsel %vm9662_vm5, %v2457_v34, %v2455_v12  ;;  %v9666_v12 = vld [vmem:[#allocation122_spill] sm:$0xff]  ;;  %vm9670_vm15 = vcmp.ge.s32.totalorder %v4393_v31, 3  ;;  %vm9671_vm5 = vcmp.ge.s32.totalorder %v4396_v37, 3 }
 0x627   :  { %2704 = vrot.lane.b32.xlu1 %v6532_v35, %s8908_s5  ;;  %2834 = vrot.lane.b32.xlu0 %v6526_v33, %s3296_s8  ;;  %v2466_v24 = vmul.f32 %v2458_v63, %v9665_v2  ;;  %v2467_v29 = vmul.f32 %v2459_v56, %v9665_v2  ;;  %v2452_v30 = vsel %vm9670_vm15, %v2450_v0, 0.0  ;;  %v2453_v50 = vsel %vm9671_vm5, %v2451_v27, 0.0  ;;  %s3222_s5 = scalar_lea.vmem %s2953_s29, 2048 }
 0x628   :  { %vm9677_vm15 = vcmp.lt.s32.totalorder %v4008_v48, 112  ;;  %p3223_p10 = scmp.ne.s32.totalorder %s2953_s29, %s3222_s5  ;;  %p3228_p12 = scmp.lt.s32.totalorder %s3222_s5, %s3222_s5 }
 0x629   :  { %v2463_v8 = vpop.permute.xlu1 %2462  ;;  %v2483_v55 = vpop.permute.xlu0 %2482  ;;  %vm9678_vm5 = vmmov %vm9677_vm15 }
 0x62a   :  { %v2464_v62 = vsel %vm9663_vm14, %v2461_v22, %v2463_v8  ;;  %v2465_v5 = vsel %vm9664_vm7, %v2463_v8, %v2461_v22  ;;  %vm9672_vm14 = vcmp.ge.s32.totalorder %v4393_v31, 2  ;;  %vm9673_vm7 = vcmp.ge.s32.totalorder %v4396_v37, 2  ;;  %p3229_p13 = por %p3228_p12, %p3227_p11 }
 0x62b   :  { %v2468_v14 = vmul.f32 %v2464_v62, %v9666_v12  ;;  %v2469_v60 = vmul.f32 %v2465_v5, %v9666_v12  ;;  %2830 = vrot.lane.b32.xlu1 %v6520_v20, %s3296_s8  ;;  %2564 = vrot.lane.b32.xlu0 %v6518_v25, %s9667_s2  ;;  %v9675_v5 = vld [vmem:[#allocation57_spill] sm:$0xff] }
 0x62c   :  { %p3230_p0 = pnand %p3229_p13, %p3223_p10 }
 0x62d   :  { %v2470_v51 = vadd.f32 %v2468_v14, %v2466_v24  ;;  %v2471_v54 = vadd.f32 %v2469_v60, %v2467_v29  ;;  %v2479_v53 = vpop.permute.xlu1 %2478  ;;  %v2499_v49 = vpop.permute.xlu0 %2498  ;;  %v9676_v29 = vld [vmem:[#allocation123_spill] sm:$0xff] }
 0x62e   :  { %v2480_v22 = vsel %vm9668_vm0, %v2477_v28, %v2479_v53  ;;  %v2481_v4 = vsel %vm9669_vm6, %v2479_v53, %v2477_v28  ;;  %vm9674_vm6 = vmmov %vm9668_vm0 }
 0x62f   :  { %v2472_v34 = vsel %vm9672_vm14, %v2470_v51, 0.0  ;;  %v2473_v63 = vsel %vm9673_vm7, %v2471_v54, 0.0  ;;  %2836 = vrot.lane.b32.xlu1 %v6532_v35, %s3296_s8  ;;  %2570 = vrot.lane.b32.xlu0 %v6526_v33, %s9667_s2  ;;  %v2488_v2 = vmul.f32 %v2480_v22, %v9675_v5  ;;  %v2489_v24 = vmul.f32 %v2481_v4, %v9675_v5 }
 0x630   :  { %v2474_v56 = vadd.f32 %v2472_v34, %v2452_v30  ;;  %v2475_v8 = vadd.f32 %v2473_v63, %v2453_v50  ;;  %vm9679_vm14 = vcmp.ge.s32.totalorder %v4393_v31, 1  ;;  %vm9680_vm7 = vcmp.ge.s32.totalorder %v4396_v37, 1 }
 0x631   :  { %v2485_v28 = vpop.permute.xlu1 %2484  ;;  %v2505_v62 = vpop.permute.xlu0 %2504 }
 0x632   :  { %v2486_v0 = vsel %vm9668_vm0, %v2483_v55, %v2485_v28  ;;  %v2487_v27 = vsel %vm9674_vm6, %v2485_v28, %v2483_v55  ;;  %vm9681_vm0 = vmmov %vm9678_vm5 }
 0x633   :  { %v2490_v12 = vmul.f32 %v2486_v0, %v9676_v29  ;;  %v2491_v14 = vmul.f32 %v2487_v27, %v9676_v29  ;;  %2566 = vrot.lane.b32.xlu1 %v6520_v20, %s9667_s2  ;;  %2718 = vrot.lane.b32.xlu0 %v6518_v25, %s8923_s4  ;;  %vm9682_vm6 = vmmov %vm9681_vm0  ;;  %v9683_v27 = vld [vmem:[#allocation65_spill] sm:$0xff] }
 0x635   :  { %v2492_v60 = vadd.f32 %v2490_v12, %v2488_v2  ;;  %v2493_v51 = vadd.f32 %v2491_v14, %v2489_v24  ;;  %v2501_v54 = vpop.permute.xlu1 %2500  ;;  %v2521_v22 = vpop.permute.xlu0 %2520  ;;  %v9684_v24 = vld [vmem:[#allocation124_spill] sm:$0xff] }
 0x636   :  { %v2502_v55 = vsel %vm9677_vm15, %v2499_v49, %v2501_v54  ;;  %v2503_v53 = vsel %vm9678_vm5, %v2501_v54, %v2499_v49  ;;  %vm9685_vm15 = vcmp.lt.s32.totalorder %v4008_v48, 111 }
 0x637   :  { %v2494_v4 = vsel %vm9679_vm14, %v2492_v60, 0.0  ;;  %v2495_v30 = vsel %vm9680_vm7, %v2493_v51, 0.0  ;;  %2572 = vrot.lane.b32.xlu1 %v6532_v35, %s9667_s2  ;;  %2724 = vrot.lane.b32.xlu0 %v6526_v33, %s8923_s4  ;;  %v2510_v5 = vmul.f32 %v2502_v55, %v9683_v27  ;;  %v2511_v2 = vmul.f32 %v2503_v53, %v9683_v27  ;;  %vm9686_vm5 = vmmov %vm9685_vm15 }
 0x638   :  { %v2496_v50 = vadd.f32 %v2494_v4, %v2474_v56  ;;  %v2497_v34 = vadd.f32 %v2495_v30, %v2475_v8  ;;  %vm9687_vm14 = vmmov %vm9686_vm5 }
 0x639   :  { %v2507_v63 = vpop.permute.xlu1 %2506  ;;  %v2527_v0 = vpop.permute.xlu0 %2526  ;;  %vm9688_vm7 = vmmov %vm9686_vm5 }
 0x63a   :  { %v2508_v28 = vsel %vm9681_vm0, %v2505_v62, %v2507_v63  ;;  %v2509_v49 = vsel %vm9682_vm6, %v2507_v63, %v2505_v62  ;;  %vm9690_vm0 = vcmp.lt.s32.totalorder %v4008_v48, 51 }
 0x63b   :  { %v2512_v29 = vmul.f32 %v2508_v28, %v9684_v24  ;;  %v2513_v56 = vmul.f32 %v2509_v49, %v9684_v24  ;;  %2720 = vrot.lane.b32.xlu1 %v6520_v20, %s8923_s4  ;;  %2850 = vrot.lane.b32.xlu0 %v6518_v25, %s3297_s16  ;;  %v1840_v27 = vsel %vm9690_vm0, %v6650_v23, %v6658_v6  ;;  %vm9691_vm6 = vmmov %vm9690_vm0  ;;  %vm9696_vm0 = vcmp.lt.s32.totalorder %v4008_v48, 110 }
 0x63d   :  { %v2514_v8 = vadd.f32 %v2512_v29, %v2510_v5  ;;  %v2515_v12 = vadd.f32 %v2513_v56, %v2511_v2  ;;  %v2523_v14 = vpop.permute.xlu1 %2522  ;;  %v2543_v51 = vpop.permute.xlu0 %2542 }
 0x63e   :  { %v2524_v62 = vsel %vm9685_vm15, %v2521_v22, %v2523_v14  ;;  %v2525_v60 = vsel %vm9686_vm5, %v2523_v14, %v2521_v22  ;;  %vm9692_vm15 = vcmp.lt.s32.totalorder %v4008_v48, 50 }
 0x63f   :  { %v2518_v54 = vadd.f32 %v2514_v8, %v2496_v50  ;;  %v2519_v55 = vadd.f32 %v2515_v12, %v2497_v34  ;;  %2726 = vrot.lane.b32.xlu1 %v6532_v35, %s8923_s4  ;;  %2856 = vrot.lane.b32.xlu0 %v6526_v33, %s3297_s16  ;;  %v2532_v22 = vmul.f32 %v2524_v62, %v9350_v47  ;;  %v9689_v34 = vld [vmem:[#allocation125_spill] sm:$0xff]  ;;  %vm9693_vm5 = vmmov %vm9692_vm15 }
 0x640   :  { %v2533_v50 = vmul.f32 %v2525_v60, %v9350_v47  ;;  %v1860_v47 = vsel %vm9692_vm15, %v6660_v13, %v6674_v41  ;;  %v1861_v5 = vsel %vm9693_vm5, %v6674_v41, %v6660_v13  ;;  %vm9698_vm15 = vcmp.lt.s32.totalorder %v4008_v48, 51  ;;  %v9702_v12 = vld [vmem:[#allocation89_spill] sm:$0xff] }
 0x641   :  { %v2529_v53 = vpop.permute.xlu1 %2528  ;;  %v7242_v63 = vpop.permute.xlu0 %2548  ;;  %v1834_v56 = vsel %vm9698_vm15, %v6644_v42, %v6642_v18  ;;  %v1864_v14 = vmul.f32 %v1861_v5, %v9702_v12  ;;  %v1865_v62 = vmul.f32 %v1860_v47, %v9702_v12 }
 0x642   :  { %v2530_v4 = vsel %vm9687_vm14, %v2527_v0, %v2529_v53  ;;  %v2531_v30 = vsel %vm9688_vm7, %v2529_v53, %v2527_v0  ;;  %v1841_v0 = vsel %vm9691_vm6, %v6658_v6, %v6650_v23  ;;  %vm9694_vm14 = vmmov %vm9693_vm5 }
 0x643   :  { %v2534_v28 = vmul.f32 %v2530_v4, %v9689_v34  ;;  %v2535_v49 = vmul.f32 %v2531_v30, %v9689_v34  ;;  %2852 = vrot.lane.b32.xlu1 %v6520_v20, %s3297_s16  ;;  %2872 = vrot.lane.b32.xlu0 %v6518_v25, %s3298_s15  ;;  %v1854_v23 = vsel %vm9694_vm14, %v6652_v44, %v6666_v36  ;;  %vm9695_vm7 = vmmov %vm9693_vm5  ;;  %vm9700_vm14 = vcmp.lt.s32.totalorder %v4393_v31, 15  ;;  %v9704_v4 = vld [vmem:[#allocation144_spill] sm:$0xff] }
 0x644   :  { %v1855_v25 = vsel %vm9695_vm7, %v6666_v36, %v6652_v44  ;;  %vm9697_vm6 = vmmov %vm9696_vm0  ;;  %vm9701_vm7 = vcmp.lt.s32.totalorder %v4396_v37, 15 }
 0x645   :  { %v2536_v2 = vadd.f32 %v2534_v28, %v2532_v22  ;;  %v2537_v24 = vadd.f32 %v2535_v49, %v2533_v50  ;;  %v2545_v29 = vpop.permute.xlu1 %2544  ;;  %v2591_v41 = vpop.permute.xlu0 %2590  ;;  %vm9699_vm5 = vmmov %vm9698_vm15  ;;  %v1862_v30 = vmul.f32 %v1855_v25, %v9704_v4  ;;  %v1863_v22 = vmul.f32 %v1854_v23, %v9704_v4  ;;  %v9709_v49 = vld [vmem:[#allocation143_spill] sm:$0xff] }
 0x646   :  { %v7278_v6 = vsel %vm9696_vm0, %v2543_v51, %v2545_v29  ;;  %v7282_v13 = vsel %vm9697_vm6, %v2545_v29, %v2543_v51  ;;  %v1835_v8 = vsel %vm9699_vm5, %v6642_v18, %v6644_v42  ;;  %v9703_v18 = vld [vmem:[#allocation86_spill] sm:$0xff]  ;;  %vm9705_vm0 = vcmp.lt.s32.totalorder %v4008_v48, 49 }
 0x647   :  { %v2538_v44 = vsel %vm9700_vm14, %v2536_v2, 0.0  ;;  %v2539_v36 = vsel %vm9701_vm7, %v2537_v24, 0.0  ;;  %2858 = vrot.lane.b32.xlu1 %v6532_v35, %s3297_s16  ;;  %2878 = vrot.lane.b32.xlu0 %v6526_v33, %s3298_s15  ;;  %v1844_v42 = vmul.f32 %v1841_v0, %v9703_v18  ;;  %v1845_v53 = vmul.f32 %v1840_v27, %v9703_v18  ;;  %vm9706_vm6 = vmmov %vm9705_vm0  ;;  %v9712_v29 = vld [vmem:[#allocation90_spill] sm:$0xff] }
 0x648   :  { %v7300_v60 = vadd.f32 %v2538_v44, %v2518_v54  ;;  %v7302_v51 = vadd.f32 %v2539_v36, %v2519_v55  ;;  %v1882_v54 = vsel %vm9705_vm0, %v6676_v52, %v6690_v7  ;;  %v1883_v55 = vsel %vm9706_vm6, %v6690_v7, %v6676_v52  ;;  %vm9710_vm14 = vmmov %vm9705_vm0 }
 0x649   :  { %v2589_v50 = vpop.permute.xlu1 %2588  ;;  %vm9707_vm15 = vcmp.lt.s32.totalorder %v4008_v48, 99  ;;  %v2597_v28 = vpop.permute.xlu0 %2596  ;;  %v1842_v27 = vmul.f32 %v1835_v8, %v9709_v49  ;;  %v1843_v0 = vmul.f32 %v1834_v56, %v9709_v49  ;;  %v1876_v47 = vsel %vm9710_vm14, %v6668_v19, %v6682_v45  ;;  %vm9711_vm7 = vmmov %vm9705_vm0  ;;  %v9713_v56 = vld [vmem:[#allocation147_spill] sm:$0xff] }
 0x64a   :  { %v2592_v33 = vsel %vm9707_vm15, %v2589_v50, %v2591_v41  ;;  %vm9708_vm5 = vmmov %vm9707_vm15  ;;  %v1877_v52 = vsel %vm9711_vm7, %v6682_v45, %v6668_v19  ;;  %v1866_v7 = vadd.f32 %v1864_v14, %v1862_v30  ;;  %v1867_v5 = vadd.f32 %v1865_v62, %v1863_v22  ;;  %v9716_v45 = vld [vmem:[#allocation76_spill] sm:$0xff]  ;;  %v9717_v62 = vld [vmem:[#allocation130_spill] sm:$0xff] }
 0x64b   :  { %v2593_v34 = vsel %vm9708_vm5, %v2591_v41, %v2589_v50  ;;  %2874 = vrot.lane.b32.xlu1 %v6520_v20, %s3298_s15  ;;  %v1846_v2 = vadd.f32 %v1844_v42, %v1842_v27  ;;  %v1847_v24 = vadd.f32 %v1845_v53, %v1843_v0  ;;  %v1886_v23 = vmul.f32 %v1883_v55, %v9712_v29  ;;  %vm9714_vm0 = vmmov %vm9708_vm5 }
 0x64c   :  { %v1887_v25 = vmul.f32 %v1882_v54, %v9712_v29  ;;  %v1884_v8 = vmul.f32 %v1877_v52, %v9713_v56  ;;  %v1885_v44 = vmul.f32 %v1876_v47, %v9713_v56  ;;  %vm9715_vm6 = vmmov %vm9714_vm0  ;;  %v2600_v12 = vmul.f32 %v2592_v33, %v9716_v45 }
 0x64d   :  { %v2595_v41 = vpop.permute.xlu1 %2594  ;;  %v2611_v20 = vpop.permute.xlu0 %2610  ;;  %v2601_v14 = vmul.f32 %v2593_v34, %v9716_v45  ;;  %vm9718_vm15 = vcmp.ge.s32.totalorder %v4393_v31, 2  ;;  %vm9719_vm5 = vcmp.ge.s32.totalorder %v4396_v37, 2  ;;  %vm9720_vm14 = vcmp.lt.s32.totalorder %v4008_v48, 98 }
 0x64e   :  { %v2598_v36 = vsel %vm9714_vm0, %v2595_v41, %v2597_v28  ;;  %v2599_v19 = vsel %vm9715_vm6, %v2597_v28, %v2595_v41  ;;  %v1868_v53 = vsel %vm9718_vm15, %v1866_v7, 0.0  ;;  %v1869_v4 = vsel %vm9719_vm5, %v1867_v5, 0.0  ;;  %vm9721_vm7 = vmmov %vm9720_vm14 }
 0x64f   :  { %v2602_v18 = vmul.f32 %v2598_v36, %v9717_v62  ;;  %v2603_v42 = vmul.f32 %v2599_v19, %v9717_v62  ;;  %2880 = vrot.lane.b32.xlu1 %v6532_v35, %s3298_s15  ;;  %v1888_v30 = vadd.f32 %v1886_v23, %v1884_v8  ;;  %v1889_v22 = vadd.f32 %v1887_v25, %v1885_v44  ;;  %v9733_v8 = vld [vmem:[#allocation77_spill] sm:$0xff]  ;;  %v9734_v19 = vld [vmem:[#allocation132_spill] sm:$0xff] }
 0x650   :  { %vm9722_vm0 = vcmp.ge.s32.totalorder %v4393_v31, 3  ;;  %vm9723_vm6 = vcmp.ge.s32.totalorder %v4396_v37, 3  ;;  %vm9724_vm15 = vcmp.lt.s32.totalorder %v4008_v48, 48 }
 0x651   :  { %v2604_v50 = vadd.f32 %v2602_v18, %v2600_v12  ;;  %v2605_v54 = vadd.f32 %v2603_v42, %v2601_v14  ;;  %v2609_v55 = vpop.permute.xlu1 %2608  ;;  %v2617_v28 = vpop.permute.xlu0 %2616  ;;  %v1848_v35 = vsel %vm9722_vm0, %v1846_v2, 0.0  ;;  %v1849_v49 = vsel %vm9723_vm6, %v1847_v24, 0.0  ;;  %vm9725_vm5 = vmmov %vm9724_vm15  ;;  %v9735_v12 = vld [vmem:[#allocation91_spill] sm:$0xff] }
 0x652   :  { %v2612_v33 = vsel %vm9720_vm14, %v2609_v55, %v2611_v20  ;;  %v2613_v34 = vsel %vm9721_vm7, %v2611_v20, %v2609_v55  ;;  %v1898_v27 = vsel %vm9724_vm15, %v6684_v57, %v6698_v9  ;;  %v1899_v0 = vsel %vm9725_vm5, %v6698_v9, %v6684_v57  ;;  %vm9728_vm0 = vmmov %vm9725_vm5  ;;  %v9730_v57 = vld [vmem:[#allocation150_spill] sm:$0xff] }
 0x653   :  { %v1870_v47 = vadd.f32 %v1868_v53, %v1848_v35  ;;  %v1871_v52 = vadd.f32 %v1869_v4, %v1849_v49  ;;  %vm9726_vm14 = vcmp.ge.s32.totalorder %v4393_v31, 1  ;;  %vm9727_vm7 = vcmp.ge.s32.totalorder %v4396_v37, 1  ;;  %vm9729_vm6 = vmmov %vm9728_vm0 }
 0x654   :  { %v1890_v7 = vsel %vm9726_vm14, %v1888_v30, 0.0  ;;  %v1891_v5 = vsel %vm9727_vm7, %v1889_v22, 0.0  ;;  %v1904_v2 = vsel %vm9728_vm0, %v6692_v58, %v6706_v15  ;;  %v1905_v24 = vsel %vm9729_vm6, %v6706_v15, %v6692_v58 }
 0x655   :  { %v2615_v29 = vpop.permute.xlu1 %2614  ;;  %v1906_v9 = vmul.f32 %v1899_v0, %v9730_v57  ;;  %v1907_v23 = vmul.f32 %v1898_v27, %v9730_v57  ;;  %vm9731_vm15 = vcmp.lt.s32.totalorder %v4008_v48, 98  ;;  %v2633_v56 = vpop.permute.xlu0 %2632  ;;  %v2620_v44 = vmul.f32 %v2612_v33, %v9733_v8 }
 0x656   :  { %v2618_v25 = vsel %vm9731_vm15, %v2615_v29, %v2617_v28  ;;  %vm9732_vm5 = vmmov %vm9731_vm15  ;;  %v2621_v36 = vmul.f32 %v2613_v34, %v9733_v8  ;;  %v1892_v15 = vadd.f32 %v1890_v7, %v1870_v47  ;;  %v1893_v45 = vadd.f32 %v1891_v5, %v1871_v52  ;;  %v9747_v52 = vld [vmem:[#allocation154_spill] sm:$0xff] }
 0x657   :  { %v2619_v41 = vsel %vm9732_vm5, %v2617_v28, %v2615_v29  ;;  %v2622_v20 = vmul.f32 %v2618_v25, %v9734_v19  ;;  %v1908_v14 = vmul.f32 %v1905_v24, %v9735_v12  ;;  %v1909_v62 = vmul.f32 %v1904_v2, %v9735_v12 }
 0x658   :  { %v2623_v58 = vmul.f32 %v2619_v41, %v9734_v19  ;;  %vm9736_vm14 = vcmp.lt.s32.totalorder %v4008_v48, 47  ;;  %vm9740_vm15 = vcmp.lt.s32.totalorder %v4008_v48, 97 }
 0x659   :  { %v1926_v18 = vsel %vm9736_vm14, %v6708_v1, %v6722_v26  ;;  %vm9737_vm7 = vmmov %vm9736_vm14  ;;  %v2624_v53 = vadd.f32 %v2622_v20, %v2620_v44  ;;  %v2631_v30 = vpop.permute.xlu1 %2630  ;;  %vm9742_vm14 = vcmp.ge.s32.totalorder %v4393_v31, 3  ;;  %v1911_v19 = vadd.f32 %v1909_v62, %v1907_v23 }
 0x65a   :  { %v1927_v42 = vsel %vm9737_vm7, %v6722_v26, %v6708_v1  ;;  %v2625_v4 = vadd.f32 %v2623_v58, %v2621_v36  ;;  %vm9738_vm0 = vmmov %vm9737_vm7  ;;  %v2634_v33 = vsel %vm9740_vm15, %v2631_v30, %v2633_v56  ;;  %v2639_v1 = vpop.permute.xlu0 %2638  ;;  %v2606_v26 = vsel %vm9742_vm14, %v2604_v50, 0.0 }
 0x65b   :  { %v1920_v22 = vsel %vm9738_vm0, %v6700_v46, %v6714_v38  ;;  %vm9739_vm6 = vmmov %vm9738_vm0  ;;  %vm9743_vm7 = vcmp.ge.s32.totalorder %v4396_v37, 3  ;;  %vm9744_vm0 = vcmp.ge.s32.totalorder %v4393_v31, 2  ;;  %vm9752_vm14 = vcmp.lt.s32.totalorder %v4008_v48, 97 }
 0x65c   :  { %v1921_v55 = vsel %vm9739_vm6, %v6714_v38, %v6700_v46  ;;  %vm9741_vm5 = vmmov %vm9740_vm15  ;;  %v2607_v28 = vsel %vm9743_vm7, %v2605_v54, 0.0  ;;  %v2626_v35 = vsel %vm9744_vm0, %v2624_v53, 0.0  ;;  %v2627_v49 = vsel %vm9745_vm10, %v2625_v4, 0.0  ;;  %v9746_v46 = vld [vmem:[#allocation92_spill] sm:$0xff]  ;;  %v9756_v4 = vld [vmem:[#allocation162_spill] sm:$0xff] }
 0x65d   :  { %v2635_v34 = vsel %vm9741_vm5, %v2633_v56, %v2631_v30  ;;  %v1930_v38 = vmul.f32 %v1927_v42, %v9746_v46  ;;  %v1931_v27 = vmul.f32 %v1926_v18, %v9746_v46  ;;  %v2628_v0 = vadd.f32 %v2626_v35, %v2606_v26  ;;  %v2637_v2 = vpop.permute.xlu1 %2636  ;;  %vm9753_vm7 = vmmov %vm9752_vm14  ;;  %v9754_v56 = vld [vmem:[#allocation135_spill] sm:$0xff] }
 0x65e   :  { %v2629_v47 = vadd.f32 %v2627_v49, %v2607_v28  ;;  %v1928_v7 = vmul.f32 %v1921_v55, %v9747_v52  ;;  %v1929_v5 = vmul.f32 %v1920_v22, %v9747_v52  ;;  %vm9748_vm6 = vcmp.lt.s32.totalorder %v4008_v48, 46  ;;  %v2745_v41 = vpop.permute.xlu0 %2744  ;;  %v9765_v46 = vld [vmem:[#allocation163_spill] sm:$0xff] }
 0x65f   :  { %v1942_v50 = vsel %vm9748_vm6, %v6716_v3, %v6730_v11  ;;  %vm9749_vm15 = vmmov %vm9748_vm6  ;;  %v2640_v57 = vsel %vm9752_vm14, %v2637_v2, %v2639_v1  ;;  %v2641_v25 = vsel %vm9753_vm7, %v2639_v1, %v2637_v2  ;;  %v1910_v36 = vadd.f32 %v1908_v14, %v1906_v9 }
 0x660   :  { %v1943_v54 = vsel %vm9749_vm15, %v6730_v11, %v6716_v3  ;;  %vm9750_vm10 = vmmov %vm9748_vm6  ;;  %v2642_v11 = vmul.f32 %v2634_v33, %v9347_v43  ;;  %v2643_v3 = vmul.f32 %v2635_v34, %v9347_v43  ;;  %v2644_v8 = vmul.f32 %v2640_v57, %v9754_v56  ;;  %v9771_v57 = vld [vmem:[#allocation34_spill] sm:$0xff] }
 0x661   :  { %v1948_v24 = vsel %vm9750_vm10, %v6724_v16, %v6738_v32  ;;  %vm9751_vm5 = vmmov %vm9748_vm6  ;;  %v2645_v44 = vmul.f32 %v2641_v25, %v9754_v56  ;;  %v1932_v20 = vadd.f32 %v1930_v38, %v1928_v7  ;;  %v1933_v58 = vadd.f32 %v1931_v27, %v1929_v5  ;;  %v2743_v53 = vpop.permute.xlu1 %2742 }
 0x662   :  { %v1949_v29 = vsel %vm9751_vm5, %v6738_v32, %v6724_v16  ;;  %v9755_v32 = vld [vmem:[#allocation95_spill] sm:$0xff]  ;;  %v2646_v18 = vadd.f32 %v2644_v8, %v2642_v11  ;;  %v1950_v30 = vmul.f32 %v1943_v54, %v9756_v4  ;;  %v1951_v22 = vmul.f32 %v1942_v50, %v9756_v4  ;;  %v2751_v23 = vpop.permute.xlu0 %2750  ;;  %v9767_v54 = vld [vmem:[#allocation178_spill] sm:$0xff]  ;;  %v9788_v4 = vld [vmem:[#allocation24_spill] sm:$0xff] }
 0x663   :  { %v1952_v16 = vmul.f32 %v1949_v29, %v9755_v32  ;;  %v1953_v12 = vmul.f32 %v1948_v24, %v9755_v32  ;;  %v2647_v42 = vadd.f32 %v2645_v44, %v2643_v3  ;;  %vm9757_vm0 = vcmp.lt.s32.totalorder %v4008_v48, 83  ;;  %v9770_v29 = vld [vmem:[#allocation36_spill] sm:$0xff]  ;;  %v9778_v44 = vld [vmem:[#allocation67_spill] sm:$0xff] }
 0x664   :  { %v2746_v43 = vsel %vm9757_vm0, %v2743_v53, %v2745_v41  ;;  %vm9758_vm6 = vmmov %vm9757_vm0  ;;  %vm9759_vm15 = vcmp.lt.s32.totalorder %v4008_v48, 45  ;;  %vm9761_vm5 = vcmp.ge.s32.totalorder %v4393_v31, 1  ;;  %vm9762_vm14 = vcmp.ge.s32.totalorder %v4396_v37, 1 }
 0x665   :  { %v2747_v9 = vsel %vm9758_vm6, %v2745_v41, %v2743_v53  ;;  %v1964_v14 = vsel %vm9759_vm15, %v6732_v17, %v6746_v61  ;;  %vm9760_vm10 = vmmov %vm9759_vm15  ;;  %v2648_v55 = vsel %vm9761_vm5, %v2646_v18, 0.0  ;;  %v2649_v33 = vsel %vm9762_vm14, %v2647_v42, 0.0  ;;  %v9775_v41 = vld [vmem:[#allocation38_spill] sm:$0xff]  ;;  %v9785_v18 = vld [vmem:[#allocation48_spill] sm:$0xff] }
 0x666   :  { %v1965_v62 = vsel %vm9760_vm10, %v6746_v61, %v6732_v17  ;;  %v7468_v34 = vadd.f32 %v1910_v36, %v1892_v15  ;;  %v7470_v1 = vadd.f32 %v1911_v19, %v1893_v45  ;;  %v7472_v26 = vadd.f32 %v2648_v55, %v2628_v0  ;;  %v2749_v15 = vpop.permute.xlu1 %2748  ;;  %vm9766_vm15 = vmmov %vm9758_vm6  ;;  %v9779_v36 = vld [vmem:[#allocation174_spill] sm:$0xff] }
 0x667   :  { %v7474_v28 = vadd.f32 %v2649_v33, %v2629_v47  ;;  %vm9763_vm7 = vcmp.lt.s32.totalorder %v4393_v31, 15  ;;  %vm9764_vm0 = vcmp.lt.s32.totalorder %v4396_v37, 15  ;;  %v7484_v17 = vadd.f32 %v1952_v16, %v1950_v30  ;;  %v2765_v47 = vpop.permute.xlu0 %2764  ;;  %v9791_v33 = vld [vmem:[#allocation22_spill] sm:$0xff] }
 0x668   :  { %v7478_v35 = vsel %vm9763_vm7, %v1932_v20, 0.0  ;;  %v7482_v61 = vsel %vm9764_vm0, %v1933_v58, 0.0  ;;  %v7486_v49 = vadd.f32 %v1953_v12, %v1951_v22  ;;  %v7489_v45 = vmul.f32 %v1965_v62, %v9765_v46  ;;  %v9784_v12 = vld [vmem:[#allocation179_spill] sm:$0xff] }
 0x669   :  { %v7492_v38 = vmul.f32 %v1964_v14, %v9765_v46  ;;  %v2752_v27 = vsel %vm9758_vm6, %v2749_v15, %v2751_v23  ;;  %v2753_v0 = vsel %vm9766_vm15, %v2751_v23, %v2749_v15  ;;  %v2754_v52 = vmul.f32 %v2746_v43, %v9396_v10  ;;  %v9789_v43 = vld [vmem:[#allocation97_spill] sm:$0xff]  ;;  %v9790_v14 = vld [vmem:[#allocation98_spill] sm:$0xff] }
 0x66a   :  { %v2755_v7 = vmul.f32 %v2747_v9, %v9396_v10  ;;  %v2756_v5 = vmul.f32 %v2752_v27, %v5547_v21  ;;  %v2757_v50 = vmul.f32 %v2753_v0, %v5547_v21  ;;  %vm9768_vm10 = vcmp.lt.s32.totalorder %v4008_v48, 35  ;;  %v9774_v10 = vld [vmem:[#allocation27_spill] sm:$0xff]  ;;  %v2763_v8 = vpop.permute.xlu1 %2762  ;;  %v9793_v0 = vld [vmem:[#allocation25_spill] sm:$0xff] }
 0x66b   :  { %v1988_v2 = vsel %vm9768_vm10, %v9767_v54, %v6762_v40  ;;  %vm9769_vm5 = vmmov %vm9768_vm10  ;;  %vm9776_vm0 = vcmp.lt.s32.totalorder %v4008_v48, 34  ;;  %v2771_v16 = vpop.permute.xlu0 %2770  ;;  %v9792_v27 = vld [vmem:[#allocation35_spill] sm:$0xff] }
 0x66c   :  { %v1989_v24 = vsel %vm9769_vm5, %v6762_v40, %v9767_v54  ;;  %vm9772_vm14 = vmmov %vm9769_vm5  ;;  %v2014_v11 = vsel %vm9776_vm0, %v9775_v41, %v9774_v10  ;;  %v2758_v3 = vadd.f32 %v2756_v5, %v2754_v52  ;;  %v2759_v56 = vadd.f32 %v2757_v50, %v2755_v7  ;;  %v9796_v5 = vld [vmem:[#allocation181_spill] sm:$0xff] }
 0x66d   :  { %v1994_v25 = vsel %vm9772_vm14, %v9771_v57, %v9770_v29  ;;  %vm9773_vm7 = vmmov %vm9769_vm5  ;;  %vm9782_vm5 = vcmp.lt.s32.totalorder %v4008_v48, 82  ;;  %v1996_v30 = vmul.f32 %v1989_v24, %v9788_v4  ;;  %v1997_v22 = vmul.f32 %v1988_v2, %v9788_v4  ;;  %v9797_v50 = vld [vmem:[#allocation40_spill] sm:$0xff] }
 0x66e   :  { %v1995_v21 = vsel %vm9773_vm7, %v9770_v29, %v9771_v57  ;;  %vm9777_vm6 = vmmov %vm9776_vm0  ;;  %v2766_v58 = vsel %vm9782_vm5, %v2763_v8, %v2765_v47  ;;  %vm9786_vm7 = vcmp.lt.s32.totalorder %v4008_v48, 45  ;;  %v1999_v23 = vmul.f32 %v1994_v25, %v9789_v43  ;;  %v2769_v7 = vpop.permute.xlu1 %2768  ;;  %v9801_v25 = vld [vmem:[#allocation138_spill] sm:$0xff] }
 0x66f   :  { %v2015_v40 = vsel %vm9777_vm6, %v9774_v10, %v9775_v41  ;;  %vm9780_vm15 = vmmov %vm9776_vm0  ;;  %v1970_v42 = vsel %vm9786_vm7, %v9785_v18, %v9784_v12  ;;  %v1998_v9 = vmul.f32 %v1995_v21, %v9789_v43  ;;  %v2019_v55 = vmul.f32 %v2014_v11, %v9790_v14  ;;  %v2787_v57 = vpop.permute.xlu0 %2786  ;;  %v9802_v41 = vld [vmem:[#allocation151_spill] sm:$0xff] }
 0x670   :  { %v2008_v19 = vsel %vm9780_vm15, %v9779_v36, %v9778_v44  ;;  %vm9781_vm10 = vmmov %vm9776_vm0  ;;  %v2018_v62 = vmul.f32 %v2015_v40, %v9790_v14  ;;  %vm9794_vm6 = vcmp.lt.s32.totalorder %v4008_v48, 33  ;;  %v2774_v21 = vmul.f32 %v2766_v58, %v9801_v25  ;;  %v9804_v14 = vld [vmem:[#allocation169_spill] sm:$0xff] }
 0x671   :  { %v2009_v20 = vsel %vm9781_vm10, %v9778_v44, %v9779_v36  ;;  %vm9783_vm14 = vmmov %vm9782_vm5  ;;  %v2017_v46 = vmul.f32 %v2008_v19, %v9791_v33  ;;  %v2001_v44 = vadd.f32 %v1999_v23, %v1997_v22 }
 0x672   :  { %v2767_v32 = vsel %vm9783_vm14, %v2765_v47, %v2763_v8  ;;  %vm9787_vm0 = vmmov %vm9786_vm7  ;;  %v2016_v15 = vmul.f32 %v2009_v20, %v9791_v33  ;;  %v2030_v47 = vsel %vm9794_vm6, %v9793_v0, %v9792_v27  ;;  %v2772_v24 = vsel %vm9783_vm14, %v2769_v7, %v2771_v16  ;;  %v9803_v20 = vld [vmem:[#allocation101_spill] sm:$0xff] }
 0x673   :  { %v1971_v53 = vsel %vm9787_vm0, %v9784_v12, %v9785_v18  ;;  %vm9795_vm15 = vmmov %vm9794_vm6  ;;  %v2775_v10 = vmul.f32 %v2767_v32, %v9801_v25  ;;  %v2776_v11 = vmul.f32 %v2772_v24, %v9802_v41  ;;  %v2000_v8 = vadd.f32 %v1998_v9, %v1996_v30  ;;  %v2793_v22 = vpop.permute.xlu0 %2792  ;;  %v9821_v25 = vld [vmem:[#allocation152_spill] sm:$0xff] }
 0x674   :  { %v2031_v52 = vsel %vm9795_vm15, %v9792_v27, %v9793_v0  ;;  %vm9798_vm10 = vmmov %vm9794_vm6  ;;  %v2020_v36 = vadd.f32 %v2018_v62, %v2016_v15  ;;  %v2021_v19 = vadd.f32 %v2019_v55, %v2017_v46  ;;  %v2039_v58 = vmul.f32 %v2030_v47, %v9804_v14 }
 0x675   :  { %v2036_v54 = vsel %vm9798_vm10, %v9797_v50, %v9796_v5  ;;  %vm9799_vm5 = vmmov %vm9794_vm6  ;;  %v2778_v4 = vadd.f32 %v2776_v11, %v2774_v21  ;;  %v2038_v33 = vmul.f32 %v2031_v52, %v9804_v14  ;;  %vm9805_vm0 = vcmp.lt.s32.totalorder %v4008_v48, 81  ;;  %v9826_v14 = vld [vmem:[#allocation30_spill] sm:$0xff] }
 0x676   :  { %v2037_v2 = vsel %vm9799_vm5, %v9796_v5, %v9797_v50  ;;  %vm9800_vm7 = vmmov %vm9783_vm14  ;;  %v2041_v18 = vmul.f32 %v2036_v54, %v9803_v20  ;;  %vm9807_vm15 = vcmp.ge.s32.totalorder %v4393_v31, 3  ;;  %vm9808_vm10 = vcmp.ge.s32.totalorder %v4396_v37, 3  ;;  %v9815_v5 = vld [vmem:[#allocation94_spill] sm:$0xff]  ;;  %v9816_v50 = vld [vmem:[#allocation173_spill] sm:$0xff] }
 0x677   :  { %v2773_v29 = vsel %vm9800_vm7, %v2771_v16, %v2769_v7  ;;  %v2040_v12 = vmul.f32 %v2037_v2, %v9803_v20  ;;  %v2785_v16 = vpop.permute.xlu1 %2784  ;;  %vm9806_vm6 = vmmov %vm9805_vm0  ;;  %v2760_v9 = vsel %vm9807_vm15, %v2758_v3, 0.0  ;;  %v2761_v23 = vsel %vm9808_vm10, %v2759_v56, 0.0 }
 0x678   :  { %v2777_v40 = vmul.f32 %v2773_v29, %v9802_v41  ;;  %v2788_v32 = vsel %vm9805_vm0, %v2785_v16, %v2787_v57  ;;  %v2789_v30 = vsel %vm9806_vm6, %v2787_v57, %v2785_v16  ;;  %vm9809_vm5 = vcmp.ge.s32.totalorder %v4393_v31, 2  ;;  %vm9811_vm7 = vmmov %vm9807_vm15  ;;  %v2655_v57 = vpop.permute.xlu0 %2654  ;;  %v9822_v41 = vld [vmem:[#allocation146_spill] sm:$0xff] }
 0x679   :  { %v2780_v62 = vsel %vm9809_vm5, %v2778_v4, 0.0  ;;  %vm9810_vm14 = vcmp.ge.s32.totalorder %v4396_v37, 2  ;;  %v2002_v15 = vsel %vm9811_vm7, %v2000_v8, 0.0  ;;  %vm9812_vm0 = vmmov %vm9808_vm10  ;;  %v2042_v47 = vadd.f32 %v2040_v12, %v2038_v33  ;;  %v9823_v8 = vld [vmem:[#allocation96_spill] sm:$0xff] }
 0x67a   :  { %v2779_v43 = vadd.f32 %v2777_v40, %v2775_v10  ;;  %v2003_v46 = vsel %vm9812_vm0, %v2001_v44, 0.0  ;;  %v2782_v27 = vadd.f32 %v2780_v62, %v2760_v9  ;;  %vm9813_vm6 = vmmov %vm9809_vm5  ;;  %v2043_v52 = vadd.f32 %v2041_v18, %v2039_v58  ;;  %v9831_v9 = vld [vmem:[#allocation44_spill] sm:$0xff] }
 0x67b   :  { %v2022_v3 = vsel %vm9813_vm6, %v2020_v36, 0.0  ;;  %vm9814_vm15 = vmmov %vm9810_vm14  ;;  %v2791_v7 = vpop.permute.xlu1 %2790  ;;  %vm9817_vm10 = vcmp.lt.s32.totalorder %v4008_v48, 32  ;;  %v2796_v21 = vmul.f32 %v2788_v32, %v9821_v25  ;;  %v2797_v10 = vmul.f32 %v2789_v30, %v9821_v25  ;;  %v9827_v32 = vld [vmem:[#allocation184_spill] sm:$0xff]  ;;  %v9828_v30 = vld [vmem:[#allocation182_spill] sm:$0xff] }
 0x67c   :  { %v2781_v55 = vsel %vm9810_vm14, %v2779_v43, 0.0  ;;  %v2023_v56 = vsel %vm9814_vm15, %v2021_v19, 0.0  ;;  %v2052_v54 = vsel %vm9817_vm10, %v9816_v50, %v9815_v5  ;;  %vm9818_vm5 = vmmov %vm9817_vm10  ;;  %vm9819_vm14 = vcmp.lt.s32.totalorder %v4008_v48, 81 }
 0x67d   :  { %v2783_v0 = vadd.f32 %v2781_v55, %v2761_v23  ;;  %v2053_v2 = vsel %vm9818_vm5, %v9815_v5, %v9816_v50  ;;  %v2794_v24 = vsel %vm9819_vm14, %v2791_v7, %v2793_v22  ;;  %vm9820_vm7 = vmmov %vm9819_vm14  ;;  %v1974_v44 = vmul.f32 %v1971_v53, %v9823_v8  ;;  %v9832_v23 = vld [vmem:[#allocation185_spill] sm:$0xff] }
 0x67e   :  { %v2795_v29 = vsel %vm9820_vm7, %v2793_v22, %v2791_v7  ;;  %v2798_v11 = vmul.f32 %v2794_v24, %v9822_v41  ;;  %v1975_v36 = vmul.f32 %v1970_v42, %v9823_v8  ;;  %v2024_v19 = vadd.f32 %v2022_v3, %v2002_v15  ;;  %vm9829_vm15 = vmmov %vm9818_vm5  ;;  %v2661_v22 = vpop.permute.xlu0 %2660  ;;  %v9839_v7 = vld [vmem:[#allocation102_spill] sm:$0xff] }
 0x67f   :  { %v2799_v40 = vmul.f32 %v2795_v29, %v9822_v41  ;;  %v2025_v20 = vadd.f32 %v2023_v56, %v2003_v46  ;;  %vm9824_vm0 = vcmp.ge.s32.totalorder %v4393_v31, 1  ;;  %vm9825_vm6 = vcmp.ge.s32.totalorder %v4396_v37, 1  ;;  %v2653_v16 = vpop.permute.xlu1 %2652  ;;  %vm9830_vm10 = vmmov %vm9818_vm5  ;;  %v9843_v29 = vld [vmem:[#allocation103_spill] sm:$0xff] }
 0x680   :  { %v2044_v12 = vsel %vm9824_vm0, %v2042_v47, 0.0  ;;  %v2045_v18 = vsel %vm9825_vm6, %v2043_v52, 0.0  ;;  %v2800_v4 = vadd.f32 %v2798_v11, %v2796_v21  ;;  %v2060_v33 = vmul.f32 %v2053_v2, %v9826_v14  ;;  %vm9835_vm7 = vmmov %vm9824_vm0  ;;  %v9841_v2 = vld [vmem:[#allocation93_spill] sm:$0xff]  ;;  %v9846_v11 = vld [vmem:[#allocation79_spill] sm:$0xff] }
 0x681   :  { %v2801_v43 = vadd.f32 %v2799_v40, %v2797_v10  ;;  %v2061_v58 = vmul.f32 %v2052_v54, %v9826_v14  ;;  %v2058_v42 = vsel %vm9829_vm15, %v9828_v30, %v9827_v32  ;;  %v2059_v53 = vsel %vm9830_vm10, %v9827_v32, %v9828_v30  ;;  %vm9836_vm0 = vmmov %vm9825_vm6  ;;  %v9840_v54 = vld [vmem:[#allocation186_spill] sm:$0xff]  ;;  %v9848_v14 = vld [vmem:[#allocation32_spill] sm:$0xff] }
 0x682   :  { %vm9833_vm5 = vcmp.lt.s32.totalorder %v4008_v48, 31  ;;  %v2802_v15 = vsel %vm9835_vm7, %v2800_v4, 0.0  ;;  %vm9837_vm6 = vcmp.lt.s32.totalorder %v4008_v48, 96  ;;  %v2062_v5 = vmul.f32 %v2059_v53, %v9839_v7  ;;  %v7670_v41 = vpop.permute.xlu0 %2676  ;;  %v9847_v4 = vld [vmem:[#allocation136_spill] sm:$0xff]  ;;  %v9850_v53 = vld [vmem:[#allocation46_spill] sm:$0xff] }
 0x683   :  { %v2080_v62 = vsel %vm9833_vm5, %v9832_v23, %v9831_v9  ;;  %vm9834_vm14 = vmmov %vm9833_vm5  ;;  %v2803_v46 = vsel %vm9836_vm0, %v2801_v43, 0.0  ;;  %v7646_v3 = vadd.f32 %v2802_v15, %v2782_v27  ;;  %v2656_v47 = vsel %vm9837_vm6, %v2653_v16, %v2655_v57 }
 0x684   :  { %v2081_v55 = vsel %vm9834_vm14, %v9831_v9, %v9832_v23  ;;  %v7648_v56 = vadd.f32 %v2803_v46, %v2783_v0  ;;  %vm9838_vm15 = vmmov %vm9837_vm6  ;;  %v2063_v50 = vmul.f32 %v2058_v42, %v9839_v7  ;;  %v2075_v27 = vsel %vm9833_vm5, %v9840_v54, %v9841_v2  ;;  %v2659_v0 = vpop.permute.xlu1 %2658  ;;  %v9849_v42 = vld [vmem:[#allocation99_spill] sm:$0xff]  ;;  %v9853_v7 = vld [vmem:[#allocation45_spill] sm:$0xff] }
 0x685   :  { %v2657_v52 = vsel %vm9838_vm15, %v2655_v57, %v2653_v16  ;;  %vm9842_vm10 = vmmov %vm9833_vm5  ;;  %v2084_v25 = vmul.f32 %v2081_v55, %v9843_v29  ;;  %v2085_v21 = vmul.f32 %v2080_v62, %v9843_v29  ;;  %v2664_v40 = vmul.f32 %v2656_v47, %v9846_v11 }
 0x686   :  { %v2074_v24 = vsel %vm9842_vm10, %v9841_v2, %v9840_v54  ;;  %vm9844_vm14 = vmmov %vm9837_vm6  ;;  %v2665_v8 = vmul.f32 %v2657_v52, %v9846_v11  ;;  %v2082_v32 = vmul.f32 %v2075_v27, %v9848_v14  ;;  %vm9851_vm0 = vcmp.lt.s32.totalorder %v4008_v48, 30  ;;  %v9854_v54 = vld [vmem:[#allocation187_spill] sm:$0xff]  ;;  %v7696_v27 = vpop.permute.xlu0 %2682 }
 0x687   :  { %v2662_v57 = vsel %vm9844_vm14, %v2659_v0, %v2661_v22  ;;  %vm9845_vm7 = vmmov %vm9837_vm6  ;;  %v2083_v30 = vmul.f32 %v2074_v24, %v9848_v14  ;;  %v2102_v9 = vsel %vm9851_vm0, %v9850_v53, %v9849_v42  ;;  %v2064_v23 = vadd.f32 %v2062_v5, %v2060_v33  ;;  %v9857_v33 = vld [vmem:[#allocation104_spill] sm:$0xff] }
 0x688   :  { %v2663_v10 = vsel %vm9845_vm7, %v2661_v22, %v2659_v0  ;;  %v2666_v43 = vmul.f32 %v2662_v57, %v9847_v4  ;;  %vm9852_vm6 = vmmov %vm9851_vm0  ;;  %v2065_v62 = vadd.f32 %v2063_v50, %v2061_v58  ;;  %v7686_v46 = vpop.permute.xlu1 %2674  ;;  %v2086_v47 = vadd.f32 %v2084_v25, %v2082_v32  ;;  %v9866_v14 = vld [vmem:[#allocation188_spill] sm:$0xff] }
 0x689   :  { %v2667_v16 = vmul.f32 %v2663_v10, %v9847_v4  ;;  %v2103_v22 = vsel %vm9852_vm6, %v9849_v42, %v9850_v53  ;;  %v2087_v52 = vadd.f32 %v2085_v21, %v2083_v30  ;;  %vm9855_vm15 = vmmov %vm9851_vm0  ;;  %v2107_v5 = vmul.f32 %v2102_v9, %v9857_v33  ;;  %v9869_v42 = vld [vmem:[#allocation66_spill] sm:$0xff] }
 0x68a   :  { %v2668_v55 = vadd.f32 %v2666_v43, %v2664_v40  ;;  %v2096_v2 = vsel %vm9855_vm15, %v9854_v54, %v9853_v7  ;;  %vm9856_vm10 = vmmov %vm9851_vm0  ;;  %v2106_v58 = vmul.f32 %v2103_v22, %v9857_v33  ;;  %vm9858_vm5 = vcmp.lt.s32.totalorder %v4393_v31, 14  ;;  %v9860_v40 = vld [vmem:[#allocation29_spill] sm:$0xff]  ;;  %v9870_v53 = vld [vmem:[#allocation195_spill] sm:$0xff] }
 0x68b   :  { %v2669_v15 = vadd.f32 %v2667_v16, %v2665_v8  ;;  %v2097_v24 = vsel %vm9856_vm10, %v9853_v7, %v9854_v54  ;;  %v1956_v29 = vsel %vm9858_vm5, %v7484_v17, 0.0  ;;  %vm9859_vm14 = vcmp.lt.s32.totalorder %v4396_v37, 14  ;;  %v9865_v16 = vld [vmem:[#allocation142_spill] sm:$0xff] }
 0x68c   :  { %v7701_v50 = vadd.f32 %v2668_v55, %v7472_v26  ;;  %v1957_v25 = vsel %vm9859_vm14, %v7486_v49, 0.0  ;;  %v1976_v21 = vadd.f32 %v1974_v44, %v7489_v45  ;;  %v1977_v57 = vadd.f32 %v1975_v36, %v7492_v38  ;;  %v7726_v38 = vpop.permute.xlu0 %2808  ;;  %v9879_v54 = vld [vmem:[#allocation73_spill] sm:$0xff] }
 0x68d   :  { %v7704_v0 = vadd.f32 %v2669_v15, %v7474_v28  ;;  %v2046_v10 = vadd.f32 %v2044_v12, %v2024_v19  ;;  %v2047_v11 = vadd.f32 %v2045_v18, %v2025_v20  ;;  %v2104_v26 = vmul.f32 %v2097_v24, %v9860_v40  ;;  %v7716_v28 = vpop.permute.xlu1 %2680  ;;  %v9875_v15 = vld [vmem:[#allocation190_spill] sm:$0xff] }
 0x68e   :  { %v2105_v8 = vmul.f32 %v2096_v2, %v9860_v40  ;;  %v1936_v4 = vadd.f32 %v7478_v35, %v7468_v34  ;;  %v1937_v17 = vadd.f32 %v7482_v61, %v7470_v1  ;;  %vm9861_vm7 = vcmp.lt.s32.totalorder %v4393_v31, 15  ;;  %v9880_v2 = vld [vmem:[#allocation131_spill] sm:$0xff] }
 0x68f   :  { %v2088_v49 = vsel %vm9861_vm7, %v2086_v47, 0.0  ;;  %vm9862_vm0 = vcmp.lt.s32.totalorder %v4396_v37, 15  ;;  %v2068_v44 = vadd.f32 %v2064_v23, %v2046_v10  ;;  %v2069_v36 = vadd.f32 %v2065_v62, %v2047_v11  ;;  %v9876_v47 = vld [vmem:[#allocation127_spill] sm:$0xff] }
 0x690   :  { %v2089_v45 = vsel %vm9862_vm0, %v2087_v52, 0.0  ;;  %v2108_v19 = vadd.f32 %v2106_v58, %v2104_v26  ;;  %v2109_v20 = vadd.f32 %v2107_v5, %v2105_v8  ;;  %v7728_v12 = vadd.f32 %v1956_v29, %v1936_v4  ;;  %v7762_v23 = vpop.permute.xlu0 %2814  ;;  %v9883_v58 = vld [vmem:[#allocation196_spill] sm:$0xff]  ;;  %v9884_v5 = vld [vmem:[#allocation197_spill] sm:$0xff]  ;;  %v9890_v40 = vld [vmem:[#allocation107_spill] sm:$0xff] }
 0x691   :  { %v7730_v18 = vadd.f32 %v1957_v25, %v1937_v17  ;;  %vm9863_vm6 = vcmp.lt.s32.totalorder %v4393_v31, 13  ;;  %vm9864_vm15 = vcmp.lt.s32.totalorder %v4396_v37, 13  ;;  %v7740_v35 = vadd.f32 %v2088_v49, %v2068_v44  ;;  %v7744_v43 = vpop.permute.xlu1 %2806  ;;  %v9891_v17 = vld [vmem:[#allocation175_spill] sm:$0xff]  ;;  %v9892_v44 = vld [vmem:[#allocation105_spill] sm:$0xff] }
 0x692   :  { %v7734_v34 = vsel %vm9863_vm6, %v1976_v21, 0.0  ;;  %v7738_v1 = vsel %vm9864_vm15, %v1977_v57, 0.0  ;;  %v7742_v61 = vadd.f32 %v2089_v45, %v2069_v36  ;;  %vm9867_vm10 = vcmp.lt.s32.totalorder %v4008_v48, 29  ;;  %v9886_v21 = vld [vmem:[#allocation198_spill] sm:$0xff]  ;;  %v9887_v57 = vld [vmem:[#allocation191_spill] sm:$0xff] }
 0x693   :  { %v2118_v32 = vsel %vm9867_vm10, %v9866_v14, %v9865_v16  ;;  %vm9868_vm5 = vmmov %vm9867_vm10  ;;  %vm9871_vm14 = vcmp.lt.s32.totalorder %v4008_v48, 18  ;;  %vm9873_vm0 = vcmp.lt.s32.totalorder %v4393_v31, 14  ;;  %vm9874_vm6 = vcmp.lt.s32.totalorder %v4396_v37, 14 }
 0x694   :  { %v2119_v30 = vsel %vm9868_vm5, %v9865_v16, %v9866_v14  ;;  %v2168_v9 = vsel %vm9871_vm14, %v9870_v53, %v9869_v42  ;;  %vm9872_vm7 = vmmov %vm9871_vm14  ;;  %v7766_v62 = vsel %vm9873_vm0, %v2108_v19, 0.0  ;;  %v7770_v55 = vsel %vm9874_vm6, %v2109_v20, 0.0  ;;  %v7812_v20 = vpop.permute.xlu0 %2696  ;;  %v9893_v16 = vld [vmem:[#allocation33_spill] sm:$0xff] }
 0x695   :  { %v2169_v22 = vsel %vm9872_vm7, %v9869_v42, %v9870_v53  ;;  %vm9877_vm15 = vmmov %vm9868_vm5  ;;  %v2162_v29 = vsel %vm9872_vm7, %v9884_v5, %v9883_v58  ;;  %v2173_v8 = vmul.f32 %v2168_v9, %v9890_v40  ;;  %v7806_v4 = vpop.permute.xlu1 %2812  ;;  %v2126_v49 = vmul.f32 %v2119_v30, %v9891_v17  ;;  %v9894_v53 = vld [vmem:[#allocation192_spill] sm:$0xff] }
 0x696   :  { %v2124_v52 = vsel %vm9877_vm15, %v9876_v47, %v9875_v15  ;;  %vm9878_vm10 = vmmov %vm9868_vm5  ;;  %vm9881_vm5 = vcmp.lt.s32.totalorder %v4008_v48, 19  ;;  %v2172_v26 = vmul.f32 %v2169_v22, %v9890_v40  ;;  %v2127_v45 = vmul.f32 %v2118_v32, %v9891_v17  ;;  %v9895_v22 = vld [vmem:[#allocation52_spill] sm:$0xff]  ;;  %v9898_v30 = vld [vmem:[#allocation31_spill] sm:$0xff] }
 0x697   :  { %v2125_v7 = vsel %vm9878_vm10, %v9875_v15, %v9876_v47  ;;  %v2142_v24 = vsel %vm9881_vm5, %v9880_v2, %v9879_v54  ;;  %vm9882_vm14 = vmmov %vm9881_vm5  ;;  %v2129_v19 = vmul.f32 %v2124_v52, %v9892_v44  ;;  %v2171_v42 = vmul.f32 %v2162_v29, %v9893_v16  ;;  %v9899_v52 = vld [vmem:[#allocation106_spill] sm:$0xff]  ;;  %v9901_v29 = vld [vmem:[#allocation55_spill] sm:$0xff] }
 0x698   :  { %v2143_v33 = vsel %vm9882_vm14, %v9879_v54, %v9880_v2  ;;  %vm9885_vm0 = vmmov %vm9872_vm7  ;;  %v2128_v36 = vmul.f32 %v2125_v7, %v9892_v44  ;;  %vm9896_vm10 = vcmp.lt.s32.totalorder %v4008_v48, 17  ;;  %v2151_v47 = vmul.f32 %v2142_v24, %v9898_v30 }
 0x699   :  { %v2163_v25 = vsel %vm9885_vm0, %v9883_v58, %v9884_v5  ;;  %vm9888_vm6 = vmmov %vm9881_vm5  ;;  %v2190_v9 = vsel %vm9896_vm10, %v9895_v22, %v9894_v53  ;;  %v2150_v15 = vmul.f32 %v2143_v33, %v9898_v30  ;;  %v2175_v58 = vadd.f32 %v2173_v8, %v2171_v42  ;;  %v9900_v5 = vld [vmem:[#allocation49_spill] sm:$0xff]  ;;  %v9904_v33 = vld [vmem:[#allocation108_spill] sm:$0xff] }
 0x69a   :  { %v2148_v10 = vsel %vm9888_vm6, %v9887_v57, %v9886_v21  ;;  %vm9889_vm15 = vmmov %vm9881_vm5  ;;  %v2170_v14 = vmul.f32 %v2163_v25, %v9893_v16  ;;  %v2195_v24 = vmul.f32 %v2190_v9, %v9904_v33  ;;  %vm9905_vm0 = vcmp.lt.s32.totalorder %v4008_v48, 110  ;;  %v9907_v8 = vld [vmem:[#allocation74_spill] sm:$0xff]  ;;  %v9908_v16 = vld [vmem:[#allocation126_spill] sm:$0xff] }
 0x69b   :  { %v2149_v11 = vsel %vm9889_vm15, %v9886_v21, %v9887_v57  ;;  %vm9897_vm5 = vmmov %vm9896_vm10  ;;  %v2153_v54 = vmul.f32 %v2148_v10, %v9899_v52  ;;  %v2551_v57 = vpop.permute.xlu1 %2550  ;;  %v2554_v17 = vmul.f32 %v7278_v6, %v9907_v8  ;;  %v2555_v44 = vmul.f32 %v7282_v13, %v9907_v8  ;;  %v9909_v9 = vld [vmem:[#allocation42_spill] sm:$0xff] }
 0x69c   :  { %v2191_v32 = vsel %vm9897_vm5, %v9894_v53, %v9895_v22  ;;  %v2152_v7 = vmul.f32 %v2149_v11, %v9899_v52  ;;  %v2174_v2 = vadd.f32 %v2172_v26, %v2170_v14  ;;  %vm9902_vm14 = vmmov %vm9897_vm5  ;;  %v2552_v10 = vsel %vm9905_vm0, %v7242_v63, %v2551_v57  ;;  %v7844_v26 = vpop.permute.xlu0 %2702 }
 0x69d   :  { %v2184_v25 = vsel %vm9902_vm14, %v9901_v29, %v9900_v5  ;;  %vm9903_vm7 = vmmov %vm9897_vm5  ;;  %v2194_v40 = vmul.f32 %v2191_v32, %v9904_v33  ;;  %v2556_v14 = vmul.f32 %v2552_v10, %v9908_v16  ;;  %v2155_v22 = vadd.f32 %v2153_v54, %v2151_v47  ;;  %v9912_v33 = vld [vmem:[#allocation64_spill] sm:$0xff]  ;;  %v9913_v10 = vld [vmem:[#allocation116_spill] sm:$0xff] }
 0x69e   :  { %v2185_v21 = vsel %vm9903_vm7, %v9900_v5, %v9901_v29  ;;  %vm9906_vm6 = vmmov %vm9905_vm0  ;;  %v2154_v53 = vadd.f32 %v2152_v7, %v2150_v15  ;;  %v2193_v30 = vmul.f32 %v2184_v25, %v9909_v9  ;;  %vm9910_vm15 = vcmp.ge.s32.totalorder %v4393_v31, 2  ;;  %v9916_v54 = vld [vmem:[#allocation72_spill] sm:$0xff] }
 0x69f   :  { %v2553_v11 = vsel %vm9906_vm6, %v2551_v57, %v7242_v63  ;;  %v2192_v32 = vmul.f32 %v2185_v21, %v9909_v9  ;;  %v2176_v63 = vsel %vm9910_vm15, %v2174_v2, 0.0  ;;  %vm9911_vm10 = vcmp.ge.s32.totalorder %v4396_v37, 2  ;;  %v7858_v29 = vpop.permute.xlu1 %2698  ;;  %v9917_v2 = vld [vmem:[#allocation59_spill] sm:$0xff] }
 0x6a0   :  { %v2557_v42 = vmul.f32 %v2553_v11, %v9908_v16  ;;  %v2177_v52 = vsel %vm9911_vm10, %v2175_v58, 0.0  ;;  %v2558_v6 = vadd.f32 %v2556_v14, %v2554_v17  ;;  %v2197_v57 = vadd.f32 %v2195_v24, %v2193_v30  ;;  %v7868_v7 = vpop.permute.xlu0 %2828  ;;  %v9922_v24 = vld [vmem:[#allocation70_spill] sm:$0xff]  ;;  %v9923_v11 = vld [vmem:[#allocation51_spill] sm:$0xff]  ;;  %v9925_v14 = vld [vmem:[#allocation109_spill] sm:$0xff] }
 0x6a1   :  { %v2196_v13 = vadd.f32 %v2194_v40, %v2192_v32  ;;  %vm9914_vm5 = vcmp.lt.s32.totalorder %v4008_v48, 16  ;;  %vm9918_vm7 = vcmp.lt.s32.totalorder %v4008_v48, 15  ;;  %vm9920_vm6 = vcmp.lt.s32.totalorder %v4393_v31, 14  ;;  %v9926_v32 = vld [vmem:[#allocation63_spill] sm:$0xff]  ;;  %v9927_v30 = vld [vmem:[#allocation62_spill] sm:$0xff] }
 0x6a2   :  { %v2559_v5 = vadd.f32 %v2557_v42, %v2555_v44  ;;  %v2212_v15 = vsel %vm9914_vm5, %v9913_v10, %v9912_v33  ;;  %vm9915_vm14 = vmmov %vm9914_vm5  ;;  %v2234_v58 = vsel %vm9918_vm7, %v9917_v2, %v9916_v54  ;;  %v2560_v21 = vsel %vm9920_vm6, %v2558_v6, 0.0 }
 0x6a3   :  { %v2213_v47 = vsel %vm9915_vm14, %v9912_v33, %v9913_v10  ;;  %vm9919_vm0 = vmmov %vm9918_vm7  ;;  %vm9921_vm15 = vcmp.lt.s32.totalorder %v4396_v37, 14  ;;  %v2207_v17 = vsel %vm9914_vm5, %v9922_v24, %v9923_v11  ;;  %v7891_v44 = vadd.f32 %v2560_v21, %v7300_v60  ;;  %v2705_v33 = vpop.permute.xlu1 %2704 }
 0x6a4   :  { %v2235_v25 = vsel %vm9919_vm0, %v9916_v54, %v9917_v2  ;;  %v2561_v40 = vsel %vm9921_vm15, %v2559_v5, 0.0  ;;  %vm9924_vm10 = vmmov %vm9914_vm5  ;;  %v2216_v42 = vmul.f32 %v2213_v47, %v9925_v14  ;;  %v2217_v9 = vmul.f32 %v2212_v15, %v9925_v14  ;;  %v9930_v54 = vld [vmem:[#allocation110_spill] sm:$0xff]  ;;  %v7908_v47 = vpop.permute.xlu0 %2834 }
 0x6a5   :  { %v2206_v8 = vsel %vm9924_vm10, %v9923_v11, %v9922_v24  ;;  %v7894_v16 = vadd.f32 %v2561_v40, %v7302_v51  ;;  %vm9928_vm14 = vmmov %vm9919_vm0  ;;  %v2130_v60 = vadd.f32 %v2128_v36, %v2126_v49  ;;  %v2131_v10 = vadd.f32 %v2129_v19, %v2127_v45  ;;  %v9933_v40 = vld [vmem:[#allocation183_spill] sm:$0xff]  ;;  %v9934_v49 = vld [vmem:[#allocation39_spill] sm:$0xff] }
 0x6a6   :  { %v2228_v6 = vsel %vm9928_vm14, %v9927_v30, %v9926_v32  ;;  %vm9929_vm7 = vmmov %vm9919_vm0  ;;  %v2238_v51 = vmul.f32 %v2235_v25, %v9930_v54  ;;  %v2239_v2 = vmul.f32 %v2234_v58, %v9930_v54  ;;  %vm9931_vm0 = vcmp.ge.s32.totalorder %v4393_v31, 3  ;;  %v9937_v54 = vld [vmem:[#allocation166_spill] sm:$0xff] }
 0x6a7   :  { %v2229_v5 = vsel %vm9929_vm7, %v9926_v32, %v9927_v30  ;;  %v2156_v15 = vsel %vm9931_vm0, %v2154_v53, 0.0  ;;  %vm9932_vm6 = vcmp.ge.s32.totalorder %v4396_v37, 3  ;;  %v2214_v24 = vmul.f32 %v2207_v17, %v9933_v40  ;;  %v7922_v30 = vpop.permute.xlu1 %2830 }
 0x6a8   :  { %v2157_v21 = vsel %vm9932_vm6, %v2155_v22, 0.0  ;;  %v2215_v11 = vmul.f32 %v2206_v8, %v9933_v40  ;;  %v2178_v14 = vadd.f32 %v2176_v63, %v2156_v15  ;;  %v2236_v45 = vmul.f32 %v2229_v5, %v9934_v49  ;;  %v9938_v8 = vld [vmem:[#allocation115_spill] sm:$0xff]  ;;  %v9944_v15 = vld [vmem:[#allocation61_spill] sm:$0xff] }
 0x6a9   :  { %v2179_v32 = vadd.f32 %v2177_v52, %v2157_v21  ;;  %v2237_v36 = vmul.f32 %v2228_v6, %v9934_v49  ;;  %vm9935_vm15 = vcmp.ge.s32.totalorder %v4393_v31, 1  ;;  %vm9936_vm10 = vcmp.ge.s32.totalorder %v4396_v37, 1 }
 0x6aa   :  { %v2198_v19 = vsel %vm9935_vm15, %v2196_v13, 0.0  ;;  %v2199_v58 = vsel %vm9936_vm10, %v2197_v57, 0.0  ;;  %v2218_v53 = vadd.f32 %v2216_v42, %v2214_v24  ;;  %v2219_v25 = vadd.f32 %v2217_v9, %v2215_v11  ;;  %v2565_v13 = vpop.permute.xlu0 %2564 }
 0x6ab   :  { %v2240_v22 = vadd.f32 %v2238_v51, %v2236_v45  ;;  %v2241_v17 = vadd.f32 %v2239_v2, %v2237_v36  ;;  %vm9939_vm5 = vcmp.lt.s32.totalorder %v4008_v48, 14  ;;  %v7934_v57 = vadd.f32 %v7766_v62, %v7740_v35  ;;  %v9943_v2 = vld [vmem:[#allocation58_spill] sm:$0xff]  ;;  %v7966_v40 = vpop.permute.xlu1 %2836  ;;  %v9952_v45 = vld [vmem:[#allocation41_spill] sm:$0xff] }
 0x6ac   :  { %v2256_v63 = vsel %vm9939_vm5, %v9938_v8, %v9937_v54  ;;  %vm9940_vm14 = vmmov %vm9939_vm5  ;;  %v7938_v42 = vadd.f32 %v7770_v55, %v7742_v61  ;;  %vm9941_vm7 = vcmp.lt.s32.totalorder %v4393_v31, 13  ;;  %vm9942_vm0 = vcmp.lt.s32.totalorder %v4396_v37, 13  ;;  %v9947_v62 = vld [vmem:[#allocation111_spill] sm:$0xff] }
 0x6ad   :  { %v2257_v52 = vsel %vm9940_vm14, %v9937_v54, %v9938_v8  ;;  %v7942_v9 = vsel %vm9941_vm7, %v2130_v60, 0.0  ;;  %v7946_v6 = vsel %vm9942_vm0, %v2131_v10, 0.0  ;;  %v2200_v5 = vadd.f32 %v2198_v19, %v2178_v14  ;;  %vm9945_vm6 = vmmov %vm9939_vm5 }
 0x6ae   :  { %v2201_v51 = vadd.f32 %v2199_v58, %v2179_v32  ;;  %v2250_v35 = vsel %vm9945_vm6, %v9944_v15, %v9943_v2  ;;  %vm9946_vm15 = vmmov %vm9939_vm5  ;;  %v2260_v55 = vmul.f32 %v2257_v52, %v9947_v62  ;;  %v2261_v60 = vmul.f32 %v2256_v63, %v9947_v62  ;;  %v2571_v49 = vpop.permute.xlu0 %2570  ;;  %v9955_v58 = vld [vmem:[#allocation153_spill] sm:$0xff] }
 0x6af   :  { %v2251_v61 = vsel %vm9946_vm15, %v9943_v2, %v9944_v15  ;;  %vm9948_vm10 = vcmp.lt.s32.totalorder %v4008_v48, 95  ;;  %v2222_v24 = vadd.f32 %v2218_v53, %v2200_v5  ;;  %vm9950_vm14 = vcmp.lt.s32.totalorder %v4393_v31, 15  ;;  %v9956_v53 = vld [vmem:[#allocation53_spill] sm:$0xff] }
 0x6b0   :  { %v2684_v10 = vsel %vm9948_vm10, %v7716_v28, %v7696_v27  ;;  %vm9949_vm5 = vmmov %vm9948_vm10  ;;  %v2223_v11 = vadd.f32 %v2219_v25, %v2201_v51  ;;  %v2242_v14 = vsel %vm9950_vm14, %v2240_v22, 0.0  ;;  %vm9951_vm7 = vcmp.lt.s32.totalorder %v4396_v37, 15  ;;  %v9960_v51 = vld [vmem:[#allocation80_spill] sm:$0xff] }
 0x6b1   :  { %v2685_v21 = vsel %vm9949_vm5, %v7696_v27, %v7716_v28  ;;  %v2243_v32 = vsel %vm9951_vm7, %v2241_v17, 0.0  ;;  %v2258_v36 = vmul.f32 %v2251_v61, %v9952_v45  ;;  %v2259_v19 = vmul.f32 %v2250_v35, %v9952_v45  ;;  %vm9953_vm0 = vmmov %vm9949_vm5  ;;  %v9959_v17 = vld [vmem:[#allocation137_spill] sm:$0xff] }
 0x6b2   :  { %v2678_v27 = vsel %vm9953_vm0, %v7686_v46, %v7670_v41  ;;  %vm9954_vm6 = vmmov %vm9953_vm0  ;;  %vm9957_vm15 = vcmp.lt.s32.totalorder %v4008_v48, 13  ;;  %v2688_v54 = vmul.f32 %v2684_v10, %v9959_v17  ;;  %v2689_v8 = vmul.f32 %v2685_v21, %v9959_v17  ;;  %v2719_v62 = vpop.permute.xlu0 %2718  ;;  %v9963_v10 = vld [vmem:[#allocation50_spill] sm:$0xff] }
 0x6b3   :  { %v2679_v28 = vsel %vm9954_vm6, %v7670_v41, %v7686_v46  ;;  %v2272_v25 = vsel %vm9957_vm15, %v9956_v53, %v9955_v58  ;;  %vm9958_vm10 = vmmov %vm9957_vm15  ;;  %v7992_v63 = vadd.f32 %v2242_v14, %v2222_v24  ;;  %v7994_v52 = vadd.f32 %v2243_v32, %v2223_v11  ;;  %v2567_v46 = vpop.permute.xlu1 %2566 }
 0x6b4   :  { %v2273_v22 = vsel %vm9958_vm10, %v9955_v58, %v9956_v53  ;;  %v2262_v5 = vadd.f32 %v2260_v55, %v2258_v36  ;;  %v2263_v41 = vadd.f32 %v2261_v60, %v2259_v19  ;;  %v2686_v2 = vmul.f32 %v2678_v27, %v9960_v51  ;;  %v9964_v55 = vld [vmem:[#allocation78_spill] sm:$0xff]  ;;  %v9965_v60 = vld [vmem:[#allocation156_spill] sm:$0xff]  ;;  %vm9966_vm7 = vmmov %vm9958_vm10 }
 0x6b5   :  { %v2687_v15 = vmul.f32 %v2679_v28, %v9960_v51  ;;  %vm9961_vm5 = vcmp.lt.s32.totalorder %v4008_v48, 94  ;;  %v2280_v21 = vmul.f32 %v2273_v22, %v9963_v10  ;;  %v2281_v24 = vmul.f32 %v2272_v25, %v9963_v10  ;;  %vm9967_vm0 = vmmov %vm9966_vm7  ;;  %v9970_v36 = vld [vmem:[#allocation140_spill] sm:$0xff] }
 0x6b6   :  { %v2706_v35 = vsel %vm9961_vm5, %v7844_v26, %v2705_v33  ;;  %vm9962_vm14 = vmmov %vm9961_vm5  ;;  %v2278_v11 = vsel %vm9966_vm7, %v9965_v60, %v9964_v55  ;;  %v2279_v14 = vsel %vm9967_vm0, %v9964_v55, %v9965_v60  ;;  %v2690_v32 = vadd.f32 %v2688_v54, %v2686_v2  ;;  %v9973_v25 = vld [vmem:[#allocation112_spill] sm:$0xff] }
 0x6b7   :  { %v2707_v61 = vsel %vm9962_vm14, %v2705_v33, %v7844_v26  ;;  %v2691_v45 = vadd.f32 %v2689_v8, %v2687_v15  ;;  %vm9968_vm6 = vmmov %vm9961_vm5  ;;  %v2710_v19 = vmul.f32 %v2706_v35, %v9970_v36  ;;  %vm9971_vm10 = vcmp.lt.s32.totalorder %v4008_v48, 109  ;;  %v2573_v53 = vpop.permute.xlu1 %2572  ;;  %v9976_v8 = vld [vmem:[#allocation87_spill] sm:$0xff]  ;;  %v9977_v15 = vld [vmem:[#allocation129_spill] sm:$0xff] }
 0x6b8   :  { %v2700_v26 = vsel %vm9968_vm6, %v7812_v20, %v7858_v29  ;;  %vm9969_vm15 = vmmov %vm9961_vm5  ;;  %v2711_v27 = vmul.f32 %v2707_v61, %v9970_v36  ;;  %v2568_v28 = vsel %vm9971_vm10, %v2565_v13, %v2567_v46  ;;  %v2282_v22 = vmul.f32 %v2279_v14, %v9973_v25 }
 0x6b9   :  { %v2701_v33 = vsel %vm9969_vm15, %v7858_v29, %v7812_v20  ;;  %vm9972_vm5 = vmmov %vm9971_vm10  ;;  %v2283_v17 = vmul.f32 %v2278_v11, %v9973_v25  ;;  %v2725_v29 = vpop.permute.xlu0 %2724  ;;  %v2708_v51 = vmul.f32 %v2700_v26, %v9976_v8  ;;  %vm9978_vm0 = vcmp.lt.s32.totalorder %v4008_v48, 80  ;;  %v9985_v25 = vld [vmem:[#allocation148_spill] sm:$0xff] }
 0x6ba   :  { %v2569_v58 = vsel %vm9972_vm5, %v2567_v46, %v2565_v13  ;;  %vm9974_vm14 = vmmov %vm9972_vm5  ;;  %v2709_v2 = vmul.f32 %v2701_v33, %v9976_v8  ;;  %v2810_v46 = vsel %vm9978_vm0, %v7744_v43, %v7726_v38  ;;  %vm9981_vm15 = vcmp.lt.s32.totalorder %v4393_v31, 15 }
 0x6bb   :  { %v2574_v54 = vsel %vm9974_vm14, %v2571_v49, %v2573_v53  ;;  %vm9975_vm7 = vmmov %vm9972_vm5  ;;  %v2692_v60 = vsel %vm9981_vm15, %v2690_v32, 0.0  ;;  %vm9982_vm10 = vcmp.lt.s32.totalorder %v4396_v37, 15  ;;  %v2712_v14 = vadd.f32 %v2710_v19, %v2708_v51  ;;  %v2721_v33 = vpop.permute.xlu1 %2720 }
 0x6bc   :  { %v2575_v20 = vsel %vm9975_vm7, %v2573_v53, %v2571_v49  ;;  %v2578_v35 = vmul.f32 %v2574_v54, %v9977_v15  ;;  %vm9979_vm6 = vmmov %vm9978_vm0  ;;  %v9980_v49 = vld [vmem:[#allocation75_spill] sm:$0xff]  ;;  %v2693_v11 = vsel %vm9982_vm10, %v2691_v45, 0.0  ;;  %v2713_v26 = vadd.f32 %v2711_v27, %v2709_v2 }
 0x6bd   :  { %v2579_v13 = vmul.f32 %v2575_v20, %v9977_v15  ;;  %v2811_v61 = vsel %vm9979_vm6, %v7726_v38, %v7744_v43  ;;  %v2576_v10 = vmul.f32 %v2568_v28, %v9980_v49  ;;  %v2577_v55 = vmul.f32 %v2569_v58, %v9980_v49  ;;  %v2851_v45 = vpop.permute.xlu0 %2850  ;;  %vm9988_vm15 = vmmov %vm9979_vm6  ;;  %v9995_v2 = vld [vmem:[#allocation100_spill] sm:$0xff] }
 0x6be   :  { %vm9983_vm5 = vcmp.lt.s32.totalorder %v4393_v31, 14  ;;  %vm9984_vm14 = vcmp.lt.s32.totalorder %v4396_v37, 14  ;;  %v2284_v58 = vadd.f32 %v2282_v22, %v2280_v21  ;;  %v2285_v53 = vadd.f32 %v2283_v17, %v2281_v24 }
 0x6bf   :  { %v8054_v36 = vsel %vm9983_vm5, %v2262_v5, 0.0  ;;  %v8058_v38 = vsel %vm9984_vm14, %v2263_v41, 0.0  ;;  %v2580_v43 = vadd.f32 %v2578_v35, %v2576_v10  ;;  %v2581_v28 = vadd.f32 %v2579_v13, %v2577_v55  ;;  %vm9989_vm10 = vmmov %vm9983_vm5  ;;  %v2727_v22 = vpop.permute.xlu1 %2726 }
 0x6c0   :  { %v2818_v32 = vmul.f32 %v2810_v46, %v9985_v25  ;;  %v2819_v54 = vmul.f32 %v2811_v61, %v9985_v25  ;;  %v2694_v19 = vadd.f32 %v2692_v60, %v7701_v50  ;;  %v2695_v27 = vadd.f32 %v2693_v11, %v7704_v0  ;;  %vm9990_vm5 = vmmov %vm9984_vm14 }
 0x6c1   :  { %vm9986_vm7 = vcmp.lt.s32.totalorder %v4008_v48, 93  ;;  %v2816_v21 = vsel %vm9979_vm6, %v7806_v4, %v7762_v23  ;;  %v2817_v24 = vsel %vm9988_vm15, %v7762_v23, %v7806_v4  ;;  %v2714_v50 = vsel %vm9989_vm10, %v2712_v14, 0.0  ;;  %v9994_v23 = vld [vmem:[#allocation141_spill] sm:$0xff]  ;;  %v2857_v11 = vpop.permute.xlu0 %2856 }
 0x6c2   :  { %v2722_v5 = vsel %vm9986_vm7, %v2719_v62, %v2721_v33  ;;  %vm9987_vm0 = vmmov %vm9986_vm7  ;;  %v2715_v0 = vsel %vm9990_vm5, %v2713_v26, 0.0  ;;  %vm9991_vm14 = vcmp.lt.s32.totalorder %v4393_v31, 13  ;;  %vm9992_vm7 = vcmp.lt.s32.totalorder %v4396_v37, 13  ;;  %v10000_v26 = vld [vmem:[#allocation139_spill] sm:$0xff] }
 0x6c3   :  { %v2723_v41 = vsel %vm9987_vm0, %v2721_v33, %v2719_v62  ;;  %v2582_v62 = vsel %vm9991_vm14, %v2580_v43, 0.0  ;;  %v2583_v17 = vsel %vm9992_vm7, %v2581_v28, 0.0  ;;  %v2728_v20 = vsel %vm9987_vm0, %v2725_v29, %v2727_v22  ;;  %vm9993_vm6 = vmmov %vm9987_vm0  ;;  %v2853_v14 = vpop.permute.xlu1 %2852  ;;  %v10001_v28 = vld [vmem:[#allocation145_spill] sm:$0xff] }
 0x6c4   :  { %v2729_v8 = vsel %vm9993_vm6, %v2727_v22, %v2725_v29  ;;  %v2730_v4 = vmul.f32 %v2722_v5, %v9994_v23  ;;  %v2731_v51 = vmul.f32 %v2723_v41, %v9994_v23  ;;  %v2732_v15 = vmul.f32 %v2728_v20, %v9995_v2  ;;  %v10031_v23 = vld [vmem:[#allocation161_spill] sm:$0xff] }
 0x6c5   :  { %v2733_v35 = vmul.f32 %v2729_v8, %v9995_v2  ;;  %vm9996_vm15 = vcmp.lt.s32.totalorder %v4008_v48, 79  ;;  %v2584_v49 = vadd.f32 %v2582_v62, %v7891_v44  ;;  %v2585_v10 = vadd.f32 %v2583_v17, %v7894_v16  ;;  %v10004_v16 = vld [vmem:[#allocation149_spill] sm:$0xff]  ;;  %v10052_v62 = vld [vmem:[#allocation180_spill] sm:$0xff] }
 0x6c6   :  { %v2832_v13 = vsel %vm9996_vm15, %v7868_v7, %v7922_v30  ;;  %vm9997_vm10 = vmmov %vm9996_vm15  ;;  %v2734_v55 = vadd.f32 %v2732_v15, %v2730_v4  ;;  %v2716_v33 = vadd.f32 %v2714_v50, %v2694_v19  ;;  %v2717_v43 = vadd.f32 %v2715_v0, %v2695_v27 }
 0x6c7   :  { %v2833_v46 = vsel %vm9997_vm10, %v7922_v30, %v7868_v7  ;;  %vm9998_vm5 = vmmov %vm9997_vm10  ;;  %v2735_v60 = vadd.f32 %v2733_v35, %v2731_v51  ;;  %v2820_v7 = vmul.f32 %v2816_v21, %v10000_v26  ;;  %v2821_v30 = vmul.f32 %v2817_v24, %v10000_v26  ;;  %v2859_v17 = vpop.permute.xlu1 %2858 }
 0x6c8   :  { %v2838_v29 = vsel %vm9998_vm5, %v7908_v47, %v7966_v40  ;;  %vm9999_vm14 = vmmov %vm9998_vm5  ;;  %v2840_v25 = vmul.f32 %v2832_v13, %v10001_v28  ;;  %v2841_v5 = vmul.f32 %v2833_v46, %v10001_v28  ;;  %vm10002_vm7 = vcmp.lt.s32.totalorder %v4393_v31, 13  ;;  %v2873_v13 = vpop.permute.xlu0 %2872  ;;  %v10013_v46 = vld [vmem:[#allocation157_spill] sm:$0xff] }
 0x6c9   :  { %v2839_v61 = vsel %vm9999_vm14, %v7966_v40, %v7908_v47  ;;  %v2736_v47 = vsel %vm10002_vm7, %v2734_v55, 0.0  ;;  %vm10003_vm0 = vcmp.lt.s32.totalorder %v4396_v37, 13  ;;  %v2842_v40 = vmul.f32 %v2838_v29, %v10004_v16 }
 0x6ca   :  { %v2737_v44 = vsel %vm10003_vm0, %v2735_v60, 0.0  ;;  %v2843_v41 = vmul.f32 %v2839_v61, %v10004_v16  ;;  %v2738_v22 = vadd.f32 %v2736_v47, %v2716_v33  ;;  %v2586_v19 = vsel %vm6356_vm13, %v2584_v49, 0.0 }
 0x6cb   :  { %v2739_v21 = vadd.f32 %v2737_v44, %v2717_v43  ;;  %v2587_v24 = vsel %vm6370_vm1, %v2585_v10, 0.0  ;;  %vm10007_vm6 = vcmp.lt.s32.totalorder %v4008_v48, 78  ;;  %vm10014_vm1 = vmmov %vm10002_vm7  ;;  %v10016_v10 = vld [vmem:[#allocation20_spill] sm:$0xff]  ;;  %v2844_v26 = vadd.f32 %v2842_v40, %v2840_v25  ;;  %v2875_v43 = vpop.permute.xlu1 %2874 }
 0x6cc   :  { %v2854_v50 = vsel %vm10007_vm6, %v2851_v45, %v2853_v14  ;;  %vm10008_vm15 = vmmov %vm10007_vm6  ;;  %v2740_v8 = vsel %vm6334_vm2, %v2738_v22, 0.0  ;;  %v2286_v61 = vsel %vm10014_vm1, %v2284_v58, 0.0  ;;  %v2845_v33 = vadd.f32 %v2843_v41, %v2841_v5  ;;  %v10026_v5 = vld [vmem:[#allocation164_spill] sm:$0xff]  ;;  %v10051_v22 = vld [vmem:[#allocation170_spill] sm:$0xff] }
 0x6cd   :  { %v2855_v0 = vsel %vm10008_vm15, %v2853_v14, %v2851_v45  ;;  %v2741_v4 = vsel %vm6346_vm3, %v2739_v21, 0.0  ;;  %vm10011_vm10 = vmmov %vm10007_vm6  ;;  %v8136_v15 = vadd.f32 %v2740_v8, %v2586_v19  ;;  %v2862_v55 = vmul.f32 %v2854_v50, %v10016_v10 }
 0x6ce   :  { %v2860_v51 = vsel %vm10011_vm10, %v2857_v11, %v2859_v17  ;;  %vm10012_vm13 = vmmov %vm10007_vm6  ;;  %v8138_v35 = vadd.f32 %v2741_v4, %v2587_v24  ;;  %v2863_v60 = vmul.f32 %v2855_v0, %v10016_v10  ;;  %v2823_v14 = vadd.f32 %v2821_v30, %v2819_v54  ;;  %v10038_v10 = vld [vmem:[#allocation88_spill] sm:$0xff] }
 0x6cf   :  { %v2861_v2 = vsel %vm10012_vm13, %v2859_v17, %v2857_v11  ;;  %v2864_v45 = vmul.f32 %v2860_v51, %v10013_v46  ;;  %vm10015_vm2 = vmmov %vm10003_vm0  ;;  %v2822_v11 = vadd.f32 %v2820_v7, %v2818_v32  ;;  %v2266_v28 = vadd.f32 %v8054_v36, %v7992_v63  ;;  %v10033_v51 = vld [vmem:[#allocation21_spill] sm:$0xff] }
 0x6d0   :  { %v2865_v29 = vmul.f32 %v2861_v2, %v10013_v46  ;;  %v2287_v49 = vsel %vm10015_vm2, %v2285_v53, 0.0  ;;  %v2267_v47 = vadd.f32 %v8058_v38, %v7994_v52  ;;  %v1980_v53 = vadd.f32 %v7734_v34, %v7728_v12 }
 0x6d1   :  { %v2866_v44 = vadd.f32 %v2864_v45, %v2862_v55  ;;  %v1981_v16 = vadd.f32 %v7738_v1, %v7730_v18  ;;  %v2134_v32 = vadd.f32 %v7942_v9, %v7934_v57  ;;  %v2135_v54 = vadd.f32 %v7946_v6, %v7938_v42  ;;  %v2879_v1 = vpop.permute.xlu0 %2878  ;;  %v2881_v57 = vpop.permute.xlu1 %2880 }
 0x6d2   :  { %v2867_v58 = vadd.f32 %v2865_v29, %v2863_v60  ;;  %v2288_v7 = vadd.f32 %v2286_v61, %v2266_v28  ;;  %v2289_v30 = vadd.f32 %v2287_v49, %v2267_v47  ;;  %vm10017_vm3 = vcmp.lt.s32.totalorder %v4008_v48, 77  ;;  %v10042_v28 = vld [vmem:[#allocation26_spill] sm:$0xff] }
 0x6d3   :  { %v2876_v63 = vsel %vm10017_vm3, %v2873_v13, %v2875_v43  ;;  %vm10018_vm5 = vmmov %vm10017_vm3  ;;  %v2826_v36 = vadd.f32 %v2822_v11, %v7646_v3  ;;  %v2827_v12 = vadd.f32 %v2823_v14, %v7648_v56  ;;  %vm10019_vm14 = vcmp.lt.s32.totalorder %v4393_v31, 15  ;;  %v10025_v56 = vld [vmem:[#allocation158_spill] sm:$0xff] }
 0x6d4   :  { %v2877_v52 = vsel %vm10018_vm5, %v2875_v43, %v2873_v13  ;;  %v2846_v18 = vsel %vm10019_vm14, %v2844_v26, 0.0  ;;  %vm10020_vm7 = vcmp.lt.s32.totalorder %v4396_v37, 15  ;;  %vm10021_vm0 = vcmp.lt.s32.totalorder %v4393_v31, 14  ;;  %vm10023_vm15 = vmmov %vm10017_vm3 }
 0x6d5   :  { %v2847_v34 = vsel %vm10020_vm7, %v2845_v33, 0.0  ;;  %v2868_v42 = vsel %vm10021_vm0, %v2866_v44, 0.0  ;;  %vm10022_vm6 = vcmp.lt.s32.totalorder %v4396_v37, 14  ;;  %v2882_v6 = vsel %vm10023_vm15, %v2879_v1, %v2881_v57  ;;  %vm10024_vm10 = vmmov %vm10017_vm3  ;;  %v10040_v33 = vld [vmem:[#allocation176_spill] sm:$0xff] }
 0x6d6   :  { %v2869_v9 = vsel %vm10022_vm6, %v2867_v58, 0.0  ;;  %v2883_v3 = vsel %vm10024_vm10, %v2881_v57, %v2879_v1  ;;  %v2884_v38 = vmul.f32 %v2876_v63, %v10025_v56  ;;  %v2885_v25 = vmul.f32 %v2877_v52, %v10025_v56  ;;  %v10045_v1 = vld [vmem:[#allocation37_spill] sm:$0xff]  ;;  %v10048_v56 = vld [vmem:[#allocation172_spill] sm:$0xff] }
 0x6d7   :  { %v2886_v40 = vmul.f32 %v2882_v6, %v10026_v5  ;;  %v2887_v41 = vmul.f32 %v2883_v3, %v10026_v5  ;;  %v2432_v21 = vsel %vm6033_vm12, %v7140_v39, 0.0  ;;  %v2433_v19 = vsel %vm6055_vm8, %v7142_v59, 0.0  ;;  %v10047_v6 = vld [vmem:[#allocation168_spill] sm:$0xff] }
 0x6d8   :  { %v2848_v27 = vadd.f32 %v2846_v18, %v2826_v36  ;;  %v2849_v24 = vadd.f32 %v2847_v34, %v2827_v12  ;;  %v2136_v50 = vsel %vm5580_vm4, %v2134_v32, 0.0  ;;  %v2137_v17 = vsel %vm5624_vm11, %v2135_v54, 0.0  ;;  %vm10036_vm4 = vmmov %vm10015_vm2  ;;  %v10044_v54 = vld [vmem:[#allocation177_spill] sm:$0xff] }
 0x6d9   :  { %v2888_v20 = vadd.f32 %v2886_v40, %v2884_v38  ;;  %v2889_v8 = vadd.f32 %v2887_v41, %v2885_v25  ;;  %vm10032_vm13 = vnez %v10031_v23  ;;  %vm10034_vm1 = vnez %v10033_v51  ;;  %v10049_v25 = vld [vmem:[#allocation171_spill] sm:$0xff]  ;;  %v10050_v40 = vld [vmem:[#allocation43_spill] sm:$0xff] }
 0x6da   :  { %v2290_v4 = vsel %vm10032_vm13, %v2288_v7, 0.0  ;;  %v2291_v39 = vsel %vm10034_vm1, %v2289_v30, 0.0  ;;  %v2870_v2 = vadd.f32 %v2868_v42, %v2848_v27  ;;  %v2871_v13 = vadd.f32 %v2869_v9, %v2849_v24  ;;  %v10046_v42 = vld [vmem:[#allocation47_spill] sm:$0xff]  ;;  %v10053_v27 = vld [vmem:[#allocation68_spill] sm:$0xff] }
 0x6db   :  { %v2898_v46 = vadd.f32 %v2432_v21, %v2290_v4  ;;  %v2899_v59 = vadd.f32 %v2433_v19, %v2291_v39  ;;  %vm10035_vm12 = vcmp.lt.s32.totalorder %v4393_v31, 13  ;;  %v2891_v29 = vsel %vm10036_vm4, %v2889_v8, 0.0 }
 0x6dc   :  { %v2890_v45 = vsel %vm10035_vm12, %v2888_v20, 0.0  ;;  %v1982_v49 = vsel %vm5381_vm9, %v1980_v53, 0.0  ;;  %vm10039_vm11 = vnez %v10038_v10  ;;  %v2893_v11 = vadd.f32 %v2891_v29, %v2871_v13 }
 0x6dd   :  { %v1983_v55 = vsel %vm10039_vm11, %v1981_v16, 0.0  ;;  %v2892_v60 = vadd.f32 %v2890_v45, %v2870_v2  ;;  %v2896_v14 = vadd.f32 %v2136_v50, %v1982_v49  ;;  %vm10041_vm8 = vnez %v10040_v33 }
 0x6de   :  { %v2897_v26 = vadd.f32 %v2137_v17, %v1983_v55  ;;  %vm10043_vm2 = vnez %v10042_v28 }
 0x6df   :  { %v2894_v43 = vsel %vm10041_vm8, %v2892_v60, 0.0  ;;  %v2895_v31 = vsel %vm10043_vm2, %v2893_v11, 0.0  ;;  %v2902_v47 = vadd.f32 %v2898_v46, %v2896_v14 }
 0x6e0   :  { %v2903_v44 = vadd.f32 %v2899_v59, %v2897_v26  ;;  %v2904_v37 = vadd.f32 %v8136_v15, %v2894_v43  ;;  %v2905_v58 = vadd.f32 %v8138_v35, %v2895_v31 }
 0x6e2   :  { %v2906_v53 = vadd.f32 %v2904_v37, %v2902_v47  ;;  %v2907_v32 = vadd.f32 %v2905_v58, %v2903_v44 }
 0x6e4   :  { %v2908_v16 = vadd.f32 %v2906_v53, %v10044_v54  ;;  %v2909_v7 = vadd.f32 %v2907_v32, %v10044_v54 }
 0x6e6   :  { %v3072_v30 = vmul.f32 -1.442695, %v2908_v16  ;;  %v3073_v63 = vmul.f32 -1.442695, %v2909_v7 }
 0x6e8   :  { %3166 = vpow2.f32 %v3072_v30 }
 0x6e9   :  { %3168 = vpow2.f32 %v3073_v63 }
 0x6f5   :  { %v3167_v52 = vpop.eup %3166 }
 0x6f6   :  { %v3169_v36 = vpop.eup %3168  ;;  %v2916_v12 = vadd.f32 1.0, %v3167_v52 }
 0x6f7   :  { %v2917_v18 = vadd.f32 1.0, %v3169_v36 }
 0x6f8   :  { %3170 = vrcp.f32 %v2916_v12 }
 0x6f9   :  { %3172 = vrcp.f32 %v2917_v18 }
 0x705   :  { %v3171_v34 = vpop.eup %3170 }
 0x706   :  { %v3173_v15 = vpop.eup %3172  ;;  %v2925_v35 = vrot.slane %v3171_v34, %v10045_v1 }
 0x707   :  { %v2929_v57 = vrot.slane %v3173_v15, %v10045_v1 }
 0x708   :  { %v2930_v9 = vmul.f32 %v2925_v35, %v10046_v42  ;;  %v2932_v3 = vmul.f32 %v2925_v35, %v10047_v6  ;;  %v2934_v38 = vmul.f32 %v2925_v35, %v10048_v56  ;;  %v2936_v5 = vmul.f32 %v2925_v35, %v10049_v25 }
 0x709   :  { %v2931_v41 = vmul.f32 %v2929_v57, %v10050_v40  ;;  %v2933_v21 = vmul.f32 %v2929_v57, %v10051_v22  ;;  %v2935_v19 = vmul.f32 %v2929_v57, %v10052_v62  ;;  %v2937_v24 = vmul.f32 %v2929_v57, %v10053_v27 }
 0x70a   :  { %2939 = vst [vmem:[#allocation8 + $0x40] sm:$0xff] %v2930_v9  ;;  %2941 = vst [vmem:[#allocation8 + $0x50] sm:$0xff] %v2932_v3 }
 0x70b   :  { %2943 = vst [vmem:[#allocation8 + $0x60] sm:$0xff] %v2934_v38  ;;  %2945 = vst [vmem:[#allocation8 + $0x70] sm:$0xff] %v2936_v5 }
 0x70c   :  { %2940 = vst [vmem:[#allocation8 + $0x48] sm:$0xff] %v2931_v41  ;;  %2942 = vst [vmem:[#allocation8 + $0x58] sm:$0xff] %v2933_v21 }
 0x70d   :  { %2944 = vst [vmem:[#allocation8 + $0x68] sm:$0xff] %v2935_v19  ;;  %2946 = vst [vmem:[#allocation8 + $0x78] sm:$0xff] %v2937_v24 }
 0x70e   :  { %3233 = shalt.err (!%p3230_p0)
}
 0x70f   :  { %s10054_s4 = smov 256   ;;  %s10055_s30 = sld [smem:[#allocation202_spill]] }
 0x715   :  { %2958 = dma.vmem_to_hbm [thread:$0]  %s2953_s29, 2048, %s10055_s30, [#allocation5], %s10054_s4, %s10054_s4, %s9531_s25  }
 0x716   :  { %3246 = dma.done.wait [#allocation5], 2048  }
 0x717   :  { %3247 = vsyncadd [#allocation5], 4294965248 }
 0x718   :  { %2962 = vsyncpa [#allocation4], 1 }
 0x719   :  { %2963 = vsyncpa [#allocation5], 1 }
 0x71a   :  { %2964 = vsyncpa [#allocation6], 1 }

</bundles_post_ra>
